<compile_context>
chip_gen: v6e
topology: v6e:2x2x1
jax: 0.10.0
libtpu: 0.0.40
codegen_flags: <defaults>
</compile_context>

<pallas_src>
import numpy as np
import jax
import jax.numpy as jnp
from jax import lax
from jax.experimental import pallas as pl
from jax.experimental.pallas import tpu as pltpu


# ----------------- host-side constant 0/1 gather matrices -------------------
def _conv3x3_shift_mats(H, W):
    """T[k] @ x_flat == flattened tap (dy, dx) of x with zero padding.
    k = (dy+1)*3 + (dx+1); x_flat laid out as (H*W, C) row-major."""
    HW = H * W
    T = np.zeros((9, HW, HW), np.float32)
    k = 0
    for dy in (-1, 0, 1):
        for dx in (-1, 0, 1):
            for h in range(H):
                hh = h + dy
                if 0 <= hh < H:
                    for w in range(W):
                        ww = w + dx
                        if 0 <= ww < W:
                            T[k, h * W + w, hh * W + ww] = 1.0
            k += 1
    return T


def _pool2x2_select_mats(H, W):
    """P[j] @ a_flat == phase j of the 2x2 / stride-2 pooling window."""
    Ho, Wo = H // 2, W // 2
    P = np.zeros((4, Ho * Wo, H * W), np.float32)
    j = 0
    for dy in (0, 1):
        for dx in (0, 1):
            for ho in range(Ho):
                for wo in range(Wo):
                    P[j, ho * Wo + wo, (2 * ho + dy) * W + (2 * wo + dx)] = 1.0
            j += 1
    return P


# ------------------------------ fused kernel --------------------------------
def _encoder_kernel(x_ref,
                    t1_ref, w1_ref, b1_ref, p1_ref,
                    t2_ref, w2_ref, b2_ref, p2_ref,
                    t3_ref, w3_ref, b3_ref, p3_ref,
                    fcw_ref, fcb_ref,
                    o_ref):
    f32, bf16 = jnp.float32, jnp.bfloat16

    def conv3x3_relu(h, t_ref, w_ref, b_ref):
        # h: (HW, Cin) f32 -> (HW, Cout) f32
        h_bf = h.astype(bf16)
        acc = jnp.zeros((h.shape[0], w_ref.shape[-1]), f32)
        for k in range(9):
            # exact 0/1 gather of the shifted tap (zero rows = SAME padding)
            tap = jnp.dot(t_ref[k], h_bf, preferred_element_type=f32).astype(bf16)
            acc = acc + jnp.dot(tap, w_ref[k], preferred_element_type=f32)
        return jnp.maximum(acc + b_ref[...], 0.0)        # bias + ReLU in f32

    def maxpool2x2(h, p_ref):
        # h: (HW, C) f32 -> (HW/4, C) f32
        h_bf = h.astype(bf16)
        a = jnp.dot(p_ref[0], h_bf, preferred_element_type=f32)
        b = jnp.dot(p_ref[1], h_bf, preferred_element_type=f32)
        c = jnp.dot(p_ref[2], h_bf, preferred_element_type=f32)
        d = jnp.dot(p_ref[3], h_bf, preferred_element_type=f32)
        return jnp.maximum(jnp.maximum(a, b), jnp.maximum(c, d))

    h = x_ref[0]                                              # (H*W, Cin) f32
    h = maxpool2x2(conv3x3_relu(h, t1_ref, w1_ref, b1_ref), p1_ref)
    h = maxpool2x2(conv3x3_relu(h, t2_ref, w2_ref, b2_ref), p2_ref)
    h = maxpool2x2(conv3x3_relu(h, t3_ref, w3_ref, b3_ref), p3_ref)
    # h: (R3, C3) -- row r is spatial position (in NHWC flatten order).
    out = fcb_ref[...]                                        # (1, latent) f32
    for r in range(h.shape[0]):
        out = out + jnp.dot(h[r:r + 1, :].astype(bf16), fcw_ref[r],
                            preferred_element_type=f32)
    o_ref[0] = out.astype(jnp.float32)


# ------------------------------ forward wrapper ------------------------------
def encoder_forward(x, params):
    """x: (N, H, W, Cin) NHWC float32 -> (N, latent) float32."""
    N, H, W, Cin = x.shape
    assert H % 8 == 0 and W % 8 == 0, "needs three 2x downsamples"
    c1 = params['conv1_w'].shape[-1]
    c2 = params['conv2_w'].shape[-1]
    c3 = params['conv3_w'].shape[-1]
    latent = params['fc_w'].shape[-1]
    H2, W2 = H // 2, W // 2
    H3, W3 = H2 // 2, W2 // 2
    R3 = (H3 // 2) * (W3 // 2)              # spatial positions feeding the fc

    bf16 = jnp.bfloat16
    t1 = jnp.asarray(_conv3x3_shift_mats(H, W), bf16)
    p1 = jnp.asarray(_pool2x2_select_mats(H, W), bf16)
    t2 = jnp.asarray(_conv3x3_shift_mats(H2, W2), bf16)
    p2 = jnp.asarray(_pool2x2_select_mats(H2, W2), bf16)
    t3 = jnp.asarray(_conv3x3_shift_mats(H3, W3), bf16)
    p3 = jnp.asarray(_pool2x2_select_mats(H3, W3), bf16)

    w1 = params['conv1_w'].reshape(9, Cin, c1).astype(bf16)
    w2 = params['conv2_w'].reshape(9, c1, c2).astype(bf16)
    w3 = params['conv3_w'].reshape(9, c2, c3).astype(bf16)
    b1 = params['conv1_b'].reshape(1, c1).astype(jnp.float32)
    b2 = params['conv2_b'].reshape(1, c2).astype(jnp.float32)
    b3 = params['conv3_b'].reshape(1, c3).astype(jnp.float32)
    fcw = params['fc_w'].reshape(R3, c3, latent).astype(bf16)
    fcb = params['fc_b'].reshape(1, latent).astype(jnp.float32)

    x_flat = x.reshape(N, H * W, Cin).astype(jnp.float32)
    consts = (t1, w1, b1, p1, t2, w2, b2, p2, t3, w3, b3, p3, fcw, fcb)

    def const_spec(a):
        if a.ndim == 3:
            return pl.BlockSpec(a.shape, lambda n: (0, 0, 0))
        return pl.BlockSpec(a.shape, lambda n: (0, 0))

    out = pl.pallas_call(
        _encoder_kernel,
        out_shape=jax.ShapeDtypeStruct((N, 1, latent), jnp.float32),
        grid_spec=pltpu.PrefetchScalarGridSpec(
            num_scalar_prefetch=0,
            grid=(N,),
            in_specs=[pl.BlockSpec((1, H * W, Cin), lambda n: (n, 0, 0))]
                     + [const_spec(a) for a in consts],
            out_specs=pl.BlockSpec((1, 1, latent), lambda n: (n, 0, 0)),
        ),
        compiler_params=pltpu.CompilerParams(
            dimension_semantics=("parallel",),
            vmem_limit_bytes=32 * 1024 * 1024,
        ),
    )(x_flat, *consts)
    return out.reshape(N, latent)


# ---------------- pure-JAX reference for verification ----------------
def encoder_reference(x, params):
    h = x
    for i in (1, 2, 3):
        w, b = params[f'conv{i}_w'], params[f'conv{i}_b']
        h = lax.conv_general_dilated(
            h, w, window_strides=(1, 1), padding='SAME',
            dimension_numbers=('NHWC', 'HWIO', 'NHWC'),
            precision=lax.Precision.HIGHEST) + b
        h = jnp.maximum(h, 0.0)
        Nb, H, W, C = h.shape
        h = h.reshape(Nb, H // 2, 2, W // 2, 2, C).max(axis=(2, 4))
    h = h.reshape(h.shape[0], -1)
    return h @ params['fc_w'] + params['fc_b']


if __name__ == "__main__":
    input_dim, latent_dim, img_size, batch = 4, 32, 16, 2
    key = jax.random.PRNGKey(0)
    ks = jax.random.split(key, 10)

    def uinit(k, shape, fan_in):
        s = 1.0 / np.sqrt(fan_in)
        return jax.random.uniform(k, shape, jnp.float32, -s, s)

    out_size = img_size // 2 ** 3
    fc_in = 128 * out_size * out_size
    params = {
        'conv1_w': uinit(ks[0], (3, 3, input_dim, 32), 9 * input_dim),
        'conv1_b': uinit(ks[1], (32,), 9 * input_dim),
        'conv2_w': uinit(ks[2], (3, 3, 32, 64), 9 * 32),
        'conv2_b': uinit(ks[3], (64,), 9 * 32),
        'conv3_w': uinit(ks[4], (3, 3, 64, 128), 9 * 64),
        'conv3_b': uinit(ks[5], (128,), 9 * 64),
        'fc_w':    uinit(ks[6], (fc_in, latent_dim), fc_in),
        'fc_b':    uinit(ks[7], (latent_dim,), fc_in),
    }

    # NHWC input (PyTorch equivalent: (batch, input_dim, img_size, img_size) NCHW)
    x = jax.random.normal(ks[8], (batch, img_size, img_size, input_dim), jnp.float32)

    fwd = jax.jit(lambda xx: encoder_forward(xx, params))
    out = jax.block_until_ready(fwd(x))
    ref = jax.block_until_ready(encoder_reference(x, params))

    assert out.shape == (batch, latent_dim)
    # 2e-2 tolerance absorbs the bf16 MXU operands vs. the f32 HIGHEST reference.
    np.testing.assert_allclose(np.asarray(out), np.asarray(ref), rtol=2e-2, atol=2e-2)
    print("KERNEL_OK")
</pallas_src>

<mosaic_0001>
module attributes {stable_mosaic.version = 11 : i64} {
  func.func @_encoder_kernel(%arg0: i32, %arg1: memref<1x256x4xf32, #tpu.memory_space<vmem>>, %arg2: memref<9x256x256xbf16, #tpu.memory_space<vmem>>, %arg3: memref<9x4x32xbf16, #tpu.memory_space<vmem>>, %arg4: memref<1x32xf32, #tpu.memory_space<vmem>>, %arg5: memref<4x64x256xbf16, #tpu.memory_space<vmem>>, %arg6: memref<9x64x64xbf16, #tpu.memory_space<vmem>>, %arg7: memref<9x32x64xbf16, #tpu.memory_space<vmem>>, %arg8: memref<1x64xf32, #tpu.memory_space<vmem>>, %arg9: memref<4x16x64xbf16, #tpu.memory_space<vmem>>, %arg10: memref<9x16x16xbf16, #tpu.memory_space<vmem>>, %arg11: memref<9x64x128xbf16, #tpu.memory_space<vmem>>, %arg12: memref<1x128xf32, #tpu.memory_space<vmem>>, %arg13: memref<4x4x16xbf16, #tpu.memory_space<vmem>>, %arg14: memref<4x128x32xbf16, #tpu.memory_space<vmem>>, %arg15: memref<1x32xf32, #tpu.memory_space<vmem>>, %arg16: memref<1x1x32xf32, #tpu.memory_space<vmem>>) attributes {dimension_semantics = [#tpu.dimension_semantics<parallel>], iteration_bounds = array<i64: 2>, scalar_prefetch = 0 : i64, scratch_operands = 0 : i64, tpu.core_type = #tpu.core_type<tc>, window_params = [{transform_indices = @transform_0, window_bounds = array<i64: 1, 256, 4>}, {pipeline_mode = #tpu.pipeline_mode<synchronous>, transform_indices = @transform_1, window_bounds = array<i64: 9, 256, 256>}, {pipeline_mode = #tpu.pipeline_mode<synchronous>, transform_indices = @transform_2, window_bounds = array<i64: 9, 4, 32>}, {pipeline_mode = #tpu.pipeline_mode<synchronous>, transform_indices = @transform_3, window_bounds = array<i64: 1, 32>}, {pipeline_mode = #tpu.pipeline_mode<synchronous>, transform_indices = @transform_4, window_bounds = array<i64: 4, 64, 256>}, {pipeline_mode = #tpu.pipeline_mode<synchronous>, transform_indices = @transform_5, window_bounds = array<i64: 9, 64, 64>}, {pipeline_mode = #tpu.pipeline_mode<synchronous>, transform_indices = @transform_6, window_bounds = array<i64: 9, 32, 64>}, {pipeline_mode = #tpu.pipeline_mode<synchronous>, transform_indices = @transform_7, window_bounds = array<i64: 1, 64>}, {pipeline_mode = #tpu.pipeline_mode<synchronous>, transform_indices = @transform_8, window_bounds = array<i64: 4, 16, 64>}, {pipeline_mode = #tpu.pipeline_mode<synchronous>, transform_indices = @transform_9, window_bounds = array<i64: 9, 16, 16>}, {pipeline_mode = #tpu.pipeline_mode<synchronous>, transform_indices = @transform_10, window_bounds = array<i64: 9, 64, 128>}, {pipeline_mode = #tpu.pipeline_mode<synchronous>, transform_indices = @transform_11, window_bounds = array<i64: 1, 128>}, {pipeline_mode = #tpu.pipeline_mode<synchronous>, transform_indices = @transform_12, window_bounds = array<i64: 4, 4, 16>}, {pipeline_mode = #tpu.pipeline_mode<synchronous>, transform_indices = @transform_13, window_bounds = array<i64: 4, 128, 32>}, {pipeline_mode = #tpu.pipeline_mode<synchronous>, transform_indices = @transform_14, window_bounds = array<i64: 1, 32>}, {transform_indices = @transform_15, window_bounds = array<i64: 1, 1, 32>}]} {
    %c0 = arith.constant 0 : index
    %c0_0 = arith.constant 0 : index
    %c0_1 = arith.constant 0 : index
    %0 = vector.load %arg1[%c0, %c0_0, %c0_1] : memref<1x256x4xf32, #tpu.memory_space<vmem>>, vector<1x256x4xf32>
    %1 = vector.shape_cast %0 : vector<1x256x4xf32> to vector<256x4xf32>
    %2 = arith.truncf %1 : vector<256x4xf32> to vector<256x4xbf16>
    %cst = arith.constant 0.000000e+00 : f32
    %3 = vector.broadcast %cst : f32 to vector<256x32xf32>
    %c0_2 = arith.constant 0 : index
    %c0_3 = arith.constant 0 : index
    %c0_4 = arith.constant 0 : index
    %4 = vector.load %arg2[%c0_2, %c0_3, %c0_4] : memref<9x256x256xbf16, #tpu.memory_space<vmem>>, vector<1x256x256xbf16>
    %5 = vector.shape_cast %4 : vector<1x256x256xbf16> to vector<256x256xbf16>
    %cst_5 = arith.constant dense<0.000000e+00> : vector<256x4xf32>
    %6 = tpu.matmul %5, %2, %cst_5 {dimension_numbers = #tpu.dot_dimension_numbers<[1], [0], [0], [1], [0, 0, 1, 1], [], []>} : vector<256x256xbf16>, vector<256x4xbf16>, vector<256x4xf32> -> vector<256x4xf32>
    %7 = arith.truncf %6 : vector<256x4xf32> to vector<256x4xbf16>
    %c0_6 = arith.constant 0 : index
    %c0_7 = arith.constant 0 : index
    %c0_8 = arith.constant 0 : index
    %8 = vector.load %arg3[%c0_6, %c0_7, %c0_8] : memref<9x4x32xbf16, #tpu.memory_space<vmem>>, vector<1x4x32xbf16>
    %9 = vector.shape_cast %8 : vector<1x4x32xbf16> to vector<4x32xbf16>
    %cst_9 = arith.constant dense<0.000000e+00> : vector<256x32xf32>
    %10 = tpu.matmul %7, %9, %cst_9 {dimension_numbers = #tpu.dot_dimension_numbers<[1], [0], [0], [1], [0, 0, 1, 1], [], []>} : vector<256x4xbf16>, vector<4x32xbf16>, vector<256x32xf32> -> vector<256x32xf32>
    %11 = arith.addf %3, %10 : vector<256x32xf32>
    %c1 = arith.constant 1 : index
    %c0_10 = arith.constant 0 : index
    %c0_11 = arith.constant 0 : index
    %12 = vector.load %arg2[%c1, %c0_10, %c0_11] : memref<9x256x256xbf16, #tpu.memory_space<vmem>>, vector<1x256x256xbf16>
    %13 = vector.shape_cast %12 : vector<1x256x256xbf16> to vector<256x256xbf16>
    %cst_12 = arith.constant dense<0.000000e+00> : vector<256x4xf32>
    %14 = tpu.matmul %13, %2, %cst_12 {dimension_numbers = #tpu.dot_dimension_numbers<[1], [0], [0], [1], [0, 0, 1, 1], [], []>} : vector<256x256xbf16>, vector<256x4xbf16>, vector<256x4xf32> -> vector<256x4xf32>
    %15 = arith.truncf %14 : vector<256x4xf32> to vector<256x4xbf16>
    %c1_13 = arith.constant 1 : index
    %c0_14 = arith.constant 0 : index
    %c0_15 = arith.constant 0 : index
    %16 = vector.load %arg3[%c1_13, %c0_14, %c0_15] : memref<9x4x32xbf16, #tpu.memory_space<vmem>>, vector<1x4x32xbf16>
    %17 = vector.shape_cast %16 : vector<1x4x32xbf16> to vector<4x32xbf16>
    %cst_16 = arith.constant dense<0.000000e+00> : vector<256x32xf32>
    %18 = tpu.matmul %15, %17, %cst_16 {dimension_numbers = #tpu.dot_dimension_numbers<[1], [0], [0], [1], [0, 0, 1, 1], [], []>} : vector<256x4xbf16>, vector<4x32xbf16>, vector<256x32xf32> -> vector<256x32xf32>
    %19 = arith.addf %11, %18 : vector<256x32xf32>
    %c2 = arith.constant 2 : index
    %c0_17 = arith.constant 0 : index
    %c0_18 = arith.constant 0 : index
    %20 = vector.load %arg2[%c2, %c0_17, %c0_18] : memref<9x256x256xbf16, #tpu.memory_space<vmem>>, vector<1x256x256xbf16>
    %21 = vector.shape_cast %20 : vector<1x256x256xbf16> to vector<256x256xbf16>
    %cst_19 = arith.constant dense<0.000000e+00> : vector<256x4xf32>
    %22 = tpu.matmul %21, %2, %cst_19 {dimension_numbers = #tpu.dot_dimension_numbers<[1], [0], [0], [1], [0, 0, 1, 1], [], []>} : vector<256x256xbf16>, vector<256x4xbf16>, vector<256x4xf32> -> vector<256x4xf32>
    %23 = arith.truncf %22 : vector<256x4xf32> to vector<256x4xbf16>
    %c2_20 = arith.constant 2 : index
    %c0_21 = arith.constant 0 : index
    %c0_22 = arith.constant 0 : index
    %24 = vector.load %arg3[%c2_20, %c0_21, %c0_22] : memref<9x4x32xbf16, #tpu.memory_space<vmem>>, vector<1x4x32xbf16>
    %25 = vector.shape_cast %24 : vector<1x4x32xbf16> to vector<4x32xbf16>
    %cst_23 = arith.constant dense<0.000000e+00> : vector<256x32xf32>
    %26 = tpu.matmul %23, %25, %cst_23 {dimension_numbers = #tpu.dot_dimension_numbers<[1], [0], [0], [1], [0, 0, 1, 1], [], []>} : vector<256x4xbf16>, vector<4x32xbf16>, vector<256x32xf32> -> vector<256x32xf32>
    %27 = arith.addf %19, %26 : vector<256x32xf32>
    %c3 = arith.constant 3 : index
    %c0_24 = arith.constant 0 : index
    %c0_25 = arith.constant 0 : index
    %28 = vector.load %arg2[%c3, %c0_24, %c0_25] : memref<9x256x256xbf16, #tpu.memory_space<vmem>>, vector<1x256x256xbf16>
    %29 = vector.shape_cast %28 : vector<1x256x256xbf16> to vector<256x256xbf16>
    %cst_26 = arith.constant dense<0.000000e+00> : vector<256x4xf32>
    %30 = tpu.matmul %29, %2, %cst_26 {dimension_numbers = #tpu.dot_dimension_numbers<[1], [0], [0], [1], [0, 0, 1, 1], [], []>} : vector<256x256xbf16>, vector<256x4xbf16>, vector<256x4xf32> -> vector<256x4xf32>
    %31 = arith.truncf %30 : vector<256x4xf32> to vector<256x4xbf16>
    %c3_27 = arith.constant 3 : index
    %c0_28 = arith.constant 0 : index
    %c0_29 = arith.constant 0 : index
    %32 = vector.load %arg3[%c3_27, %c0_28, %c0_29] : memref<9x4x32xbf16, #tpu.memory_space<vmem>>, vector<1x4x32xbf16>
    %33 = vector.shape_cast %32 : vector<1x4x32xbf16> to vector<4x32xbf16>
    %cst_30 = arith.constant dense<0.000000e+00> : vector<256x32xf32>
    %34 = tpu.matmul %31, %33, %cst_30 {dimension_numbers = #tpu.dot_dimension_numbers<[1], [0], [0], [1], [0, 0, 1, 1], [], []>} : vector<256x4xbf16>, vector<4x32xbf16>, vector<256x32xf32> -> vector<256x32xf32>
    %35 = arith.addf %27, %34 : vector<256x32xf32>
    %c4 = arith.constant 4 : index
    %c0_31 = arith.constant 0 : index
    %c0_32 = arith.constant 0 : index
    %36 = vector.load %arg2[%c4, %c0_31, %c0_32] : memref<9x256x256xbf16, #tpu.memory_space<vmem>>, vector<1x256x256xbf16>
    %37 = vector.shape_cast %36 : vector<1x256x256xbf16> to vector<256x256xbf16>
    %cst_33 = arith.constant dense<0.000000e+00> : vector<256x4xf32>
    %38 = tpu.matmul %37, %2, %cst_33 {dimension_numbers = #tpu.dot_dimension_numbers<[1], [0], [0], [1], [0, 0, 1, 1], [], []>} : vector<256x256xbf16>, vector<256x4xbf16>, vector<256x4xf32> -> vector<256x4xf32>
    %39 = arith.truncf %38 : vector<256x4xf32> to vector<256x4xbf16>
    %c4_34 = arith.constant 4 : index
    %c0_35 = arith.constant 0 : index
    %c0_36 = arith.constant 0 : index
    %40 = vector.load %arg3[%c4_34, %c0_35, %c0_36] : memref<9x4x32xbf16, #tpu.memory_space<vmem>>, vector<1x4x32xbf16>
    %41 = vector.shape_cast %40 : vector<1x4x32xbf16> to vector<4x32xbf16>
    %cst_37 = arith.constant dense<0.000000e+00> : vector<256x32xf32>
    %42 = tpu.matmul %39, %41, %cst_37 {dimension_numbers = #tpu.dot_dimension_numbers<[1], [0], [0], [1], [0, 0, 1, 1], [], []>} : vector<256x4xbf16>, vector<4x32xbf16>, vector<256x32xf32> -> vector<256x32xf32>
    %43 = arith.addf %35, %42 : vector<256x32xf32>
    %c5 = arith.constant 5 : index
    %c0_38 = arith.constant 0 : index
    %c0_39 = arith.constant 0 : index
    %44 = vector.load %arg2[%c5, %c0_38, %c0_39] : memref<9x256x256xbf16, #tpu.memory_space<vmem>>, vector<1x256x256xbf16>
    %45 = vector.shape_cast %44 : vector<1x256x256xbf16> to vector<256x256xbf16>
    %cst_40 = arith.constant dense<0.000000e+00> : vector<256x4xf32>
    %46 = tpu.matmul %45, %2, %cst_40 {dimension_numbers = #tpu.dot_dimension_numbers<[1], [0], [0], [1], [0, 0, 1, 1], [], []>} : vector<256x256xbf16>, vector<256x4xbf16>, vector<256x4xf32> -> vector<256x4xf32>
    %47 = arith.truncf %46 : vector<256x4xf32> to vector<256x4xbf16>
    %c5_41 = arith.constant 5 : index
    %c0_42 = arith.constant 0 : index
    %c0_43 = arith.constant 0 : index
    %48 = vector.load %arg3[%c5_41, %c0_42, %c0_43] : memref<9x4x32xbf16, #tpu.memory_space<vmem>>, vector<1x4x32xbf16>
    %49 = vector.shape_cast %48 : vector<1x4x32xbf16> to vector<4x32xbf16>
    %cst_44 = arith.constant dense<0.000000e+00> : vector<256x32xf32>
    %50 = tpu.matmul %47, %49, %cst_44 {dimension_numbers = #tpu.dot_dimension_numbers<[1], [0], [0], [1], [0, 0, 1, 1], [], []>} : vector<256x4xbf16>, vector<4x32xbf16>, vector<256x32xf32> -> vector<256x32xf32>
    %51 = arith.addf %43, %50 : vector<256x32xf32>
    %c6 = arith.constant 6 : index
    %c0_45 = arith.constant 0 : index
    %c0_46 = arith.constant 0 : index
    %52 = vector.load %arg2[%c6, %c0_45, %c0_46] : memref<9x256x256xbf16, #tpu.memory_space<vmem>>, vector<1x256x256xbf16>
    %53 = vector.shape_cast %52 : vector<1x256x256xbf16> to vector<256x256xbf16>
    %cst_47 = arith.constant dense<0.000000e+00> : vector<256x4xf32>
    %54 = tpu.matmul %53, %2, %cst_47 {dimension_numbers = #tpu.dot_dimension_numbers<[1], [0], [0], [1], [0, 0, 1, 1], [], []>} : vector<256x256xbf16>, vector<256x4xbf16>, vector<256x4xf32> -> vector<256x4xf32>
    %55 = arith.truncf %54 : vector<256x4xf32> to vector<256x4xbf16>
    %c6_48 = arith.constant 6 : index
    %c0_49 = arith.constant 0 : index
    %c0_50 = arith.constant 0 : index
    %56 = vector.load %arg3[%c6_48, %c0_49, %c0_50] : memref<9x4x32xbf16, #tpu.memory_space<vmem>>, vector<1x4x32xbf16>
    %57 = vector.shape_cast %56 : vector<1x4x32xbf16> to vector<4x32xbf16>
    %cst_51 = arith.constant dense<0.000000e+00> : vector<256x32xf32>
    %58 = tpu.matmul %55, %57, %cst_51 {dimension_numbers = #tpu.dot_dimension_numbers<[1], [0], [0], [1], [0, 0, 1, 1], [], []>} : vector<256x4xbf16>, vector<4x32xbf16>, vector<256x32xf32> -> vector<256x32xf32>
    %59 = arith.addf %51, %58 : vector<256x32xf32>
    %c7 = arith.constant 7 : index
    %c0_52 = arith.constant 0 : index
    %c0_53 = arith.constant 0 : index
    %60 = vector.load %arg2[%c7, %c0_52, %c0_53] : memref<9x256x256xbf16, #tpu.memory_space<vmem>>, vector<1x256x256xbf16>
    %61 = vector.shape_cast %60 : vector<1x256x256xbf16> to vector<256x256xbf16>
    %cst_54 = arith.constant dense<0.000000e+00> : vector<256x4xf32>
    %62 = tpu.matmul %61, %2, %cst_54 {dimension_numbers = #tpu.dot_dimension_numbers<[1], [0], [0], [1], [0, 0, 1, 1], [], []>} : vector<256x256xbf16>, vector<256x4xbf16>, vector<256x4xf32> -> vector<256x4xf32>
    %63 = arith.truncf %62 : vector<256x4xf32> to vector<256x4xbf16>
    %c7_55 = arith.constant 7 : index
    %c0_56 = arith.constant 0 : index
    %c0_57 = arith.constant 0 : index
    %64 = vector.load %arg3[%c7_55, %c0_56, %c0_57] : memref<9x4x32xbf16, #tpu.memory_space<vmem>>, vector<1x4x32xbf16>
    %65 = vector.shape_cast %64 : vector<1x4x32xbf16> to vector<4x32xbf16>
    %cst_58 = arith.constant dense<0.000000e+00> : vector<256x32xf32>
    %66 = tpu.matmul %63, %65, %cst_58 {dimension_numbers = #tpu.dot_dimension_numbers<[1], [0], [0], [1], [0, 0, 1, 1], [], []>} : vector<256x4xbf16>, vector<4x32xbf16>, vector<256x32xf32> -> vector<256x32xf32>
    %67 = arith.addf %59, %66 : vector<256x32xf32>
    %c8 = arith.constant 8 : index
    %c0_59 = arith.constant 0 : index
    %c0_60 = arith.constant 0 : index
    %68 = vector.load %arg2[%c8, %c0_59, %c0_60] : memref<9x256x256xbf16, #tpu.memory_space<vmem>>, vector<1x256x256xbf16>
    %69 = vector.shape_cast %68 : vector<1x256x256xbf16> to vector<256x256xbf16>
    %cst_61 = arith.constant dense<0.000000e+00> : vector<256x4xf32>
    %70 = tpu.matmul %69, %2, %cst_61 {dimension_numbers = #tpu.dot_dimension_numbers<[1], [0], [0], [1], [0, 0, 1, 1], [], []>} : vector<256x256xbf16>, vector<256x4xbf16>, vector<256x4xf32> -> vector<256x4xf32>
    %71 = arith.truncf %70 : vector<256x4xf32> to vector<256x4xbf16>
    %c8_62 = arith.constant 8 : index
    %c0_63 = arith.constant 0 : index
    %c0_64 = arith.constant 0 : index
    %72 = vector.load %arg3[%c8_62, %c0_63, %c0_64] : memref<9x4x32xbf16, #tpu.memory_space<vmem>>, vector<1x4x32xbf16>
    %73 = vector.shape_cast %72 : vector<1x4x32xbf16> to vector<4x32xbf16>
    %cst_65 = arith.constant dense<0.000000e+00> : vector<256x32xf32>
    %74 = tpu.matmul %71, %73, %cst_65 {dimension_numbers = #tpu.dot_dimension_numbers<[1], [0], [0], [1], [0, 0, 1, 1], [], []>} : vector<256x4xbf16>, vector<4x32xbf16>, vector<256x32xf32> -> vector<256x32xf32>
    %75 = arith.addf %67, %74 : vector<256x32xf32>
    %c0_66 = arith.constant 0 : index
    %c0_67 = arith.constant 0 : index
    %76 = vector.load %arg4[%c0_66, %c0_67] : memref<1x32xf32, #tpu.memory_space<vmem>>, vector<1x32xf32>
    %77 = vector.broadcast %76 : vector<1x32xf32> to vector<256x32xf32>
    %78 = arith.addf %75, %77 : vector<256x32xf32>
    %cst_68 = arith.constant 0.000000e+00 : f32
    %79 = vector.broadcast %cst_68 : f32 to vector<256x32xf32>
    %80 = arith.maximumf %78, %79 : vector<256x32xf32>
    %81 = arith.truncf %80 : vector<256x32xf32> to vector<256x32xbf16>
    %c0_69 = arith.constant 0 : index
    %c0_70 = arith.constant 0 : index
    %c0_71 = arith.constant 0 : index
    %82 = vector.load %arg5[%c0_69, %c0_70, %c0_71] : memref<4x64x256xbf16, #tpu.memory_space<vmem>>, vector<1x64x256xbf16>
    %83 = vector.shape_cast %82 : vector<1x64x256xbf16> to vector<64x256xbf16>
    %cst_72 = arith.constant dense<0.000000e+00> : vector<64x32xf32>
    %84 = tpu.matmul %83, %81, %cst_72 {dimension_numbers = #tpu.dot_dimension_numbers<[1], [0], [0], [1], [0, 0, 1, 1], [], []>} : vector<64x256xbf16>, vector<256x32xbf16>, vector<64x32xf32> -> vector<64x32xf32>
    %c1_73 = arith.constant 1 : index
    %c0_74 = arith.constant 0 : index
    %c0_75 = arith.constant 0 : index
    %85 = vector.load %arg5[%c1_73, %c0_74, %c0_75] : memref<4x64x256xbf16, #tpu.memory_space<vmem>>, vector<1x64x256xbf16>
    %86 = vector.shape_cast %85 : vector<1x64x256xbf16> to vector<64x256xbf16>
    %cst_76 = arith.constant dense<0.000000e+00> : vector<64x32xf32>
    %87 = tpu.matmul %86, %81, %cst_76 {dimension_numbers = #tpu.dot_dimension_numbers<[1], [0], [0], [1], [0, 0, 1, 1], [], []>} : vector<64x256xbf16>, vector<256x32xbf16>, vector<64x32xf32> -> vector<64x32xf32>
    %c2_77 = arith.constant 2 : index
    %c0_78 = arith.constant 0 : index
    %c0_79 = arith.constant 0 : index
    %88 = vector.load %arg5[%c2_77, %c0_78, %c0_79] : memref<4x64x256xbf16, #tpu.memory_space<vmem>>, vector<1x64x256xbf16>
    %89 = vector.shape_cast %88 : vector<1x64x256xbf16> to vector<64x256xbf16>
    %cst_80 = arith.constant dense<0.000000e+00> : vector<64x32xf32>
    %90 = tpu.matmul %89, %81, %cst_80 {dimension_numbers = #tpu.dot_dimension_numbers<[1], [0], [0], [1], [0, 0, 1, 1], [], []>} : vector<64x256xbf16>, vector<256x32xbf16>, vector<64x32xf32> -> vector<64x32xf32>
    %c3_81 = arith.constant 3 : index
    %c0_82 = arith.constant 0 : index
    %c0_83 = arith.constant 0 : index
    %91 = vector.load %arg5[%c3_81, %c0_82, %c0_83] : memref<4x64x256xbf16, #tpu.memory_space<vmem>>, vector<1x64x256xbf16>
    %92 = vector.shape_cast %91 : vector<1x64x256xbf16> to vector<64x256xbf16>
    %cst_84 = arith.constant dense<0.000000e+00> : vector<64x32xf32>
    %93 = tpu.matmul %92, %81, %cst_84 {dimension_numbers = #tpu.dot_dimension_numbers<[1], [0], [0], [1], [0, 0, 1, 1], [], []>} : vector<64x256xbf16>, vector<256x32xbf16>, vector<64x32xf32> -> vector<64x32xf32>
    %94 = arith.maximumf %84, %87 : vector<64x32xf32>
    %95 = arith.maximumf %90, %93 : vector<64x32xf32>
    %96 = arith.maximumf %94, %95 : vector<64x32xf32>
    %97 = arith.truncf %96 : vector<64x32xf32> to vector<64x32xbf16>
    %cst_85 = arith.constant 0.000000e+00 : f32
    %98 = vector.broadcast %cst_85 : f32 to vector<64x64xf32>
    %c0_86 = arith.constant 0 : index
    %c0_87 = arith.constant 0 : index
    %c0_88 = arith.constant 0 : index
    %99 = vector.load %arg6[%c0_86, %c0_87, %c0_88] : memref<9x64x64xbf16, #tpu.memory_space<vmem>>, vector<1x64x64xbf16>
    %100 = vector.shape_cast %99 : vector<1x64x64xbf16> to vector<64x64xbf16>
    %cst_89 = arith.constant dense<0.000000e+00> : vector<64x32xf32>
    %101 = tpu.matmul %100, %97, %cst_89 {dimension_numbers = #tpu.dot_dimension_numbers<[1], [0], [0], [1], [0, 0, 1, 1], [], []>} : vector<64x64xbf16>, vector<64x32xbf16>, vector<64x32xf32> -> vector<64x32xf32>
    %102 = arith.truncf %101 : vector<64x32xf32> to vector<64x32xbf16>
    %c0_90 = arith.constant 0 : index
    %c0_91 = arith.constant 0 : index
    %c0_92 = arith.constant 0 : index
    %103 = vector.load %arg7[%c0_90, %c0_91, %c0_92] : memref<9x32x64xbf16, #tpu.memory_space<vmem>>, vector<1x32x64xbf16>
    %104 = vector.shape_cast %103 : vector<1x32x64xbf16> to vector<32x64xbf16>
    %cst_93 = arith.constant dense<0.000000e+00> : vector<64x64xf32>
    %105 = tpu.matmul %102, %104, %cst_93 {dimension_numbers = #tpu.dot_dimension_numbers<[1], [0], [0], [1], [0, 0, 1, 1], [], []>} : vector<64x32xbf16>, vector<32x64xbf16>, vector<64x64xf32> -> vector<64x64xf32>
    %106 = arith.addf %98, %105 : vector<64x64xf32>
    %c1_94 = arith.constant 1 : index
    %c0_95 = arith.constant 0 : index
    %c0_96 = arith.constant 0 : index
    %107 = vector.load %arg6[%c1_94, %c0_95, %c0_96] : memref<9x64x64xbf16, #tpu.memory_space<vmem>>, vector<1x64x64xbf16>
    %108 = vector.shape_cast %107 : vector<1x64x64xbf16> to vector<64x64xbf16>
    %cst_97 = arith.constant dense<0.000000e+00> : vector<64x32xf32>
    %109 = tpu.matmul %108, %97, %cst_97 {dimension_numbers = #tpu.dot_dimension_numbers<[1], [0], [0], [1], [0, 0, 1, 1], [], []>} : vector<64x64xbf16>, vector<64x32xbf16>, vector<64x32xf32> -> vector<64x32xf32>
    %110 = arith.truncf %109 : vector<64x32xf32> to vector<64x32xbf16>
    %c1_98 = arith.constant 1 : index
    %c0_99 = arith.constant 0 : index
    %c0_100 = arith.constant 0 : index
    %111 = vector.load %arg7[%c1_98, %c0_99, %c0_100] : memref<9x32x64xbf16, #tpu.memory_space<vmem>>, vector<1x32x64xbf16>
    %112 = vector.shape_cast %111 : vector<1x32x64xbf16> to vector<32x64xbf16>
    %cst_101 = arith.constant dense<0.000000e+00> : vector<64x64xf32>
    %113 = tpu.matmul %110, %112, %cst_101 {dimension_numbers = #tpu.dot_dimension_numbers<[1], [0], [0], [1], [0, 0, 1, 1], [], []>} : vector<64x32xbf16>, vector<32x64xbf16>, vector<64x64xf32> -> vector<64x64xf32>
    %114 = arith.addf %106, %113 : vector<64x64xf32>
    %c2_102 = arith.constant 2 : index
    %c0_103 = arith.constant 0 : index
    %c0_104 = arith.constant 0 : index
    %115 = vector.load %arg6[%c2_102, %c0_103, %c0_104] : memref<9x64x64xbf16, #tpu.memory_space<vmem>>, vector<1x64x64xbf16>
    %116 = vector.shape_cast %115 : vector<1x64x64xbf16> to vector<64x64xbf16>
    %cst_105 = arith.constant dense<0.000000e+00> : vector<64x32xf32>
    %117 = tpu.matmul %116, %97, %cst_105 {dimension_numbers = #tpu.dot_dimension_numbers<[1], [0], [0], [1], [0, 0, 1, 1], [], []>} : vector<64x64xbf16>, vector<64x32xbf16>, vector<64x32xf32> -> vector<64x32xf32>
    %118 = arith.truncf %117 : vector<64x32xf32> to vector<64x32xbf16>
    %c2_106 = arith.constant 2 : index
    %c0_107 = arith.constant 0 : index
    %c0_108 = arith.constant 0 : index
    %119 = vector.load %arg7[%c2_106, %c0_107, %c0_108] : memref<9x32x64xbf16, #tpu.memory_space<vmem>>, vector<1x32x64xbf16>
    %120 = vector.shape_cast %119 : vector<1x32x64xbf16> to vector<32x64xbf16>
    %cst_109 = arith.constant dense<0.000000e+00> : vector<64x64xf32>
    %121 = tpu.matmul %118, %120, %cst_109 {dimension_numbers = #tpu.dot_dimension_numbers<[1], [0], [0], [1], [0, 0, 1, 1], [], []>} : vector<64x32xbf16>, vector<32x64xbf16>, vector<64x64xf32> -> vector<64x64xf32>
    %122 = arith.addf %114, %121 : vector<64x64xf32>
    %c3_110 = arith.constant 3 : index
    %c0_111 = arith.constant 0 : index
    %c0_112 = arith.constant 0 : index
    %123 = vector.load %arg6[%c3_110, %c0_111, %c0_112] : memref<9x64x64xbf16, #tpu.memory_space<vmem>>, vector<1x64x64xbf16>
    %124 = vector.shape_cast %123 : vector<1x64x64xbf16> to vector<64x64xbf16>
    %cst_113 = arith.constant dense<0.000000e+00> : vector<64x32xf32>
    %125 = tpu.matmul %124, %97, %cst_113 {dimension_numbers = #tpu.dot_dimension_numbers<[1], [0], [0], [1], [0, 0, 1, 1], [], []>} : vector<64x64xbf16>, vector<64x32xbf16>, vector<64x32xf32> -> vector<64x32xf32>
    %126 = arith.truncf %125 : vector<64x32xf32> to vector<64x32xbf16>
    %c3_114 = arith.constant 3 : index
    %c0_115 = arith.constant 0 : index
    %c0_116 = arith.constant 0 : index
    %127 = vector.load %arg7[%c3_114, %c0_115, %c0_116] : memref<9x32x64xbf16, #tpu.memory_space<vmem>>, vector<1x32x64xbf16>
    %128 = vector.shape_cast %127 : vector<1x32x64xbf16> to vector<32x64xbf16>
    %cst_117 = arith.constant dense<0.000000e+00> : vector<64x64xf32>
    %129 = tpu.matmul %126, %128, %cst_117 {dimension_numbers = #tpu.dot_dimension_numbers<[1], [0], [0], [1], [0, 0, 1, 1], [], []>} : vector<64x32xbf16>, vector<32x64xbf16>, vector<64x64xf32> -> vector<64x64xf32>
    %130 = arith.addf %122, %129 : vector<64x64xf32>
    %c4_118 = arith.constant 4 : index
    %c0_119 = arith.constant 0 : index
    %c0_120 = arith.constant 0 : index
    %131 = vector.load %arg6[%c4_118, %c0_119, %c0_120] : memref<9x64x64xbf16, #tpu.memory_space<vmem>>, vector<1x64x64xbf16>
    %132 = vector.shape_cast %131 : vector<1x64x64xbf16> to vector<64x64xbf16>
    %cst_121 = arith.constant dense<0.000000e+00> : vector<64x32xf32>
    %133 = tpu.matmul %132, %97, %cst_121 {dimension_numbers = #tpu.dot_dimension_numbers<[1], [0], [0], [1], [0, 0, 1, 1], [], []>} : vector<64x64xbf16>, vector<64x32xbf16>, vector<64x32xf32> -> vector<64x32xf32>
    %134 = arith.truncf %133 : vector<64x32xf32> to vector<64x32xbf16>
    %c4_122 = arith.constant 4 : index
    %c0_123 = arith.constant 0 : index
    %c0_124 = arith.constant 0 : index
    %135 = vector.load %arg7[%c4_122, %c0_123, %c0_124] : memref<9x32x64xbf16, #tpu.memory_space<vmem>>, vector<1x32x64xbf16>
    %136 = vector.shape_cast %135 : vector<1x32x64xbf16> to vector<32x64xbf16>
    %cst_125 = arith.constant dense<0.000000e+00> : vector<64x64xf32>
    %137 = tpu.matmul %134, %136, %cst_125 {dimension_numbers = #tpu.dot_dimension_numbers<[1], [0], [0], [1], [0, 0, 1, 1], [], []>} : vector<64x32xbf16>, vector<32x64xbf16>, vector<64x64xf32> -> vector<64x64xf32>
    %138 = arith.addf %130, %137 : vector<64x64xf32>
    %c5_126 = arith.constant 5 : index
    %c0_127 = arith.constant 0 : index
    %c0_128 = arith.constant 0 : index
    %139 = vector.load %arg6[%c5_126, %c0_127, %c0_128] : memref<9x64x64xbf16, #tpu.memory_space<vmem>>, vector<1x64x64xbf16>
    %140 = vector.shape_cast %139 : vector<1x64x64xbf16> to vector<64x64xbf16>
    %cst_129 = arith.constant dense<0.000000e+00> : vector<64x32xf32>
    %141 = tpu.matmul %140, %97, %cst_129 {dimension_numbers = #tpu.dot_dimension_numbers<[1], [0], [0], [1], [0, 0, 1, 1], [], []>} : vector<64x64xbf16>, vector<64x32xbf16>, vector<64x32xf32> -> vector<64x32xf32>
    %142 = arith.truncf %141 : vector<64x32xf32> to vector<64x32xbf16>
    %c5_130 = arith.constant 5 : index
    %c0_131 = arith.constant 0 : index
    %c0_132 = arith.constant 0 : index
    %143 = vector.load %arg7[%c5_130, %c0_131, %c0_132] : memref<9x32x64xbf16, #tpu.memory_space<vmem>>, vector<1x32x64xbf16>
    %144 = vector.shape_cast %143 : vector<1x32x64xbf16> to vector<32x64xbf16>
    %cst_133 = arith.constant dense<0.000000e+00> : vector<64x64xf32>
    %145 = tpu.matmul %142, %144, %cst_133 {dimension_numbers = #tpu.dot_dimension_numbers<[1], [0], [0], [1], [0, 0, 1, 1], [], []>} : vector<64x32xbf16>, vector<32x64xbf16>, vector<64x64xf32> -> vector<64x64xf32>
    %146 = arith.addf %138, %145 : vector<64x64xf32>
    %c6_134 = arith.constant 6 : index
    %c0_135 = arith.constant 0 : index
    %c0_136 = arith.constant 0 : index
    %147 = vector.load %arg6[%c6_134, %c0_135, %c0_136] : memref<9x64x64xbf16, #tpu.memory_space<vmem>>, vector<1x64x64xbf16>
    %148 = vector.shape_cast %147 : vector<1x64x64xbf16> to vector<64x64xbf16>
    %cst_137 = arith.constant dense<0.000000e+00> : vector<64x32xf32>
    %149 = tpu.matmul %148, %97, %cst_137 {dimension_numbers = #tpu.dot_dimension_numbers<[1], [0], [0], [1], [0, 0, 1, 1], [], []>} : vector<64x64xbf16>, vector<64x32xbf16>, vector<64x32xf32> -> vector<64x32xf32>
    %150 = arith.truncf %149 : vector<64x32xf32> to vector<64x32xbf16>
    %c6_138 = arith.constant 6 : index
    %c0_139 = arith.constant 0 : index
    %c0_140 = arith.constant 0 : index
    %151 = vector.load %arg7[%c6_138, %c0_139, %c0_140] : memref<9x32x64xbf16, #tpu.memory_space<vmem>>, vector<1x32x64xbf16>
    %152 = vector.shape_cast %151 : vector<1x32x64xbf16> to vector<32x64xbf16>
    %cst_141 = arith.constant dense<0.000000e+00> : vector<64x64xf32>
    %153 = tpu.matmul %150, %152, %cst_141 {dimension_numbers = #tpu.dot_dimension_numbers<[1], [0], [0], [1], [0, 0, 1, 1], [], []>} : vector<64x32xbf16>, vector<32x64xbf16>, vector<64x64xf32> -> vector<64x64xf32>
    %154 = arith.addf %146, %153 : vector<64x64xf32>
    %c7_142 = arith.constant 7 : index
    %c0_143 = arith.constant 0 : index
    %c0_144 = arith.constant 0 : index
    %155 = vector.load %arg6[%c7_142, %c0_143, %c0_144] : memref<9x64x64xbf16, #tpu.memory_space<vmem>>, vector<1x64x64xbf16>
    %156 = vector.shape_cast %155 : vector<1x64x64xbf16> to vector<64x64xbf16>
    %cst_145 = arith.constant dense<0.000000e+00> : vector<64x32xf32>
    %157 = tpu.matmul %156, %97, %cst_145 {dimension_numbers = #tpu.dot_dimension_numbers<[1], [0], [0], [1], [0, 0, 1, 1], [], []>} : vector<64x64xbf16>, vector<64x32xbf16>, vector<64x32xf32> -> vector<64x32xf32>
    %158 = arith.truncf %157 : vector<64x32xf32> to vector<64x32xbf16>
    %c7_146 = arith.constant 7 : index
    %c0_147 = arith.constant 0 : index
    %c0_148 = arith.constant 0 : index
    %159 = vector.load %arg7[%c7_146, %c0_147, %c0_148] : memref<9x32x64xbf16, #tpu.memory_space<vmem>>, vector<1x32x64xbf16>
    %160 = vector.shape_cast %159 : vector<1x32x64xbf16> to vector<32x64xbf16>
    %cst_149 = arith.constant dense<0.000000e+00> : vector<64x64xf32>
    %161 = tpu.matmul %158, %160, %cst_149 {dimension_numbers = #tpu.dot_dimension_numbers<[1], [0], [0], [1], [0, 0, 1, 1], [], []>} : vector<64x32xbf16>, vector<32x64xbf16>, vector<64x64xf32> -> vector<64x64xf32>
    %162 = arith.addf %154, %161 : vector<64x64xf32>
    %c8_150 = arith.constant 8 : index
    %c0_151 = arith.constant 0 : index
    %c0_152 = arith.constant 0 : index
    %163 = vector.load %arg6[%c8_150, %c0_151, %c0_152] : memref<9x64x64xbf16, #tpu.memory_space<vmem>>, vector<1x64x64xbf16>
    %164 = vector.shape_cast %163 : vector<1x64x64xbf16> to vector<64x64xbf16>
    %cst_153 = arith.constant dense<0.000000e+00> : vector<64x32xf32>
    %165 = tpu.matmul %164, %97, %cst_153 {dimension_numbers = #tpu.dot_dimension_numbers<[1], [0], [0], [1], [0, 0, 1, 1], [], []>} : vector<64x64xbf16>, vector<64x32xbf16>, vector<64x32xf32> -> vector<64x32xf32>
    %166 = arith.truncf %165 : vector<64x32xf32> to vector<64x32xbf16>
    %c8_154 = arith.constant 8 : index
    %c0_155 = arith.constant 0 : index
    %c0_156 = arith.constant 0 : index
    %167 = vector.load %arg7[%c8_154, %c0_155, %c0_156] : memref<9x32x64xbf16, #tpu.memory_space<vmem>>, vector<1x32x64xbf16>
    %168 = vector.shape_cast %167 : vector<1x32x64xbf16> to vector<32x64xbf16>
    %cst_157 = arith.constant dense<0.000000e+00> : vector<64x64xf32>
    %169 = tpu.matmul %166, %168, %cst_157 {dimension_numbers = #tpu.dot_dimension_numbers<[1], [0], [0], [1], [0, 0, 1, 1], [], []>} : vector<64x32xbf16>, vector<32x64xbf16>, vector<64x64xf32> -> vector<64x64xf32>
    %170 = arith.addf %162, %169 : vector<64x64xf32>
    %c0_158 = arith.constant 0 : index
    %c0_159 = arith.constant 0 : index
    %171 = vector.load %arg8[%c0_158, %c0_159] : memref<1x64xf32, #tpu.memory_space<vmem>>, vector<1x64xf32>
    %172 = vector.broadcast %171 : vector<1x64xf32> to vector<64x64xf32>
    %173 = arith.addf %170, %172 : vector<64x64xf32>
    %cst_160 = arith.constant 0.000000e+00 : f32
    %174 = vector.broadcast %cst_160 : f32 to vector<64x64xf32>
    %175 = arith.maximumf %173, %174 : vector<64x64xf32>
    %176 = arith.truncf %175 : vector<64x64xf32> to vector<64x64xbf16>
    %c0_161 = arith.constant 0 : index
    %c0_162 = arith.constant 0 : index
    %c0_163 = arith.constant 0 : index
    %177 = vector.load %arg9[%c0_161, %c0_162, %c0_163] : memref<4x16x64xbf16, #tpu.memory_space<vmem>>, vector<1x16x64xbf16>
    %178 = vector.shape_cast %177 : vector<1x16x64xbf16> to vector<16x64xbf16>
    %cst_164 = arith.constant dense<0.000000e+00> : vector<16x64xf32>
    %179 = tpu.matmul %178, %176, %cst_164 {dimension_numbers = #tpu.dot_dimension_numbers<[1], [0], [0], [1], [0, 0, 1, 1], [], []>} : vector<16x64xbf16>, vector<64x64xbf16>, vector<16x64xf32> -> vector<16x64xf32>
    %c1_165 = arith.constant 1 : index
    %c0_166 = arith.constant 0 : index
    %c0_167 = arith.constant 0 : index
    %180 = vector.load %arg9[%c1_165, %c0_166, %c0_167] : memref<4x16x64xbf16, #tpu.memory_space<vmem>>, vector<1x16x64xbf16>
    %181 = vector.shape_cast %180 : vector<1x16x64xbf16> to vector<16x64xbf16>
    %cst_168 = arith.constant dense<0.000000e+00> : vector<16x64xf32>
    %182 = tpu.matmul %181, %176, %cst_168 {dimension_numbers = #tpu.dot_dimension_numbers<[1], [0], [0], [1], [0, 0, 1, 1], [], []>} : vector<16x64xbf16>, vector<64x64xbf16>, vector<16x64xf32> -> vector<16x64xf32>
    %c2_169 = arith.constant 2 : index
    %c0_170 = arith.constant 0 : index
    %c0_171 = arith.constant 0 : index
    %183 = vector.load %arg9[%c2_169, %c0_170, %c0_171] : memref<4x16x64xbf16, #tpu.memory_space<vmem>>, vector<1x16x64xbf16>
    %184 = vector.shape_cast %183 : vector<1x16x64xbf16> to vector<16x64xbf16>
    %cst_172 = arith.constant dense<0.000000e+00> : vector<16x64xf32>
    %185 = tpu.matmul %184, %176, %cst_172 {dimension_numbers = #tpu.dot_dimension_numbers<[1], [0], [0], [1], [0, 0, 1, 1], [], []>} : vector<16x64xbf16>, vector<64x64xbf16>, vector<16x64xf32> -> vector<16x64xf32>
    %c3_173 = arith.constant 3 : index
    %c0_174 = arith.constant 0 : index
    %c0_175 = arith.constant 0 : index
    %186 = vector.load %arg9[%c3_173, %c0_174, %c0_175] : memref<4x16x64xbf16, #tpu.memory_space<vmem>>, vector<1x16x64xbf16>
    %187 = vector.shape_cast %186 : vector<1x16x64xbf16> to vector<16x64xbf16>
    %cst_176 = arith.constant dense<0.000000e+00> : vector<16x64xf32>
    %188 = tpu.matmul %187, %176, %cst_176 {dimension_numbers = #tpu.dot_dimension_numbers<[1], [0], [0], [1], [0, 0, 1, 1], [], []>} : vector<16x64xbf16>, vector<64x64xbf16>, vector<16x64xf32> -> vector<16x64xf32>
    %189 = arith.maximumf %179, %182 : vector<16x64xf32>
    %190 = arith.maximumf %185, %188 : vector<16x64xf32>
    %191 = arith.maximumf %189, %190 : vector<16x64xf32>
    %192 = arith.truncf %191 : vector<16x64xf32> to vector<16x64xbf16>
    %cst_177 = arith.constant 0.000000e+00 : f32
    %193 = vector.broadcast %cst_177 : f32 to vector<16x128xf32>
    %c0_178 = arith.constant 0 : index
    %c0_179 = arith.constant 0 : index
    %c0_180 = arith.constant 0 : index
    %194 = vector.load %arg10[%c0_178, %c0_179, %c0_180] : memref<9x16x16xbf16, #tpu.memory_space<vmem>>, vector<1x16x16xbf16>
    %195 = vector.shape_cast %194 : vector<1x16x16xbf16> to vector<16x16xbf16>
    %cst_181 = arith.constant dense<0.000000e+00> : vector<16x64xf32>
    %196 = tpu.matmul %195, %192, %cst_181 {dimension_numbers = #tpu.dot_dimension_numbers<[1], [0], [0], [1], [0, 0, 1, 1], [], []>} : vector<16x16xbf16>, vector<16x64xbf16>, vector<16x64xf32> -> vector<16x64xf32>
    %197 = arith.truncf %196 : vector<16x64xf32> to vector<16x64xbf16>
    %c0_182 = arith.constant 0 : index
    %c0_183 = arith.constant 0 : index
    %c0_184 = arith.constant 0 : index
    %198 = vector.load %arg11[%c0_182, %c0_183, %c0_184] : memref<9x64x128xbf16, #tpu.memory_space<vmem>>, vector<1x64x128xbf16>
    %199 = vector.shape_cast %198 : vector<1x64x128xbf16> to vector<64x128xbf16>
    %cst_185 = arith.constant dense<0.000000e+00> : vector<16x128xf32>
    %200 = tpu.matmul %197, %199, %cst_185 {dimension_numbers = #tpu.dot_dimension_numbers<[1], [0], [0], [1], [0, 0, 1, 1], [], []>} : vector<16x64xbf16>, vector<64x128xbf16>, vector<16x128xf32> -> vector<16x128xf32>
    %201 = arith.addf %193, %200 : vector<16x128xf32>
    %c1_186 = arith.constant 1 : index
    %c0_187 = arith.constant 0 : index
    %c0_188 = arith.constant 0 : index
    %202 = vector.load %arg10[%c1_186, %c0_187, %c0_188] : memref<9x16x16xbf16, #tpu.memory_space<vmem>>, vector<1x16x16xbf16>
    %203 = vector.shape_cast %202 : vector<1x16x16xbf16> to vector<16x16xbf16>
    %cst_189 = arith.constant dense<0.000000e+00> : vector<16x64xf32>
    %204 = tpu.matmul %203, %192, %cst_189 {dimension_numbers = #tpu.dot_dimension_numbers<[1], [0], [0], [1], [0, 0, 1, 1], [], []>} : vector<16x16xbf16>, vector<16x64xbf16>, vector<16x64xf32> -> vector<16x64xf32>
    %205 = arith.truncf %204 : vector<16x64xf32> to vector<16x64xbf16>
    %c1_190 = arith.constant 1 : index
    %c0_191 = arith.constant 0 : index
    %c0_192 = arith.constant 0 : index
    %206 = vector.load %arg11[%c1_190, %c0_191, %c0_192] : memref<9x64x128xbf16, #tpu.memory_space<vmem>>, vector<1x64x128xbf16>
    %207 = vector.shape_cast %206 : vector<1x64x128xbf16> to vector<64x128xbf16>
    %cst_193 = arith.constant dense<0.000000e+00> : vector<16x128xf32>
    %208 = tpu.matmul %205, %207, %cst_193 {dimension_numbers = #tpu.dot_dimension_numbers<[1], [0], [0], [1], [0, 0, 1, 1], [], []>} : vector<16x64xbf16>, vector<64x128xbf16>, vector<16x128xf32> -> vector<16x128xf32>
    %209 = arith.addf %201, %208 : vector<16x128xf32>
    %c2_194 = arith.constant 2 : index
    %c0_195 = arith.constant 0 : index
    %c0_196 = arith.constant 0 : index
    %210 = vector.load %arg10[%c2_194, %c0_195, %c0_196] : memref<9x16x16xbf16, #tpu.memory_space<vmem>>, vector<1x16x16xbf16>
    %211 = vector.shape_cast %210 : vector<1x16x16xbf16> to vector<16x16xbf16>
    %cst_197 = arith.constant dense<0.000000e+00> : vector<16x64xf32>
    %212 = tpu.matmul %211, %192, %cst_197 {dimension_numbers = #tpu.dot_dimension_numbers<[1], [0], [0], [1], [0, 0, 1, 1], [], []>} : vector<16x16xbf16>, vector<16x64xbf16>, vector<16x64xf32> -> vector<16x64xf32>
    %213 = arith.truncf %212 : vector<16x64xf32> to vector<16x64xbf16>
    %c2_198 = arith.constant 2 : index
    %c0_199 = arith.constant 0 : index
    %c0_200 = arith.constant 0 : index
    %214 = vector.load %arg11[%c2_198, %c0_199, %c0_200] : memref<9x64x128xbf16, #tpu.memory_space<vmem>>, vector<1x64x128xbf16>
    %215 = vector.shape_cast %214 : vector<1x64x128xbf16> to vector<64x128xbf16>
    %cst_201 = arith.constant dense<0.000000e+00> : vector<16x128xf32>
    %216 = tpu.matmul %213, %215, %cst_201 {dimension_numbers = #tpu.dot_dimension_numbers<[1], [0], [0], [1], [0, 0, 1, 1], [], []>} : vector<16x64xbf16>, vector<64x128xbf16>, vector<16x128xf32> -> vector<16x128xf32>
    %217 = arith.addf %209, %216 : vector<16x128xf32>
    %c3_202 = arith.constant 3 : index
    %c0_203 = arith.constant 0 : index
    %c0_204 = arith.constant 0 : index
    %218 = vector.load %arg10[%c3_202, %c0_203, %c0_204] : memref<9x16x16xbf16, #tpu.memory_space<vmem>>, vector<1x16x16xbf16>
    %219 = vector.shape_cast %218 : vector<1x16x16xbf16> to vector<16x16xbf16>
    %cst_205 = arith.constant dense<0.000000e+00> : vector<16x64xf32>
    %220 = tpu.matmul %219, %192, %cst_205 {dimension_numbers = #tpu.dot_dimension_numbers<[1], [0], [0], [1], [0, 0, 1, 1], [], []>} : vector<16x16xbf16>, vector<16x64xbf16>, vector<16x64xf32> -> vector<16x64xf32>
    %221 = arith.truncf %220 : vector<16x64xf32> to vector<16x64xbf16>
    %c3_206 = arith.constant 3 : index
    %c0_207 = arith.constant 0 : index
    %c0_208 = arith.constant 0 : index
    %222 = vector.load %arg11[%c3_206, %c0_207, %c0_208] : memref<9x64x128xbf16, #tpu.memory_space<vmem>>, vector<1x64x128xbf16>
    %223 = vector.shape_cast %222 : vector<1x64x128xbf16> to vector<64x128xbf16>
    %cst_209 = arith.constant dense<0.000000e+00> : vector<16x128xf32>
    %224 = tpu.matmul %221, %223, %cst_209 {dimension_numbers = #tpu.dot_dimension_numbers<[1], [0], [0], [1], [0, 0, 1, 1], [], []>} : vector<16x64xbf16>, vector<64x128xbf16>, vector<16x128xf32> -> vector<16x128xf32>
    %225 = arith.addf %217, %224 : vector<16x128xf32>
    %c4_210 = arith.constant 4 : index
    %c0_211 = arith.constant 0 : index
    %c0_212 = arith.constant 0 : index
    %226 = vector.load %arg10[%c4_210, %c0_211, %c0_212] : memref<9x16x16xbf16, #tpu.memory_space<vmem>>, vector<1x16x16xbf16>
    %227 = vector.shape_cast %226 : vector<1x16x16xbf16> to vector<16x16xbf16>
    %cst_213 = arith.constant dense<0.000000e+00> : vector<16x64xf32>
    %228 = tpu.matmul %227, %192, %cst_213 {dimension_numbers = #tpu.dot_dimension_numbers<[1], [0], [0], [1], [0, 0, 1, 1], [], []>} : vector<16x16xbf16>, vector<16x64xbf16>, vector<16x64xf32> -> vector<16x64xf32>
    %229 = arith.truncf %228 : vector<16x64xf32> to vector<16x64xbf16>
    %c4_214 = arith.constant 4 : index
    %c0_215 = arith.constant 0 : index
    %c0_216 = arith.constant 0 : index
    %230 = vector.load %arg11[%c4_214, %c0_215, %c0_216] : memref<9x64x128xbf16, #tpu.memory_space<vmem>>, vector<1x64x128xbf16>
    %231 = vector.shape_cast %230 : vector<1x64x128xbf16> to vector<64x128xbf16>
    %cst_217 = arith.constant dense<0.000000e+00> : vector<16x128xf32>
    %232 = tpu.matmul %229, %231, %cst_217 {dimension_numbers = #tpu.dot_dimension_numbers<[1], [0], [0], [1], [0, 0, 1, 1], [], []>} : vector<16x64xbf16>, vector<64x128xbf16>, vector<16x128xf32> -> vector<16x128xf32>
    %233 = arith.addf %225, %232 : vector<16x128xf32>
    %c5_218 = arith.constant 5 : index
    %c0_219 = arith.constant 0 : index
    %c0_220 = arith.constant 0 : index
    %234 = vector.load %arg10[%c5_218, %c0_219, %c0_220] : memref<9x16x16xbf16, #tpu.memory_space<vmem>>, vector<1x16x16xbf16>
    %235 = vector.shape_cast %234 : vector<1x16x16xbf16> to vector<16x16xbf16>
    %cst_221 = arith.constant dense<0.000000e+00> : vector<16x64xf32>
    %236 = tpu.matmul %235, %192, %cst_221 {dimension_numbers = #tpu.dot_dimension_numbers<[1], [0], [0], [1], [0, 0, 1, 1], [], []>} : vector<16x16xbf16>, vector<16x64xbf16>, vector<16x64xf32> -> vector<16x64xf32>
    %237 = arith.truncf %236 : vector<16x64xf32> to vector<16x64xbf16>
    %c5_222 = arith.constant 5 : index
    %c0_223 = arith.constant 0 : index
    %c0_224 = arith.constant 0 : index
    %238 = vector.load %arg11[%c5_222, %c0_223, %c0_224] : memref<9x64x128xbf16, #tpu.memory_space<vmem>>, vector<1x64x128xbf16>
    %239 = vector.shape_cast %238 : vector<1x64x128xbf16> to vector<64x128xbf16>
    %cst_225 = arith.constant dense<0.000000e+00> : vector<16x128xf32>
    %240 = tpu.matmul %237, %239, %cst_225 {dimension_numbers = #tpu.dot_dimension_numbers<[1], [0], [0], [1], [0, 0, 1, 1], [], []>} : vector<16x64xbf16>, vector<64x128xbf16>, vector<16x128xf32> -> vector<16x128xf32>
    %241 = arith.addf %233, %240 : vector<16x128xf32>
    %c6_226 = arith.constant 6 : index
    %c0_227 = arith.constant 0 : index
    %c0_228 = arith.constant 0 : index
    %242 = vector.load %arg10[%c6_226, %c0_227, %c0_228] : memref<9x16x16xbf16, #tpu.memory_space<vmem>>, vector<1x16x16xbf16>
    %243 = vector.shape_cast %242 : vector<1x16x16xbf16> to vector<16x16xbf16>
    %cst_229 = arith.constant dense<0.000000e+00> : vector<16x64xf32>
    %244 = tpu.matmul %243, %192, %cst_229 {dimension_numbers = #tpu.dot_dimension_numbers<[1], [0], [0], [1], [0, 0, 1, 1], [], []>} : vector<16x16xbf16>, vector<16x64xbf16>, vector<16x64xf32> -> vector<16x64xf32>
    %245 = arith.truncf %244 : vector<16x64xf32> to vector<16x64xbf16>
    %c6_230 = arith.constant 6 : index
    %c0_231 = arith.constant 0 : index
    %c0_232 = arith.constant 0 : index
    %246 = vector.load %arg11[%c6_230, %c0_231, %c0_232] : memref<9x64x128xbf16, #tpu.memory_space<vmem>>, vector<1x64x128xbf16>
    %247 = vector.shape_cast %246 : vector<1x64x128xbf16> to vector<64x128xbf16>
    %cst_233 = arith.constant dense<0.000000e+00> : vector<16x128xf32>
    %248 = tpu.matmul %245, %247, %cst_233 {dimension_numbers = #tpu.dot_dimension_numbers<[1], [0], [0], [1], [0, 0, 1, 1], [], []>} : vector<16x64xbf16>, vector<64x128xbf16>, vector<16x128xf32> -> vector<16x128xf32>
    %249 = arith.addf %241, %248 : vector<16x128xf32>
    %c7_234 = arith.constant 7 : index
    %c0_235 = arith.constant 0 : index
    %c0_236 = arith.constant 0 : index
    %250 = vector.load %arg10[%c7_234, %c0_235, %c0_236] : memref<9x16x16xbf16, #tpu.memory_space<vmem>>, vector<1x16x16xbf16>
    %251 = vector.shape_cast %250 : vector<1x16x16xbf16> to vector<16x16xbf16>
    %cst_237 = arith.constant dense<0.000000e+00> : vector<16x64xf32>
    %252 = tpu.matmul %251, %192, %cst_237 {dimension_numbers = #tpu.dot_dimension_numbers<[1], [0], [0], [1], [0, 0, 1, 1], [], []>} : vector<16x16xbf16>, vector<16x64xbf16>, vector<16x64xf32> -> vector<16x64xf32>
    %253 = arith.truncf %252 : vector<16x64xf32> to vector<16x64xbf16>
    %c7_238 = arith.constant 7 : index
    %c0_239 = arith.constant 0 : index
    %c0_240 = arith.constant 0 : index
    %254 = vector.load %arg11[%c7_238, %c0_239, %c0_240] : memref<9x64x128xbf16, #tpu.memory_space<vmem>>, vector<1x64x128xbf16>
    %255 = vector.shape_cast %254 : vector<1x64x128xbf16> to vector<64x128xbf16>
    %cst_241 = arith.constant dense<0.000000e+00> : vector<16x128xf32>
    %256 = tpu.matmul %253, %255, %cst_241 {dimension_numbers = #tpu.dot_dimension_numbers<[1], [0], [0], [1], [0, 0, 1, 1], [], []>} : vector<16x64xbf16>, vector<64x128xbf16>, vector<16x128xf32> -> vector<16x128xf32>
    %257 = arith.addf %249, %256 : vector<16x128xf32>
    %c8_242 = arith.constant 8 : index
    %c0_243 = arith.constant 0 : index
    %c0_244 = arith.constant 0 : index
    %258 = vector.load %arg10[%c8_242, %c0_243, %c0_244] : memref<9x16x16xbf16, #tpu.memory_space<vmem>>, vector<1x16x16xbf16>
    %259 = vector.shape_cast %258 : vector<1x16x16xbf16> to vector<16x16xbf16>
    %cst_245 = arith.constant dense<0.000000e+00> : vector<16x64xf32>
    %260 = tpu.matmul %259, %192, %cst_245 {dimension_numbers = #tpu.dot_dimension_numbers<[1], [0], [0], [1], [0, 0, 1, 1], [], []>} : vector<16x16xbf16>, vector<16x64xbf16>, vector<16x64xf32> -> vector<16x64xf32>
    %261 = arith.truncf %260 : vector<16x64xf32> to vector<16x64xbf16>
    %c8_246 = arith.constant 8 : index
    %c0_247 = arith.constant 0 : index
    %c0_248 = arith.constant 0 : index
    %262 = vector.load %arg11[%c8_246, %c0_247, %c0_248] : memref<9x64x128xbf16, #tpu.memory_space<vmem>>, vector<1x64x128xbf16>
    %263 = vector.shape_cast %262 : vector<1x64x128xbf16> to vector<64x128xbf16>
    %cst_249 = arith.constant dense<0.000000e+00> : vector<16x128xf32>
    %264 = tpu.matmul %261, %263, %cst_249 {dimension_numbers = #tpu.dot_dimension_numbers<[1], [0], [0], [1], [0, 0, 1, 1], [], []>} : vector<16x64xbf16>, vector<64x128xbf16>, vector<16x128xf32> -> vector<16x128xf32>
    %265 = arith.addf %257, %264 : vector<16x128xf32>
    %c0_250 = arith.constant 0 : index
    %c0_251 = arith.constant 0 : index
    %266 = vector.load %arg12[%c0_250, %c0_251] : memref<1x128xf32, #tpu.memory_space<vmem>>, vector<1x128xf32>
    %267 = vector.broadcast %266 : vector<1x128xf32> to vector<16x128xf32>
    %268 = arith.addf %265, %267 : vector<16x128xf32>
    %cst_252 = arith.constant 0.000000e+00 : f32
    %269 = vector.broadcast %cst_252 : f32 to vector<16x128xf32>
    %270 = arith.maximumf %268, %269 : vector<16x128xf32>
    %271 = arith.truncf %270 : vector<16x128xf32> to vector<16x128xbf16>
    %c0_253 = arith.constant 0 : index
    %c0_254 = arith.constant 0 : index
    %c0_255 = arith.constant 0 : index
    %272 = vector.load %arg13[%c0_253, %c0_254, %c0_255] : memref<4x4x16xbf16, #tpu.memory_space<vmem>>, vector<1x4x16xbf16>
    %273 = vector.shape_cast %272 : vector<1x4x16xbf16> to vector<4x16xbf16>
    %cst_256 = arith.constant dense<0.000000e+00> : vector<4x128xf32>
    %274 = tpu.matmul %273, %271, %cst_256 {dimension_numbers = #tpu.dot_dimension_numbers<[1], [0], [0], [1], [0, 0, 1, 1], [], []>} : vector<4x16xbf16>, vector<16x128xbf16>, vector<4x128xf32> -> vector<4x128xf32>
    %c1_257 = arith.constant 1 : index
    %c0_258 = arith.constant 0 : index
    %c0_259 = arith.constant 0 : index
    %275 = vector.load %arg13[%c1_257, %c0_258, %c0_259] : memref<4x4x16xbf16, #tpu.memory_space<vmem>>, vector<1x4x16xbf16>
    %276 = vector.shape_cast %275 : vector<1x4x16xbf16> to vector<4x16xbf16>
    %cst_260 = arith.constant dense<0.000000e+00> : vector<4x128xf32>
    %277 = tpu.matmul %276, %271, %cst_260 {dimension_numbers = #tpu.dot_dimension_numbers<[1], [0], [0], [1], [0, 0, 1, 1], [], []>} : vector<4x16xbf16>, vector<16x128xbf16>, vector<4x128xf32> -> vector<4x128xf32>
    %c2_261 = arith.constant 2 : index
    %c0_262 = arith.constant 0 : index
    %c0_263 = arith.constant 0 : index
    %278 = vector.load %arg13[%c2_261, %c0_262, %c0_263] : memref<4x4x16xbf16, #tpu.memory_space<vmem>>, vector<1x4x16xbf16>
    %279 = vector.shape_cast %278 : vector<1x4x16xbf16> to vector<4x16xbf16>
    %cst_264 = arith.constant dense<0.000000e+00> : vector<4x128xf32>
    %280 = tpu.matmul %279, %271, %cst_264 {dimension_numbers = #tpu.dot_dimension_numbers<[1], [0], [0], [1], [0, 0, 1, 1], [], []>} : vector<4x16xbf16>, vector<16x128xbf16>, vector<4x128xf32> -> vector<4x128xf32>
    %c3_265 = arith.constant 3 : index
    %c0_266 = arith.constant 0 : index
    %c0_267 = arith.constant 0 : index
    %281 = vector.load %arg13[%c3_265, %c0_266, %c0_267] : memref<4x4x16xbf16, #tpu.memory_space<vmem>>, vector<1x4x16xbf16>
    %282 = vector.shape_cast %281 : vector<1x4x16xbf16> to vector<4x16xbf16>
    %cst_268 = arith.constant dense<0.000000e+00> : vector<4x128xf32>
    %283 = tpu.matmul %282, %271, %cst_268 {dimension_numbers = #tpu.dot_dimension_numbers<[1], [0], [0], [1], [0, 0, 1, 1], [], []>} : vector<4x16xbf16>, vector<16x128xbf16>, vector<4x128xf32> -> vector<4x128xf32>
    %284 = arith.maximumf %274, %277 : vector<4x128xf32>
    %285 = arith.maximumf %280, %283 : vector<4x128xf32>
    %286 = arith.maximumf %284, %285 : vector<4x128xf32>
    %c0_269 = arith.constant 0 : index
    %c0_270 = arith.constant 0 : index
    %287 = vector.load %arg15[%c0_269, %c0_270] : memref<1x32xf32, #tpu.memory_space<vmem>>, vector<1x32xf32>
    %288 = vector.extract_strided_slice %286 {offsets = [0, 0], sizes = [1, 128], strides = [1, 1]} : vector<4x128xf32> to vector<1x128xf32>
    %289 = arith.truncf %288 : vector<1x128xf32> to vector<1x128xbf16>
    %c0_271 = arith.constant 0 : index
    %c0_272 = arith.constant 0 : index
    %c0_273 = arith.constant 0 : index
    %290 = vector.load %arg14[%c0_271, %c0_272, %c0_273] : memref<4x128x32xbf16, #tpu.memory_space<vmem>>, vector<1x128x32xbf16>
    %291 = vector.shape_cast %290 : vector<1x128x32xbf16> to vector<128x32xbf16>
    %cst_274 = arith.constant dense<0.000000e+00> : vector<1x32xf32>
    %292 = tpu.matmul %289, %291, %cst_274 {dimension_numbers = #tpu.dot_dimension_numbers<[1], [0], [0], [1], [0, 0, 1, 1], [], []>} : vector<1x128xbf16>, vector<128x32xbf16>, vector<1x32xf32> -> vector<1x32xf32>
    %293 = arith.addf %287, %292 : vector<1x32xf32>
    %294 = vector.extract_strided_slice %286 {offsets = [1, 0], sizes = [1, 128], strides = [1, 1]} : vector<4x128xf32> to vector<1x128xf32>
    %295 = arith.truncf %294 : vector<1x128xf32> to vector<1x128xbf16>
    %c1_275 = arith.constant 1 : index
    %c0_276 = arith.constant 0 : index
    %c0_277 = arith.constant 0 : index
    %296 = vector.load %arg14[%c1_275, %c0_276, %c0_277] : memref<4x128x32xbf16, #tpu.memory_space<vmem>>, vector<1x128x32xbf16>
    %297 = vector.shape_cast %296 : vector<1x128x32xbf16> to vector<128x32xbf16>
    %cst_278 = arith.constant dense<0.000000e+00> : vector<1x32xf32>
    %298 = tpu.matmul %295, %297, %cst_278 {dimension_numbers = #tpu.dot_dimension_numbers<[1], [0], [0], [1], [0, 0, 1, 1], [], []>} : vector<1x128xbf16>, vector<128x32xbf16>, vector<1x32xf32> -> vector<1x32xf32>
    %299 = arith.addf %293, %298 : vector<1x32xf32>
    %300 = vector.extract_strided_slice %286 {offsets = [2, 0], sizes = [1, 128], strides = [1, 1]} : vector<4x128xf32> to vector<1x128xf32>
    %301 = arith.truncf %300 : vector<1x128xf32> to vector<1x128xbf16>
    %c2_279 = arith.constant 2 : index
    %c0_280 = arith.constant 0 : index
    %c0_281 = arith.constant 0 : index
    %302 = vector.load %arg14[%c2_279, %c0_280, %c0_281] : memref<4x128x32xbf16, #tpu.memory_space<vmem>>, vector<1x128x32xbf16>
    %303 = vector.shape_cast %302 : vector<1x128x32xbf16> to vector<128x32xbf16>
    %cst_282 = arith.constant dense<0.000000e+00> : vector<1x32xf32>
    %304 = tpu.matmul %301, %303, %cst_282 {dimension_numbers = #tpu.dot_dimension_numbers<[1], [0], [0], [1], [0, 0, 1, 1], [], []>} : vector<1x128xbf16>, vector<128x32xbf16>, vector<1x32xf32> -> vector<1x32xf32>
    %305 = arith.addf %299, %304 : vector<1x32xf32>
    %306 = vector.extract_strided_slice %286 {offsets = [3, 0], sizes = [1, 128], strides = [1, 1]} : vector<4x128xf32> to vector<1x128xf32>
    %307 = arith.truncf %306 : vector<1x128xf32> to vector<1x128xbf16>
    %c3_283 = arith.constant 3 : index
    %c0_284 = arith.constant 0 : index
    %c0_285 = arith.constant 0 : index
    %308 = vector.load %arg14[%c3_283, %c0_284, %c0_285] : memref<4x128x32xbf16, #tpu.memory_space<vmem>>, vector<1x128x32xbf16>
    %309 = vector.shape_cast %308 : vector<1x128x32xbf16> to vector<128x32xbf16>
    %cst_286 = arith.constant dense<0.000000e+00> : vector<1x32xf32>
    %310 = tpu.matmul %307, %309, %cst_286 {dimension_numbers = #tpu.dot_dimension_numbers<[1], [0], [0], [1], [0, 0, 1, 1], [], []>} : vector<1x128xbf16>, vector<128x32xbf16>, vector<1x32xf32> -> vector<1x32xf32>
    %311 = arith.addf %305, %310 : vector<1x32xf32>
    %c0_287 = arith.constant 0 : index
    %c0_288 = arith.constant 0 : index
    %c0_289 = arith.constant 0 : index
    %312 = vector.load %arg16[%c0_287, %c0_288, %c0_289] : memref<1x1x32xf32, #tpu.memory_space<vmem>>, vector<1x1x32xf32>
    %313 = vector.shape_cast %312 : vector<1x1x32xf32> to vector<1x32xf32>
    %314 = vector.shape_cast %311 : vector<1x32xf32> to vector<1x1x32xf32>
    tpu.vector_store %arg16[%c0_287, %c0_288, %c0_289], %314 {strides = array<i32>} : memref<1x1x32xf32, #tpu.memory_space<vmem>>, vector<1x1x32xf32>,
    return
  }
  func.func @transform_0(%arg0: i32) -> (i32, i32, i32) {
    %c0_i32 = arith.constant 0 : i32
    %c0_i32_0 = arith.constant 0 : i32
    %c0_i32_1 = arith.constant 0 : i32
    return %arg0, %c0_i32, %c0_i32_0 : i32, i32, i32
  }
  func.func @transform_1(%arg0: i32) -> (i32, i32, i32) {
    %c0_i32 = arith.constant 0 : i32
    %c0_i32_0 = arith.constant 0 : i32
    %c0_i32_1 = arith.constant 0 : i32
    %c0_i32_2 = arith.constant 0 : i32
    return %c0_i32, %c0_i32_0, %c0_i32_1 : i32, i32, i32
  }
  func.func @transform_2(%arg0: i32) -> (i32, i32, i32) {
    %c0_i32 = arith.constant 0 : i32
    %c0_i32_0 = arith.constant 0 : i32
    %c0_i32_1 = arith.constant 0 : i32
    %c0_i32_2 = arith.constant 0 : i32
    return %c0_i32, %c0_i32_0, %c0_i32_1 : i32, i32, i32
  }
  func.func @transform_3(%arg0: i32) -> (i32, i32) {
    %c0_i32 = arith.constant 0 : i32
    %c0_i32_0 = arith.constant 0 : i32
    %c0_i32_1 = arith.constant 0 : i32
    return %c0_i32, %c0_i32_0 : i32, i32
  }
  func.func @transform_4(%arg0: i32) -> (i32, i32, i32) {
    %c0_i32 = arith.constant 0 : i32
    %c0_i32_0 = arith.constant 0 : i32
    %c0_i32_1 = arith.constant 0 : i32
    %c0_i32_2 = arith.constant 0 : i32
    return %c0_i32, %c0_i32_0, %c0_i32_1 : i32, i32, i32
  }
  func.func @transform_5(%arg0: i32) -> (i32, i32, i32) {
    %c0_i32 = arith.constant 0 : i32
    %c0_i32_0 = arith.constant 0 : i32
    %c0_i32_1 = arith.constant 0 : i32
    %c0_i32_2 = arith.constant 0 : i32
    return %c0_i32, %c0_i32_0, %c0_i32_1 : i32, i32, i32
  }
  func.func @transform_6(%arg0: i32) -> (i32, i32, i32) {
    %c0_i32 = arith.constant 0 : i32
    %c0_i32_0 = arith.constant 0 : i32
    %c0_i32_1 = arith.constant 0 : i32
    %c0_i32_2 = arith.constant 0 : i32
    return %c0_i32, %c0_i32_0, %c0_i32_1 : i32, i32, i32
  }
  func.func @transform_7(%arg0: i32) -> (i32, i32) {
    %c0_i32 = arith.constant 0 : i32
    %c0_i32_0 = arith.constant 0 : i32
    %c0_i32_1 = arith.constant 0 : i32
    return %c0_i32, %c0_i32_0 : i32, i32
  }
  func.func @transform_8(%arg0: i32) -> (i32, i32, i32) {
    %c0_i32 = arith.constant 0 : i32
    %c0_i32_0 = arith.constant 0 : i32
    %c0_i32_1 = arith.constant 0 : i32
    %c0_i32_2 = arith.constant 0 : i32
    return %c0_i32, %c0_i32_0, %c0_i32_1 : i32, i32, i32
  }
  func.func @transform_9(%arg0: i32) -> (i32, i32, i32) {
    %c0_i32 = arith.constant 0 : i32
    %c0_i32_0 = arith.constant 0 : i32
    %c0_i32_1 = arith.constant 0 : i32
    %c0_i32_2 = arith.constant 0 : i32
    return %c0_i32, %c0_i32_0, %c0_i32_1 : i32, i32, i32
  }
  func.func @transform_10(%arg0: i32) -> (i32, i32, i32) {
    %c0_i32 = arith.constant 0 : i32
    %c0_i32_0 = arith.constant 0 : i32
    %c0_i32_1 = arith.constant 0 : i32
    %c0_i32_2 = arith.constant 0 : i32
    return %c0_i32, %c0_i32_0, %c0_i32_1 : i32, i32, i32
  }
  func.func @transform_11(%arg0: i32) -> (i32, i32) {
    %c0_i32 = arith.constant 0 : i32
    %c0_i32_0 = arith.constant 0 : i32
    %c0_i32_1 = arith.constant 0 : i32
    return %c0_i32, %c0_i32_0 : i32, i32
  }
  func.func @transform_12(%arg0: i32) -> (i32, i32, i32) {
    %c0_i32 = arith.constant 0 : i32
    %c0_i32_0 = arith.constant 0 : i32
    %c0_i32_1 = arith.constant 0 : i32
    %c0_i32_2 = arith.constant 0 : i32
    return %c0_i32, %c0_i32_0, %c0_i32_1 : i32, i32, i32
  }
  func.func @transform_13(%arg0: i32) -> (i32, i32, i32) {
    %c0_i32 = arith.constant 0 : i32
    %c0_i32_0 = arith.constant 0 : i32
    %c0_i32_1 = arith.constant 0 : i32
    %c0_i32_2 = arith.constant 0 : i32
    return %c0_i32, %c0_i32_0, %c0_i32_1 : i32, i32, i32
  }
  func.func @transform_14(%arg0: i32) -> (i32, i32) {
    %c0_i32 = arith.constant 0 : i32
    %c0_i32_0 = arith.constant 0 : i32
    %c0_i32_1 = arith.constant 0 : i32
    return %c0_i32, %c0_i32_0 : i32, i32
  }
  func.func @transform_15(%arg0: i32) -> (i32, i32, i32) {
    %c0_i32 = arith.constant 0 : i32
    %c0_i32_0 = arith.constant 0 : i32
    %c0_i32_1 = arith.constant 0 : i32
    return %arg0, %c0_i32, %c0_i32_0 : i32, i32, i32
  }
}

</mosaic_0001>

<bundles_post_ra>
// kernel: _lambda_.1
= control target key start
LH: loop header
LB: loop body
LE: loop exit
PB: predicated region body
PF: predicated region fallthrough
CT: control target
= control target key end

     0   :  { %s17426_s0 = inlined_call_operand.vmem [shape: f32[2,256,4], index: 0, kind: input, shape index: {}]   ;;  %s17427_s1 = inlined_call_operand.hbm [shape: bf16[9,256,256], index: 1, kind: input, shape index: {}]   ;;  %s17428_s2 = inlined_call_operand.hbm [shape: bf16[9,4,32], index: 2, kind: input, shape index: {}]   ;;  %s17429_s3 = inlined_call_operand.hbm [shape: f32[1,32], index: 3, kind: input, shape index: {}]   ;;  %s17430_s4 = inlined_call_operand.hbm [shape: bf16[4,64,256], index: 4, kind: input, shape index: {}]   ;;  %s17431_s5 = inlined_call_operand.hbm [shape: bf16[9,64,64], index: 5, kind: input, shape index: {}]   ;;  %s17432_s6 = inlined_call_operand.hbm [shape: bf16[9,32,64], index: 6, kind: input, shape index: {}]   ;;  %s17433_s7 = inlined_call_operand.hbm [shape: f32[1,64], index: 7, kind: input, shape index: {}]   ;;  %s17434_s8 = inlined_call_operand.hbm [shape: bf16[4,16,64], index: 8, kind: input, shape index: {}]   ;;  %s17435_s9 = inlined_call_operand.hbm [shape: bf16[9,16,16], index: 9, kind: input, shape index: {}]   ;;  %s17436_s10 = inlined_call_operand.hbm [shape: bf16[9,64,128], index: 10, kind: input, shape index: {}]   ;;  %s17437_s11 = inlined_call_operand.hbm [shape: f32[1,128], index: 11, kind: input, shape index: {}]   ;;  %s17438_s12 = inlined_call_operand.hbm [shape: bf16[4,4,16], index: 12, kind: input, shape index: {}]   ;;  %s17439_s13 = inlined_call_operand.hbm [shape: bf16[4,128,32], index: 13, kind: input, shape index: {}]   ;;  %s17440_s14 = inlined_call_operand.hbm [shape: f32[1,32], index: 14, kind: input, shape index: {}]   ;;  %s17441_s15 = inlined_call_operand.hbm [shape: f32[2,1,32], index: 15, kind: output, shape index: {}]  }
   0x1   :  { %17459 = sst [smem:[#allocation90_spill]] %s17427_s1 }
   0x2   :  { %17460 = sst [smem:[#allocation91_spill]] %s17428_s2 }
   0x3   :  { %17461 = sst [smem:[#allocation92_spill]] %s17441_s15 }
   0x4   :  { %20 = vsyncpa [#allocation3], 0 }
   0x5   :  { %21 = vsyncpa [#allocation6], 0 }
   0x6   :  { %22 = vsyncpa [#allocation9], 0 }
   0x7   :  { %23 = vsyncpa [#allocation12], 0 }
   0x8   :  { %24 = vsyncpa [#allocation15], 0 }
   0x9   :  { %25 = vsyncpa [#allocation18], 0 }
   0xa   :  { %26 = vsyncpa [#allocation21], 0 }
   0xb   :  { %27 = vsyncpa [#allocation24], 0 }
   0xc   :  { %28 = vsyncpa [#allocation4], 0 }
   0xd   :  { %30 = vsyncpa [#allocation4 + $0x1], 0  ;;  %s15494_s18 = smov 0   ;;  %s15496_s19 = smov 0  }
   0xe   :  { %s15498_s20 = smov 0   ;;  %s15500_s21 = smov 0  }
   0xf LB: > { %17462 = sst [smem:[#allocation35_spill]] %s15377_s18  ;;  %s15515_s22 = sadd.s32 4294967295, %s15389_s21   ;;  %s15389_s21 = sphi %s15500_s21, %s17601_s21   ;;  %s15385_s20 = sphi %s15498_s20, %s17603_s20   ;;  %s15381_s19 = sphi %s15496_s19, %s17605_s19   ;;  %s15377_s18 = sphi %s15494_s18, %s17604_s18  }
  0x10   : > { %17463 = sst [smem:[#allocation36_spill]] %s15385_s20  ;;  %s10937_s23 = sadd.s32 4294967294, %s15389_s21  }
  0x11   : > { %17464 = sst [smem:[#allocation37_spill]] %s15389_s21  ;;  %s15519_s24 = sadd.s32 1, %s15389_s21  }
  0x12   : > { %17465 = sst [smem:[#allocation38_spill]] %s15519_s24  ;;  %s363_s25 = sadd.s32 1, %s15385_s20 }
  0x13   : > { %s360_s26 = ssub.s32 %s15389_s21, %s15519_s24  ;;  %p373_p0 = scmp.ne.s32.totalorder %s15385_s20, %s15381_s19 }
  0x14   : > { %p361_p1 = scmp.eq.s32.totalorder %s360_s26, 0  ;;  %p374_p2 = scmp.eq.s32.totalorder %s15515_s22, 1 }
  0x15   : > { %p379_p3 = scmp.ne.s32.totalorder %s15381_s19, %s15377_s18  ;;  %p380_p4 = scmp.eq.s32.totalorder %s10937_s23, 1 }
  0x16   : > { %s15530_s27 = scalar_select %p361_p1, %s15385_s20, %s363_s25  }
  0x17   : > { %p15532_p5 = por %p374_p2, %p373_p0  ;;  %p15536_p6 = por %p380_p4, %p379_p3 }
  0x18   : > { %17466 = sst [smem:[#allocation39_spill]] %s15530_s27  ;;  %p10938_p7 = scmp.ge.s32.totalorder %s15389_s21, 1 }
  0x19   : > { %s17468_s29 = scalar_select %p15536_p6, 1, 0 }
  0x1a   : > { %p387_p8 = scmp.lt.s32.totalorder %s15389_s21, 3  ;;  %p17452_p9 = scmp.eq.s32.totalorder %s15515_s22, 0 }
  0x1b   : > { %17469 = sst [smem:[#allocation40_spill]] %s17468_s29  ;;  %s15391_s16 = smov [#allocation5]  }
  0x1c   : > { %p15543_p10 = pnand %p10938_p7, %p387_p8  ;;  %s412_s17 = sshll.u32 %s15391_s16, 4  ;;  %s413_s17 = int_to_ptr.vmem [resolvable:$true] %s412_s17 }
  0x1d   : > { %s15392_s25 = smov [#allocation8]   ;;  %s14944_s20 = scalar_lea.vmem %s413_s17, 288 }
  0x1e   : > { %p14188_p11 = pneg %p15543_p10  ;;  %s436_s26 = sshll.u32 %s15392_s25, 4  ;;  %s437_s26 = int_to_ptr.vmem [resolvable:$true] %s436_s26 }
  0x1f   : > { %p14945_p0 = scmp.ne.s32.totalorder %s413_s17, %s14944_s20  ;;  %p14952_p3 = scmp.lt.s32.totalorder %s413_s17, %s413_s17 }
  0x20   : > { %p15551_p12 = pnand %p17452_p9, %p14188_p11  ;;  %p14953_p4 = scmp.lt.s32.totalorder %s14944_s20, %s14944_s20 }
  0x22   : > { %p15557_p13 = pneg %p15551_p12  ;;  %p14954_p7 = por %p14953_p4, %p14952_p3 }
  0x24   : > { %p14947_p1 = pnand %p14945_p0, %p15557_p13 }
  0x26   : > { %p14948_p2 = pneg %p14947_p1 }
  0x28   : > { %p14955_p8 = pnand %p14954_p7, %p14948_p2 }
  0x2a   : > { %14958 = shalt.err (!%p14955_p8)
}
  0x2b   : > { %s17448_s16 = smov 32   ;;  %s17449_s25 = smov 2  }
  0x2c   : > { %s17473_s2 = sld [smem:[#allocation91_spill]]  ;;  %s14970_s18 = scalar_lea.vmem %s437_s26, 4096 }
  0x2d   : > { %p14971_p11 = scmp.ne.s32.totalorder %s437_s26, %s14970_s18  ;;  %p14978_p2 = scmp.lt.s32.totalorder %s437_s26, %s437_s26 }
  0x2e   : > { %p14979_p3 = scmp.lt.s32.totalorder %s14970_s18, %s14970_s18 }
  0x2f   : > { %p14973_p0 = pnand %p14971_p11, %p15557_p13 }
  0x30   : > { %p14980_p4 = por %p14979_p3, %p14978_p2 }
  0x31   : > { %p14974_p1 = pneg %p14973_p0 }
  0x32   : > { %14194 = dma.hbm_to_vmem [thread:$0]  (!%p15551_p12), %s17473_s2, 288, %s413_s17, [#allocation6], %s17448_s16, %s17448_s16, %s17449_s25  }
  0x33   : > { %p14981_p7 = pnand %p14980_p4, %p14974_p1 }
  0x35   : > { %14984 = shalt.err (!%p14981_p7)
}
  0x36   : > { %s17451_s20 = smov 128   ;;  %s17453_s21 = smov 8  }
  0x37   : > { %14200 = dma.hbm_to_vmem [thread:$0]  (!%p15551_p12), %s17430_s4, 4096, %s437_s26, [#allocation9], %s17451_s20, %s17451_s20, %s17453_s21  }
  0x38   : > { %s15397_s17 = smov [#allocation11]   ;;  %s15398_s25 = smov [#allocation14]  }
  0x39   : > { %s462_s16 = sshll.u32 %s15397_s17, 4  ;;  %s486_s2 = sshll.u32 %s15398_s25, 4  ;;  %s463_s16 = int_to_ptr.vmem [resolvable:$true] %s462_s16  ;;  %s487_s2 = int_to_ptr.vmem [resolvable:$true] %s486_s2 }
  0x3a   : > { %s14996_s18 = scalar_lea.vmem %s463_s16, 2304  ;;  %p15004_p1 = scmp.lt.s32.totalorder %s463_s16, %s463_s16 }
  0x3b   : > { %p14997_p8 = scmp.ne.s32.totalorder %s463_s16, %s14996_s18  ;;  %p15005_p2 = scmp.lt.s32.totalorder %s14996_s18, %s14996_s18 }
  0x3d   : > { %p14999_p11 = pnand %p14997_p8, %p15557_p13  ;;  %p15006_p3 = por %p15005_p2, %p15004_p1 }
  0x3f   : > { %p15000_p0 = pneg %p14999_p11 }
  0x41   : > { %p15007_p4 = pnand %p15006_p3, %p15000_p0 }
  0x43   : > { %15010 = shalt.err (!%p15007_p4)
}
  0x44   : > { %s17454_s15 = smov 64   ;;  %s17456_s26 = smov 4  }
  0x45   : > { %14206 = dma.hbm_to_vmem [thread:$0]  (!%p15551_p12), %s17432_s6, 2304, %s463_s16, [#allocation12], %s17454_s15, %s17454_s15, %s17456_s26  }
  0x46   : > { %s15022_s29 = scalar_lea.vmem %s487_s2, 512  ;;  %p15030_p1 = scmp.lt.s32.totalorder %s487_s2, %s487_s2 }
  0x47   : > { %p15023_p7 = scmp.ne.s32.totalorder %s487_s2, %s15022_s29  ;;  %p15031_p0 = scmp.lt.s32.totalorder %s15022_s29, %s15022_s29 }
  0x49   : > { %p15025_p8 = pnand %p15023_p7, %p15557_p13  ;;  %p15032_p2 = por %p15031_p0, %p15030_p1 }
  0x4b   : > { %p15026_p11 = pneg %p15025_p8 }
  0x4d   : > { %p15033_p3 = pnand %p15032_p2, %p15026_p11 }
  0x4f   : > { %15036 = shalt.err (!%p15033_p3)
}
  0x50   : > { %14212 = dma.hbm_to_vmem [thread:$0]  (!%p15551_p12), %s17434_s8, 512, %s487_s2, [#allocation15], %s17454_s15, %s17454_s15, %s17456_s26  }
  0x51   : > { %s15401_s16 = smov [#allocation17]   ;;  %s15402_s24 = smov [#allocation20]  }
  0x52   : > { %s512_s25 = sshll.u32 %s15401_s16, 4  ;;  %s536_s20 = sshll.u32 %s15402_s24, 4  ;;  %s513_s25 = int_to_ptr.vmem [resolvable:$true] %s512_s25  ;;  %s537_s20 = int_to_ptr.vmem [resolvable:$true] %s536_s20 }
  0x53   : > { %s15048_s29 = scalar_lea.vmem %s513_s25, 4608  ;;  %p15056_p11 = scmp.lt.s32.totalorder %s513_s25, %s513_s25 }
  0x54   : > { %p15049_p4 = scmp.ne.s32.totalorder %s513_s25, %s15048_s29  ;;  %p15057_p1 = scmp.lt.s32.totalorder %s15048_s29, %s15048_s29 }
  0x56   : > { %p15051_p7 = pnand %p15049_p4, %p15557_p13  ;;  %p15058_p0 = por %p15057_p1, %p15056_p11 }
  0x58   : > { %p15052_p8 = pneg %p15051_p7 }
  0x5a   : > { %p15059_p2 = pnand %p15058_p0, %p15052_p8 }
  0x5c   : > { %15062 = shalt.err (!%p15059_p2)
}
  0x5d   : > { %14218 = dma.hbm_to_vmem [thread:$0]  (!%p15551_p12), %s17436_s10, 4608, %s513_s25, [#allocation18], %s17454_s15, %s17454_s15, %s17456_s26  }
  0x5e   : > { %s15074_s18 = scalar_lea.vmem %s537_s20, 128  ;;  %p15082_p9 = scmp.lt.s32.totalorder %s537_s20, %s537_s20 }
  0x5f   : > { %p15075_p3 = scmp.ne.s32.totalorder %s537_s20, %s15074_s18  ;;  %p15083_p6 = scmp.lt.s32.totalorder %s15074_s18, %s15074_s18 }
  0x61   : > { %p15077_p4 = pnand %p15075_p3, %p15557_p13  ;;  %p15084_p11 = por %p15083_p6, %p15082_p9 }
  0x63   : > { %p15078_p7 = pneg %p15077_p4 }
  0x65   : > { %p15085_p8 = pnand %p15084_p11, %p15078_p7 }
  0x67   : > { %15088 = shalt.err (!%p15085_p8)
}
  0x68   : > { %s17474_s16 = smov 2   ;;  %s17475_s24 = smov 32  }
  0x69   : > { %14224 = dma.hbm_to_vmem [thread:$0]  (!%p15551_p12), %s17438_s12, 128, %s537_s20, [#allocation21], %s17475_s24, %s17475_s24, %s17474_s16  }
  0x6a   : > { %s15403_s25 = smov [#allocation2]   ;;  %s15404_s17 = smov [#allocation7]  }
  0x6b   : > { %s399_s2 = sshll.u32 %s15403_s25, 4  ;;  %s426_s15 = sshll.u32 %s15404_s17, 4  ;;  %s400_s2 = int_to_ptr.vmem [resolvable:$true] %s399_s2  ;;  %s427_s15 = int_to_ptr.vmem [resolvable:$true] %s426_s15 }
  0x6c   : > { %s15100_s18 = scalar_lea.vmem %s400_s2, 36864  ;;  %p15108_p0 = scmp.lt.s32.totalorder %s400_s2, %s400_s2 }
  0x6d   : > { %p15101_p6 = scmp.ne.s32.totalorder %s400_s2, %s15100_s18  ;;  %p15109_p2 = scmp.lt.s32.totalorder %s15100_s18, %s15100_s18 }
  0x6f   : > { %p15103_p9 = pnand %p15101_p6, %p15557_p13  ;;  %p15110_p3 = por %p15109_p2, %p15108_p0 }
  0x71   : > { %p15104_p1 = pneg %p15103_p9 }
  0x73   : > { %p15111_p4 = pnand %p15110_p3, %p15104_p1 }
  0x75   : > { %15114 = shalt.err (!%p15111_p4)
}
  0x76   : > { %s17476_s21 = smov 8   ;;  %s17477_s20 = smov 128  }
  0x77   : > { %s17478_s1 = sld [smem:[#allocation90_spill]]  ;;  %s15126_s29 = scalar_lea.vmem %s427_s15, 16 }
  0x78   : > { %p15127_p7 = scmp.ne.s32.totalorder %s427_s15, %s15126_s29  ;;  %s15133_s25 = scalar_lea.vmem %s427_s15, 32 }
  0x79   : > { %p15134_p6 = scmp.lt.s32.totalorder %s427_s15, %s427_s15  ;;  %p15135_p9 = scmp.lt.s32.totalorder %s15133_s25, %s15126_s29 }
  0x7a   : > { %p15129_p11 = pnand %p15127_p7, %p15557_p13 }
  0x7b   : > { %p15136_p1 = por %p15135_p9, %p15134_p6 }
  0x7c   : > { %p15130_p8 = pneg %p15129_p11 }
  0x7d   : > { %14191 = dma.hbm_to_vmem [thread:$0]  (!%p15551_p12), %s17478_s1, 36864, %s400_s2, [#allocation3], %s17477_s20, %s17477_s20, %s17476_s21  }
  0x7e   : > { %p15137_p0 = pnand %p15136_p1, %p15130_p8 }
  0x80   : > { %15140 = shalt.err (!%p15137_p0)
}
  0x81   : > { %14197 = dma.hbm_to_vmem [thread:$0]  (!%p15551_p12), %s17429_s3, 16, %s427_s15, [#allocation6]  }
  0x82   : > { %s15405_s16 = smov [#allocation10]   ;;  %s15406_s21 = smov [#allocation13]  }
  0x83   : > { %s449_s2 = sshll.u32 %s15405_s16, 4  ;;  %s476_s20 = sshll.u32 %s15406_s21, 4  ;;  %s450_s2 = int_to_ptr.vmem [resolvable:$true] %s449_s2  ;;  %s477_s20 = int_to_ptr.vmem [resolvable:$true] %s476_s20 }
  0x84   : > { %s15152_s24 = scalar_lea.vmem %s450_s2, 4608  ;;  %p15160_p7 = scmp.lt.s32.totalorder %s450_s2, %s450_s2 }
  0x85   : > { %p15153_p2 = scmp.ne.s32.totalorder %s450_s2, %s15152_s24  ;;  %p15161_p11 = scmp.lt.s32.totalorder %s15152_s24, %s15152_s24 }
  0x87   : > { %p15155_p3 = pnand %p15153_p2, %p15557_p13  ;;  %p15162_p8 = por %p15161_p11, %p15160_p7 }
  0x89   : > { %p15156_p4 = pneg %p15155_p3 }
  0x8b   : > { %p15163_p6 = pnand %p15162_p8, %p15156_p4 }
  0x8d   : > { %15166 = shalt.err (!%p15163_p6)
}
  0x8e   : > { %s17479_s15 = smov 64   ;;  %s15178_s17 = scalar_lea.vmem %s477_s20, 16 }
  0x8f   : > { %14203 = dma.hbm_to_vmem [thread:$0]  (!%p15551_p12), %s17431_s5, 4608, %s450_s2, [#allocation9], %s17479_s15, %s17479_s15, %s17456_s26  }
  0x90   : > { %p15179_p9 = scmp.ne.s32.totalorder %s477_s20, %s15178_s17  ;;  %s15185_s18 = scalar_lea.vmem %s477_s20, 32 }
  0x91   : > { %p15186_p2 = scmp.lt.s32.totalorder %s477_s20, %s477_s20  ;;  %p15187_p3 = scmp.lt.s32.totalorder %s15185_s18, %s15178_s17 }
  0x92   : > { %p15181_p1 = pnand %p15179_p9, %p15557_p13 }
  0x93   : > { %p15188_p4 = por %p15187_p3, %p15186_p2 }
  0x94   : > { %p15182_p0 = pneg %p15181_p1 }
  0x96   : > { %p15189_p7 = pnand %p15188_p4, %p15182_p0 }
  0x98   : > { %15192 = shalt.err (!%p15189_p7)
}
  0x99   : > { %14209 = dma.hbm_to_vmem [thread:$0]  (!%p15551_p12), %s17433_s7, 16, %s477_s20, [#allocation12]  }
  0x9a   : > { %s15407_s24 = smov [#allocation16]   ;;  %s15408_s29 = smov [#allocation19]  }
  0x9b   : > { %s499_s2 = sshll.u32 %s15407_s24, 4  ;;  %s526_s25 = sshll.u32 %s15408_s29, 4  ;;  %s500_s2 = int_to_ptr.vmem [resolvable:$true] %s499_s2  ;;  %s527_s25 = int_to_ptr.vmem [resolvable:$true] %s526_s25 }
  0x9c   : > { %s15204_s26 = scalar_lea.vmem %s500_s2, 1152  ;;  %p15212_p9 = scmp.lt.s32.totalorder %s500_s2, %s500_s2 }
  0x9d   : > { %p15205_p11 = scmp.ne.s32.totalorder %s500_s2, %s15204_s26  ;;  %p15213_p1 = scmp.lt.s32.totalorder %s15204_s26, %s15204_s26 }
  0x9f   : > { %p15207_p8 = pnand %p15205_p11, %p15557_p13  ;;  %p15214_p0 = por %p15213_p1, %p15212_p9 }
  0xa1   : > { %p15208_p6 = pneg %p15207_p8 }
  0xa3   : > { %p15215_p2 = pnand %p15214_p0, %p15208_p6 }
  0xa5   : > { %15218 = shalt.err (!%p15215_p2)
}
  0xa6   : > { %s17480_s17 = smov 4   ;;  %s15230_s16 = scalar_lea.vmem %s527_s25, 16 }
  0xa7   : > { %14215 = dma.hbm_to_vmem [thread:$0]  (!%p15551_p12), %s17435_s9, 1152, %s500_s2, [#allocation15], %s17479_s15, %s17479_s15, %s17480_s17  }
  0xa8   : > { %p15231_p3 = scmp.ne.s32.totalorder %s527_s25, %s15230_s16  ;;  %s15237_s21 = scalar_lea.vmem %s527_s25, 32 }
  0xa9   : > { %p15238_p11 = scmp.lt.s32.totalorder %s527_s25, %s527_s25  ;;  %p15239_p8 = scmp.lt.s32.totalorder %s15237_s21, %s15230_s16 }
  0xaa   : > { %p15233_p4 = pnand %p15231_p3, %p15557_p13 }
  0xab   : > { %p15240_p6 = por %p15239_p8, %p15238_p11 }
  0xac   : > { %p15234_p7 = pneg %p15233_p4 }
  0xae   : > { %p15241_p9 = pnand %p15240_p6, %p15234_p7 }
  0xb0   : > { %15244 = shalt.err (!%p15241_p9)
}
  0xb1   : > { %14221 = dma.hbm_to_vmem [thread:$0]  (!%p15551_p12), %s17437_s11, 16, %s527_s25, [#allocation18]  }
  0xb2   : > { %s15409_s29 = smov [#allocation22]   ;;  %s15410_s20 = smov [#allocation23]  }
  0xb3   : > { %s549_s2 = sshll.u32 %s15409_s29, 4  ;;  %s563_s18 = sshll.u32 %s15410_s20, 4  ;;  %s550_s2 = int_to_ptr.vmem [resolvable:$true] %s549_s2  ;;  %s564_s18 = int_to_ptr.vmem [resolvable:$true] %s563_s18 }
  0xb4   : > { %s15256_s1 = scalar_lea.vmem %s550_s2, 4096  ;;  %p15264_p3 = scmp.lt.s32.totalorder %s550_s2, %s550_s2 }
  0xb5   : > { %p15257_p1 = scmp.ne.s32.totalorder %s550_s2, %s15256_s1  ;;  %p15265_p4 = scmp.lt.s32.totalorder %s15256_s1, %s15256_s1 }
  0xb7   : > { %p15259_p0 = pnand %p15257_p1, %p15557_p13  ;;  %p15266_p7 = por %p15265_p4, %p15264_p3 }
  0xb9   : > { %p15260_p2 = pneg %p15259_p0 }
  0xbb   : > { %p15267_p11 = pnand %p15266_p7, %p15260_p2 }
  0xbd   : > { %15270 = shalt.err (!%p15267_p11)
}
  0xbe   : > { %14227 = dma.hbm_to_vmem [thread:$0]  (!%p15551_p12), %s17439_s13, 4096, %s550_s2, [#allocation21], %s17479_s15, %s17479_s15, %s17480_s17  }
  0xbf   : > { %s15282_s21 = scalar_lea.vmem %s564_s18, 16  ;;  %s15289_s26 = scalar_lea.vmem %s564_s18, 32 }
  0xc0   : > { %p15283_p8 = scmp.ne.s32.totalorder %s564_s18, %s15282_s21  ;;  %p15290_p1 = scmp.lt.s32.totalorder %s564_s18, %s564_s18 }
  0xc1   : > { %p15291_p0 = scmp.lt.s32.totalorder %s15289_s26, %s15282_s21 }
  0xc2   : > { %p15285_p6 = pnand %p15283_p8, %p15557_p13 }
  0xc3   : > { %p15292_p2 = por %p15291_p0, %p15290_p1 }
  0xc4   : > { %p15286_p9 = pneg %p15285_p6 }
  0xc6   : > { %p15293_p3 = pnand %p15292_p2, %p15286_p9 }
  0xc8   : > { %15296 = shalt.err (!%p15293_p3)
}
  0xc9   : > { %14230 = dma.hbm_to_vmem [thread:$0]  (!%p15551_p12), %s17440_s14, 16, %s564_s18, [#allocation24]  }
  0xca   : > { %584 = sbr.rel (%p15543_p10) target bundleno = 6120 (0x17e8), region = 80 }
  0xcf   : > { %p17481_p4 = scmp.eq.s32.totalorder %s15515_s22, 0 }
  0xd1   : > { %15340 = dma.done.wait (%p17481_p4), [#allocation3], 36864   ;;  %p17482_p13 = pmov %p17481_p4 }
  0xd2   : > { %p17483_p7 = pmov %p17481_p4 }
  0xd3   : > { %15342 = vsyncadd (%p17482_p13), [#allocation3], 4294930432 }
  0xd4   : > { %15344 = dma.done.wait (%p17483_p7), [#allocation6], 304   ;;  %p17484_p11 = pmov %p17481_p4 }
  0xd5   : > { %p17485_p8 = pmov %p17481_p4 }
  0xd6   : > { %15346 = vsyncadd (%p17484_p11), [#allocation6], 4294966992 }
  0xd7   : > { %15348 = dma.done.wait (%p17485_p8), [#allocation9], 8704   ;;  %p17486_p12 = pmov %p17481_p4 }
  0xd8   : > { %p17487_p10 = pmov %p17481_p4 }
  0xd9   : > { %15350 = vsyncadd (%p17486_p12), [#allocation9], 4294958592 }
  0xda   : > { %15352 = dma.done.wait (%p17487_p10), [#allocation12], 2320   ;;  %p17488_p6 = pmov %p17481_p4 }
  0xdb   : > { %p17489_p9 = pmov %p17481_p4 }
  0xdc   : > { %15354 = vsyncadd (%p17488_p6), [#allocation12], 4294964976 }
  0xdd   : > { %15356 = dma.done.wait (%p17489_p9), [#allocation15], 1664   ;;  %p17490_p1 = pmov %p17481_p4 }
  0xdf   : > { %15358 = vsyncadd (%p17490_p1), [#allocation15], 4294965632  ;;  %p17491_p0 = pmov %p17490_p1 }
  0xe1   : > { %15360 = dma.done.wait (%p17491_p0), [#allocation18], 4624   ;;  %p17492_p2 = pmov %p17491_p0 }
  0xe2   : > { %p17493_p3 = pmov %p17491_p0 }
  0xe3   : > { %15362 = vsyncadd (%p17492_p2), [#allocation18], 4294962672 }
  0xe4   : > { %15364 = dma.done.wait (%p17493_p3), [#allocation21], 4224   ;;  %p17494_p4 = pmov %p17491_p0 }
  0xe5   : > { %p17495_p13 = pmov %p17491_p0 }
  0xe6   : > { %15366 = vsyncadd (%p17494_p4), [#allocation21], 4294963072 }
  0xe7   : > { %15368 = dma.done.wait (%p17495_p13), [#allocation24], 16   ;;  %p17496_p7 = pmov %p17491_p0 }
  0xe8   : > { %p683_p11 = scmp.lt.s32.totalorder %s15515_s22, 1  ;;  %v14320_v27 = vld [vmem:[#allocation2 + $0x4] ss:$8 sps:$4 sm:$0xff]   ;;  %v14318_v50 = vld [vmem:[#allocation2] ss:$8 sps:$4 sm:$0xff]   ;;  %vm1528_vm0 = vcmask 1041408  }
  0xe9   : > { %15370 = vsyncadd (%p17496_p7), [#allocation24], 4294967280  ;;  %v14323_v31 = vld [vmem:[#allocation2 + $0x104] ss:$8 sps:$4 sm:$0xff]   ;;  %961 = vmatprep.mubr.bf16.mxu0 %v14320_v27  ;;  %v14321_v51 = vld [vmem:[#allocation2 + $0x100] ss:$8 sps:$4 sm:$0xff]  }
  0xea   : > { %s684_s27 = scalar_select %p683_p11, %s15515_s22, 1  ;;  %1332 = vmatprep.mubr.bf16.mxu1 %v14323_v31  ;;  %v14324_v52 = vld [vmem:[#allocation2 + $0x14] ss:$8 sps:$4 sm:$0xff]   ;;  %v14328_v54 = vld [vmem:[#allocation2 + $0x10] ss:$8 sps:$4 sm:$0xff]   ;;  %vm1479_vm1 = vcmask 31744  }
  0xeb   : > { %v14326_v53 = vld [vmem:[#allocation2 + $0x114] ss:$8 sps:$4 sm:$0xff]   ;;  %v14329_v55 = vld [vmem:[#allocation2 + $0x110] ss:$8 sps:$4 sm:$0xff]   ;;  %v14330_v56 = vld [vmem:[#allocation2 + $0x24] ss:$8 sps:$4 sm:$0xff]  }
  0xec   : > { %s11674_s30 = sshll.u32 %s684_s27, 8  ;;  %v14332_v57 = vld [vmem:[#allocation2 + $0x124] ss:$8 sps:$4 sm:$0xff]   ;;  %v14334_v58 = vld [vmem:[#allocation2 + $0x20] ss:$8 sps:$4 sm:$0xff]   ;;  %vm6815_vm2 = vcmask 523264  }
  0xed   : > { %s15728_s17 = scalar_lea.vmem %s17426_s0, %s11674_s30  ;;  %v14335_v59 = vld [vmem:[#allocation2 + $0x120] ss:$8 sps:$4 sm:$0xff]   ;;  %v14336_v60 = vld [vmem:[#allocation2 + $0x34] ss:$8 sps:$4 sm:$0xff]   ;;  %v14340_v62 = vld [vmem:[#allocation2 + $0x30] ss:$8 sps:$4 sm:$0xff]  }
  0xee   : > { %v719_v0 = vld [vmem:[%s15728_s17 + $0xf0] sm:$0xff]  ;;  %v720_v1 = vld [vmem:[%s15728_s17 + $0xf8] sm:$0xff]  ;;  %v717_v5 = vld [vmem:[%s15728_s17 + $0xe0] sm:$0xff]  ;;  %vm7028_vm3 = vcmask 261120   ;;  %vm15412_vm4 = vmmov 0   ;;  %vm8927_vm5 = vcmask 130048  }
  0xef   : > { %v703_v2 = vld [vmem:[%s15728_s17 + $0x70] sm:$0xff]  ;;  %v15733_v3 = vpack.c.bf16 %v720_v1, %v719_v0  ;;  %v704_v4 = vld [vmem:[%s15728_s17 + $0x78] sm:$0xff]  ;;  %v718_v6 = vld [vmem:[%s15728_s17 + $0xe8] sm:$0xff]  ;;  %s681_s29 = sand.u32 1, %s15381_s19   ;;  %s11671_s2 = sshll.u32 %s15515_s22, 4  ;;  %vm10731_vm6 = vcmask 253952  }
  0xf0   : > { %v15738_v7 = vpack.c.bf16 %v704_v4, %v703_v2  ;;  %v15740_v8 = vpack.c.bf16 %v718_v6, %v717_v5  ;;  %v701_v9 = vld [vmem:[%s15728_s17 + $0x60] sm:$0xff]  ;;  %v702_v10 = vld [vmem:[%s15728_s17 + $0x68] sm:$0xff]  ;;  %v715_v11 = vld [vmem:[%s15728_s17 + $0xd0] sm:$0xff]  ;;  %s682_s20 = scalar_lea.vmem [#allocation25], %s681_s29  ;;  %s17595_s21 = sld [smem:[#allocation92_spill]] }
  0xf1   : > { %11675 = vmatprep.subr.bf16.mxu0 %v15733_v3  ;;  %11787 = vmatprep.subr.bf16.mxu1 %v15733_v3  ;;  %v716_v12 = vld [vmem:[%s15728_s17 + $0xd8] sm:$0xff]  ;;  %v15750_v13 = vpack.c.bf16 %v702_v10, %v701_v9  ;;  %v699_v15 = vld [vmem:[%s15728_s17 + $0x50] sm:$0xff]  ;;  %v713_v17 = vld [vmem:[%s15728_s17 + $0xc0] sm:$0xff]  ;;  %s10746_s18 = sshll.u32 %s682_s20, 4  ;;  %s10734_s22 = scalar_lea.sflag [#allocation4], %s681_s29  ;;  %s17387_s18 = int_to_ptr.vmem [resolvable:$true] %s10746_s18 }
  0xf2   : > { %11676 = vmatpush3.bf16.msra.mxu0 %v15738_v7  ;;  %11788 = vmatpush3.bf16.msra.mxu1 %v15738_v7  ;;  %v15754_v14 = vpack.c.bf16 %v716_v12, %v715_v11  ;;  %v700_v16 = vld [vmem:[%s15728_s17 + $0x58] sm:$0xff]  ;;  %v714_v18 = vld [vmem:[%s15728_s17 + $0xc8] sm:$0xff]  ;;  %v697_v21 = vld [vmem:[%s15728_s17 + $0x40] sm:$0xff]  ;;  %s15297_s24 = scalar_lea.vmem %s17387_s18, 16  ;;  %s15413_s27 = smov [#allocation25]  }
  0xf3   : > { %11677 = vmatprep.subr.bf16.mxu0 %v15740_v8  ;;  %11789 = vmatprep.subr.bf16.mxu1 %v15740_v8  ;;  %v15762_v19 = vpack.c.bf16 %v700_v16, %v699_v15  ;;  %v15766_v20 = vpack.c.bf16 %v714_v18, %v713_v17  ;;  %v698_v22 = vld [vmem:[%s15728_s17 + $0x48] sm:$0xff]  ;;  %v711_v23 = vld [vmem:[%s15728_s17 + $0xb0] sm:$0xff]  ;;  %v712_v24 = vld [vmem:[%s15728_s17 + $0xb8] sm:$0xff]  ;;  %p15298_p8 = scmp.ne.s32.totalorder %s17387_s18, %s15297_s24  ;;  %s15301_s30 = sshll.u32 %s15413_s27, 4  ;;  %s15302_s30 = int_to_ptr.vmem [resolvable:$false] %s15301_s30 }
  0xf4   : > { %v695_v25 = vld [vmem:[%s15728_s17 + $0x30] sm:$0xff]  ;;  %v696_v26 = vld [vmem:[%s15728_s17 + $0x38] sm:$0xff]  ;;  %v15776_v28 = vpack.c.bf16 %v698_v22, %v697_v21  ;;  %v709_v29 = vld [vmem:[%s15728_s17 + $0xa0] sm:$0xff]  ;;  %v15781_v30 = vpack.c.bf16 %v712_v24, %v711_v23  ;;  %s15303_s23 = scalar_lea.vmem %s15302_s30, 32  ;;  %p15304_p6 = scmp.lt.s32.totalorder %s17387_s18, %s15302_s30 }
  0xf5   : > { %v710_v32 = vld [vmem:[%s15728_s17 + $0xa8] sm:$0xff]  ;;  %v15786_v33 = vpack.c.bf16 %v696_v26, %v695_v25  ;;  %v693_v34 = vld [vmem:[%s15728_s17 + $0x20] sm:$0xff]  ;;  %v707_v37 = vld [vmem:[%s15728_s17 + $0x90] sm:$0xff]  ;;  %p15299_p12 = pnand %p15298_p8, %p15532_p5  ;;  %p15305_p9 = scmp.lt.s32.totalorder %s15303_s23, %s15297_s24 }
  0xf6   : > { %11678 = vmatpush3.bf16.msra.mxu0 %v15750_v13  ;;  %11790 = vmatpush3.bf16.msra.mxu1 %v15750_v13  ;;  %v15791_v35 = vpack.c.bf16 %v710_v32, %v709_v29  ;;  %v694_v36 = vld [vmem:[%s15728_s17 + $0x28] sm:$0xff]  ;;  %v708_v38 = vld [vmem:[%s15728_s17 + $0x98] sm:$0xff]  ;;  %v691_v40 = vld [vmem:[%s15728_s17 + $0x10] sm:$0xff]  ;;  %s17596_s26 = smov %s17595_s21  ;;  %s17385_s1 = scalar_lea.hbm %s17595_s21, %s11671_s2 }
  0xf7   : > { %11679 = vmatprep.subr.bf16.mxu0 %v15754_v14  ;;  %11791 = vmatprep.subr.bf16.mxu1 %v15754_v14  ;;  %v15798_v39 = vpack.c.bf16 %v694_v36, %v693_v34  ;;  %v692_v41 = vld [vmem:[%s15728_s17 + $0x18] sm:$0xff]  ;;  %v15804_v42 = vpack.c.bf16 %v708_v38, %v707_v37  ;;  %v705_v43 = vld [vmem:[%s15728_s17 + $0x80] sm:$0xff]  ;;  %v706_v44 = vld [vmem:[%s15728_s17 + $0x88] sm:$0xff]  ;;  %p15300_p10 = pneg %p15299_p12  ;;  %p15306_p1 = por %p15305_p9, %p15304_p6 }
  0xf8   : > { %v15810_v45 = vpack.c.bf16 %v692_v41, %v691_v40  ;;  %v689_v46 = vld [vmem:[%s15728_s17] sm:$0xff]  ;;  %v15815_v47 = vpack.c.bf16 %v706_v44, %v705_v43  ;;  %v690_v48 = vld [vmem:[%s15728_s17 + $0x8] sm:$0xff]  ;;  %v14338_v61 = vld [vmem:[#allocation2 + $0x134] ss:$8 sps:$4 sm:$0xff]  }
  0xf9   : > { %v15820_v49 = vpack.c.bf16 %v690_v48, %v689_v46  ;;  %v14341_v63 = vld [vmem:[#allocation2 + $0x130] ss:$8 sps:$4 sm:$0xff]   ;;  %v1478_v0 = vld [vmem:[#allocation5 + $0x2] sm:$0x3]  ;;  %v14342_v1 = vld [vmem:[#allocation2 + $0x44] ss:$8 sps:$4 sm:$0xff]   ;;  %p15307_p0 = pnand %p15306_p1, %p15300_p10 }
  0xfa   : > { %11680 = vmatpush3.bf16.msra.mxu0 %v15762_v19  ;;  %11792 = vmatpush3.bf16.msra.mxu1 %v15762_v19  ;;  %v14344_v2 = vld [vmem:[#allocation2 + $0x144] ss:$8 sps:$4 sm:$0xff]   ;;  %v1530_v4 = vsel %vm1528_vm0, %v1478_v0, 0  ;;  %v14346_v5 = vld [vmem:[#allocation2 + $0x40] ss:$8 sps:$4 sm:$0xff]  }
  0xfb   : > { %11681 = vmatprep.subr.bf16.mxu0 %v15766_v20  ;;  %11793 = vmatprep.subr.bf16.mxu1 %v15766_v20  ;;  %v14347_v6 = vld [vmem:[#allocation2 + $0x140] ss:$8 sps:$4 sm:$0xff]   ;;  %v14348_v9 = vld [vmem:[#allocation2 + $0x54] ss:$8 sps:$4 sm:$0xff]   ;;  %v14352_v11 = vld [vmem:[#allocation2 + $0x50] ss:$8 sps:$4 sm:$0xff]  }
  0xfc   : > { %v14350_v10 = vld [vmem:[#allocation2 + $0x154] ss:$8 sps:$4 sm:$0xff]   ;;  %v14353_v12 = vld [vmem:[#allocation2 + $0x150] ss:$8 sps:$4 sm:$0xff]   ;;  %v14354_v15 = vld [vmem:[#allocation2 + $0x64] ss:$8 sps:$4 sm:$0xff]  }
  0xfd   : > { %v14356_v16 = vld [vmem:[#allocation2 + $0x164] ss:$8 sps:$4 sm:$0xff]   ;;  %v14358_v17 = vld [vmem:[#allocation2 + $0x60] ss:$8 sps:$4 sm:$0xff]   ;;  %v14360_v21 = vld [vmem:[#allocation2 + $0x74] ss:$8 sps:$4 sm:$0xff]  }
  0xfe   : > { %11682 = vmatpush3.bf16.msra.mxu0 %v15776_v28  ;;  %11794 = vmatpush3.bf16.msra.mxu1 %v15776_v28  ;;  %v14359_v18 = vld [vmem:[#allocation2 + $0x160] ss:$8 sps:$4 sm:$0xff]   ;;  %v14362_v22 = vld [vmem:[#allocation2 + $0x174] ss:$8 sps:$4 sm:$0xff]   ;;  %v14364_v23 = vld [vmem:[#allocation2 + $0x70] ss:$8 sps:$4 sm:$0xff]  }
  0xff   : > { %11683 = vmatprep.subr.bf16.mxu0 %v15781_v30  ;;  %11795 = vmatprep.subr.bf16.mxu1 %v15781_v30  ;;  %v14365_v24 = vld [vmem:[#allocation2 + $0x170] ss:$8 sps:$4 sm:$0xff]   ;;  %v14366_v25 = vld [vmem:[#allocation2 + $0x84] ss:$8 sps:$4 sm:$0xff]   ;;  %v14370_v27 = vld [vmem:[#allocation2 + $0x80] ss:$8 sps:$4 sm:$0xff]  }
 0x100   : > { %v14368_v26 = vld [vmem:[#allocation2 + $0x184] ss:$8 sps:$4 sm:$0xff]   ;;  %v14371_v29 = vld [vmem:[#allocation2 + $0x180] ss:$8 sps:$4 sm:$0xff]   ;;  %v14372_v31 = vld [vmem:[#allocation2 + $0x94] ss:$8 sps:$4 sm:$0xff]  }
 0x101   : > { %v14374_v32 = vld [vmem:[#allocation2 + $0x194] ss:$8 sps:$4 sm:$0xff]   ;;  %v14376_v34 = vld [vmem:[#allocation2 + $0x90] ss:$8 sps:$4 sm:$0xff]   ;;  %v14378_v37 = vld [vmem:[#allocation2 + $0xa4] ss:$8 sps:$4 sm:$0xff]  }
 0x102   : > { %11684 = vmatpush3.bf16.msra.mxu0 %v15786_v33  ;;  %11796 = vmatpush3.bf16.msra.mxu1 %v15786_v33  ;;  %v14377_v36 = vld [vmem:[#allocation2 + $0x190] ss:$8 sps:$4 sm:$0xff]   ;;  %v14380_v38 = vld [vmem:[#allocation2 + $0x1a4] ss:$8 sps:$4 sm:$0xff]   ;;  %v14382_v40 = vld [vmem:[#allocation2 + $0xa0] ss:$8 sps:$4 sm:$0xff]  }
 0x103   : > { %11685 = vmatprep.subr.bf16.mxu0 %v15791_v35  ;;  %11797 = vmatprep.subr.bf16.mxu1 %v15791_v35  ;;  %v14383_v41 = vld [vmem:[#allocation2 + $0x1a0] ss:$8 sps:$4 sm:$0xff]   ;;  %v14384_v43 = vld [vmem:[#allocation2 + $0xb4] ss:$8 sps:$4 sm:$0xff]  }
 0x104   : > { %v14386_v44 = vld [vmem:[#allocation2 + $0x1b4] ss:$8 sps:$4 sm:$0xff]   ;;  %v1106_v46 = vld [vmem:[#allocation5] sm:$0x3] }
 0x105   : > { %v1742_v48 = vsel %vm1528_vm0, %v1106_v46, 0 }
 0x106   : > { %11686 = vmatpush3.bf16.msra.mxu0 %v15798_v39  ;;  %11798 = vmatpush3.bf16.msra.mxu1 %v15798_v39 }
 0x107   : > { %11687 = vmatprep.subr.bf16.mxu0 %v15804_v42  ;;  %11799 = vmatprep.subr.bf16.mxu1 %v15804_v42 }
 0x10a   : > { %11688 = vmatpush3.bf16.msra.mxu0 %v15810_v45  ;;  %11800 = vmatpush3.bf16.msra.mxu1 %v15810_v45 }
 0x10b   : > { %11689 = vmatprep.subr.bf16.mxu0 %v15815_v47  ;;  %11801 = vmatprep.subr.bf16.mxu1 %v15815_v47 }
 0x10e   : > { %11690 = vmatpush3.bf16.msra.mxu0 %v15820_v49  ;;  %11802 = vmatpush3.bf16.msra.mxu1 %v15820_v49 }
 0x10f   : > { %14121 = vmatprep.subr.msk.bf16.mxu0 %vm1528_vm0, %v1478_v0  ;;  %14122 = vmatprep.subr.msk.bf16.mxu1 %vm1528_vm0, %v1106_v46  ;;  %v14408_v0 = vld [vmem:[#allocation2 + $0xf4] ss:$8 sps:$4 sm:$0xff]  }
 0x111   : > { %962 = vmatmul.mubr.bf16.vlgmr.msra.gmra.mxu0 %v14318_v50  ;;  %1333 = vmatmul.mubr.bf16.vlgmr.msra.gmra.mxu1 %v14321_v51  ;;  %v14388_v50 = vld [vmem:[#allocation2 + $0xb0] ss:$8 sps:$4 sm:$0xff]  }
 0x112   : > { %969 = vmatprep.mubr.bf16.mxu0 %v14324_v52  ;;  %1340 = vmatprep.mubr.bf16.mxu1 %v14326_v53  ;;  %v14389_v51 = vld [vmem:[#allocation2 + $0x1b0] ss:$8 sps:$4 sm:$0xff]   ;;  %v14390_v52 = vld [vmem:[#allocation2 + $0xc4] ss:$8 sps:$4 sm:$0xff]  }
 0x113   : > { %13250 = vmatpush3.bf16.msra.mxu0 %v1530_v4  ;;  %13284 = vmatpush3.bf16.msra.mxu1 %v1742_v48  ;;  %v14392_v53 = vld [vmem:[#allocation2 + $0x1c4] ss:$8 sps:$4 sm:$0xff]   ;;  %v14413_v4 = vld [vmem:[#allocation2 + $0x1f0] ss:$8 sps:$4 sm:$0xff]  }
 0x114   : > { %11933 = vmatprep.subr.bf16.mxu0 %v15733_v3 }
 0x119   : > { %970 = vmatmul.mubr.bf16.gmra.mxu0 %v14328_v54  ;;  %1341 = vmatmul.mubr.bf16.gmra.mxu1 %v14329_v55  ;;  %v14394_v54 = vld [vmem:[#allocation2 + $0xc0] ss:$8 sps:$4 sm:$0xff]  }
 0x11a   : > { %977 = vmatprep.mubr.bf16.mxu0 %v14330_v56  ;;  %1348 = vmatprep.mubr.bf16.mxu1 %v14332_v57  ;;  %v14395_v55 = vld [vmem:[#allocation2 + $0x1c0] ss:$8 sps:$4 sm:$0xff]   ;;  %v14396_v56 = vld [vmem:[#allocation2 + $0xd4] ss:$8 sps:$4 sm:$0xff]  }
 0x11b   : > { %v14398_v57 = vld [vmem:[#allocation2 + $0x1d4] ss:$8 sps:$4 sm:$0xff]  }
 0x121   : > { %978 = vmatmul.mubr.bf16.gmra.mxu0 %v14334_v58  ;;  %1349 = vmatmul.mubr.bf16.gmra.mxu1 %v14335_v59  ;;  %v14400_v58 = vld [vmem:[#allocation2 + $0xd0] ss:$8 sps:$4 sm:$0xff]  }
 0x122   : > { %985 = vmatprep.mubr.bf16.mxu0 %v14336_v60  ;;  %1356 = vmatprep.mubr.bf16.mxu1 %v14338_v61  ;;  %v14401_v59 = vld [vmem:[#allocation2 + $0x1d0] ss:$8 sps:$4 sm:$0xff]   ;;  %v14402_v60 = vld [vmem:[#allocation2 + $0xe4] ss:$8 sps:$4 sm:$0xff]  }
 0x123   : > { %v14404_v61 = vld [vmem:[#allocation2 + $0x1e4] ss:$8 sps:$4 sm:$0xff]  }
 0x129   : > { %986 = vmatmul.mubr.bf16.gmra.mxu0 %v14340_v62  ;;  %1357 = vmatmul.mubr.bf16.gmra.mxu1 %v14341_v63  ;;  %v14406_v62 = vld [vmem:[#allocation2 + $0xe0] ss:$8 sps:$4 sm:$0xff]  }
 0x12a   : > { %993 = vmatprep.mubr.bf16.mxu0 %v14342_v1  ;;  %1364 = vmatprep.mubr.bf16.mxu1 %v14344_v2  ;;  %v14407_v63 = vld [vmem:[#allocation2 + $0x1e0] ss:$8 sps:$4 sm:$0xff]   ;;  %v14410_v1 = vld [vmem:[#allocation2 + $0x1f4] ss:$8 sps:$4 sm:$0xff]   ;;  %v14412_v2 = vld [vmem:[#allocation2 + $0xf0] ss:$8 sps:$4 sm:$0xff]  }
 0x131   : > { %994 = vmatmul.mubr.bf16.gmra.mxu0 %v14346_v5  ;;  %1365 = vmatmul.mubr.bf16.gmra.mxu1 %v14347_v6 }
 0x132   : > { %1001 = vmatprep.mubr.bf16.mxu0 %v14348_v9  ;;  %1372 = vmatprep.mubr.bf16.mxu1 %v14350_v10 }
 0x139   : > { %1002 = vmatmul.mubr.bf16.gmra.mxu0 %v14352_v11  ;;  %1373 = vmatmul.mubr.bf16.gmra.mxu1 %v14353_v12 }
 0x13a   : > { %1009 = vmatprep.mubr.bf16.mxu0 %v14354_v15  ;;  %1380 = vmatprep.mubr.bf16.mxu1 %v14356_v16 }
 0x141   : > { %1010 = vmatmul.mubr.bf16.gmra.mxu0 %v14358_v17  ;;  %1381 = vmatmul.mubr.bf16.gmra.mxu1 %v14359_v18 }
 0x142   : > { %1017 = vmatprep.mubr.bf16.mxu0 %v14360_v21  ;;  %1388 = vmatprep.mubr.bf16.mxu1 %v14362_v22 }
 0x149   : > { %1018 = vmatmul.mubr.bf16.gmra.mxu0 %v14364_v23  ;;  %1389 = vmatmul.mubr.bf16.gmra.mxu1 %v14365_v24 }
 0x14a   : > { %1025 = vmatprep.mubr.bf16.mxu0 %v14366_v25  ;;  %1396 = vmatprep.mubr.bf16.mxu1 %v14368_v26 }
 0x151   : > { %1026 = vmatmul.mubr.bf16.gmra.mxu0 %v14370_v27  ;;  %1397 = vmatmul.mubr.bf16.gmra.mxu1 %v14371_v29 }
 0x152   : > { %1033 = vmatprep.mubr.bf16.mxu0 %v14372_v31  ;;  %1404 = vmatprep.mubr.bf16.mxu1 %v14374_v32 }
 0x159   : > { %1034 = vmatmul.mubr.bf16.gmra.mxu0 %v14376_v34  ;;  %1405 = vmatmul.mubr.bf16.gmra.mxu1 %v14377_v36 }
 0x15a   : > { %1041 = vmatprep.mubr.bf16.mxu0 %v14378_v37  ;;  %1412 = vmatprep.mubr.bf16.mxu1 %v14380_v38 }
 0x161   : > { %1042 = vmatmul.mubr.bf16.gmra.mxu0 %v14382_v40  ;;  %1413 = vmatmul.mubr.bf16.gmra.mxu1 %v14383_v41 }
 0x162   : > { %1049 = vmatprep.mubr.bf16.mxu0 %v14384_v43  ;;  %1420 = vmatprep.mubr.bf16.mxu1 %v14386_v44 }
 0x169   : > { %1050 = vmatmul.mubr.bf16.gmra.mxu0 %v14388_v50  ;;  %1421 = vmatmul.mubr.bf16.gmra.mxu1 %v14389_v51 }
 0x16a   : > { %1057 = vmatprep.mubr.bf16.mxu0 %v14390_v52  ;;  %1428 = vmatprep.mubr.bf16.mxu1 %v14392_v53 }
 0x171   : > { %1058 = vmatmul.mubr.bf16.gmra.mxu0 %v14394_v54  ;;  %1429 = vmatmul.mubr.bf16.gmra.mxu1 %v14395_v55 }
 0x172   : > { %1065 = vmatprep.mubr.bf16.mxu0 %v14396_v56  ;;  %1436 = vmatprep.mubr.bf16.mxu1 %v14398_v57 }
 0x179   : > { %1066 = vmatmul.mubr.bf16.gmra.mxu0 %v14400_v58  ;;  %1437 = vmatmul.mubr.bf16.gmra.mxu1 %v14401_v59 }
 0x17a   : > { %1073 = vmatprep.mubr.bf16.mxu0 %v14402_v60  ;;  %1444 = vmatprep.mubr.bf16.mxu1 %v14404_v61 }
 0x181   : > { %1074 = vmatmul.mubr.bf16.gmra.mxu0 %v14406_v62  ;;  %1445 = vmatmul.mubr.bf16.gmra.mxu1 %v14407_v63 }
 0x182   : > { %1081 = vmatprep.mubr.bf16.mxu0 %v14408_v0  ;;  %1452 = vmatprep.mubr.bf16.mxu1 %v14410_v1 }
 0x189   : > { %1082 = vmatmul.mubr.bf16.gmra.mxu0 %v14412_v2  ;;  %1453 = vmatmul.mubr.bf16.gmra.mxu1 %v14413_v4 }
 0x1d1   : > { %v11691_v5 = vpop.f32.mrf.mxu0  ;;  %v11803_v6 = vpop.f32.mrf.mxu1 }
 0x1d3   : > { %v11692_v9 = vpop.f32.mrf.mxu0  ;;  %v11804_v10 = vpop.f32.mrf.mxu1 }
 0x1d4   : > { %v11693_v15 = vadd.f32 %v11692_v9, %v11691_v5  ;;  %v11805_v18 = vadd.f32 %v11804_v10, %v11803_v6 }
 0x1d5   : > { %v11694_v11 = vpop.f32.mrf.mxu0  ;;  %v11806_v12 = vpop.f32.mrf.mxu1 }
 0x1d7   : > { %v11695_v16 = vpop.f32.mrf.mxu0  ;;  %v11807_v17 = vpop.f32.mrf.mxu1 }
 0x1d8   : > { %v11696_v21 = vadd.f32 %v11695_v16, %v11694_v11  ;;  %v11808_v22 = vadd.f32 %v11807_v17, %v11806_v12 }
 0x1d9   : > { %v11697_v23 = vpop.f32.mrf.mxu0  ;;  %v11809_v24 = vpop.f32.mrf.mxu1 }
 0x1da   : > { %v1090_v25 = vpack.c.bf16 %v11696_v21, %v11693_v15  ;;  %v1461_v26 = vpack.c.bf16 %v11808_v22, %v11805_v18 }
 0x1db   : > { %v11698_v27 = vpop.f32.mrf.mxu0  ;;  %v11810_v29 = vpop.f32.mrf.mxu1 }
 0x1dc   : > { %13251 = vmatprep.mubr.msk.bf16.mxu0 %vm1479_vm1, %v1461_v26  ;;  %13285 = vmatprep.mubr.msk.bf16.mxu1 %vm1479_vm1, %v1090_v25  ;;  %v11699_v34 = vadd.f32 %v11698_v27, %v11697_v23  ;;  %v11811_v38 = vadd.f32 %v11810_v29, %v11809_v24 }
 0x1dd   : > { %v11700_v31 = vpop.f32.mrf.mxu0  ;;  %v11812_v32 = vpop.f32.mrf.mxu1 }
 0x1df   : > { %v11701_v36 = vpop.f32.mrf.mxu0  ;;  %v11813_v37 = vpop.f32.mrf.mxu1 }
 0x1e0   : > { %v11702_v40 = vadd.f32 %v11701_v36, %v11700_v31  ;;  %v11814_v41 = vadd.f32 %v11813_v37, %v11812_v32 }
 0x1e1   : > { %v11703_v43 = vpop.f32.mrf.mxu0  ;;  %v11815_v44 = vpop.f32.mrf.mxu1 }
 0x1e2   : > { %v1091_v46 = vpack.c.bf16 %v11702_v40, %v11699_v34  ;;  %v1462_v48 = vpack.c.bf16 %v11814_v41, %v11811_v38 }
 0x1e3   : > { %v11704_v50 = vpop.f32.mrf.mxu0  ;;  %v11816_v51 = vpop.f32.mrf.mxu1 }
 0x1e4   : > { %13252 = vmatmul.mubr.msk.bf16.vlgmr.msra.gmra.mxu0 %vm1479_vm1, %v1462_v48  ;;  %13286 = vmatmul.mubr.msk.bf16.vlgmr.msra.gmra.mxu1 %vm1479_vm1, %v1091_v46  ;;  %v11705_v54 = vadd.f32 %v11704_v50, %v11703_v43  ;;  %v11817_v57 = vadd.f32 %v11816_v51, %v11815_v44 }
 0x1e5   : > { %v11706_v52 = vpop.f32.mrf.mxu0  ;;  %v11818_v53 = vpop.f32.mrf.mxu1  ;;  %11934 = vmatpush3.bf16.msra.mxu0 %v15738_v7 }
 0x1e6   : > { %11935 = vmatprep.subr.bf16.mxu0 %v15740_v8 }
 0x1e7   : > { %v11707_v55 = vpop.f32.mrf.mxu0  ;;  %v11819_v56 = vpop.f32.mrf.mxu1 }
 0x1e8   : > { %v11708_v58 = vadd.f32 %v11707_v55, %v11706_v52  ;;  %v11820_v59 = vadd.f32 %v11819_v56, %v11818_v53 }
 0x1e9   : > { %v11709_v60 = vpop.f32.mrf.mxu0  ;;  %v11821_v61 = vpop.f32.mrf.mxu1  ;;  %11936 = vmatpush3.bf16.msra.mxu0 %v15750_v13 }
 0x1ea   : > { %v1092_v62 = vpack.c.bf16 %v11708_v58, %v11705_v54  ;;  %v1463_v63 = vpack.c.bf16 %v11820_v59, %v11817_v57  ;;  %11937 = vmatprep.subr.bf16.mxu0 %v15754_v14 }
 0x1eb   : > { %v11710_v0 = vpop.f32.mrf.mxu0  ;;  %v11822_v1 = vpop.f32.mrf.mxu1 }
 0x1ec   : > { %13255 = vmatprep.mubr.msk.bf16.mxu0 %vm1479_vm1, %v1463_v63  ;;  %13289 = vmatprep.mubr.msk.bf16.mxu1 %vm1479_vm1, %v1092_v62  ;;  %v11711_v5 = vadd.f32 %v11710_v0, %v11709_v60  ;;  %v11823_v10 = vadd.f32 %v11822_v1, %v11821_v61 }
 0x1ed   : > { %v11712_v2 = vpop.f32.mrf.mxu0  ;;  %v11824_v4 = vpop.f32.mrf.mxu1  ;;  %11938 = vmatpush3.bf16.msra.mxu0 %v15762_v19 }
 0x1ee   : > { %11939 = vmatprep.subr.bf16.mxu0 %v15766_v20 }
 0x1ef   : > { %v11713_v6 = vpop.f32.mrf.mxu0  ;;  %v11825_v9 = vpop.f32.mrf.mxu1 }
 0x1f0   : > { %v11714_v11 = vadd.f32 %v11713_v6, %v11712_v2  ;;  %v11826_v12 = vadd.f32 %v11825_v9, %v11824_v4 }
 0x1f1   : > { %v11715_v15 = vpop.f32.mrf.mxu0  ;;  %v11827_v16 = vpop.f32.mrf.mxu1  ;;  %11940 = vmatpush3.bf16.msra.mxu0 %v15776_v28 }
 0x1f2   : > { %v1093_v17 = vpack.c.bf16 %v11714_v11, %v11711_v5  ;;  %v1464_v18 = vpack.c.bf16 %v11826_v12, %v11823_v10  ;;  %11941 = vmatprep.subr.bf16.mxu0 %v15781_v30 }
 0x1f3   : > { %v11716_v21 = vpop.f32.mrf.mxu0  ;;  %v11828_v22 = vpop.f32.mrf.mxu1 }
 0x1f4   : > { %13256 = vmatmul.mubr.msk.bf16.gmra.mxu0 %vm1479_vm1, %v1464_v18  ;;  %13290 = vmatmul.mubr.msk.bf16.gmra.mxu1 %vm1479_vm1, %v1093_v17  ;;  %v11717_v25 = vadd.f32 %v11716_v21, %v11715_v15  ;;  %v11829_v29 = vadd.f32 %v11828_v22, %v11827_v16 }
 0x1f5   : > { %v11718_v23 = vpop.f32.mrf.mxu0  ;;  %v11830_v24 = vpop.f32.mrf.mxu1  ;;  %11942 = vmatpush3.bf16.msra.mxu0 %v15786_v33 }
 0x1f6   : > { %11943 = vmatprep.subr.bf16.mxu0 %v15791_v35 }
 0x1f7   : > { %v11719_v26 = vpop.f32.mrf.mxu0  ;;  %v11831_v27 = vpop.f32.mrf.mxu1 }
 0x1f8   : > { %v11720_v31 = vadd.f32 %v11719_v26, %v11718_v23  ;;  %v11832_v32 = vadd.f32 %v11831_v27, %v11830_v24 }
 0x1f9   : > { %v11721_v34 = vpop.f32.mrf.mxu0  ;;  %v11833_v36 = vpop.f32.mrf.mxu1  ;;  %11944 = vmatpush3.bf16.msra.mxu0 %v15798_v39 }
 0x1fa   : > { %v1094_v37 = vpack.c.bf16 %v11720_v31, %v11717_v25  ;;  %v1465_v38 = vpack.c.bf16 %v11832_v32, %v11829_v29  ;;  %11945 = vmatprep.subr.bf16.mxu0 %v15804_v42 }
 0x1fb   : > { %v11722_v40 = vpop.f32.mrf.mxu0  ;;  %v11834_v41 = vpop.f32.mrf.mxu1 }
 0x1fc   : > { %13259 = vmatprep.mubr.msk.bf16.mxu0 %vm1479_vm1, %v1465_v38  ;;  %13293 = vmatprep.mubr.msk.bf16.mxu1 %vm1479_vm1, %v1094_v37  ;;  %v11723_v46 = vadd.f32 %v11722_v40, %v11721_v34  ;;  %v11835_v51 = vadd.f32 %v11834_v41, %v11833_v36 }
 0x1fd   : > { %v11724_v43 = vpop.f32.mrf.mxu0  ;;  %v11836_v44 = vpop.f32.mrf.mxu1  ;;  %11946 = vmatpush3.bf16.msra.mxu0 %v15810_v45 }
 0x1fe   : > { %11947 = vmatprep.subr.bf16.mxu0 %v15815_v47 }
 0x1ff   : > { %v11725_v48 = vpop.f32.mrf.mxu0  ;;  %v11837_v50 = vpop.f32.mrf.mxu1 }
 0x200   : > { %v11726_v52 = vadd.f32 %v11725_v48, %v11724_v43  ;;  %v11838_v53 = vadd.f32 %v11837_v50, %v11836_v44 }
 0x201   : > { %v11727_v54 = vpop.f32.mrf.mxu0  ;;  %v11839_v55 = vpop.f32.mrf.mxu1  ;;  %11948 = vmatpush3.bf16.msra.mxu0 %v15820_v49 }
 0x202   : > { %v1095_v56 = vpack.c.bf16 %v11726_v52, %v11723_v46  ;;  %v1466_v57 = vpack.c.bf16 %v11838_v53, %v11835_v51 }
 0x203   : > { %v11728_v58 = vpop.f32.mrf.mxu0  ;;  %v11840_v59 = vpop.f32.mrf.mxu1 }
 0x204   : > { %13260 = vmatmul.mubr.msk.bf16.gmra.mxu0 %vm1479_vm1, %v1466_v57  ;;  %13294 = vmatmul.mubr.msk.bf16.gmra.mxu1 %vm1479_vm1, %v1095_v56  ;;  %v11729_v62 = vadd.f32 %v11728_v58, %v11727_v54  ;;  %v11841_v1 = vadd.f32 %v11840_v59, %v11839_v55 }
 0x205   : > { %v11730_v60 = vpop.f32.mrf.mxu0  ;;  %v11842_v61 = vpop.f32.mrf.mxu1 }
 0x207   : > { %v11731_v63 = vpop.f32.mrf.mxu0  ;;  %v11843_v0 = vpop.f32.mrf.mxu1 }
 0x208   : > { %v11732_v2 = vadd.f32 %v11731_v63, %v11730_v60  ;;  %v11844_v4 = vadd.f32 %v11843_v0, %v11842_v61 }
 0x209   : > { %v11733_v5 = vpop.f32.mrf.mxu0  ;;  %v11845_v6 = vpop.f32.mrf.mxu1 }
 0x20a   : > { %v1096_v9 = vpack.c.bf16 %v11732_v2, %v11729_v62  ;;  %v1467_v10 = vpack.c.bf16 %v11844_v4, %v11841_v1 }
 0x20b   : > { %v11734_v11 = vpop.f32.mrf.mxu0  ;;  %v11846_v12 = vpop.f32.mrf.mxu1 }
 0x20c   : > { %13263 = vmatprep.mubr.msk.bf16.mxu0 %vm1479_vm1, %v1467_v10  ;;  %13297 = vmatprep.mubr.msk.bf16.mxu1 %vm1479_vm1, %v1096_v9  ;;  %v11735_v17 = vadd.f32 %v11734_v11, %v11733_v5  ;;  %v11847_v22 = vadd.f32 %v11846_v12, %v11845_v6 }
 0x20d   : > { %v11736_v15 = vpop.f32.mrf.mxu0  ;;  %v11848_v16 = vpop.f32.mrf.mxu1 }
 0x20f   : > { %v11737_v18 = vpop.f32.mrf.mxu0  ;;  %v11849_v21 = vpop.f32.mrf.mxu1 }
 0x210   : > { %v11738_v23 = vadd.f32 %v11737_v18, %v11736_v15  ;;  %v11850_v24 = vadd.f32 %v11849_v21, %v11848_v16 }
 0x211   : > { %v11739_v25 = vpop.f32.mrf.mxu0  ;;  %v11851_v26 = vpop.f32.mrf.mxu1 }
 0x212   : > { %v1097_v27 = vpack.c.bf16 %v11738_v23, %v11735_v17  ;;  %v1468_v29 = vpack.c.bf16 %v11850_v24, %v11847_v22 }
 0x213   : > { %v11740_v31 = vpop.f32.mrf.mxu0  ;;  %v11852_v32 = vpop.f32.mrf.mxu1 }
 0x214   : > { %13264 = vmatmul.mubr.msk.bf16.gmra.mxu0 %vm1479_vm1, %v1468_v29  ;;  %13298 = vmatmul.mubr.msk.bf16.gmra.mxu1 %vm1479_vm1, %v1097_v27  ;;  %v11741_v37 = vadd.f32 %v11740_v31, %v11739_v25  ;;  %v11853_v41 = vadd.f32 %v11852_v32, %v11851_v26 }
 0x215   : > { %v11742_v34 = vpop.f32.mrf.mxu0  ;;  %v11854_v36 = vpop.f32.mrf.mxu1 }
 0x217   : > { %v11743_v38 = vpop.f32.mrf.mxu0  ;;  %v11855_v40 = vpop.f32.mrf.mxu1 }
 0x218   : > { %v11744_v43 = vadd.f32 %v11743_v38, %v11742_v34  ;;  %v11856_v44 = vadd.f32 %v11855_v40, %v11854_v36 }
 0x219   : > { %v11745_v46 = vpop.f32.mrf.mxu0  ;;  %v11857_v48 = vpop.f32.mrf.mxu1 }
 0x21a   : > { %v1098_v50 = vpack.c.bf16 %v11744_v43, %v11741_v37  ;;  %v1469_v51 = vpack.c.bf16 %v11856_v44, %v11853_v41 }
 0x21b   : > { %v11746_v52 = vpop.f32.mrf.mxu0  ;;  %v11858_v53 = vpop.f32.mrf.mxu1 }
 0x21c   : > { %13267 = vmatprep.mubr.msk.bf16.mxu0 %vm1479_vm1, %v1469_v51  ;;  %13301 = vmatprep.mubr.msk.bf16.mxu1 %vm1479_vm1, %v1098_v50  ;;  %v11747_v56 = vadd.f32 %v11746_v52, %v11745_v46  ;;  %v11859_v59 = vadd.f32 %v11858_v53, %v11857_v48 }
 0x21d   : > { %v11748_v54 = vpop.f32.mrf.mxu0  ;;  %v11860_v55 = vpop.f32.mrf.mxu1 }
 0x21f   : > { %v11749_v57 = vpop.f32.mrf.mxu0  ;;  %v11861_v58 = vpop.f32.mrf.mxu1 }
 0x220   : > { %v11750_v60 = vadd.f32 %v11749_v57, %v11748_v54  ;;  %v11862_v61 = vadd.f32 %v11861_v58, %v11860_v55 }
 0x221   : > { %v11751_v62 = vpop.f32.mrf.mxu0  ;;  %v11863_v63 = vpop.f32.mrf.mxu1 }
 0x222   : > { %v1099_v0 = vpack.c.bf16 %v11750_v60, %v11747_v56  ;;  %v1470_v1 = vpack.c.bf16 %v11862_v61, %v11859_v59 }
 0x223   : > { %v11752_v2 = vpop.f32.mrf.mxu0  ;;  %v11864_v4 = vpop.f32.mrf.mxu1 }
 0x224   : > { %13268 = vmatmul.mubr.msk.bf16.gmra.mxu0 %vm1479_vm1, %v1470_v1  ;;  %13302 = vmatmul.mubr.msk.bf16.gmra.mxu1 %vm1479_vm1, %v1099_v0  ;;  %v11753_v9 = vadd.f32 %v11752_v2, %v11751_v62  ;;  %v11865_v12 = vadd.f32 %v11864_v4, %v11863_v63 }
 0x225   : > { %v11754_v5 = vpop.f32.mrf.mxu0  ;;  %v11866_v6 = vpop.f32.mrf.mxu1 }
 0x227   : > { %v11755_v10 = vpop.f32.mrf.mxu0  ;;  %v11867_v11 = vpop.f32.mrf.mxu1 }
 0x228   : > { %v11756_v15 = vadd.f32 %v11755_v10, %v11754_v5  ;;  %v11868_v16 = vadd.f32 %v11867_v11, %v11866_v6 }
 0x229   : > { %v11757_v17 = vpop.f32.mrf.mxu0  ;;  %v11869_v18 = vpop.f32.mrf.mxu1 }
 0x22a   : > { %v1100_v21 = vpack.c.bf16 %v11756_v15, %v11753_v9  ;;  %v1471_v22 = vpack.c.bf16 %v11868_v16, %v11865_v12 }
 0x22b   : > { %v11758_v23 = vpop.f32.mrf.mxu0  ;;  %v11870_v24 = vpop.f32.mrf.mxu1 }
 0x22c   : > { %13271 = vmatprep.mubr.msk.bf16.mxu0 %vm1479_vm1, %v1471_v22  ;;  %13305 = vmatprep.mubr.msk.bf16.mxu1 %vm1479_vm1, %v1100_v21  ;;  %v11759_v27 = vadd.f32 %v11758_v23, %v11757_v17  ;;  %v11871_v32 = vadd.f32 %v11870_v24, %v11869_v18 }
 0x22d   : > { %v11760_v25 = vpop.f32.mrf.mxu0  ;;  %v11872_v26 = vpop.f32.mrf.mxu1 }
 0x22f   : > { %v11761_v29 = vpop.f32.mrf.mxu0  ;;  %v11873_v31 = vpop.f32.mrf.mxu1 }
 0x230   : > { %v11762_v34 = vadd.f32 %v11761_v29, %v11760_v25  ;;  %v11874_v36 = vadd.f32 %v11873_v31, %v11872_v26 }
 0x231   : > { %v11763_v37 = vpop.f32.mrf.mxu0  ;;  %v11875_v38 = vpop.f32.mrf.mxu1 }
 0x232   : > { %v1101_v40 = vpack.c.bf16 %v11762_v34, %v11759_v27  ;;  %v1472_v41 = vpack.c.bf16 %v11874_v36, %v11871_v32 }
 0x233   : > { %v11764_v43 = vpop.f32.mrf.mxu0  ;;  %v11876_v44 = vpop.f32.mrf.mxu1 }
 0x234   : > { %13272 = vmatmul.mubr.msk.bf16.gmra.mxu0 %vm1479_vm1, %v1472_v41  ;;  %13306 = vmatmul.mubr.msk.bf16.gmra.mxu1 %vm1479_vm1, %v1101_v40  ;;  %v11765_v50 = vadd.f32 %v11764_v43, %v11763_v37  ;;  %v11877_v53 = vadd.f32 %v11876_v44, %v11875_v38 }
 0x235   : > { %v11766_v46 = vpop.f32.mrf.mxu0  ;;  %v11878_v48 = vpop.f32.mrf.mxu1 }
 0x237   : > { %v11767_v51 = vpop.f32.mrf.mxu0  ;;  %v11879_v52 = vpop.f32.mrf.mxu1 }
 0x238   : > { %v11768_v54 = vadd.f32 %v11767_v51, %v11766_v46  ;;  %v11880_v55 = vadd.f32 %v11879_v52, %v11878_v48 }
 0x239   : > { %v11769_v56 = vpop.f32.mrf.mxu0  ;;  %v11881_v57 = vpop.f32.mrf.mxu1 }
 0x23a   : > { %v1102_v58 = vpack.c.bf16 %v11768_v54, %v11765_v50  ;;  %v1473_v59 = vpack.c.bf16 %v11880_v55, %v11877_v53  ;;  %v14416_v50 = vld [vmem:[#allocation2 + $0x204] ss:$8 sps:$4 sm:$0xff]   ;;  %v14414_v53 = vld [vmem:[#allocation2 + $0x200] ss:$8 sps:$4 sm:$0xff]   ;;  %v14417_v54 = vld [vmem:[#allocation2 + $0x214] ss:$8 sps:$4 sm:$0xff]  }
 0x23b   : > { %v11770_v60 = vpop.f32.mrf.mxu0  ;;  %v11882_v61 = vpop.f32.mrf.mxu1  ;;  %v14419_v55 = vld [vmem:[#allocation2 + $0x210] ss:$8 sps:$4 sm:$0xff]  }
 0x23c   : > { %13275 = vmatprep.mubr.msk.bf16.mxu0 %vm1479_vm1, %v1473_v59  ;;  %13309 = vmatprep.mubr.msk.bf16.mxu1 %vm1479_vm1, %v1102_v58  ;;  %v11771_v0 = vadd.f32 %v11770_v60, %v11769_v56  ;;  %v11883_v4 = vadd.f32 %v11882_v61, %v11881_v57  ;;  %v14420_v56 = vld [vmem:[#allocation2 + $0x224] ss:$8 sps:$4 sm:$0xff]   ;;  %v14422_v57 = vld [vmem:[#allocation2 + $0x220] ss:$8 sps:$4 sm:$0xff]   ;;  %v14423_v58 = vld [vmem:[#allocation2 + $0x234] ss:$8 sps:$4 sm:$0xff]  }
 0x23d   : > { %v11772_v62 = vpop.f32.mrf.mxu0  ;;  %v11884_v63 = vpop.f32.mrf.mxu1  ;;  %v14425_v59 = vld [vmem:[#allocation2 + $0x230] ss:$8 sps:$4 sm:$0xff]   ;;  %v14428_v60 = vld [vmem:[#allocation2 + $0x244] ss:$8 sps:$4 sm:$0xff]   ;;  %v14426_v61 = vld [vmem:[#allocation2 + $0x240] ss:$8 sps:$4 sm:$0xff]  }
 0x23f   : > { %v11773_v1 = vpop.f32.mrf.mxu0  ;;  %v11885_v2 = vpop.f32.mrf.mxu1 }
 0x240   : > { %v11774_v5 = vadd.f32 %v11773_v1, %v11772_v62  ;;  %v11886_v6 = vadd.f32 %v11885_v2, %v11884_v63  ;;  %v14431_v62 = vld [vmem:[#allocation2 + $0x254] ss:$8 sps:$4 sm:$0xff]   ;;  %v14429_v63 = vld [vmem:[#allocation2 + $0x250] ss:$8 sps:$4 sm:$0xff]   ;;  %v14432_v1 = vld [vmem:[#allocation2 + $0x260] ss:$8 sps:$4 sm:$0xff]  }
 0x241   : > { %v11775_v9 = vpop.f32.mrf.mxu0  ;;  %v11887_v10 = vpop.f32.mrf.mxu1  ;;  %v14437_v2 = vld [vmem:[#allocation2 + $0x274] ss:$8 sps:$4 sm:$0xff]  }
 0x242   : > { %v1103_v11 = vpack.c.bf16 %v11774_v5, %v11771_v0  ;;  %v1474_v12 = vpack.c.bf16 %v11886_v6, %v11883_v4  ;;  %v14434_v0 = vld [vmem:[#allocation2 + $0x264] ss:$8 sps:$4 sm:$0xff]   ;;  %v14435_v4 = vld [vmem:[#allocation2 + $0x270] ss:$8 sps:$4 sm:$0xff]   ;;  %v14438_v6 = vld [vmem:[#allocation2 + $0x280] ss:$8 sps:$4 sm:$0xff]  }
 0x243   : > { %v11776_v15 = vpop.f32.mrf.mxu0  ;;  %v11888_v16 = vpop.f32.mrf.mxu1  ;;  %v14440_v5 = vld [vmem:[#allocation2 + $0x284] ss:$8 sps:$4 sm:$0xff]  }
 0x244   : > { %13276 = vmatmul.mubr.msk.bf16.gmra.mxu0 %vm1479_vm1, %v1474_v12  ;;  %13310 = vmatmul.mubr.msk.bf16.gmra.mxu1 %vm1479_vm1, %v1103_v11  ;;  %v11777_v21 = vadd.f32 %v11776_v15, %v11775_v9  ;;  %v11889_v24 = vadd.f32 %v11888_v16, %v11887_v10  ;;  %v14443_v9 = vld [vmem:[#allocation2 + $0x294] ss:$8 sps:$4 sm:$0xff]   ;;  %v14441_v10 = vld [vmem:[#allocation2 + $0x290] ss:$8 sps:$4 sm:$0xff]   ;;  %v14446_v11 = vld [vmem:[#allocation2 + $0x2a4] ss:$8 sps:$4 sm:$0xff]  }
 0x245   : > { %v11778_v17 = vpop.f32.mrf.mxu0  ;;  %v11890_v18 = vpop.f32.mrf.mxu1 }
 0x247   : > { %v11779_v22 = vpop.f32.mrf.mxu0  ;;  %v11891_v23 = vpop.f32.mrf.mxu1 }
 0x248   : > { %v11780_v25 = vadd.f32 %v11779_v22, %v11778_v17  ;;  %v11892_v26 = vadd.f32 %v11891_v23, %v11890_v18 }
 0x249   : > { %v11781_v27 = vpop.f32.mrf.mxu0  ;;  %v11893_v29 = vpop.f32.mrf.mxu1 }
 0x24a   : > { %v1104_v31 = vpack.c.bf16 %v11780_v25, %v11777_v21  ;;  %v1475_v32 = vpack.c.bf16 %v11892_v26, %v11889_v24  ;;  %v14444_v24 = vld [vmem:[#allocation2 + $0x2a0] ss:$8 sps:$4 sm:$0xff]   ;;  %v14449_v26 = vld [vmem:[#allocation2 + $0x2b4] ss:$8 sps:$4 sm:$0xff]  }
 0x24b   : > { %v11782_v34 = vpop.f32.mrf.mxu0  ;;  %v11894_v36 = vpop.f32.mrf.mxu1 }
 0x24c   : > { %13279 = vmatprep.mubr.msk.bf16.mxu0 %vm1479_vm1, %v1475_v32  ;;  %13313 = vmatprep.mubr.msk.bf16.mxu1 %vm1479_vm1, %v1104_v31  ;;  %v11783_v40 = vadd.f32 %v11782_v34, %v11781_v27  ;;  %v11895_v44 = vadd.f32 %v11894_v36, %v11893_v29  ;;  %v2276_v27 = vld [vmem:[#allocation5 + $0x4] sm:$0x3]  ;;  %v14447_v31 = vld [vmem:[#allocation2 + $0x2b0] ss:$8 sps:$4 sm:$0xff]  }
 0x24d   : > { %v11784_v37 = vpop.f32.mrf.mxu0  ;;  %v11896_v38 = vpop.f32.mrf.mxu1  ;;  %14123 = vmatprep.subr.msk.bf16.mxu1 %vm1528_vm0, %v2276_v27  ;;  %v2326_v29 = vsel %vm1528_vm0, %v2276_v27, 0  ;;  %v14452_v32 = vld [vmem:[#allocation2 + $0x2c4] ss:$8 sps:$4 sm:$0xff]  }
 0x24e   : > { %13318 = vmatpush3.bf16.msra.mxu1 %v2326_v29 }
 0x24f   : > { %v11785_v41 = vpop.f32.mrf.mxu0  ;;  %v11897_v43 = vpop.f32.mrf.mxu1  ;;  %12062 = vmatprep.subr.bf16.mxu1 %v15733_v3 }
 0x250   : > { %v11786_v46 = vadd.f32 %v11785_v41, %v11784_v37  ;;  %v11898_v48 = vadd.f32 %v11897_v43, %v11896_v38 }
 0x252   : > { %v1105_v51 = vpack.c.bf16 %v11786_v46, %v11783_v40  ;;  %v1476_v52 = vpack.c.bf16 %v11898_v48, %v11895_v44 }
 0x254   : > { %13280 = vmatmul.mubr.msk.bf16.gmra.mxu0 %vm1479_vm1, %v1476_v52  ;;  %13314 = vmatmul.mubr.msk.bf16.gmra.mxu1 %vm1479_vm1, %v1105_v51  ;;  %v14455_v52 = vld [vmem:[#allocation2 + $0x2d4] ss:$8 sps:$4 sm:$0xff]  }
 0x255   : > { %2130 = vmatprep.mubr.bf16.mxu0 %v14416_v50  ;;  %v14450_v50 = vld [vmem:[#allocation2 + $0x2c0] ss:$8 sps:$4 sm:$0xff]  }
 0x25c   : > { %2131 = vmatmul.mubr.bf16.vlgmr.msra.gmra.mxu0 %v14414_v53  ;;  %v14453_v53 = vld [vmem:[#allocation2 + $0x2d0] ss:$8 sps:$4 sm:$0xff]  }
 0x25d   : > { %2138 = vmatprep.mubr.bf16.mxu0 %v14417_v54  ;;  %v14458_v54 = vld [vmem:[#allocation2 + $0x2e4] ss:$8 sps:$4 sm:$0xff]  }
 0x264   : > { %2139 = vmatmul.mubr.bf16.gmra.mxu0 %v14419_v55 }
 0x265   : > { %2146 = vmatprep.mubr.bf16.mxu0 %v14420_v56 }
 0x26c   : > { %2147 = vmatmul.mubr.bf16.gmra.mxu0 %v14422_v57 }
 0x26d   : > { %2154 = vmatprep.mubr.bf16.mxu0 %v14423_v58 }
 0x274   : > { %2155 = vmatmul.mubr.bf16.gmra.mxu0 %v14425_v59 }
 0x275   : > { %2162 = vmatprep.mubr.bf16.mxu0 %v14428_v60 }
 0x27c   : > { %2163 = vmatmul.mubr.bf16.gmra.mxu0 %v14426_v61 }
 0x27d   : > { %2170 = vmatprep.mubr.bf16.mxu0 %v14431_v62 }
 0x284   : > { %2171 = vmatmul.mubr.bf16.gmra.mxu0 %v14429_v63 }
 0x285   : > { %2178 = vmatprep.mubr.bf16.mxu0 %v14434_v0 }
 0x28c   : > { %2179 = vmatmul.mubr.bf16.gmra.mxu0 %v14432_v1  ;;  %v14456_v1 = vld [vmem:[#allocation2 + $0x2e0] ss:$8 sps:$4 sm:$0xff]  }
 0x28d   : > { %2186 = vmatprep.mubr.bf16.mxu0 %v14437_v2 }
 0x294   : > { %2187 = vmatmul.mubr.bf16.gmra.mxu0 %v14435_v4  ;;  %v14461_v4 = vld [vmem:[#allocation2 + $0x2f4] ss:$8 sps:$4 sm:$0xff]  }
 0x295   : > { %2194 = vmatprep.mubr.bf16.mxu0 %v14440_v5  ;;  %v14459_v5 = vld [vmem:[#allocation2 + $0x2f0] ss:$8 sps:$4 sm:$0xff]  }
 0x29c   : > { %2195 = vmatmul.mubr.bf16.gmra.mxu0 %v14438_v6 }
 0x29d   : > { %2202 = vmatprep.mubr.bf16.mxu0 %v14443_v9 }
 0x2a4   : > { %v13253_v12 = vpop.f32.mrf.mxu0  ;;  %v13287_v15 = vpop.f32.mrf.mxu1  ;;  %2203 = vmatmul.mubr.bf16.gmra.mxu0 %v14441_v10 }
 0x2a5   : > { %v15878_v16 = vadd.f32 %v13287_v15, %v13253_v12  ;;  %2210 = vmatprep.mubr.bf16.mxu0 %v14446_v11 }
 0x2a6   : > { %v1566_v17 = vpop.f32.mrf.mxu0  ;;  %v1778_v18 = vpop.f32.mrf.mxu1 }
 0x2a7   : > { %v15880_v21 = vadd.f32 %v1778_v18, %v1566_v17 }
 0x2a8   : > { %v13254_v22 = vpop.f32.mrf.mxu0  ;;  %v13288_v23 = vpop.f32.mrf.mxu1 }
 0x2a9   : > { %v15882_v25 = vadd.f32 %v13288_v23, %v13254_v22 }
 0x2aa   : > { %v15887_v34 = vpop.f32.mrf.mxu0  ;;  %v15889_v36 = vpop.f32.mrf.mxu1 }
 0x2ab   : > { %17497 = vst [vmem:[#allocation41_spill] sm:$0xff] %v15887_v34  ;;  %17498 = vst [vmem:[#allocation42_spill] sm:$0xff] %v15889_v36 }
 0x2ac   : > { %2211 = vmatmul.mubr.bf16.gmra.mxu0 %v14444_v24 }
 0x2ad   : > { %2218 = vmatprep.mubr.bf16.mxu0 %v14449_v26 }
 0x2b4   : > { %v13257_v37 = vpop.f32.mrf.mxu0  ;;  %v13291_v38 = vpop.f32.mrf.mxu1  ;;  %2219 = vmatmul.mubr.bf16.gmra.mxu0 %v14447_v31 }
 0x2b5   : > { %v15891_v40 = vadd.f32 %v13291_v38, %v13257_v37  ;;  %2226 = vmatprep.mubr.bf16.mxu0 %v14452_v32 }
 0x2b6   : > { %v1582_v41 = vpop.f32.mrf.mxu0  ;;  %v1794_v43 = vpop.f32.mrf.mxu1 }
 0x2b7   : > { %v15893_v44 = vadd.f32 %v1794_v43, %v1582_v41 }
 0x2b8   : > { %v13258_v46 = vpop.f32.mrf.mxu0  ;;  %v13292_v48 = vpop.f32.mrf.mxu1 }
 0x2b9   : > { %v15895_v51 = vadd.f32 %v13292_v48, %v13258_v46 }
 0x2ba   : > { %v15897_v55 = vpop.f32.mrf.mxu0  ;;  %v15899_v56 = vpop.f32.mrf.mxu1 }
 0x2bb   : > { %17499 = vst [vmem:[#allocation43_spill] sm:$0xff] %v15897_v55  ;;  %17500 = vst [vmem:[#allocation44_spill] sm:$0xff] %v15899_v56 }
 0x2bc   : > { %2227 = vmatmul.mubr.bf16.gmra.mxu0 %v14450_v50 }
 0x2bd   : > { %2234 = vmatprep.mubr.bf16.mxu0 %v14455_v52 }
 0x2c4   : > { %v13261_v57 = vpop.f32.mrf.mxu0  ;;  %v13295_v58 = vpop.f32.mrf.mxu1  ;;  %2235 = vmatmul.mubr.bf16.gmra.mxu0 %v14453_v53 }
 0x2c5   : > { %v15901_v59 = vadd.f32 %v13295_v58, %v13261_v57  ;;  %2242 = vmatprep.mubr.bf16.mxu0 %v14458_v54 }
 0x2c6   : > { %v1598_v60 = vpop.f32.mrf.mxu0  ;;  %v1810_v61 = vpop.f32.mrf.mxu1 }
 0x2c7   : > { %v15903_v62 = vadd.f32 %v1810_v61, %v1598_v60 }
 0x2c8   : > { %v13262_v63 = vpop.f32.mrf.mxu0  ;;  %v13296_v0 = vpop.f32.mrf.mxu1 }
 0x2c9   : > { %v15905_v2 = vadd.f32 %v13296_v0, %v13262_v63 }
 0x2ca   : > { %v15907_v6 = vpop.f32.mrf.mxu0  ;;  %v15909_v9 = vpop.f32.mrf.mxu1 }
 0x2cb   : > { %17501 = vst [vmem:[#allocation45_spill] sm:$0xff] %v15907_v6  ;;  %17502 = vst [vmem:[#allocation46_spill] sm:$0xff] %v15909_v9 }
 0x2cc   : > { %2243 = vmatmul.mubr.bf16.gmra.mxu0 %v14456_v1 }
 0x2cd   : > { %2250 = vmatprep.mubr.bf16.mxu0 %v14461_v4 }
 0x2d4   : > { %v13265_v10 = vpop.f32.mrf.mxu0  ;;  %v13299_v11 = vpop.f32.mrf.mxu1  ;;  %2251 = vmatmul.mubr.bf16.gmra.mxu0 %v14459_v5 }
 0x2d5   : > { %v15911_v12 = vadd.f32 %v13299_v11, %v13265_v10 }
 0x2d6   : > { %v1614_v15 = vpop.f32.mrf.mxu0  ;;  %v1826_v17 = vpop.f32.mrf.mxu1 }
 0x2d7   : > { %v15913_v18 = vadd.f32 %v1826_v17, %v1614_v15 }
 0x2d8   : > { %v13266_v22 = vpop.f32.mrf.mxu0  ;;  %v13300_v23 = vpop.f32.mrf.mxu1 }
 0x2d9   : > { %v15915_v24 = vadd.f32 %v13300_v23, %v13266_v22 }
 0x2da   : > { %v15917_v26 = vpop.f32.mrf.mxu0  ;;  %v15919_v27 = vpop.f32.mrf.mxu1 }
 0x2e4   : > { %v13269_v29 = vpop.f32.mrf.mxu0  ;;  %v13303_v31 = vpop.f32.mrf.mxu1 }
 0x2e5   : > { %v15921_v32 = vadd.f32 %v13303_v31, %v13269_v29 }
 0x2e6   : > { %v1630_v37 = vpop.f32.mrf.mxu0  ;;  %v1842_v38 = vpop.f32.mrf.mxu1 }
 0x2e7   : > { %v15923_v41 = vadd.f32 %v1842_v38, %v1630_v37 }
 0x2e8   : > { %v13270_v43 = vpop.f32.mrf.mxu0  ;;  %v13304_v46 = vpop.f32.mrf.mxu1 }
 0x2e9   : > { %v15925_v48 = vadd.f32 %v13304_v46, %v13270_v43 }
 0x2ea   : > { %v15927_v50 = vpop.f32.mrf.mxu0  ;;  %v15929_v52 = vpop.f32.mrf.mxu1 }
 0x2eb   : > { %17503 = vst [vmem:[#allocation47_spill] sm:$0xff] %v15927_v50  ;;  %17504 = vst [vmem:[#allocation48_spill] sm:$0xff] %v15929_v52 }
 0x2f4   : > { %v13273_v53 = vpop.f32.mrf.mxu0  ;;  %v13307_v54 = vpop.f32.mrf.mxu1 }
 0x2f5   : > { %v15931_v57 = vadd.f32 %v13307_v54, %v13273_v53 }
 0x2f6   : > { %v1646_v58 = vpop.f32.mrf.mxu0  ;;  %v1858_v60 = vpop.f32.mrf.mxu1 }
 0x2f7   : > { %v15933_v61 = vadd.f32 %v1858_v60, %v1646_v58 }
 0x2f8   : > { %v13274_v63 = vpop.f32.mrf.mxu0  ;;  %v13308_v0 = vpop.f32.mrf.mxu1 }
 0x2f9   : > { %v15935_v1 = vadd.f32 %v13308_v0, %v13274_v63 }
 0x2fa   : > { %v15937_v4 = vpop.f32.mrf.mxu0  ;;  %v15939_v5 = vpop.f32.mrf.mxu1 }
 0x2fb   : > { %17505 = vst [vmem:[#allocation49_spill] sm:$0xff] %v15937_v4  ;;  %17506 = vst [vmem:[#allocation50_spill] sm:$0xff] %v15939_v5 }
 0x304   : > { %v13277_v10 = vpop.f32.mrf.mxu0  ;;  %v13311_v11 = vpop.f32.mrf.mxu1 }
 0x305   : > { %v15941_v15 = vadd.f32 %v13311_v11, %v13277_v10 }
 0x306   : > { %v1662_v17 = vpop.f32.mrf.mxu0  ;;  %v1874_v22 = vpop.f32.mrf.mxu1 }
 0x307   : > { %v15943_v23 = vadd.f32 %v1874_v22, %v1662_v17 }
 0x308   : > { %v13278_v29 = vpop.f32.mrf.mxu0  ;;  %v13312_v31 = vpop.f32.mrf.mxu1 }
 0x309   : > { %v15945_v37 = vadd.f32 %v13312_v31, %v13278_v29 }
 0x30a   : > { %v15947_v38 = vpop.f32.mrf.mxu0  ;;  %v15949_v43 = vpop.f32.mrf.mxu1 }
 0x30b   : > { %17507 = vst [vmem:[#allocation51_spill] sm:$0xff] %v15947_v38  ;;  %17508 = vst [vmem:[#allocation52_spill] sm:$0xff] %v15949_v43 }
 0x314   : > { %v13281_v46 = vpop.f32.mrf.mxu0  ;;  %v13315_v53 = vpop.f32.mrf.mxu1 }
 0x315   : > { %v15951_v54 = vadd.f32 %v13315_v53, %v13281_v46 }
 0x316   : > { %v1678_v58 = vpop.f32.mrf.mxu0  ;;  %v1890_v60 = vpop.f32.mrf.mxu1 }
 0x317   : > { %v15953_v63 = vadd.f32 %v1890_v60, %v1678_v58 }
 0x318   : > { %v13282_v0 = vpop.f32.mrf.mxu0  ;;  %v13316_v10 = vpop.f32.mrf.mxu1 }
 0x319   : > { %v15955_v11 = vadd.f32 %v13316_v10, %v13282_v0 }
 0x31a   : > { %v15957_v17 = vpop.f32.mrf.mxu0 }
 0x31c   : > { %v11949_v22 = vpop.f32.mrf.mxu0 }
 0x31e   : > { %v11950_v29 = vpop.f32.mrf.mxu0 }
 0x31f   : > { %v11951_v34 = vadd.f32 %v11950_v29, %v11949_v22 }
 0x320   : > { %v11952_v31 = vpop.f32.mrf.mxu0 }
 0x322   : > { %v11953_v36 = vpop.f32.mrf.mxu0 }
 0x323   : > { %v11954_v52 = vadd.f32 %v11953_v36, %v11952_v31 }
 0x324   : > { %v11955_v50 = vpop.f32.mrf.mxu0 }
 0x325   : > { %v2259_v56 = vpack.c.bf16 %v11954_v52, %v11951_v34 }
 0x326   : > { %v11956_v46 = vpop.f32.mrf.mxu0 }
 0x327   : > { %13319 = vmatprep.mubr.msk.bf16.mxu1 %vm1479_vm1, %v2259_v56  ;;  %v11957_v60 = vadd.f32 %v11956_v46, %v11955_v50 }
 0x328   : > { %v11958_v53 = vpop.f32.mrf.mxu0 }
 0x32a   : > { %v11959_v58 = vpop.f32.mrf.mxu0 }
 0x32b   : > { %v11960_v55 = vadd.f32 %v11959_v58, %v11958_v53 }
 0x32c   : > { %v11961_v5 = vpop.f32.mrf.mxu0 }
 0x32d   : > { %v2260_v0 = vpack.c.bf16 %v11960_v55, %v11957_v60 }
 0x32e   : > { %v11962_v10 = vpop.f32.mrf.mxu0 }
 0x32f   : > { %13320 = vmatmul.mubr.msk.bf16.vlgmr.msra.gmra.mxu1 %vm1479_vm1, %v2260_v0  ;;  %v11963_v22 = vadd.f32 %v11962_v10, %v11961_v5 }
 0x330   : > { %v11964_v4 = vpop.f32.mrf.mxu0  ;;  %12063 = vmatpush3.bf16.msra.mxu1 %v15738_v7 }
 0x331   : > { %12064 = vmatprep.subr.bf16.mxu1 %v15740_v8 }
 0x332   : > { %v11965_v36 = vpop.f32.mrf.mxu0 }
 0x333   : > { %v11966_v34 = vadd.f32 %v11965_v36, %v11964_v4 }
 0x334   : > { %v11967_v52 = vpop.f32.mrf.mxu0  ;;  %12065 = vmatpush3.bf16.msra.mxu1 %v15750_v13 }
 0x335   : > { %v2261_v56 = vpack.c.bf16 %v11966_v34, %v11963_v22  ;;  %12066 = vmatprep.subr.bf16.mxu1 %v15754_v14 }
 0x336   : > { %v11968_v50 = vpop.f32.mrf.mxu0 }
 0x337   : > { %13323 = vmatprep.mubr.msk.bf16.mxu1 %vm1479_vm1, %v2261_v56  ;;  %v11969_v31 = vadd.f32 %v11968_v50, %v11967_v52 }
 0x338   : > { %v11970_v55 = vpop.f32.mrf.mxu0  ;;  %12067 = vmatpush3.bf16.msra.mxu1 %v15762_v19 }
 0x339   : > { %12068 = vmatprep.subr.bf16.mxu1 %v15766_v20 }
 0x33a   : > { %v11971_v29 = vpop.f32.mrf.mxu0 }
 0x33b   : > { %v11972_v46 = vadd.f32 %v11971_v29, %v11970_v55 }
 0x33c   : > { %v11973_v53 = vpop.f32.mrf.mxu0  ;;  %12069 = vmatpush3.bf16.msra.mxu1 %v15776_v28 }
 0x33d   : > { %v2262_v4 = vpack.c.bf16 %v11972_v46, %v11969_v31  ;;  %12070 = vmatprep.subr.bf16.mxu1 %v15781_v30 }
 0x33e   : > { %v11974_v5 = vpop.f32.mrf.mxu0 }
 0x33f   : > { %13324 = vmatmul.mubr.msk.bf16.gmra.mxu1 %vm1479_vm1, %v2262_v4  ;;  %v11975_v0 = vadd.f32 %v11974_v5, %v11973_v53 }
 0x340   : > { %v11976_v58 = vpop.f32.mrf.mxu0  ;;  %12071 = vmatpush3.bf16.msra.mxu1 %v15786_v33 }
 0x341   : > { %12072 = vmatprep.subr.bf16.mxu1 %v15791_v35 }
 0x342   : > { %v11977_v60 = vpop.f32.mrf.mxu0 }
 0x343   : > { %v11978_v10 = vadd.f32 %v11977_v60, %v11976_v58 }
 0x344   : > { %v11979_v36 = vpop.f32.mrf.mxu0  ;;  %12073 = vmatpush3.bf16.msra.mxu1 %v15798_v39 }
 0x345   : > { %v2263_v22 = vpack.c.bf16 %v11978_v10, %v11975_v0  ;;  %12074 = vmatprep.subr.bf16.mxu1 %v15804_v42 }
 0x346   : > { %v11980_v34 = vpop.f32.mrf.mxu0 }
 0x347   : > { %13327 = vmatprep.mubr.msk.bf16.mxu1 %vm1479_vm1, %v2263_v22  ;;  %v11981_v50 = vadd.f32 %v11980_v34, %v11979_v36 }
 0x348   : > { %v11982_v52 = vpop.f32.mrf.mxu0  ;;  %12075 = vmatpush3.bf16.msra.mxu1 %v15810_v45 }
 0x349   : > { %12076 = vmatprep.subr.bf16.mxu1 %v15815_v47 }
 0x34a   : > { %v11983_v56 = vpop.f32.mrf.mxu0 }
 0x34b   : > { %v11984_v55 = vadd.f32 %v11983_v56, %v11982_v52 }
 0x34c   : > { %v11985_v29 = vpop.f32.mrf.mxu0  ;;  %12077 = vmatpush3.bf16.msra.mxu1 %v15820_v49 }
 0x34d   : > { %v2264_v31 = vpack.c.bf16 %v11984_v55, %v11981_v50 }
 0x34e   : > { %v11986_v46 = vpop.f32.mrf.mxu0 }
 0x34f   : > { %13328 = vmatmul.mubr.msk.bf16.gmra.mxu1 %vm1479_vm1, %v2264_v31  ;;  %v11987_v5 = vadd.f32 %v11986_v46, %v11985_v29 }
 0x350   : > { %v11988_v53 = vpop.f32.mrf.mxu0 }
 0x352   : > { %v11989_v4 = vpop.f32.mrf.mxu0 }
 0x353   : > { %v11990_v58 = vadd.f32 %v11989_v4, %v11988_v53 }
 0x354   : > { %v11991_v60 = vpop.f32.mrf.mxu0 }
 0x355   : > { %v2265_v0 = vpack.c.bf16 %v11990_v58, %v11987_v5 }
 0x356   : > { %v11992_v10 = vpop.f32.mrf.mxu0 }
 0x357   : > { %13331 = vmatprep.mubr.msk.bf16.mxu1 %vm1479_vm1, %v2265_v0  ;;  %v11993_v36 = vadd.f32 %v11992_v10, %v11991_v60 }
 0x358   : > { %v11994_v22 = vpop.f32.mrf.mxu0 }
 0x35a   : > { %v11995_v9 = vpop.f32.mrf.mxu0 }
 0x35b   : > { %v11996_v34 = vadd.f32 %v11995_v9, %v11994_v22 }
 0x35c   : > { %v11997_v52 = vpop.f32.mrf.mxu0 }
 0x35d   : > { %v2266_v56 = vpack.c.bf16 %v11996_v34, %v11993_v36 }
 0x35e   : > { %v11998_v6 = vpop.f32.mrf.mxu0 }
 0x35f   : > { %13332 = vmatmul.mubr.msk.bf16.gmra.mxu1 %vm1479_vm1, %v2266_v56  ;;  %v11999_v31 = vadd.f32 %v11998_v6, %v11997_v52 }
 0x360   : > { %v12000_v50 = vpop.f32.mrf.mxu0 }
 0x362   : > { %v12001_v55 = vpop.f32.mrf.mxu0 }
 0x363   : > { %v12002_v43 = vadd.f32 %v12001_v55, %v12000_v50 }
 0x364   : > { %v12003_v29 = vpop.f32.mrf.mxu0 }
 0x365   : > { %v2267_v46 = vpack.c.bf16 %v12002_v43, %v11999_v31 }
 0x366   : > { %v12004_v53 = vpop.f32.mrf.mxu0 }
 0x367   : > { %13335 = vmatprep.mubr.msk.bf16.mxu1 %vm1479_vm1, %v2267_v46  ;;  %v12005_v58 = vadd.f32 %v12004_v53, %v12003_v29 }
 0x368   : > { %v12006_v4 = vpop.f32.mrf.mxu0 }
 0x36a   : > { %v12007_v5 = vpop.f32.mrf.mxu0 }
 0x36b   : > { %v12008_v0 = vadd.f32 %v12007_v5, %v12006_v4 }
 0x36c   : > { %v12009_v60 = vpop.f32.mrf.mxu0 }
 0x36d   : > { %v2268_v9 = vpack.c.bf16 %v12008_v0, %v12005_v58 }
 0x36e   : > { %v12010_v10 = vpop.f32.mrf.mxu0 }
 0x36f   : > { %13336 = vmatmul.mubr.msk.bf16.gmra.mxu1 %vm1479_vm1, %v2268_v9  ;;  %v12011_v34 = vadd.f32 %v12010_v10, %v12009_v60 }
 0x370   : > { %v12012_v22 = vpop.f32.mrf.mxu0 }
 0x372   : > { %v12013_v36 = vpop.f32.mrf.mxu0 }
 0x373   : > { %v12014_v56 = vadd.f32 %v12013_v36, %v12012_v22 }
 0x374   : > { %v12015_v6 = vpop.f32.mrf.mxu0 }
 0x375   : > { %v2269_v52 = vpack.c.bf16 %v12014_v56, %v12011_v34 }
 0x376   : > { %v12016_v50 = vpop.f32.mrf.mxu0 }
 0x377   : > { %13339 = vmatprep.mubr.msk.bf16.mxu1 %vm1479_vm1, %v2269_v52  ;;  %v12017_v31 = vadd.f32 %v12016_v50, %v12015_v6 }
 0x378   : > { %v12018_v43 = vpop.f32.mrf.mxu0 }
 0x37a   : > { %v12019_v55 = vpop.f32.mrf.mxu0 }
 0x37b   : > { %v12020_v46 = vadd.f32 %v12019_v55, %v12018_v43 }
 0x37c   : > { %v12021_v29 = vpop.f32.mrf.mxu0 }
 0x37d   : > { %v2270_v53 = vpack.c.bf16 %v12020_v46, %v12017_v31 }
 0x37e   : > { %v12022_v4 = vpop.f32.mrf.mxu0 }
 0x37f   : > { %13340 = vmatmul.mubr.msk.bf16.gmra.mxu1 %vm1479_vm1, %v2270_v53  ;;  %v12023_v0 = vadd.f32 %v12022_v4, %v12021_v29 }
 0x380   : > { %v12024_v5 = vpop.f32.mrf.mxu0 }
 0x382   : > { %v12025_v58 = vpop.f32.mrf.mxu0 }
 0x383   : > { %v12026_v9 = vadd.f32 %v12025_v58, %v12024_v5 }
 0x384   : > { %v12027_v60 = vpop.f32.mrf.mxu0 }
 0x385   : > { %v2271_v10 = vpack.c.bf16 %v12026_v9, %v12023_v0 }
 0x386   : > { %v12028_v22 = vpop.f32.mrf.mxu0 }
 0x387   : > { %13343 = vmatprep.mubr.msk.bf16.mxu1 %vm1479_vm1, %v2271_v10  ;;  %v12029_v56 = vadd.f32 %v12028_v22, %v12027_v60  ;;  %v14464_v60 = vld [vmem:[#allocation2 + $0x304] ss:$8 sps:$4 sm:$0xff]  }
 0x388   : > { %v12030_v36 = vpop.f32.mrf.mxu0 }
 0x38a   : > { %v12031_v34 = vpop.f32.mrf.mxu0 }
 0x38b   : > { %v12032_v52 = vadd.f32 %v12031_v34, %v12030_v36  ;;  %v14462_v36 = vld [vmem:[#allocation2 + $0x300] ss:$8 sps:$4 sm:$0xff]   ;;  %v14467_v34 = vld [vmem:[#allocation2 + $0x314] ss:$8 sps:$4 sm:$0xff]  }
 0x38c   : > { %v12033_v6 = vpop.f32.mrf.mxu0 }
 0x38d   : > { %v2272_v50 = vpack.c.bf16 %v12032_v52, %v12029_v56  ;;  %v14465_v56 = vld [vmem:[#allocation2 + $0x310] ss:$8 sps:$4 sm:$0xff]   ;;  %v14470_v52 = vld [vmem:[#allocation2 + $0x324] ss:$8 sps:$4 sm:$0xff]  }
 0x38e   : > { %v12034_v43 = vpop.f32.mrf.mxu0 }
 0x38f   : > { %13344 = vmatmul.mubr.msk.bf16.gmra.mxu1 %vm1479_vm1, %v2272_v50  ;;  %v12035_v46 = vadd.f32 %v12034_v43, %v12033_v6  ;;  %v14468_v6 = vld [vmem:[#allocation2 + $0x320] ss:$8 sps:$4 sm:$0xff]   ;;  %v14473_v50 = vld [vmem:[#allocation2 + $0x334] ss:$8 sps:$4 sm:$0xff]   ;;  %v14471_v43 = vld [vmem:[#allocation2 + $0x330] ss:$8 sps:$4 sm:$0xff]  }
 0x390   : > { %v12036_v55 = vpop.f32.mrf.mxu0 }
 0x392   : > { %v12037_v31 = vpop.f32.mrf.mxu0 }
 0x393   : > { %v12038_v53 = vadd.f32 %v12037_v31, %v12036_v55  ;;  %v14476_v55 = vld [vmem:[#allocation2 + $0x344] ss:$8 sps:$4 sm:$0xff]   ;;  %v14474_v31 = vld [vmem:[#allocation2 + $0x340] ss:$8 sps:$4 sm:$0xff]  }
 0x394   : > { %v12039_v29 = vpop.f32.mrf.mxu0 }
 0x395   : > { %v2273_v4 = vpack.c.bf16 %v12038_v53, %v12035_v46  ;;  %v14479_v46 = vld [vmem:[#allocation2 + $0x354] ss:$8 sps:$4 sm:$0xff]   ;;  %v14477_v53 = vld [vmem:[#allocation2 + $0x350] ss:$8 sps:$4 sm:$0xff]  }
 0x396   : > { %v12040_v5 = vpop.f32.mrf.mxu0 }
 0x397   : > { %13347 = vmatprep.mubr.msk.bf16.mxu1 %vm1479_vm1, %v2273_v4  ;;  %v12041_v9 = vadd.f32 %v12040_v5, %v12039_v29  ;;  %v14482_v29 = vld [vmem:[#allocation2 + $0x364] ss:$8 sps:$4 sm:$0xff]   ;;  %v14480_v5 = vld [vmem:[#allocation2 + $0x360] ss:$8 sps:$4 sm:$0xff]  }
 0x398   : > { %v12042_v58 = vpop.f32.mrf.mxu0  ;;  %v2892_v4 = vld [vmem:[#allocation5 + $0x6] sm:$0x3] }
 0x399   : > { %14124 = vmatprep.subr.msk.bf16.mxu0 %vm1528_vm0, %v2892_v4 }
 0x39a   : > { %v12043_v0 = vpop.f32.mrf.mxu0 }
 0x39b   : > { %v12044_v10 = vadd.f32 %v12043_v0, %v12042_v58  ;;  %v14485_v58 = vld [vmem:[#allocation2 + $0x374] ss:$8 sps:$4 sm:$0xff]   ;;  %v2942_v0 = vsel %vm1528_vm0, %v2892_v4, 0  ;;  %v14500_v4 = vld [vmem:[#allocation2 + $0x3c4] ss:$8 sps:$4 sm:$0xff]  }
 0x39c   : > { %13352 = vmatpush3.bf16.msra.mxu0 %v2942_v0 }
 0x39d   : > { %v2274_v22 = vpack.c.bf16 %v12044_v10, %v12041_v9  ;;  %12191 = vmatprep.subr.bf16.mxu0 %v15733_v3  ;;  %v14483_v9 = vld [vmem:[#allocation2 + $0x370] ss:$8 sps:$4 sm:$0xff]   ;;  %v14488_v10 = vld [vmem:[#allocation2 + $0x384] ss:$8 sps:$4 sm:$0xff]  }
 0x39f   : > { %13348 = vmatmul.mubr.msk.bf16.gmra.mxu1 %vm1479_vm1, %v2274_v22  ;;  %v14491_v22 = vld [vmem:[#allocation2 + $0x394] ss:$8 sps:$4 sm:$0xff]  }
 0x3a0   : > { %2746 = vmatprep.mubr.bf16.mxu1 %v14464_v60  ;;  %v14486_v60 = vld [vmem:[#allocation2 + $0x380] ss:$8 sps:$4 sm:$0xff]  }
 0x3a7   : > { %2747 = vmatmul.mubr.bf16.vlgmr.msra.gmra.mxu1 %v14462_v36  ;;  %v14489_v36 = vld [vmem:[#allocation2 + $0x390] ss:$8 sps:$4 sm:$0xff]  }
 0x3a8   : > { %2754 = vmatprep.mubr.bf16.mxu1 %v14467_v34  ;;  %v14494_v34 = vld [vmem:[#allocation2 + $0x3a4] ss:$8 sps:$4 sm:$0xff]  }
 0x3af   : > { %2755 = vmatmul.mubr.bf16.gmra.mxu1 %v14465_v56  ;;  %v15993_v56 = vpop.f32.mrf.mxu1 }
 0x3b0   : > { %2762 = vmatprep.mubr.bf16.mxu1 %v14470_v52  ;;  %17509 = vst [vmem:[#allocation53_spill] sm:$0xff] %v15993_v56 }
 0x3b7   : > { %2763 = vmatmul.mubr.bf16.gmra.mxu1 %v14468_v6 }
 0x3b8   : > { %2770 = vmatprep.mubr.bf16.mxu1 %v14473_v50 }
 0x3bf   : > { %2771 = vmatmul.mubr.bf16.gmra.mxu1 %v14471_v43 }
 0x3c0   : > { %2778 = vmatprep.mubr.bf16.mxu1 %v14476_v55 }
 0x3c7   : > { %2779 = vmatmul.mubr.bf16.gmra.mxu1 %v14474_v31  ;;  %v14492_v31 = vld [vmem:[#allocation2 + $0x3a0] ss:$8 sps:$4 sm:$0xff]  }
 0x3c8   : > { %2786 = vmatprep.mubr.bf16.mxu1 %v14479_v46 }
 0x3cf   : > { %2787 = vmatmul.mubr.bf16.gmra.mxu1 %v14477_v53  ;;  %v14497_v53 = vld [vmem:[#allocation2 + $0x3b4] ss:$8 sps:$4 sm:$0xff]  }
 0x3d0   : > { %2794 = vmatprep.mubr.bf16.mxu1 %v14482_v29  ;;  %v14495_v29 = vld [vmem:[#allocation2 + $0x3b0] ss:$8 sps:$4 sm:$0xff]  }
 0x3d7   : > { %2795 = vmatmul.mubr.bf16.gmra.mxu1 %v14480_v5 }
 0x3d8   : > { %2802 = vmatprep.mubr.bf16.mxu1 %v14485_v58 }
 0x3df   : > { %2803 = vmatmul.mubr.bf16.gmra.mxu1 %v14483_v9 }
 0x3e0   : > { %2810 = vmatprep.mubr.bf16.mxu1 %v14488_v10 }
 0x3e7   : > { %2811 = vmatmul.mubr.bf16.gmra.mxu1 %v14486_v60  ;;  %v14503_v60 = vld [vmem:[#allocation2 + $0x3d4] ss:$8 sps:$4 sm:$0xff]  }
 0x3e8   : > { %2818 = vmatprep.mubr.bf16.mxu1 %v14491_v22  ;;  %v14501_v22 = vld [vmem:[#allocation2 + $0x3d0] ss:$8 sps:$4 sm:$0xff]  }
 0x3ef   : > { %v13321_v52 = vpop.f32.mrf.mxu1  ;;  %2819 = vmatmul.mubr.bf16.gmra.mxu1 %v14489_v36  ;;  %v14506_v36 = vld [vmem:[#allocation2 + $0x3e4] ss:$8 sps:$4 sm:$0xff]  }
 0x3f0   : > { %v15996_v6 = vadd.f32 %v13321_v52, %v15878_v16  ;;  %2826 = vmatprep.mubr.bf16.mxu1 %v14494_v34 }
 0x3f1   : > { %v2362_v50 = vpop.f32.mrf.mxu1 }
 0x3f2   : > { %v15999_v43 = vadd.f32 %v2362_v50, %v15880_v21 }
 0x3f3   : > { %v13322_v55 = vpop.f32.mrf.mxu1 }
 0x3f4   : > { %v16002_v46 = vadd.f32 %v13322_v55, %v15882_v25  ;;  %v14498_v25 = vld [vmem:[#allocation2 + $0x3c0] ss:$8 sps:$4 sm:$0xff]  }
 0x3f5   : > { %v16004_v5 = vpop.f32.mrf.mxu1 }
 0x3f6   : > { %17510 = vst [vmem:[#allocation54_spill] sm:$0xff] %v16004_v5 }
 0x3f7   : > { %2827 = vmatmul.mubr.bf16.gmra.mxu1 %v14492_v31 }
 0x3f8   : > { %2834 = vmatprep.mubr.bf16.mxu1 %v14497_v53  ;;  %v14509_v53 = vld [vmem:[#allocation2 + $0x3f4] ss:$8 sps:$4 sm:$0xff]  }
 0x3ff   : > { %v13325_v58 = vpop.f32.mrf.mxu1  ;;  %2835 = vmatmul.mubr.bf16.gmra.mxu1 %v14495_v29  ;;  %v14507_v29 = vld [vmem:[#allocation2 + $0x3f0] ss:$8 sps:$4 sm:$0xff]  }
 0x400   : > { %v16007_v16 = vadd.f32 %v13325_v58, %v15891_v40  ;;  %2842 = vmatprep.mubr.bf16.mxu1 %v14500_v4 }
 0x401   : > { %v2378_v21 = vpop.f32.mrf.mxu1 }
 0x402   : > { %v16010_v0 = vadd.f32 %v2378_v21, %v15893_v44 }
 0x403   : > { %v13326_v9 = vpop.f32.mrf.mxu1 }
 0x404   : > { %v16013_v10 = vadd.f32 %v13326_v9, %v15895_v51  ;;  %v14504_v51 = vld [vmem:[#allocation2 + $0x3e0] ss:$8 sps:$4 sm:$0xff]  }
 0x405   : > { %v16015_v34 = vpop.f32.mrf.mxu1 }
 0x406   : > { %17511 = vst [vmem:[#allocation55_spill] sm:$0xff] %v16015_v34 }
 0x407   : > { %2843 = vmatmul.mubr.bf16.gmra.mxu1 %v14498_v25 }
 0x408   : > { %2850 = vmatprep.mubr.bf16.mxu1 %v14503_v60 }
 0x40f   : > { %v13329_v52 = vpop.f32.mrf.mxu1  ;;  %2851 = vmatmul.mubr.bf16.gmra.mxu1 %v14501_v22 }
 0x410   : > { %v16018_v40 = vadd.f32 %v13329_v52, %v15901_v59  ;;  %2858 = vmatprep.mubr.bf16.mxu1 %v14506_v36 }
 0x411   : > { %v2394_v44 = vpop.f32.mrf.mxu1 }
 0x412   : > { %v16021_v50 = vadd.f32 %v2394_v44, %v15903_v62 }
 0x413   : > { %v13330_v55 = vpop.f32.mrf.mxu1 }
 0x414   : > { %v16024_v31 = vadd.f32 %v13330_v55, %v15905_v2 }
 0x415   : > { %v16026_v4 = vpop.f32.mrf.mxu1 }
 0x416   : > { %17512 = vst [vmem:[#allocation56_spill] sm:$0xff] %v16026_v4 }
 0x417   : > { %2859 = vmatmul.mubr.bf16.gmra.mxu1 %v14504_v51 }
 0x418   : > { %2866 = vmatprep.mubr.bf16.mxu1 %v14509_v53 }
 0x41f   : > { %v13333_v58 = vpop.f32.mrf.mxu1  ;;  %2867 = vmatmul.mubr.bf16.gmra.mxu1 %v14507_v29 }
 0x420   : > { %v16029_v59 = vadd.f32 %v13333_v58, %v15911_v12 }
 0x421   : > { %v2410_v21 = vpop.f32.mrf.mxu1 }
 0x422   : > { %v16032_v62 = vadd.f32 %v2410_v21, %v15913_v18 }
 0x423   : > { %v13334_v9 = vpop.f32.mrf.mxu1 }
 0x424   : > { %v16035_v25 = vadd.f32 %v13334_v9, %v15915_v24 }
 0x425   : > { %v16037_v2 = vpop.f32.mrf.mxu1 }
 0x42f   : > { %v13337_v60 = vpop.f32.mrf.mxu1 }
 0x430   : > { %v16040_v22 = vadd.f32 %v13337_v60, %v15921_v32 }
 0x431   : > { %v2426_v36 = vpop.f32.mrf.mxu1 }
 0x432   : > { %v16043_v52 = vadd.f32 %v2426_v36, %v15923_v41 }
 0x433   : > { %v13338_v12 = vpop.f32.mrf.mxu1 }
 0x434   : > { %v16046_v44 = vadd.f32 %v13338_v12, %v15925_v48 }
 0x435   : > { %v16048_v18 = vpop.f32.mrf.mxu1 }
 0x436   : > { %17513 = vst [vmem:[#allocation57_spill] sm:$0xff] %v16048_v18 }
 0x43f   : > { %v13341_v55 = vpop.f32.mrf.mxu1 }
 0x440   : > { %v16051_v24 = vadd.f32 %v13341_v55, %v15931_v57 }
 0x441   : > { %v2442_v51 = vpop.f32.mrf.mxu1 }
 0x442   : > { %v16054_v53 = vadd.f32 %v2442_v51, %v15933_v61 }
 0x443   : > { %v13342_v32 = vpop.f32.mrf.mxu1 }
 0x444   : > { %v16057_v29 = vadd.f32 %v13342_v32, %v15935_v1 }
 0x445   : > { %v16059_v41 = vpop.f32.mrf.mxu1 }
 0x446   : > { %17514 = vst [vmem:[#allocation58_spill] sm:$0xff] %v16059_v41 }
 0x44f   : > { %v13345_v58 = vpop.f32.mrf.mxu1 }
 0x450   : > { %v16062_v48 = vadd.f32 %v13345_v58, %v15941_v15 }
 0x451   : > { %v2458_v21 = vpop.f32.mrf.mxu1 }
 0x452   : > { %v16065_v9 = vadd.f32 %v2458_v21, %v15943_v23 }
 0x453   : > { %v13346_v57 = vpop.f32.mrf.mxu1 }
 0x454   : > { %v16068_v60 = vadd.f32 %v13346_v57, %v15945_v37 }
 0x455   : > { %v16070_v61 = vpop.f32.mrf.mxu1 }
 0x456   : > { %17515 = vst [vmem:[#allocation59_spill] sm:$0xff] %v16070_v61 }
 0x45f   : > { %v13349_v36 = vpop.f32.mrf.mxu1 }
 0x460   : > { %v16073_v1 = vadd.f32 %v13349_v36, %v15951_v54 }
 0x461   : > { %v2474_v12 = vpop.f32.mrf.mxu1 }
 0x462   : > { %v16076_v55 = vadd.f32 %v2474_v12, %v15953_v63 }
 0x463   : > { %v13350_v15 = vpop.f32.mrf.mxu1 }
 0x464   : > { %v16079_v51 = vadd.f32 %v13350_v15, %v15955_v11 }
 0x465   : > { %v16081_v23 = vpop.f32.mrf.mxu1 }
 0x466   : > { %17516 = vst [vmem:[#allocation60_spill] sm:$0xff] %v16081_v23 }
 0x467   : > { %v12078_v32 = vpop.f32.mrf.mxu1 }
 0x469   : > { %v12079_v58 = vpop.f32.mrf.mxu1 }
 0x46a   : > { %v12080_v57 = vadd.f32 %v12079_v58, %v12078_v32 }
 0x46b   : > { %v12081_v37 = vpop.f32.mrf.mxu1 }
 0x46d   : > { %v12082_v21 = vpop.f32.mrf.mxu1 }
 0x46e   : > { %v12083_v5 = vadd.f32 %v12082_v21, %v12081_v37 }
 0x46f   : > { %v12084_v18 = vpop.f32.mrf.mxu1 }
 0x470   : > { %v2875_v34 = vpack.c.bf16 %v12083_v5, %v12080_v57 }
 0x471   : > { %v12085_v54 = vpop.f32.mrf.mxu1 }
 0x472   : > { %13353 = vmatprep.mubr.msk.bf16.mxu0 %vm1479_vm1, %v2875_v34  ;;  %v12086_v12 = vadd.f32 %v12085_v54, %v12084_v18 }
 0x473   : > { %v12087_v36 = vpop.f32.mrf.mxu1 }
 0x475   : > { %v12088_v63 = vpop.f32.mrf.mxu1 }
 0x476   : > { %v12089_v41 = vadd.f32 %v12088_v63, %v12087_v36 }
 0x477   : > { %v12090_v4 = vpop.f32.mrf.mxu1 }
 0x478   : > { %v2876_v11 = vpack.c.bf16 %v12089_v41, %v12086_v12 }
 0x479   : > { %v12091_v15 = vpop.f32.mrf.mxu1 }
 0x47a   : > { %13354 = vmatmul.mubr.msk.bf16.vlgmr.msra.gmra.mxu0 %vm1479_vm1, %v2876_v11  ;;  %v12092_v58 = vadd.f32 %v12091_v15, %v12090_v4 }
 0x47b   : > { %v12093_v61 = vpop.f32.mrf.mxu1  ;;  %12192 = vmatpush3.bf16.msra.mxu0 %v15738_v7 }
 0x47c   : > { %12193 = vmatprep.subr.bf16.mxu0 %v15740_v8 }
 0x47d   : > { %v12094_v32 = vpop.f32.mrf.mxu1 }
 0x47e   : > { %v12095_v5 = vadd.f32 %v12094_v32, %v12093_v61 }
 0x47f   : > { %v12096_v37 = vpop.f32.mrf.mxu1  ;;  %12194 = vmatpush3.bf16.msra.mxu0 %v15750_v13 }
 0x480   : > { %v2877_v34 = vpack.c.bf16 %v12095_v5, %v12092_v58  ;;  %12195 = vmatprep.subr.bf16.mxu0 %v15754_v14 }
 0x481   : > { %v12097_v18 = vpop.f32.mrf.mxu1 }
 0x482   : > { %13357 = vmatprep.mubr.msk.bf16.mxu0 %vm1479_vm1, %v2877_v34  ;;  %v12098_v57 = vadd.f32 %v12097_v18, %v12096_v37 }
 0x483   : > { %v12099_v41 = vpop.f32.mrf.mxu1  ;;  %12196 = vmatpush3.bf16.msra.mxu0 %v15762_v19 }
 0x484   : > { %12197 = vmatprep.subr.bf16.mxu0 %v15766_v20 }
 0x485   : > { %v12100_v21 = vpop.f32.mrf.mxu1 }
 0x486   : > { %v12101_v54 = vadd.f32 %v12100_v21, %v12099_v41 }
 0x487   : > { %v12102_v36 = vpop.f32.mrf.mxu1  ;;  %12198 = vmatpush3.bf16.msra.mxu0 %v15776_v28 }
 0x488   : > { %v2878_v4 = vpack.c.bf16 %v12101_v54, %v12098_v57  ;;  %12199 = vmatprep.subr.bf16.mxu0 %v15781_v30 }
 0x489   : > { %v12103_v61 = vpop.f32.mrf.mxu1 }
 0x48a   : > { %13358 = vmatmul.mubr.msk.bf16.gmra.mxu0 %vm1479_vm1, %v2878_v4  ;;  %v12104_v11 = vadd.f32 %v12103_v61, %v12102_v36 }
 0x48b   : > { %v12105_v63 = vpop.f32.mrf.mxu1  ;;  %12200 = vmatpush3.bf16.msra.mxu0 %v15786_v33 }
 0x48c   : > { %12201 = vmatprep.subr.bf16.mxu0 %v15791_v35 }
 0x48d   : > { %v12106_v12 = vpop.f32.mrf.mxu1 }
 0x48e   : > { %v12107_v15 = vadd.f32 %v12106_v12, %v12105_v63 }
 0x48f   : > { %v12108_v32 = vpop.f32.mrf.mxu1  ;;  %12202 = vmatpush3.bf16.msra.mxu0 %v15798_v39 }
 0x490   : > { %v2879_v58 = vpack.c.bf16 %v12107_v15, %v12104_v11  ;;  %12203 = vmatprep.subr.bf16.mxu0 %v15804_v42 }
 0x491   : > { %v12109_v5 = vpop.f32.mrf.mxu1 }
 0x492   : > { %13361 = vmatprep.mubr.msk.bf16.mxu0 %vm1479_vm1, %v2879_v58  ;;  %v12110_v18 = vadd.f32 %v12109_v5, %v12108_v32 }
 0x493   : > { %v12111_v37 = vpop.f32.mrf.mxu1  ;;  %12204 = vmatpush3.bf16.msra.mxu0 %v15810_v45 }
 0x494   : > { %12205 = vmatprep.subr.bf16.mxu0 %v15815_v47 }
 0x495   : > { %v12112_v34 = vpop.f32.mrf.mxu1 }
 0x496   : > { %v12113_v41 = vadd.f32 %v12112_v34, %v12111_v37 }
 0x497   : > { %v12114_v21 = vpop.f32.mrf.mxu1  ;;  %12206 = vmatpush3.bf16.msra.mxu0 %v15820_v49 }
 0x498   : > { %v2880_v57 = vpack.c.bf16 %v12113_v41, %v12110_v18 }
 0x499   : > { %v12115_v54 = vpop.f32.mrf.mxu1 }
 0x49a   : > { %13362 = vmatmul.mubr.msk.bf16.gmra.mxu0 %vm1479_vm1, %v2880_v57  ;;  %v12116_v61 = vadd.f32 %v12115_v54, %v12114_v21 }
 0x49b   : > { %v12117_v36 = vpop.f32.mrf.mxu1 }
 0x49d   : > { %v12118_v4 = vpop.f32.mrf.mxu1 }
 0x49e   : > { %v12119_v63 = vadd.f32 %v12118_v4, %v12117_v36 }
 0x49f   : > { %v12120_v12 = vpop.f32.mrf.mxu1 }
 0x4a0   : > { %v2881_v11 = vpack.c.bf16 %v12119_v63, %v12116_v61 }
 0x4a1   : > { %v12121_v15 = vpop.f32.mrf.mxu1 }
 0x4a2   : > { %13365 = vmatprep.mubr.msk.bf16.mxu0 %vm1479_vm1, %v2881_v11  ;;  %v12122_v32 = vadd.f32 %v12121_v15, %v12120_v12 }
 0x4a3   : > { %v12123_v58 = vpop.f32.mrf.mxu1 }
 0x4a5   : > { %v12124_v23 = vpop.f32.mrf.mxu1 }
 0x4a6   : > { %v12125_v5 = vadd.f32 %v12124_v23, %v12123_v58 }
 0x4a7   : > { %v12126_v37 = vpop.f32.mrf.mxu1 }
 0x4a8   : > { %v2882_v34 = vpack.c.bf16 %v12125_v5, %v12122_v32 }
 0x4a9   : > { %v12127_v38 = vpop.f32.mrf.mxu1 }
 0x4aa   : > { %13366 = vmatmul.mubr.msk.bf16.gmra.mxu0 %vm1479_vm1, %v2882_v34  ;;  %v12128_v57 = vadd.f32 %v12127_v38, %v12126_v37 }
 0x4ab   : > { %v12129_v18 = vpop.f32.mrf.mxu1 }
 0x4ad   : > { %v12130_v41 = vpop.f32.mrf.mxu1 }
 0x4ae   : > { %v12131_v56 = vadd.f32 %v12130_v41, %v12129_v18 }
 0x4af   : > { %v12132_v21 = vpop.f32.mrf.mxu1 }
 0x4b0   : > { %v2883_v54 = vpack.c.bf16 %v12131_v56, %v12128_v57 }
 0x4b1   : > { %v12133_v36 = vpop.f32.mrf.mxu1 }
 0x4b2   : > { %13369 = vmatprep.mubr.msk.bf16.mxu0 %vm1479_vm1, %v2883_v54  ;;  %v12134_v63 = vadd.f32 %v12133_v36, %v12132_v21 }
 0x4b3   : > { %v12135_v4 = vpop.f32.mrf.mxu1 }
 0x4b5   : > { %v12136_v61 = vpop.f32.mrf.mxu1 }
 0x4b6   : > { %v12137_v11 = vadd.f32 %v12136_v61, %v12135_v4 }
 0x4b7   : > { %v12138_v12 = vpop.f32.mrf.mxu1 }
 0x4b8   : > { %v2884_v23 = vpack.c.bf16 %v12137_v11, %v12134_v63 }
 0x4b9   : > { %v12139_v15 = vpop.f32.mrf.mxu1 }
 0x4ba   : > { %13370 = vmatmul.mubr.msk.bf16.gmra.mxu0 %vm1479_vm1, %v2884_v23  ;;  %v12140_v5 = vadd.f32 %v12139_v15, %v12138_v12 }
 0x4bb   : > { %v12141_v58 = vpop.f32.mrf.mxu1 }
 0x4bd   : > { %v12142_v32 = vpop.f32.mrf.mxu1 }
 0x4be   : > { %v12143_v34 = vadd.f32 %v12142_v32, %v12141_v58 }
 0x4bf   : > { %v12144_v38 = vpop.f32.mrf.mxu1 }
 0x4c0   : > { %v2885_v37 = vpack.c.bf16 %v12143_v34, %v12140_v5 }
 0x4c1   : > { %v12145_v18 = vpop.f32.mrf.mxu1 }
 0x4c2   : > { %13373 = vmatprep.mubr.msk.bf16.mxu0 %vm1479_vm1, %v2885_v37  ;;  %v12146_v57 = vadd.f32 %v12145_v18, %v12144_v38 }
 0x4c3   : > { %v12147_v56 = vpop.f32.mrf.mxu1 }
 0x4c5   : > { %v12148_v41 = vpop.f32.mrf.mxu1 }
 0x4c6   : > { %v12149_v54 = vadd.f32 %v12148_v41, %v12147_v56 }
 0x4c7   : > { %v12150_v21 = vpop.f32.mrf.mxu1 }
 0x4c8   : > { %v2886_v36 = vpack.c.bf16 %v12149_v54, %v12146_v57 }
 0x4c9   : > { %v12151_v4 = vpop.f32.mrf.mxu1 }
 0x4ca   : > { %13374 = vmatmul.mubr.msk.bf16.gmra.mxu0 %vm1479_vm1, %v2886_v36  ;;  %v12152_v11 = vadd.f32 %v12151_v4, %v12150_v21 }
 0x4cb   : > { %v12153_v61 = vpop.f32.mrf.mxu1 }
 0x4cd   : > { %v12154_v63 = vpop.f32.mrf.mxu1 }
 0x4ce   : > { %v12155_v23 = vadd.f32 %v12154_v63, %v12153_v61 }
 0x4cf   : > { %v12156_v12 = vpop.f32.mrf.mxu1 }
 0x4d0   : > { %v2887_v15 = vpack.c.bf16 %v12155_v23, %v12152_v11 }
 0x4d1   : > { %v12157_v58 = vpop.f32.mrf.mxu1 }
 0x4d2   : > { %13377 = vmatprep.mubr.msk.bf16.mxu0 %vm1479_vm1, %v2887_v15  ;;  %v12158_v34 = vadd.f32 %v12157_v58, %v12156_v12  ;;  %v14512_v12 = vld [vmem:[#allocation2 + $0x404] ss:$8 sps:$4 sm:$0xff]  }
 0x4d3   : > { %v12159_v32 = vpop.f32.mrf.mxu1 }
 0x4d5   : > { %v12160_v5 = vpop.f32.mrf.mxu1 }
 0x4d6   : > { %v12161_v37 = vadd.f32 %v12160_v5, %v12159_v32  ;;  %v14510_v32 = vld [vmem:[#allocation2 + $0x400] ss:$8 sps:$4 sm:$0xff]   ;;  %v14515_v5 = vld [vmem:[#allocation2 + $0x414] ss:$8 sps:$4 sm:$0xff]  }
 0x4d7   : > { %v12162_v38 = vpop.f32.mrf.mxu1 }
 0x4d8   : > { %v2888_v18 = vpack.c.bf16 %v12161_v37, %v12158_v34  ;;  %v14513_v34 = vld [vmem:[#allocation2 + $0x410] ss:$8 sps:$4 sm:$0xff]   ;;  %v14518_v37 = vld [vmem:[#allocation2 + $0x424] ss:$8 sps:$4 sm:$0xff]  }
 0x4d9   : > { %v12163_v56 = vpop.f32.mrf.mxu1 }
 0x4da   : > { %13378 = vmatmul.mubr.msk.bf16.gmra.mxu0 %vm1479_vm1, %v2888_v18  ;;  %v12164_v54 = vadd.f32 %v12163_v56, %v12162_v38  ;;  %v14516_v38 = vld [vmem:[#allocation2 + $0x420] ss:$8 sps:$4 sm:$0xff]   ;;  %v14521_v18 = vld [vmem:[#allocation2 + $0x434] ss:$8 sps:$4 sm:$0xff]   ;;  %v14519_v56 = vld [vmem:[#allocation2 + $0x430] ss:$8 sps:$4 sm:$0xff]  }
 0x4db   : > { %v12165_v41 = vpop.f32.mrf.mxu1 }
 0x4dd   : > { %v12166_v57 = vpop.f32.mrf.mxu1 }
 0x4de   : > { %v12167_v36 = vadd.f32 %v12166_v57, %v12165_v41  ;;  %v14524_v41 = vld [vmem:[#allocation2 + $0x444] ss:$8 sps:$4 sm:$0xff]   ;;  %v14522_v57 = vld [vmem:[#allocation2 + $0x440] ss:$8 sps:$4 sm:$0xff]  }
 0x4df   : > { %v12168_v21 = vpop.f32.mrf.mxu1 }
 0x4e0   : > { %v2889_v4 = vpack.c.bf16 %v12167_v36, %v12164_v54  ;;  %v14527_v54 = vld [vmem:[#allocation2 + $0x454] ss:$8 sps:$4 sm:$0xff]   ;;  %v14525_v36 = vld [vmem:[#allocation2 + $0x450] ss:$8 sps:$4 sm:$0xff]  }
 0x4e1   : > { %v12169_v61 = vpop.f32.mrf.mxu1 }
 0x4e2   : > { %13381 = vmatprep.mubr.msk.bf16.mxu0 %vm1479_vm1, %v2889_v4  ;;  %v12170_v23 = vadd.f32 %v12169_v61, %v12168_v21  ;;  %v14530_v21 = vld [vmem:[#allocation2 + $0x464] ss:$8 sps:$4 sm:$0xff]   ;;  %v3508_v4 = vld [vmem:[#allocation5 + $0x8] sm:$0x3] }
 0x4e3   : > { %v12171_v63 = vpop.f32.mrf.mxu1  ;;  %v14528_v61 = vld [vmem:[#allocation2 + $0x460] ss:$8 sps:$4 sm:$0xff]   ;;  %14125 = vmatprep.subr.msk.bf16.mxu1 %vm1528_vm0, %v3508_v4 }
 0x4e5   : > { %v12172_v11 = vpop.f32.mrf.mxu1 }
 0x4e6   : > { %v12173_v15 = vadd.f32 %v12172_v11, %v12171_v63  ;;  %v14533_v63 = vld [vmem:[#allocation2 + $0x474] ss:$8 sps:$4 sm:$0xff]   ;;  %v3558_v11 = vsel %vm1528_vm0, %v3508_v4, 0 }
 0x4e7   : > { %13386 = vmatpush3.bf16.msra.mxu1 %v3558_v11 }
 0x4e8   : > { %v2890_v58 = vpack.c.bf16 %v12173_v15, %v12170_v23  ;;  %12320 = vmatprep.subr.bf16.mxu1 %v15733_v3  ;;  %v14531_v23 = vld [vmem:[#allocation2 + $0x470] ss:$8 sps:$4 sm:$0xff]   ;;  %v14536_v15 = vld [vmem:[#allocation2 + $0x484] ss:$8 sps:$4 sm:$0xff]  }
 0x4ea   : > { %13382 = vmatmul.mubr.msk.bf16.gmra.mxu0 %vm1479_vm1, %v2890_v58  ;;  %v14539_v58 = vld [vmem:[#allocation2 + $0x494] ss:$8 sps:$4 sm:$0xff]  }
 0x4eb   : > { %3362 = vmatprep.mubr.bf16.mxu0 %v14512_v12  ;;  %v14534_v12 = vld [vmem:[#allocation2 + $0x480] ss:$8 sps:$4 sm:$0xff]  }
 0x4f2   : > { %3363 = vmatmul.mubr.bf16.vlgmr.msra.gmra.mxu0 %v14510_v32  ;;  %v14537_v32 = vld [vmem:[#allocation2 + $0x490] ss:$8 sps:$4 sm:$0xff]  }
 0x4f3   : > { %3370 = vmatprep.mubr.bf16.mxu0 %v14515_v5  ;;  %v14542_v5 = vld [vmem:[#allocation2 + $0x4a4] ss:$8 sps:$4 sm:$0xff]  }
 0x4fa   : > { %3371 = vmatmul.mubr.bf16.gmra.mxu0 %v14513_v34 }
 0x4fb   : > { %3378 = vmatprep.mubr.bf16.mxu0 %v14518_v37 }
 0x502   : > { %3379 = vmatmul.mubr.bf16.gmra.mxu0 %v14516_v38 }
 0x503   : > { %3386 = vmatprep.mubr.bf16.mxu0 %v14521_v18 }
 0x50a   : > { %3387 = vmatmul.mubr.bf16.gmra.mxu0 %v14519_v56 }
 0x50b   : > { %3394 = vmatprep.mubr.bf16.mxu0 %v14524_v41  ;;  %v14540_v41 = vld [vmem:[#allocation2 + $0x4a0] ss:$8 sps:$4 sm:$0xff]  }
 0x512   : > { %3395 = vmatmul.mubr.bf16.gmra.mxu0 %v14522_v57 }
 0x513   : > { %3402 = vmatprep.mubr.bf16.mxu0 %v14527_v54  ;;  %v14545_v54 = vld [vmem:[#allocation2 + $0x4b4] ss:$8 sps:$4 sm:$0xff]  }
 0x51a   : > { %3403 = vmatmul.mubr.bf16.gmra.mxu0 %v14525_v36  ;;  %v14543_v36 = vld [vmem:[#allocation2 + $0x4b0] ss:$8 sps:$4 sm:$0xff]  }
 0x51b   : > { %3410 = vmatprep.mubr.bf16.mxu0 %v14530_v21  ;;  %v14548_v21 = vld [vmem:[#allocation2 + $0x4c4] ss:$8 sps:$4 sm:$0xff]  }
 0x522   : > { %3411 = vmatmul.mubr.bf16.gmra.mxu0 %v14528_v61 }
 0x523   : > { %3418 = vmatprep.mubr.bf16.mxu0 %v14533_v63 }
 0x52a   : > { %3419 = vmatmul.mubr.bf16.gmra.mxu0 %v14531_v23 }
 0x52b   : > { %3426 = vmatprep.mubr.bf16.mxu0 %v14536_v15  ;;  %v14551_v15 = vld [vmem:[#allocation2 + $0x4d4] ss:$8 sps:$4 sm:$0xff]  }
 0x532   : > { %3427 = vmatmul.mubr.bf16.gmra.mxu0 %v14534_v12  ;;  %v14549_v12 = vld [vmem:[#allocation2 + $0x4d0] ss:$8 sps:$4 sm:$0xff]  }
 0x533   : > { %3434 = vmatprep.mubr.bf16.mxu0 %v14539_v58  ;;  %v14554_v58 = vld [vmem:[#allocation2 + $0x4e4] ss:$8 sps:$4 sm:$0xff]  }
 0x53a   : > { %v13355_v34 = vpop.f32.mrf.mxu0  ;;  %3435 = vmatmul.mubr.bf16.gmra.mxu0 %v14537_v32 }
 0x53b   : > { %v16118_v37 = vadd.f32 %v13355_v34, %v15996_v6  ;;  %3442 = vmatprep.mubr.bf16.mxu0 %v14542_v5 }
 0x53c   : > { %v2978_v38 = vpop.f32.mrf.mxu0 }
 0x53d   : > { %v16121_v18 = vadd.f32 %v2978_v38, %v15999_v43 }
 0x53e   : > { %v13356_v56 = vpop.f32.mrf.mxu0 }
 0x53f   : > { %v16124_v57 = vadd.f32 %v13356_v56, %v16002_v46  ;;  %v14546_v46 = vld [vmem:[#allocation2 + $0x4c0] ss:$8 sps:$4 sm:$0xff]  }
 0x540   : > { %v16126_v4 = vpop.f32.mrf.mxu0 }
 0x541   : > { %17517 = vst [vmem:[#allocation61_spill] sm:$0xff] %v16126_v4 }
 0x542   : > { %3443 = vmatmul.mubr.bf16.gmra.mxu0 %v14540_v41  ;;  %v14557_v41 = vld [vmem:[#allocation2 + $0x4f4] ss:$8 sps:$4 sm:$0xff]  }
 0x543   : > { %3450 = vmatprep.mubr.bf16.mxu0 %v14545_v54  ;;  %v14555_v54 = vld [vmem:[#allocation2 + $0x4f0] ss:$8 sps:$4 sm:$0xff]  }
 0x54a   : > { %v13359_v61 = vpop.f32.mrf.mxu0  ;;  %3451 = vmatmul.mubr.bf16.gmra.mxu0 %v14543_v36 }
 0x54b   : > { %v16129_v6 = vadd.f32 %v13359_v61, %v16007_v16  ;;  %3458 = vmatprep.mubr.bf16.mxu0 %v14548_v21 }
 0x54c   : > { %v2994_v43 = vpop.f32.mrf.mxu0 }
 0x54d   : > { %v16132_v63 = vadd.f32 %v2994_v43, %v16010_v0 }
 0x54e   : > { %v13360_v11 = vpop.f32.mrf.mxu0 }
 0x54f   : > { %v16135_v23 = vadd.f32 %v13360_v11, %v16013_v10  ;;  %v14552_v10 = vld [vmem:[#allocation2 + $0x4e0] ss:$8 sps:$4 sm:$0xff]  }
 0x550   : > { %v16137_v32 = vpop.f32.mrf.mxu0 }
 0x551   : > { %17518 = vst [vmem:[#allocation62_spill] sm:$0xff] %v16137_v32 }
 0x552   : > { %3459 = vmatmul.mubr.bf16.gmra.mxu0 %v14546_v46 }
 0x553   : > { %3466 = vmatprep.mubr.bf16.mxu0 %v14551_v15 }
 0x55a   : > { %v13363_v5 = vpop.f32.mrf.mxu0  ;;  %3467 = vmatmul.mubr.bf16.gmra.mxu0 %v14549_v12 }
 0x55b   : > { %v16140_v16 = vadd.f32 %v13363_v5, %v16018_v40  ;;  %3474 = vmatprep.mubr.bf16.mxu0 %v14554_v58 }
 0x55c   : > { %v3010_v0 = vpop.f32.mrf.mxu0 }
 0x55d   : > { %v16143_v34 = vadd.f32 %v3010_v0, %v16021_v50 }
 0x55e   : > { %v13364_v38 = vpop.f32.mrf.mxu0 }
 0x55f   : > { %v16146_v56 = vadd.f32 %v13364_v38, %v16024_v31 }
 0x560   : > { %v16148_v36 = vpop.f32.mrf.mxu0 }
 0x561   : > { %17519 = vst [vmem:[#allocation63_spill] sm:$0xff] %v16148_v36 }
 0x562   : > { %3475 = vmatmul.mubr.bf16.gmra.mxu0 %v14552_v10 }
 0x563   : > { %3482 = vmatprep.mubr.bf16.mxu0 %v14557_v41 }
 0x56a   : > { %v13367_v21 = vpop.f32.mrf.mxu0  ;;  %3483 = vmatmul.mubr.bf16.gmra.mxu0 %v14555_v54 }
 0x56b   : > { %v16151_v40 = vadd.f32 %v13367_v21, %v16029_v59 }
 0x56c   : > { %v3026_v61 = vpop.f32.mrf.mxu0 }
 0x56d   : > { %v16154_v50 = vadd.f32 %v3026_v61, %v16032_v62 }
 0x56e   : > { %v13368_v43 = vpop.f32.mrf.mxu0 }
 0x56f   : > { %v16157_v11 = vadd.f32 %v13368_v43, %v16035_v25 }
 0x570   : > { %v16159_v31 = vpop.f32.mrf.mxu0 }
 0x571   : > { %17520 = vst [vmem:[#allocation64_spill] sm:$0xff] %v16159_v31 }
 0x57a   : > { %v13371_v46 = vpop.f32.mrf.mxu0 }
 0x57b   : > { %v16162_v15 = vadd.f32 %v13371_v46, %v16040_v22 }
 0x57c   : > { %v3042_v12 = vpop.f32.mrf.mxu0 }
 0x57d   : > { %v16165_v58 = vadd.f32 %v3042_v12, %v16043_v52 }
 0x57e   : > { %v13372_v59 = vpop.f32.mrf.mxu0 }
 0x57f   : > { %v16168_v5 = vadd.f32 %v13372_v59, %v16046_v44 }
 0x580   : > { %v16170_v62 = vpop.f32.mrf.mxu0 }
 0x581   : > { %17521 = vst [vmem:[#allocation65_spill] sm:$0xff] %v16170_v62 }
 0x58a   : > { %v13375_v0 = vpop.f32.mrf.mxu0 }
 0x58b   : > { %v16173_v25 = vadd.f32 %v13375_v0, %v16051_v24 }
 0x58c   : > { %v3058_v38 = vpop.f32.mrf.mxu0 }
 0x58d   : > { %v16176_v10 = vadd.f32 %v3058_v38, %v16054_v53 }
 0x58e   : > { %v13376_v22 = vpop.f32.mrf.mxu0 }
 0x58f   : > { %v16179_v41 = vadd.f32 %v13376_v22, %v16057_v29 }
 0x590   : > { %v16181_v52 = vpop.f32.mrf.mxu0 }
 0x591   : > { %17522 = vst [vmem:[#allocation66_spill] sm:$0xff] %v16181_v52 }
 0x59a   : > { %v13379_v54 = vpop.f32.mrf.mxu0 }
 0x59b   : > { %v16184_v44 = vadd.f32 %v13379_v54, %v16062_v48 }
 0x59c   : > { %v3074_v21 = vpop.f32.mrf.mxu0 }
 0x59d   : > { %v16187_v61 = vadd.f32 %v3074_v21, %v16065_v9 }
 0x59e   : > { %v13380_v24 = vpop.f32.mrf.mxu0 }
 0x59f   : > { %v16190_v43 = vadd.f32 %v13380_v24, %v16068_v60 }
 0x5a0   : > { %v16192_v53 = vpop.f32.mrf.mxu0 }
 0x5a1   : > { %17523 = vst [vmem:[#allocation67_spill] sm:$0xff] %v16192_v53 }
 0x5aa   : > { %v13383_v46 = vpop.f32.mrf.mxu0 }
 0x5ab   : > { %v16195_v29 = vadd.f32 %v13383_v46, %v16073_v1 }
 0x5ac   : > { %v3090_v12 = vpop.f32.mrf.mxu0 }
 0x5ad   : > { %v16198_v59 = vadd.f32 %v3090_v12, %v16076_v55 }
 0x5ae   : > { %v13384_v48 = vpop.f32.mrf.mxu0 }
 0x5af   : > { %v16201_v0 = vadd.f32 %v13384_v48, %v16079_v51 }
 0x5b0   : > { %v16203_v9 = vpop.f32.mrf.mxu0 }
 0x5b1   : > { %17524 = vst [vmem:[#allocation68_spill] sm:$0xff] %v16203_v9 }
 0x5b2   : > { %v12207_v38 = vpop.f32.mrf.mxu0 }
 0x5b4   : > { %v12208_v22 = vpop.f32.mrf.mxu0 }
 0x5b5   : > { %v12209_v21 = vadd.f32 %v12208_v22, %v12207_v38 }
 0x5b6   : > { %v12210_v60 = vpop.f32.mrf.mxu0 }
 0x5b8   : > { %v12211_v54 = vpop.f32.mrf.mxu0 }
 0x5b9   : > { %v12212_v24 = vadd.f32 %v12211_v54, %v12210_v60 }
 0x5ba   : > { %v12213_v4 = vpop.f32.mrf.mxu0 }
 0x5bb   : > { %v3491_v62 = vpack.c.bf16 %v12212_v24, %v12209_v21 }
 0x5bc   : > { %v12214_v1 = vpop.f32.mrf.mxu0 }
 0x5bd   : > { %13387 = vmatprep.mubr.msk.bf16.mxu1 %vm1479_vm1, %v3491_v62  ;;  %v12215_v12 = vadd.f32 %v12214_v1, %v12213_v4 }
 0x5be   : > { %v12216_v46 = vpop.f32.mrf.mxu0 }
 0x5c0   : > { %v12217_v55 = vpop.f32.mrf.mxu0 }
 0x5c1   : > { %v12218_v32 = vadd.f32 %v12217_v55, %v12216_v46 }
 0x5c2   : > { %v12219_v52 = vpop.f32.mrf.mxu0 }
 0x5c3   : > { %v3492_v51 = vpack.c.bf16 %v12218_v32, %v12215_v12 }
 0x5c4   : > { %v12220_v48 = vpop.f32.mrf.mxu0 }
 0x5c5   : > { %13388 = vmatmul.mubr.msk.bf16.vlgmr.msra.gmra.mxu1 %vm1479_vm1, %v3492_v51  ;;  %v12221_v22 = vadd.f32 %v12220_v48, %v12219_v52 }
 0x5c6   : > { %v12222_v36 = vpop.f32.mrf.mxu0  ;;  %12321 = vmatpush3.bf16.msra.mxu1 %v15738_v7 }
 0x5c7   : > { %12322 = vmatprep.subr.bf16.mxu1 %v15740_v8 }
 0x5c8   : > { %v12223_v38 = vpop.f32.mrf.mxu0 }
 0x5c9   : > { %v12224_v60 = vadd.f32 %v12223_v38, %v12222_v36 }
 0x5ca   : > { %v12225_v54 = vpop.f32.mrf.mxu0  ;;  %12323 = vmatpush3.bf16.msra.mxu1 %v15750_v13 }
 0x5cb   : > { %v3493_v62 = vpack.c.bf16 %v12224_v60, %v12221_v22  ;;  %12324 = vmatprep.subr.bf16.mxu1 %v15754_v14 }
 0x5cc   : > { %v12226_v4 = vpop.f32.mrf.mxu0 }
 0x5cd   : > { %13391 = vmatprep.mubr.msk.bf16.mxu1 %vm1479_vm1, %v3493_v62  ;;  %v12227_v24 = vadd.f32 %v12226_v4, %v12225_v54 }
 0x5ce   : > { %v12228_v32 = vpop.f32.mrf.mxu0  ;;  %12325 = vmatpush3.bf16.msra.mxu1 %v15762_v19 }
 0x5cf   : > { %12326 = vmatprep.subr.bf16.mxu1 %v15766_v20 }
 0x5d0   : > { %v12229_v21 = vpop.f32.mrf.mxu0 }
 0x5d1   : > { %v12230_v1 = vadd.f32 %v12229_v21, %v12228_v32 }
 0x5d2   : > { %v12231_v46 = vpop.f32.mrf.mxu0  ;;  %12327 = vmatpush3.bf16.msra.mxu1 %v15776_v28 }
 0x5d3   : > { %v3494_v36 = vpack.c.bf16 %v12230_v1, %v12227_v24  ;;  %12328 = vmatprep.subr.bf16.mxu1 %v15781_v30 }
 0x5d4   : > { %v12232_v52 = vpop.f32.mrf.mxu0 }
 0x5d5   : > { %13392 = vmatmul.mubr.msk.bf16.gmra.mxu1 %vm1479_vm1, %v3494_v36  ;;  %v12233_v51 = vadd.f32 %v12232_v52, %v12231_v46 }
 0x5d6   : > { %v12234_v55 = vpop.f32.mrf.mxu0  ;;  %12329 = vmatpush3.bf16.msra.mxu1 %v15786_v33 }
 0x5d7   : > { %12330 = vmatprep.subr.bf16.mxu1 %v15791_v35 }
 0x5d8   : > { %v12235_v12 = vpop.f32.mrf.mxu0 }
 0x5d9   : > { %v12236_v48 = vadd.f32 %v12235_v12, %v12234_v55 }
 0x5da   : > { %v12237_v38 = vpop.f32.mrf.mxu0  ;;  %12331 = vmatpush3.bf16.msra.mxu1 %v15798_v39 }
 0x5db   : > { %v3495_v22 = vpack.c.bf16 %v12236_v48, %v12233_v51  ;;  %12332 = vmatprep.subr.bf16.mxu1 %v15804_v42 }
 0x5dc   : > { %v12238_v60 = vpop.f32.mrf.mxu0 }
 0x5dd   : > { %13395 = vmatprep.mubr.msk.bf16.mxu1 %vm1479_vm1, %v3495_v22  ;;  %v12239_v4 = vadd.f32 %v12238_v60, %v12237_v38 }
 0x5de   : > { %v12240_v54 = vpop.f32.mrf.mxu0  ;;  %12333 = vmatpush3.bf16.msra.mxu1 %v15810_v45 }
 0x5df   : > { %12334 = vmatprep.subr.bf16.mxu1 %v15815_v47 }
 0x5e0   : > { %v12241_v62 = vpop.f32.mrf.mxu0 }
 0x5e1   : > { %v12242_v32 = vadd.f32 %v12241_v62, %v12240_v54 }
 0x5e2   : > { %v12243_v21 = vpop.f32.mrf.mxu0  ;;  %12335 = vmatpush3.bf16.msra.mxu1 %v15820_v49 }
 0x5e3   : > { %v3496_v24 = vpack.c.bf16 %v12242_v32, %v12239_v4 }
 0x5e4   : > { %v12244_v1 = vpop.f32.mrf.mxu0 }
 0x5e5   : > { %13396 = vmatmul.mubr.msk.bf16.gmra.mxu1 %vm1479_vm1, %v3496_v24  ;;  %v12245_v52 = vadd.f32 %v12244_v1, %v12243_v21 }
 0x5e6   : > { %v12246_v46 = vpop.f32.mrf.mxu0 }
 0x5e8   : > { %v12247_v36 = vpop.f32.mrf.mxu0 }
 0x5e9   : > { %v12248_v55 = vadd.f32 %v12247_v36, %v12246_v46 }
 0x5ea   : > { %v12249_v12 = vpop.f32.mrf.mxu0 }
 0x5eb   : > { %v3497_v51 = vpack.c.bf16 %v12248_v55, %v12245_v52 }
 0x5ec   : > { %v12250_v48 = vpop.f32.mrf.mxu0 }
 0x5ed   : > { %13399 = vmatprep.mubr.msk.bf16.mxu1 %vm1479_vm1, %v3497_v51  ;;  %v12251_v38 = vadd.f32 %v12250_v48, %v12249_v12 }
 0x5ee   : > { %v12252_v22 = vpop.f32.mrf.mxu0 }
 0x5f0   : > { %v12253_v53 = vpop.f32.mrf.mxu0 }
 0x5f1   : > { %v12254_v60 = vadd.f32 %v12253_v53, %v12252_v22 }
 0x5f2   : > { %v12255_v54 = vpop.f32.mrf.mxu0 }
 0x5f3   : > { %v3498_v62 = vpack.c.bf16 %v12254_v60, %v12251_v38 }
 0x5f4   : > { %v12256_v9 = vpop.f32.mrf.mxu0 }
 0x5f5   : > { %13400 = vmatmul.mubr.msk.bf16.gmra.mxu1 %vm1479_vm1, %v3498_v62  ;;  %v12257_v24 = vadd.f32 %v12256_v9, %v12255_v54 }
 0x5f6   : > { %v12258_v4 = vpop.f32.mrf.mxu0 }
 0x5f8   : > { %v12259_v32 = vpop.f32.mrf.mxu0 }
 0x5f9   : > { %v12260_v31 = vadd.f32 %v12259_v32, %v12258_v4 }
 0x5fa   : > { %v12261_v21 = vpop.f32.mrf.mxu0 }
 0x5fb   : > { %v3499_v1 = vpack.c.bf16 %v12260_v31, %v12257_v24 }
 0x5fc   : > { %v12262_v46 = vpop.f32.mrf.mxu0 }
 0x5fd   : > { %13403 = vmatprep.mubr.msk.bf16.mxu1 %vm1479_vm1, %v3499_v1  ;;  %v12263_v55 = vadd.f32 %v12262_v46, %v12261_v21 }
 0x5fe   : > { %v12264_v36 = vpop.f32.mrf.mxu0 }
 0x600   : > { %v12265_v52 = vpop.f32.mrf.mxu0 }
 0x601   : > { %v12266_v51 = vadd.f32 %v12265_v52, %v12264_v36 }
 0x602   : > { %v12267_v12 = vpop.f32.mrf.mxu0 }
 0x603   : > { %v3500_v53 = vpack.c.bf16 %v12266_v51, %v12263_v55 }
 0x604   : > { %v12268_v48 = vpop.f32.mrf.mxu0 }
 0x605   : > { %13404 = vmatmul.mubr.msk.bf16.gmra.mxu1 %vm1479_vm1, %v3500_v53  ;;  %v12269_v60 = vadd.f32 %v12268_v48, %v12267_v12 }
 0x606   : > { %v12270_v22 = vpop.f32.mrf.mxu0 }
 0x608   : > { %v12271_v38 = vpop.f32.mrf.mxu0 }
 0x609   : > { %v12272_v62 = vadd.f32 %v12271_v38, %v12270_v22 }
 0x60a   : > { %v12273_v9 = vpop.f32.mrf.mxu0 }
 0x60b   : > { %v3501_v54 = vpack.c.bf16 %v12272_v62, %v12269_v60 }
 0x60c   : > { %v12274_v4 = vpop.f32.mrf.mxu0 }
 0x60d   : > { %13407 = vmatprep.mubr.msk.bf16.mxu1 %vm1479_vm1, %v3501_v54  ;;  %v12275_v24 = vadd.f32 %v12274_v4, %v12273_v9 }
 0x60e   : > { %v12276_v31 = vpop.f32.mrf.mxu0 }
 0x610   : > { %v12277_v32 = vpop.f32.mrf.mxu0 }
 0x611   : > { %v12278_v1 = vadd.f32 %v12277_v32, %v12276_v31 }
 0x612   : > { %v12279_v21 = vpop.f32.mrf.mxu0 }
 0x613   : > { %v3502_v46 = vpack.c.bf16 %v12278_v1, %v12275_v24 }
 0x614   : > { %v12280_v36 = vpop.f32.mrf.mxu0 }
 0x615   : > { %13408 = vmatmul.mubr.msk.bf16.gmra.mxu1 %vm1479_vm1, %v3502_v46  ;;  %v12281_v51 = vadd.f32 %v12280_v36, %v12279_v21 }
 0x616   : > { %v12282_v52 = vpop.f32.mrf.mxu0 }
 0x618   : > { %v12283_v55 = vpop.f32.mrf.mxu0 }
 0x619   : > { %v12284_v53 = vadd.f32 %v12283_v55, %v12282_v52 }
 0x61a   : > { %v12285_v12 = vpop.f32.mrf.mxu0 }
 0x61b   : > { %v3503_v48 = vpack.c.bf16 %v12284_v53, %v12281_v51 }
 0x61c   : > { %v12286_v22 = vpop.f32.mrf.mxu0 }
 0x61d   : > { %13411 = vmatprep.mubr.msk.bf16.mxu1 %vm1479_vm1, %v3503_v48  ;;  %v12287_v62 = vadd.f32 %v12286_v22, %v12285_v12  ;;  %v14560_v12 = vld [vmem:[#allocation2 + $0x504] ss:$8 sps:$4 sm:$0xff]  }
 0x61e   : > { %v12288_v38 = vpop.f32.mrf.mxu0 }
 0x620   : > { %v12289_v60 = vpop.f32.mrf.mxu0 }
 0x621   : > { %v12290_v54 = vadd.f32 %v12289_v60, %v12288_v38  ;;  %v14558_v38 = vld [vmem:[#allocation2 + $0x500] ss:$8 sps:$4 sm:$0xff]   ;;  %v14563_v60 = vld [vmem:[#allocation2 + $0x514] ss:$8 sps:$4 sm:$0xff]  }
 0x622   : > { %v12291_v9 = vpop.f32.mrf.mxu0 }
 0x623   : > { %v3504_v4 = vpack.c.bf16 %v12290_v54, %v12287_v62  ;;  %v14561_v62 = vld [vmem:[#allocation2 + $0x510] ss:$8 sps:$4 sm:$0xff]   ;;  %v14566_v54 = vld [vmem:[#allocation2 + $0x524] ss:$8 sps:$4 sm:$0xff]  }
 0x624   : > { %v12292_v31 = vpop.f32.mrf.mxu0 }
 0x625   : > { %13412 = vmatmul.mubr.msk.bf16.gmra.mxu1 %vm1479_vm1, %v3504_v4  ;;  %v12293_v1 = vadd.f32 %v12292_v31, %v12291_v9  ;;  %v14564_v9 = vld [vmem:[#allocation2 + $0x520] ss:$8 sps:$4 sm:$0xff]   ;;  %v14569_v4 = vld [vmem:[#allocation2 + $0x534] ss:$8 sps:$4 sm:$0xff]   ;;  %v14567_v31 = vld [vmem:[#allocation2 + $0x530] ss:$8 sps:$4 sm:$0xff]  }
 0x626   : > { %v12294_v32 = vpop.f32.mrf.mxu0 }
 0x628   : > { %v12295_v24 = vpop.f32.mrf.mxu0 }
 0x629   : > { %v12296_v46 = vadd.f32 %v12295_v24, %v12294_v32  ;;  %v14572_v32 = vld [vmem:[#allocation2 + $0x544] ss:$8 sps:$4 sm:$0xff]   ;;  %v14570_v24 = vld [vmem:[#allocation2 + $0x540] ss:$8 sps:$4 sm:$0xff]  }
 0x62a   : > { %v12297_v21 = vpop.f32.mrf.mxu0 }
 0x62b   : > { %v3505_v36 = vpack.c.bf16 %v12296_v46, %v12293_v1  ;;  %v14575_v1 = vld [vmem:[#allocation2 + $0x554] ss:$8 sps:$4 sm:$0xff]   ;;  %v14573_v46 = vld [vmem:[#allocation2 + $0x550] ss:$8 sps:$4 sm:$0xff]  }
 0x62c   : > { %v12298_v52 = vpop.f32.mrf.mxu0 }
 0x62d   : > { %13415 = vmatprep.mubr.msk.bf16.mxu1 %vm1479_vm1, %v3505_v36  ;;  %v12299_v53 = vadd.f32 %v12298_v52, %v12297_v21  ;;  %v14578_v21 = vld [vmem:[#allocation2 + $0x564] ss:$8 sps:$4 sm:$0xff]   ;;  %v4124_v36 = vld [vmem:[#allocation5 + $0xa] sm:$0x3] }
 0x62e   : > { %v12300_v55 = vpop.f32.mrf.mxu0  ;;  %v14576_v52 = vld [vmem:[#allocation2 + $0x560] ss:$8 sps:$4 sm:$0xff]   ;;  %14126 = vmatprep.subr.msk.bf16.mxu0 %vm1528_vm0, %v4124_v36 }
 0x630   : > { %v12301_v51 = vpop.f32.mrf.mxu0 }
 0x631   : > { %v12302_v48 = vadd.f32 %v12301_v51, %v12300_v55  ;;  %v14581_v55 = vld [vmem:[#allocation2 + $0x574] ss:$8 sps:$4 sm:$0xff]   ;;  %v4174_v51 = vsel %vm1528_vm0, %v4124_v36, 0 }
 0x632   : > { %13420 = vmatpush3.bf16.msra.mxu0 %v4174_v51 }
 0x633   : > { %v3506_v22 = vpack.c.bf16 %v12302_v48, %v12299_v53  ;;  %12449 = vmatprep.subr.bf16.mxu0 %v15733_v3  ;;  %v14579_v53 = vld [vmem:[#allocation2 + $0x570] ss:$8 sps:$4 sm:$0xff]   ;;  %v14584_v48 = vld [vmem:[#allocation2 + $0x584] ss:$8 sps:$4 sm:$0xff]  }
 0x635   : > { %13416 = vmatmul.mubr.msk.bf16.gmra.mxu1 %vm1479_vm1, %v3506_v22  ;;  %v14587_v22 = vld [vmem:[#allocation2 + $0x594] ss:$8 sps:$4 sm:$0xff]  }
 0x636   : > { %3978 = vmatprep.mubr.bf16.mxu1 %v14560_v12  ;;  %v14582_v12 = vld [vmem:[#allocation2 + $0x580] ss:$8 sps:$4 sm:$0xff]  }
 0x63d   : > { %3979 = vmatmul.mubr.bf16.vlgmr.msra.gmra.mxu1 %v14558_v38  ;;  %v14585_v38 = vld [vmem:[#allocation2 + $0x590] ss:$8 sps:$4 sm:$0xff]  }
 0x63e   : > { %3986 = vmatprep.mubr.bf16.mxu1 %v14563_v60  ;;  %v14590_v60 = vld [vmem:[#allocation2 + $0x5a4] ss:$8 sps:$4 sm:$0xff]  }
 0x645   : > { %3987 = vmatmul.mubr.bf16.gmra.mxu1 %v14561_v62 }
 0x646   : > { %3994 = vmatprep.mubr.bf16.mxu1 %v14566_v54 }
 0x64d   : > { %3995 = vmatmul.mubr.bf16.gmra.mxu1 %v14564_v9 }
 0x64e   : > { %4002 = vmatprep.mubr.bf16.mxu1 %v14569_v4 }
 0x655   : > { %4003 = vmatmul.mubr.bf16.gmra.mxu1 %v14567_v31 }
 0x656   : > { %4010 = vmatprep.mubr.bf16.mxu1 %v14572_v32  ;;  %v14588_v32 = vld [vmem:[#allocation2 + $0x5a0] ss:$8 sps:$4 sm:$0xff]  }
 0x65d   : > { %4011 = vmatmul.mubr.bf16.gmra.mxu1 %v14570_v24 }
 0x65e   : > { %4018 = vmatprep.mubr.bf16.mxu1 %v14575_v1  ;;  %v14593_v1 = vld [vmem:[#allocation2 + $0x5b4] ss:$8 sps:$4 sm:$0xff]  }
 0x665   : > { %4019 = vmatmul.mubr.bf16.gmra.mxu1 %v14573_v46  ;;  %v14591_v46 = vld [vmem:[#allocation2 + $0x5b0] ss:$8 sps:$4 sm:$0xff]  }
 0x666   : > { %4026 = vmatprep.mubr.bf16.mxu1 %v14578_v21  ;;  %v14596_v21 = vld [vmem:[#allocation2 + $0x5c4] ss:$8 sps:$4 sm:$0xff]  }
 0x66d   : > { %4027 = vmatmul.mubr.bf16.gmra.mxu1 %v14576_v52 }
 0x66e   : > { %4034 = vmatprep.mubr.bf16.mxu1 %v14581_v55 }
 0x675   : > { %4035 = vmatmul.mubr.bf16.gmra.mxu1 %v14579_v53 }
 0x676   : > { %4042 = vmatprep.mubr.bf16.mxu1 %v14584_v48  ;;  %v14599_v48 = vld [vmem:[#allocation2 + $0x5d4] ss:$8 sps:$4 sm:$0xff]  }
 0x67d   : > { %4043 = vmatmul.mubr.bf16.gmra.mxu1 %v14582_v12  ;;  %v14597_v12 = vld [vmem:[#allocation2 + $0x5d0] ss:$8 sps:$4 sm:$0xff]  }
 0x67e   : > { %4050 = vmatprep.mubr.bf16.mxu1 %v14587_v22  ;;  %v14602_v22 = vld [vmem:[#allocation2 + $0x5e4] ss:$8 sps:$4 sm:$0xff]  }
 0x685   : > { %v13389_v62 = vpop.f32.mrf.mxu1  ;;  %4051 = vmatmul.mubr.bf16.gmra.mxu1 %v14585_v38 }
 0x686   : > { %v16240_v54 = vadd.f32 %v13389_v62, %v16118_v37  ;;  %4058 = vmatprep.mubr.bf16.mxu1 %v14590_v60 }
 0x687   : > { %v3594_v9 = vpop.f32.mrf.mxu1 }
 0x688   : > { %v16243_v4 = vadd.f32 %v3594_v9, %v16121_v18 }
 0x689   : > { %v13390_v31 = vpop.f32.mrf.mxu1 }
 0x68a   : > { %v16246_v24 = vadd.f32 %v13390_v31, %v16124_v57  ;;  %v14594_v57 = vld [vmem:[#allocation2 + $0x5c0] ss:$8 sps:$4 sm:$0xff]  }
 0x68b   : > { %v16248_v36 = vpop.f32.mrf.mxu1 }
 0x68c   : > { %17525 = vst [vmem:[#allocation69_spill] sm:$0xff] %v16248_v36 }
 0x68d   : > { %4059 = vmatmul.mubr.bf16.gmra.mxu1 %v14588_v32  ;;  %v14605_v32 = vld [vmem:[#allocation2 + $0x5f4] ss:$8 sps:$4 sm:$0xff]  }
 0x68e   : > { %4066 = vmatprep.mubr.bf16.mxu1 %v14593_v1  ;;  %v14603_v1 = vld [vmem:[#allocation2 + $0x5f0] ss:$8 sps:$4 sm:$0xff]  }
 0x695   : > { %v13393_v52 = vpop.f32.mrf.mxu1  ;;  %4067 = vmatmul.mubr.bf16.gmra.mxu1 %v14591_v46 }
 0x696   : > { %v16251_v37 = vadd.f32 %v13393_v52, %v16129_v6  ;;  %4074 = vmatprep.mubr.bf16.mxu1 %v14596_v21 }
 0x697   : > { %v3610_v18 = vpop.f32.mrf.mxu1 }
 0x698   : > { %v16254_v55 = vadd.f32 %v3610_v18, %v16132_v63 }
 0x699   : > { %v13394_v51 = vpop.f32.mrf.mxu1 }
 0x69a   : > { %v16257_v53 = vadd.f32 %v13394_v51, %v16135_v23  ;;  %v14600_v23 = vld [vmem:[#allocation2 + $0x5e0] ss:$8 sps:$4 sm:$0xff]  }
 0x69b   : > { %v16259_v38 = vpop.f32.mrf.mxu1 }
 0x69c   : > { %17526 = vst [vmem:[#allocation70_spill] sm:$0xff] %v16259_v38 }
 0x69d   : > { %4075 = vmatmul.mubr.bf16.gmra.mxu1 %v14594_v57 }
 0x69e   : > { %4082 = vmatprep.mubr.bf16.mxu1 %v14599_v48 }
 0x6a5   : > { %v13397_v60 = vpop.f32.mrf.mxu1  ;;  %4083 = vmatmul.mubr.bf16.gmra.mxu1 %v14597_v12 }
 0x6a6   : > { %v16262_v6 = vadd.f32 %v13397_v60, %v16140_v16  ;;  %4090 = vmatprep.mubr.bf16.mxu1 %v14602_v22 }
 0x6a7   : > { %v3626_v63 = vpop.f32.mrf.mxu1 }
 0x6a8   : > { %v16265_v62 = vadd.f32 %v3626_v63, %v16143_v34 }
 0x6a9   : > { %v13398_v9 = vpop.f32.mrf.mxu1 }
 0x6aa   : > { %v16268_v31 = vadd.f32 %v13398_v9, %v16146_v56 }
 0x6ab   : > { %v16270_v46 = vpop.f32.mrf.mxu1 }
 0x6ac   : > { %17527 = vst [vmem:[#allocation71_spill] sm:$0xff] %v16270_v46 }
 0x6ad   : > { %4091 = vmatmul.mubr.bf16.gmra.mxu1 %v14600_v23 }
 0x6ae   : > { %4098 = vmatprep.mubr.bf16.mxu1 %v14605_v32 }
 0x6b5   : > { %v13401_v21 = vpop.f32.mrf.mxu1  ;;  %4099 = vmatmul.mubr.bf16.gmra.mxu1 %v14603_v1 }
 0x6b6   : > { %v16273_v16 = vadd.f32 %v13401_v21, %v16151_v40 }
 0x6b7   : > { %v3642_v52 = vpop.f32.mrf.mxu1 }
 0x6b8   : > { %v16276_v34 = vadd.f32 %v3642_v52, %v16154_v50 }
 0x6b9   : > { %v13402_v18 = vpop.f32.mrf.mxu1 }
 0x6ba   : > { %v16279_v51 = vadd.f32 %v13402_v18, %v16157_v11 }
 0x6bb   : > { %v16281_v56 = vpop.f32.mrf.mxu1 }
 0x6bc   : > { %17528 = vst [vmem:[#allocation72_spill] sm:$0xff] %v16281_v56 }
 0x6c5   : > { %v13405_v57 = vpop.f32.mrf.mxu1 }
 0x6c6   : > { %v16284_v48 = vadd.f32 %v13405_v57, %v16162_v15 }
 0x6c7   : > { %v3658_v12 = vpop.f32.mrf.mxu1 }
 0x6c8   : > { %v16287_v22 = vadd.f32 %v3658_v12, %v16165_v58 }
 0x6c9   : > { %v13406_v40 = vpop.f32.mrf.mxu1 }
 0x6ca   : > { %v16290_v60 = vadd.f32 %v13406_v40, %v16168_v5 }
 0x6cb   : > { %v16292_v50 = vpop.f32.mrf.mxu1 }
 0x6cc   : > { %17529 = vst [vmem:[#allocation73_spill] sm:$0xff] %v16292_v50 }
 0x6d5   : > { %v13409_v63 = vpop.f32.mrf.mxu1 }
 0x6d6   : > { %v16295_v11 = vadd.f32 %v13409_v63, %v16173_v25 }
 0x6d7   : > { %v3674_v9 = vpop.f32.mrf.mxu1 }
 0x6d8   : > { %v16298_v23 = vadd.f32 %v3674_v9, %v16176_v10 }
 0x6d9   : > { %v13410_v15 = vpop.f32.mrf.mxu1 }
 0x6da   : > { %v16301_v32 = vadd.f32 %v13410_v15, %v16179_v41 }
 0x6db   : > { %v16303_v58 = vpop.f32.mrf.mxu1 }
 0x6dc   : > { %17530 = vst [vmem:[#allocation74_spill] sm:$0xff] %v16303_v58 }
 0x6e5   : > { %v13413_v1 = vpop.f32.mrf.mxu1 }
 0x6e6   : > { %v16306_v5 = vadd.f32 %v13413_v1, %v16184_v44 }
 0x6e7   : > { %v3690_v21 = vpop.f32.mrf.mxu1 }
 0x6e8   : > { %v16309_v52 = vadd.f32 %v3690_v21, %v16187_v61 }
 0x6e9   : > { %v13414_v25 = vpop.f32.mrf.mxu1 }
 0x6ea   : > { %v16312_v18 = vadd.f32 %v13414_v25, %v16190_v43 }
 0x6eb   : > { %v16314_v10 = vpop.f32.mrf.mxu1 }
 0x6ec   : > { %17531 = vst [vmem:[#allocation75_spill] sm:$0xff] %v16314_v10 }
 0x6f5   : > { %v13417_v57 = vpop.f32.mrf.mxu1 }
 0x6f6   : > { %v16317_v41 = vadd.f32 %v13417_v57, %v16195_v29 }
 0x6f7   : > { %v3706_v12 = vpop.f32.mrf.mxu1 }
 0x6f8   : > { %v16320_v40 = vadd.f32 %v3706_v12, %v16198_v59 }
 0x6f9   : > { %v13418_v44 = vpop.f32.mrf.mxu1 }
 0x6fa   : > { %v16323_v63 = vadd.f32 %v13418_v44, %v16201_v0 }
 0x6fb   : > { %v16325_v61 = vpop.f32.mrf.mxu1 }
 0x6fc   : > { %17532 = vst [vmem:[#allocation76_spill] sm:$0xff] %v16325_v61 }
 0x6fd   : > { %v12336_v9 = vpop.f32.mrf.mxu1 }
 0x6ff   : > { %v12337_v15 = vpop.f32.mrf.mxu1 }
 0x700   : > { %v12338_v21 = vadd.f32 %v12337_v15, %v12336_v9 }
 0x701   : > { %v12339_v43 = vpop.f32.mrf.mxu1 }
 0x703   : > { %v12340_v1 = vpop.f32.mrf.mxu1 }
 0x704   : > { %v12341_v25 = vadd.f32 %v12340_v1, %v12339_v43 }
 0x705   : > { %v12342_v36 = vpop.f32.mrf.mxu1 }
 0x706   : > { %v4107_v50 = vpack.c.bf16 %v12341_v25, %v12338_v21 }
 0x707   : > { %v12343_v29 = vpop.f32.mrf.mxu1 }
 0x708   : > { %13421 = vmatprep.mubr.msk.bf16.mxu0 %vm1479_vm1, %v4107_v50  ;;  %v12344_v12 = vadd.f32 %v12343_v29, %v12342_v36 }
 0x709   : > { %v12345_v57 = vpop.f32.mrf.mxu1 }
 0x70b   : > { %v12346_v59 = vpop.f32.mrf.mxu1 }
 0x70c   : > { %v12347_v38 = vadd.f32 %v12346_v59, %v12345_v57 }
 0x70d   : > { %v12348_v58 = vpop.f32.mrf.mxu1 }
 0x70e   : > { %v4108_v0 = vpack.c.bf16 %v12347_v38, %v12344_v12 }
 0x70f   : > { %v12349_v44 = vpop.f32.mrf.mxu1 }
 0x710   : > { %13422 = vmatmul.mubr.msk.bf16.vlgmr.msra.gmra.mxu0 %vm1479_vm1, %v4108_v0  ;;  %v12350_v15 = vadd.f32 %v12349_v44, %v12348_v58 }
 0x711   : > { %v12351_v46 = vpop.f32.mrf.mxu1  ;;  %12450 = vmatpush3.bf16.msra.mxu0 %v15738_v7 }
 0x712   : > { %12451 = vmatprep.subr.bf16.mxu0 %v15740_v8 }
 0x713   : > { %v12352_v9 = vpop.f32.mrf.mxu1 }
 0x714   : > { %v12353_v43 = vadd.f32 %v12352_v9, %v12351_v46 }
 0x715   : > { %v12354_v1 = vpop.f32.mrf.mxu1  ;;  %12452 = vmatpush3.bf16.msra.mxu0 %v15750_v13 }
 0x716   : > { %v4109_v50 = vpack.c.bf16 %v12353_v43, %v12350_v15  ;;  %12453 = vmatprep.subr.bf16.mxu0 %v15754_v14 }
 0x717   : > { %v12355_v36 = vpop.f32.mrf.mxu1 }
 0x718   : > { %13425 = vmatprep.mubr.msk.bf16.mxu0 %vm1479_vm1, %v4109_v50  ;;  %v12356_v25 = vadd.f32 %v12355_v36, %v12354_v1 }
 0x719   : > { %v12357_v38 = vpop.f32.mrf.mxu1  ;;  %12454 = vmatpush3.bf16.msra.mxu0 %v15762_v19 }
 0x71a   : > { %12455 = vmatprep.subr.bf16.mxu0 %v15766_v20 }
 0x71b   : > { %v12358_v21 = vpop.f32.mrf.mxu1 }
 0x71c   : > { %v12359_v29 = vadd.f32 %v12358_v21, %v12357_v38 }
 0x71d   : > { %v12360_v57 = vpop.f32.mrf.mxu1  ;;  %12456 = vmatpush3.bf16.msra.mxu0 %v15776_v28 }
 0x71e   : > { %v4110_v46 = vpack.c.bf16 %v12359_v29, %v12356_v25  ;;  %12457 = vmatprep.subr.bf16.mxu0 %v15781_v30 }
 0x71f   : > { %v12361_v58 = vpop.f32.mrf.mxu1 }
 0x720   : > { %13426 = vmatmul.mubr.msk.bf16.gmra.mxu0 %vm1479_vm1, %v4110_v46  ;;  %v12362_v0 = vadd.f32 %v12361_v58, %v12360_v57 }
 0x721   : > { %v12363_v59 = vpop.f32.mrf.mxu1  ;;  %12458 = vmatpush3.bf16.msra.mxu0 %v15786_v33 }
 0x722   : > { %12459 = vmatprep.subr.bf16.mxu0 %v15791_v35 }
 0x723   : > { %v12364_v12 = vpop.f32.mrf.mxu1 }
 0x724   : > { %v12365_v44 = vadd.f32 %v12364_v12, %v12363_v59 }
 0x725   : > { %v12366_v9 = vpop.f32.mrf.mxu1  ;;  %12460 = vmatpush3.bf16.msra.mxu0 %v15798_v39 }
 0x726   : > { %v4111_v15 = vpack.c.bf16 %v12365_v44, %v12362_v0  ;;  %12461 = vmatprep.subr.bf16.mxu0 %v15804_v42 }
 0x727   : > { %v12367_v43 = vpop.f32.mrf.mxu1 }
 0x728   : > { %13429 = vmatprep.mubr.msk.bf16.mxu0 %vm1479_vm1, %v4111_v15  ;;  %v12368_v36 = vadd.f32 %v12367_v43, %v12366_v9 }
 0x729   : > { %v12369_v1 = vpop.f32.mrf.mxu1  ;;  %12462 = vmatpush3.bf16.msra.mxu0 %v15810_v45 }
 0x72a   : > { %12463 = vmatprep.subr.bf16.mxu0 %v15815_v47 }
 0x72b   : > { %v12370_v50 = vpop.f32.mrf.mxu1 }
 0x72c   : > { %v12371_v38 = vadd.f32 %v12370_v50, %v12369_v1 }
 0x72d   : > { %v12372_v21 = vpop.f32.mrf.mxu1  ;;  %12464 = vmatpush3.bf16.msra.mxu0 %v15820_v49 }
 0x72e   : > { %v4112_v25 = vpack.c.bf16 %v12371_v38, %v12368_v36 }
 0x72f   : > { %v12373_v29 = vpop.f32.mrf.mxu1 }
 0x730   : > { %13430 = vmatmul.mubr.msk.bf16.gmra.mxu0 %vm1479_vm1, %v4112_v25  ;;  %v12374_v58 = vadd.f32 %v12373_v29, %v12372_v21 }
 0x731   : > { %v12375_v57 = vpop.f32.mrf.mxu1 }
 0x733   : > { %v12376_v46 = vpop.f32.mrf.mxu1 }
 0x734   : > { %v12377_v59 = vadd.f32 %v12376_v46, %v12375_v57 }
 0x735   : > { %v12378_v12 = vpop.f32.mrf.mxu1 }
 0x736   : > { %v4113_v0 = vpack.c.bf16 %v12377_v59, %v12374_v58 }
 0x737   : > { %v12379_v44 = vpop.f32.mrf.mxu1 }
 0x738   : > { %13433 = vmatprep.mubr.msk.bf16.mxu0 %vm1479_vm1, %v4113_v0  ;;  %v12380_v9 = vadd.f32 %v12379_v44, %v12378_v12 }
 0x739   : > { %v12381_v15 = vpop.f32.mrf.mxu1 }
 0x73b   : > { %v12382_v10 = vpop.f32.mrf.mxu1 }
 0x73c   : > { %v12383_v43 = vadd.f32 %v12382_v10, %v12381_v15 }
 0x73d   : > { %v12384_v1 = vpop.f32.mrf.mxu1 }
 0x73e   : > { %v4114_v50 = vpack.c.bf16 %v12383_v43, %v12380_v9 }
 0x73f   : > { %v12385_v61 = vpop.f32.mrf.mxu1 }
 0x740   : > { %13434 = vmatmul.mubr.msk.bf16.gmra.mxu0 %vm1479_vm1, %v4114_v50  ;;  %v12386_v25 = vadd.f32 %v12385_v61, %v12384_v1 }
 0x741   : > { %v12387_v36 = vpop.f32.mrf.mxu1 }
 0x743   : > { %v12388_v38 = vpop.f32.mrf.mxu1 }
 0x744   : > { %v12389_v56 = vadd.f32 %v12388_v38, %v12387_v36 }
 0x745   : > { %v12390_v21 = vpop.f32.mrf.mxu1 }
 0x746   : > { %v4115_v29 = vpack.c.bf16 %v12389_v56, %v12386_v25 }
 0x747   : > { %v12391_v57 = vpop.f32.mrf.mxu1 }
 0x748   : > { %13437 = vmatprep.mubr.msk.bf16.mxu0 %vm1479_vm1, %v4115_v29  ;;  %v12392_v59 = vadd.f32 %v12391_v57, %v12390_v21 }
 0x749   : > { %v12393_v46 = vpop.f32.mrf.mxu1 }
 0x74b   : > { %v12394_v58 = vpop.f32.mrf.mxu1 }
 0x74c   : > { %v12395_v0 = vadd.f32 %v12394_v58, %v12393_v46 }
 0x74d   : > { %v12396_v12 = vpop.f32.mrf.mxu1 }
 0x74e   : > { %v4116_v10 = vpack.c.bf16 %v12395_v0, %v12392_v59 }
 0x74f   : > { %v12397_v44 = vpop.f32.mrf.mxu1 }
 0x750   : > { %13438 = vmatmul.mubr.msk.bf16.gmra.mxu0 %vm1479_vm1, %v4116_v10  ;;  %v12398_v43 = vadd.f32 %v12397_v44, %v12396_v12 }
 0x751   : > { %v12399_v15 = vpop.f32.mrf.mxu1 }
 0x753   : > { %v12400_v9 = vpop.f32.mrf.mxu1 }
 0x754   : > { %v12401_v50 = vadd.f32 %v12400_v9, %v12399_v15 }
 0x755   : > { %v12402_v61 = vpop.f32.mrf.mxu1 }
 0x756   : > { %v4117_v1 = vpack.c.bf16 %v12401_v50, %v12398_v43 }
 0x757   : > { %v12403_v36 = vpop.f32.mrf.mxu1 }
 0x758   : > { %13441 = vmatprep.mubr.msk.bf16.mxu0 %vm1479_vm1, %v4117_v1  ;;  %v12404_v25 = vadd.f32 %v12403_v36, %v12402_v61 }
 0x759   : > { %v12405_v56 = vpop.f32.mrf.mxu1 }
 0x75b   : > { %v12406_v38 = vpop.f32.mrf.mxu1 }
 0x75c   : > { %v12407_v29 = vadd.f32 %v12406_v38, %v12405_v56 }
 0x75d   : > { %v12408_v21 = vpop.f32.mrf.mxu1 }
 0x75e   : > { %v4118_v57 = vpack.c.bf16 %v12407_v29, %v12404_v25 }
 0x75f   : > { %v12409_v46 = vpop.f32.mrf.mxu1 }
 0x760   : > { %13442 = vmatmul.mubr.msk.bf16.gmra.mxu0 %vm1479_vm1, %v4118_v57  ;;  %v12410_v0 = vadd.f32 %v12409_v46, %v12408_v21 }
 0x761   : > { %v12411_v58 = vpop.f32.mrf.mxu1 }
 0x763   : > { %v12412_v59 = vpop.f32.mrf.mxu1 }
 0x764   : > { %v12413_v10 = vadd.f32 %v12412_v59, %v12411_v58 }
 0x765   : > { %v12414_v12 = vpop.f32.mrf.mxu1 }
 0x766   : > { %v4119_v44 = vpack.c.bf16 %v12413_v10, %v12410_v0 }
 0x767   : > { %v12415_v15 = vpop.f32.mrf.mxu1 }
 0x768   : > { %13445 = vmatprep.mubr.msk.bf16.mxu0 %vm1479_vm1, %v4119_v44  ;;  %v12416_v50 = vadd.f32 %v12415_v15, %v12414_v12  ;;  %v14608_v12 = vld [vmem:[#allocation2 + $0x604] ss:$8 sps:$4 sm:$0xff]  }
 0x769   : > { %v12417_v9 = vpop.f32.mrf.mxu1 }
 0x76b   : > { %v12418_v43 = vpop.f32.mrf.mxu1 }
 0x76c   : > { %v12419_v1 = vadd.f32 %v12418_v43, %v12417_v9  ;;  %v14606_v9 = vld [vmem:[#allocation2 + $0x600] ss:$8 sps:$4 sm:$0xff]   ;;  %v14611_v43 = vld [vmem:[#allocation2 + $0x614] ss:$8 sps:$4 sm:$0xff]  }
 0x76d   : > { %v12420_v61 = vpop.f32.mrf.mxu1 }
 0x76e   : > { %v4120_v36 = vpack.c.bf16 %v12419_v1, %v12416_v50  ;;  %v14609_v50 = vld [vmem:[#allocation2 + $0x610] ss:$8 sps:$4 sm:$0xff]   ;;  %v14614_v1 = vld [vmem:[#allocation2 + $0x624] ss:$8 sps:$4 sm:$0xff]  }
 0x76f   : > { %v12421_v56 = vpop.f32.mrf.mxu1 }
 0x770   : > { %13446 = vmatmul.mubr.msk.bf16.gmra.mxu0 %vm1479_vm1, %v4120_v36  ;;  %v12422_v29 = vadd.f32 %v12421_v56, %v12420_v61  ;;  %v14612_v61 = vld [vmem:[#allocation2 + $0x620] ss:$8 sps:$4 sm:$0xff]   ;;  %v14617_v36 = vld [vmem:[#allocation2 + $0x634] ss:$8 sps:$4 sm:$0xff]   ;;  %v14615_v56 = vld [vmem:[#allocation2 + $0x630] ss:$8 sps:$4 sm:$0xff]  }
 0x771   : > { %v12423_v38 = vpop.f32.mrf.mxu1 }
 0x773   : > { %v12424_v25 = vpop.f32.mrf.mxu1 }
 0x774   : > { %v12425_v57 = vadd.f32 %v12424_v25, %v12423_v38  ;;  %v14620_v38 = vld [vmem:[#allocation2 + $0x644] ss:$8 sps:$4 sm:$0xff]   ;;  %v14618_v25 = vld [vmem:[#allocation2 + $0x640] ss:$8 sps:$4 sm:$0xff]  }
 0x775   : > { %v12426_v21 = vpop.f32.mrf.mxu1 }
 0x776   : > { %v4121_v46 = vpack.c.bf16 %v12425_v57, %v12422_v29  ;;  %v14623_v29 = vld [vmem:[#allocation2 + $0x654] ss:$8 sps:$4 sm:$0xff]   ;;  %v14621_v57 = vld [vmem:[#allocation2 + $0x650] ss:$8 sps:$4 sm:$0xff]  }
 0x777   : > { %v12427_v58 = vpop.f32.mrf.mxu1 }
 0x778   : > { %13449 = vmatprep.mubr.msk.bf16.mxu0 %vm1479_vm1, %v4121_v46  ;;  %v12428_v10 = vadd.f32 %v12427_v58, %v12426_v21  ;;  %v14626_v21 = vld [vmem:[#allocation2 + $0x664] ss:$8 sps:$4 sm:$0xff]   ;;  %v14624_v58 = vld [vmem:[#allocation2 + $0x660] ss:$8 sps:$4 sm:$0xff]  }
 0x779   : > { %v12429_v59 = vpop.f32.mrf.mxu1  ;;  %v4740_v46 = vld [vmem:[#allocation5 + $0xc] sm:$0x3] }
 0x77a   : > { %14127 = vmatprep.subr.msk.bf16.mxu1 %vm1528_vm0, %v4740_v46 }
 0x77b   : > { %v12430_v0 = vpop.f32.mrf.mxu1 }
 0x77c   : > { %v12431_v44 = vadd.f32 %v12430_v0, %v12429_v59  ;;  %v14629_v59 = vld [vmem:[#allocation2 + $0x674] ss:$8 sps:$4 sm:$0xff]   ;;  %v4790_v0 = vsel %vm1528_vm0, %v4740_v46, 0 }
 0x77d   : > { %13454 = vmatpush3.bf16.msra.mxu1 %v4790_v0 }
 0x77e   : > { %v4122_v15 = vpack.c.bf16 %v12431_v44, %v12428_v10  ;;  %12578 = vmatprep.subr.bf16.mxu1 %v15733_v3  ;;  %v14627_v10 = vld [vmem:[#allocation2 + $0x670] ss:$8 sps:$4 sm:$0xff]   ;;  %v14632_v44 = vld [vmem:[#allocation2 + $0x684] ss:$8 sps:$4 sm:$0xff]  }
 0x780   : > { %13450 = vmatmul.mubr.msk.bf16.gmra.mxu0 %vm1479_vm1, %v4122_v15  ;;  %v14635_v15 = vld [vmem:[#allocation2 + $0x694] ss:$8 sps:$4 sm:$0xff]  }
 0x781   : > { %4594 = vmatprep.mubr.bf16.mxu0 %v14608_v12  ;;  %v14630_v12 = vld [vmem:[#allocation2 + $0x680] ss:$8 sps:$4 sm:$0xff]  }
 0x788   : > { %4595 = vmatmul.mubr.bf16.vlgmr.msra.gmra.mxu0 %v14606_v9  ;;  %v14633_v9 = vld [vmem:[#allocation2 + $0x690] ss:$8 sps:$4 sm:$0xff]  }
 0x789   : > { %4602 = vmatprep.mubr.bf16.mxu0 %v14611_v43  ;;  %v14638_v43 = vld [vmem:[#allocation2 + $0x6a4] ss:$8 sps:$4 sm:$0xff]  }
 0x790   : > { %4603 = vmatmul.mubr.bf16.gmra.mxu0 %v14609_v50 }
 0x791   : > { %4610 = vmatprep.mubr.bf16.mxu0 %v14614_v1 }
 0x798   : > { %4611 = vmatmul.mubr.bf16.gmra.mxu0 %v14612_v61 }
 0x799   : > { %4618 = vmatprep.mubr.bf16.mxu0 %v14617_v36 }
 0x7a0   : > { %4619 = vmatmul.mubr.bf16.gmra.mxu0 %v14615_v56 }
 0x7a1   : > { %4626 = vmatprep.mubr.bf16.mxu0 %v14620_v38  ;;  %v14636_v38 = vld [vmem:[#allocation2 + $0x6a0] ss:$8 sps:$4 sm:$0xff]  }
 0x7a8   : > { %4627 = vmatmul.mubr.bf16.gmra.mxu0 %v14618_v25 }
 0x7a9   : > { %4634 = vmatprep.mubr.bf16.mxu0 %v14623_v29  ;;  %v14641_v29 = vld [vmem:[#allocation2 + $0x6b4] ss:$8 sps:$4 sm:$0xff]  }
 0x7b0   : > { %4635 = vmatmul.mubr.bf16.gmra.mxu0 %v14621_v57  ;;  %v14639_v57 = vld [vmem:[#allocation2 + $0x6b0] ss:$8 sps:$4 sm:$0xff]  }
 0x7b1   : > { %4642 = vmatprep.mubr.bf16.mxu0 %v14626_v21  ;;  %v14644_v21 = vld [vmem:[#allocation2 + $0x6c4] ss:$8 sps:$4 sm:$0xff]  }
 0x7b8   : > { %4643 = vmatmul.mubr.bf16.gmra.mxu0 %v14624_v58 }
 0x7b9   : > { %4650 = vmatprep.mubr.bf16.mxu0 %v14629_v59 }
 0x7c0   : > { %4651 = vmatmul.mubr.bf16.gmra.mxu0 %v14627_v10 }
 0x7c1   : > { %4658 = vmatprep.mubr.bf16.mxu0 %v14632_v44  ;;  %v14647_v44 = vld [vmem:[#allocation2 + $0x6d4] ss:$8 sps:$4 sm:$0xff]  }
 0x7c8   : > { %4659 = vmatmul.mubr.bf16.gmra.mxu0 %v14630_v12  ;;  %v14645_v12 = vld [vmem:[#allocation2 + $0x6d0] ss:$8 sps:$4 sm:$0xff]  }
 0x7c9   : > { %4666 = vmatprep.mubr.bf16.mxu0 %v14635_v15  ;;  %v14650_v15 = vld [vmem:[#allocation2 + $0x6e4] ss:$8 sps:$4 sm:$0xff]  }
 0x7d0   : > { %v13423_v50 = vpop.f32.mrf.mxu0  ;;  %4667 = vmatmul.mubr.bf16.gmra.mxu0 %v14633_v9 }
 0x7d1   : > { %v16362_v1 = vadd.f32 %v13423_v50, %v16240_v54  ;;  %4674 = vmatprep.mubr.bf16.mxu0 %v14638_v43 }
 0x7d2   : > { %v4210_v61 = vpop.f32.mrf.mxu0 }
 0x7d3   : > { %v16365_v36 = vadd.f32 %v4210_v61, %v16243_v4 }
 0x7d4   : > { %v13424_v56 = vpop.f32.mrf.mxu0 }
 0x7d5   : > { %v16368_v25 = vadd.f32 %v13424_v56, %v16246_v24  ;;  %v14642_v24 = vld [vmem:[#allocation2 + $0x6c0] ss:$8 sps:$4 sm:$0xff]  }
 0x7d6   : > { %v16370_v46 = vpop.f32.mrf.mxu0 }
 0x7d7   : > { %17533 = vst [vmem:[#allocation77_spill] sm:$0xff] %v16370_v46 }
 0x7d8   : > { %4675 = vmatmul.mubr.bf16.gmra.mxu0 %v14636_v38  ;;  %v14653_v38 = vld [vmem:[#allocation2 + $0x6f4] ss:$8 sps:$4 sm:$0xff]  }
 0x7d9   : > { %4682 = vmatprep.mubr.bf16.mxu0 %v14641_v29  ;;  %v14651_v29 = vld [vmem:[#allocation2 + $0x6f0] ss:$8 sps:$4 sm:$0xff]  }
 0x7e0   : > { %v13427_v58 = vpop.f32.mrf.mxu0  ;;  %4683 = vmatmul.mubr.bf16.gmra.mxu0 %v14639_v57 }
 0x7e1   : > { %v16373_v54 = vadd.f32 %v13427_v58, %v16251_v37  ;;  %4690 = vmatprep.mubr.bf16.mxu0 %v14644_v21 }
 0x7e2   : > { %v4226_v4 = vpop.f32.mrf.mxu0 }
 0x7e3   : > { %v16376_v59 = vadd.f32 %v4226_v4, %v16254_v55 }
 0x7e4   : > { %v13428_v0 = vpop.f32.mrf.mxu0 }
 0x7e5   : > { %v16379_v10 = vadd.f32 %v13428_v0, %v16257_v53  ;;  %v14648_v53 = vld [vmem:[#allocation2 + $0x6e0] ss:$8 sps:$4 sm:$0xff]  }
 0x7e6   : > { %v16381_v9 = vpop.f32.mrf.mxu0 }
 0x7e7   : > { %17534 = vst [vmem:[#allocation78_spill] sm:$0xff] %v16381_v9 }
 0x7e8   : > { %4691 = vmatmul.mubr.bf16.gmra.mxu0 %v14642_v24 }
 0x7e9   : > { %4698 = vmatprep.mubr.bf16.mxu0 %v14647_v44 }
 0x7f0   : > { %v13431_v43 = vpop.f32.mrf.mxu0  ;;  %4699 = vmatmul.mubr.bf16.gmra.mxu0 %v14645_v12 }
 0x7f1   : > { %v16384_v37 = vadd.f32 %v13431_v43, %v16262_v6  ;;  %4706 = vmatprep.mubr.bf16.mxu0 %v14650_v15 }
 0x7f2   : > { %v4242_v55 = vpop.f32.mrf.mxu0 }
 0x7f3   : > { %v16387_v50 = vadd.f32 %v4242_v55, %v16265_v62 }
 0x7f4   : > { %v13432_v61 = vpop.f32.mrf.mxu0 }
 0x7f5   : > { %v16390_v56 = vadd.f32 %v13432_v61, %v16268_v31 }
 0x7f6   : > { %v16392_v57 = vpop.f32.mrf.mxu0 }
 0x7f7   : > { %17535 = vst [vmem:[#allocation79_spill] sm:$0xff] %v16392_v57 }
 0x7f8   : > { %4707 = vmatmul.mubr.bf16.gmra.mxu0 %v14648_v53 }
 0x7f9   : > { %4714 = vmatprep.mubr.bf16.mxu0 %v14653_v38 }
 0x800   : > { %v13435_v21 = vpop.f32.mrf.mxu0  ;;  %4715 = vmatmul.mubr.bf16.gmra.mxu0 %v14651_v29 }
 0x801   : > { %v16395_v6 = vadd.f32 %v13435_v21, %v16273_v16 }
 0x802   : > { %v4258_v58 = vpop.f32.mrf.mxu0 }
 0x803   : > { %v16398_v62 = vadd.f32 %v4258_v58, %v16276_v34 }
 0x804   : > { %v13436_v4 = vpop.f32.mrf.mxu0 }
 0x805   : > { %v16401_v0 = vadd.f32 %v13436_v4, %v16279_v51 }
 0x806   : > { %v16403_v31 = vpop.f32.mrf.mxu0 }
 0x807   : > { %17536 = vst [vmem:[#allocation80_spill] sm:$0xff] %v16403_v31 }
 0x810   : > { %v13439_v24 = vpop.f32.mrf.mxu0 }
 0x811   : > { %v16406_v44 = vadd.f32 %v13439_v24, %v16284_v48 }
 0x812   : > { %v4274_v12 = vpop.f32.mrf.mxu0 }
 0x813   : > { %v16409_v15 = vadd.f32 %v4274_v12, %v16287_v22 }
 0x814   : > { %v13440_v16 = vpop.f32.mrf.mxu0 }
 0x815   : > { %v16412_v43 = vadd.f32 %v13440_v16, %v16290_v60 }
 0x816   : > { %v16414_v34 = vpop.f32.mrf.mxu0 }
 0x817   : > { %17537 = vst [vmem:[#allocation81_spill] sm:$0xff] %v16414_v34 }
 0x820   : > { %v13443_v55 = vpop.f32.mrf.mxu0 }
 0x821   : > { %v16417_v51 = vadd.f32 %v13443_v55, %v16295_v11 }
 0x822   : > { %v4290_v61 = vpop.f32.mrf.mxu0 }
 0x823   : > { %v16420_v53 = vadd.f32 %v4290_v61, %v16298_v23 }
 0x824   : > { %v13444_v48 = vpop.f32.mrf.mxu0 }
 0x825   : > { %v16423_v38 = vadd.f32 %v13444_v48, %v16301_v32 }
 0x826   : > { %v16425_v22 = vpop.f32.mrf.mxu0 }
 0x827   : > { %17538 = vst [vmem:[#allocation82_spill] sm:$0xff] %v16425_v22 }
 0x830   : > { %v13447_v29 = vpop.f32.mrf.mxu0 }
 0x831   : > { %v16428_v60 = vadd.f32 %v13447_v29, %v16306_v5 }
 0x832   : > { %v4306_v21 = vpop.f32.mrf.mxu0 }
 0x833   : > { %v16431_v58 = vadd.f32 %v4306_v21, %v16309_v52 }
 0x834   : > { %v13448_v11 = vpop.f32.mrf.mxu0 }
 0x835   : > { %v16434_v4 = vadd.f32 %v13448_v11, %v16312_v18 }
 0x836   : > { %v16436_v23 = vpop.f32.mrf.mxu0 }
 0x837   : > { %17539 = vst [vmem:[#allocation83_spill] sm:$0xff] %v16436_v23 }
 0x840   : > { %v13451_v24 = vpop.f32.mrf.mxu0 }
 0x841   : > { %v16439_v32 = vadd.f32 %v13451_v24, %v16317_v41 }
 0x842   : > { %v4322_v12 = vpop.f32.mrf.mxu0 }
 0x843   : > { %v16442_v16 = vadd.f32 %v4322_v12, %v16320_v40 }
 0x844   : > { %v13452_v5 = vpop.f32.mrf.mxu0 }
 0x845   : > { %v16445_v55 = vadd.f32 %v13452_v5, %v16323_v63 }
 0x846   : > { %v16447_v52 = vpop.f32.mrf.mxu0 }
 0x847   : > { %17540 = vst [vmem:[#allocation84_spill] sm:$0xff] %v16447_v52 }
 0x848   : > { %v12465_v61 = vpop.f32.mrf.mxu0 }
 0x84a   : > { %v12466_v48 = vpop.f32.mrf.mxu0 }
 0x84b   : > { %v12467_v21 = vadd.f32 %v12466_v48, %v12465_v61 }
 0x84c   : > { %v12468_v18 = vpop.f32.mrf.mxu0 }
 0x84e   : > { %v12469_v29 = vpop.f32.mrf.mxu0 }
 0x84f   : > { %v12470_v11 = vadd.f32 %v12469_v29, %v12468_v18 }
 0x850   : > { %v12471_v46 = vpop.f32.mrf.mxu0 }
 0x851   : > { %v4723_v34 = vpack.c.bf16 %v12470_v11, %v12467_v21 }
 0x852   : > { %v12472_v41 = vpop.f32.mrf.mxu0 }
 0x853   : > { %13455 = vmatprep.mubr.msk.bf16.mxu1 %vm1479_vm1, %v4723_v34  ;;  %v12473_v12 = vadd.f32 %v12472_v41, %v12471_v46 }
 0x854   : > { %v12474_v24 = vpop.f32.mrf.mxu0 }
 0x856   : > { %v12475_v40 = vpop.f32.mrf.mxu0 }
 0x857   : > { %v12476_v9 = vadd.f32 %v12475_v40, %v12474_v24 }
 0x858   : > { %v12477_v22 = vpop.f32.mrf.mxu0 }
 0x859   : > { %v4724_v63 = vpack.c.bf16 %v12476_v9, %v12473_v12 }
 0x85a   : > { %v12478_v5 = vpop.f32.mrf.mxu0 }
 0x85b   : > { %13456 = vmatmul.mubr.msk.bf16.vlgmr.msra.gmra.mxu1 %vm1479_vm1, %v4724_v63  ;;  %v12479_v48 = vadd.f32 %v12478_v5, %v12477_v22 }
 0x85c   : > { %v12480_v57 = vpop.f32.mrf.mxu0  ;;  %12579 = vmatpush3.bf16.msra.mxu1 %v15738_v7 }
 0x85d   : > { %12580 = vmatprep.subr.bf16.mxu1 %v15740_v8 }
 0x85e   : > { %v12481_v61 = vpop.f32.mrf.mxu0 }
 0x85f   : > { %v12482_v18 = vadd.f32 %v12481_v61, %v12480_v57 }
 0x860   : > { %v12483_v29 = vpop.f32.mrf.mxu0  ;;  %12581 = vmatpush3.bf16.msra.mxu1 %v15750_v13 }
 0x861   : > { %v4725_v34 = vpack.c.bf16 %v12482_v18, %v12479_v48  ;;  %12582 = vmatprep.subr.bf16.mxu1 %v15754_v14 }
 0x862   : > { %v12484_v46 = vpop.f32.mrf.mxu0 }
 0x863   : > { %13459 = vmatprep.mubr.msk.bf16.mxu1 %vm1479_vm1, %v4725_v34  ;;  %v12485_v11 = vadd.f32 %v12484_v46, %v12483_v29 }
 0x864   : > { %v12486_v9 = vpop.f32.mrf.mxu0  ;;  %12583 = vmatpush3.bf16.msra.mxu1 %v15762_v19 }
 0x865   : > { %12584 = vmatprep.subr.bf16.mxu1 %v15766_v20 }
 0x866   : > { %v12487_v21 = vpop.f32.mrf.mxu0 }
 0x867   : > { %v12488_v41 = vadd.f32 %v12487_v21, %v12486_v9 }
 0x868   : > { %v12489_v24 = vpop.f32.mrf.mxu0  ;;  %12585 = vmatpush3.bf16.msra.mxu1 %v15776_v28 }
 0x869   : > { %v4726_v57 = vpack.c.bf16 %v12488_v41, %v12485_v11  ;;  %12586 = vmatprep.subr.bf16.mxu1 %v15781_v30 }
 0x86a   : > { %v12490_v22 = vpop.f32.mrf.mxu0 }
 0x86b   : > { %13460 = vmatmul.mubr.msk.bf16.gmra.mxu1 %vm1479_vm1, %v4726_v57  ;;  %v12491_v63 = vadd.f32 %v12490_v22, %v12489_v24 }
 0x86c   : > { %v12492_v40 = vpop.f32.mrf.mxu0  ;;  %12587 = vmatpush3.bf16.msra.mxu1 %v15786_v33 }
 0x86d   : > { %12588 = vmatprep.subr.bf16.mxu1 %v15791_v35 }
 0x86e   : > { %v12493_v12 = vpop.f32.mrf.mxu0 }
 0x86f   : > { %v12494_v5 = vadd.f32 %v12493_v12, %v12492_v40 }
 0x870   : > { %v12495_v61 = vpop.f32.mrf.mxu0  ;;  %12589 = vmatpush3.bf16.msra.mxu1 %v15798_v39 }
 0x871   : > { %v4727_v48 = vpack.c.bf16 %v12494_v5, %v12491_v63  ;;  %12590 = vmatprep.subr.bf16.mxu1 %v15804_v42 }
 0x872   : > { %v12496_v18 = vpop.f32.mrf.mxu0 }
 0x873   : > { %13463 = vmatprep.mubr.msk.bf16.mxu1 %vm1479_vm1, %v4727_v48  ;;  %v12497_v46 = vadd.f32 %v12496_v18, %v12495_v61 }
 0x874   : > { %v12498_v29 = vpop.f32.mrf.mxu0  ;;  %12591 = vmatpush3.bf16.msra.mxu1 %v15810_v45 }
 0x875   : > { %12592 = vmatprep.subr.bf16.mxu1 %v15815_v47 }
 0x876   : > { %v12499_v34 = vpop.f32.mrf.mxu0 }
 0x877   : > { %v12500_v9 = vadd.f32 %v12499_v34, %v12498_v29 }
 0x878   : > { %v12501_v21 = vpop.f32.mrf.mxu0  ;;  %12593 = vmatpush3.bf16.msra.mxu1 %v15820_v49 }
 0x879   : > { %v4728_v11 = vpack.c.bf16 %v12500_v9, %v12497_v46 }
 0x87a   : > { %v12502_v41 = vpop.f32.mrf.mxu0 }
 0x87b   : > { %13464 = vmatmul.mubr.msk.bf16.gmra.mxu1 %vm1479_vm1, %v4728_v11  ;;  %v12503_v22 = vadd.f32 %v12502_v41, %v12501_v21 }
 0x87c   : > { %v12504_v24 = vpop.f32.mrf.mxu0 }
 0x87e   : > { %v12505_v57 = vpop.f32.mrf.mxu0 }
 0x87f   : > { %v12506_v40 = vadd.f32 %v12505_v57, %v12504_v24 }
 0x880   : > { %v12507_v12 = vpop.f32.mrf.mxu0 }
 0x881   : > { %v4729_v63 = vpack.c.bf16 %v12506_v40, %v12503_v22 }
 0x882   : > { %v12508_v5 = vpop.f32.mrf.mxu0 }
 0x883   : > { %13467 = vmatprep.mubr.msk.bf16.mxu1 %vm1479_vm1, %v4729_v63  ;;  %v12509_v61 = vadd.f32 %v12508_v5, %v12507_v12 }
 0x884   : > { %v12510_v48 = vpop.f32.mrf.mxu0 }
 0x886   : > { %v12511_v23 = vpop.f32.mrf.mxu0 }
 0x887   : > { %v12512_v18 = vadd.f32 %v12511_v23, %v12510_v48 }
 0x888   : > { %v12513_v29 = vpop.f32.mrf.mxu0 }
 0x889   : > { %v4730_v34 = vpack.c.bf16 %v12512_v18, %v12509_v61 }
 0x88a   : > { %v12514_v52 = vpop.f32.mrf.mxu0 }
 0x88b   : > { %13468 = vmatmul.mubr.msk.bf16.gmra.mxu1 %vm1479_vm1, %v4730_v34  ;;  %v12515_v11 = vadd.f32 %v12514_v52, %v12513_v29 }
 0x88c   : > { %v12516_v46 = vpop.f32.mrf.mxu0 }
 0x88e   : > { %v12517_v9 = vpop.f32.mrf.mxu0 }
 0x88f   : > { %v12518_v31 = vadd.f32 %v12517_v9, %v12516_v46 }
 0x890   : > { %v12519_v21 = vpop.f32.mrf.mxu0 }
 0x891   : > { %v4731_v41 = vpack.c.bf16 %v12518_v31, %v12515_v11 }
 0x892   : > { %v12520_v24 = vpop.f32.mrf.mxu0 }
 0x893   : > { %13471 = vmatprep.mubr.msk.bf16.mxu1 %vm1479_vm1, %v4731_v41  ;;  %v12521_v40 = vadd.f32 %v12520_v24, %v12519_v21 }
 0x894   : > { %v12522_v57 = vpop.f32.mrf.mxu0 }
 0x896   : > { %v12523_v22 = vpop.f32.mrf.mxu0 }
 0x897   : > { %v12524_v63 = vadd.f32 %v12523_v22, %v12522_v57 }
 0x898   : > { %v12525_v12 = vpop.f32.mrf.mxu0 }
 0x899   : > { %v4732_v23 = vpack.c.bf16 %v12524_v63, %v12521_v40 }
 0x89a   : > { %v12526_v5 = vpop.f32.mrf.mxu0 }
 0x89b   : > { %13472 = vmatmul.mubr.msk.bf16.gmra.mxu1 %vm1479_vm1, %v4732_v23  ;;  %v12527_v18 = vadd.f32 %v12526_v5, %v12525_v12 }
 0x89c   : > { %v12528_v48 = vpop.f32.mrf.mxu0 }
 0x89e   : > { %v12529_v61 = vpop.f32.mrf.mxu0 }
 0x89f   : > { %v12530_v34 = vadd.f32 %v12529_v61, %v12528_v48 }
 0x8a0   : > { %v12531_v52 = vpop.f32.mrf.mxu0 }
 0x8a1   : > { %v4733_v29 = vpack.c.bf16 %v12530_v34, %v12527_v18 }
 0x8a2   : > { %v12532_v46 = vpop.f32.mrf.mxu0 }
 0x8a3   : > { %13475 = vmatprep.mubr.msk.bf16.mxu1 %vm1479_vm1, %v4733_v29  ;;  %v12533_v11 = vadd.f32 %v12532_v46, %v12531_v52 }
 0x8a4   : > { %v12534_v31 = vpop.f32.mrf.mxu0 }
 0x8a6   : > { %v12535_v9 = vpop.f32.mrf.mxu0 }
 0x8a7   : > { %v12536_v41 = vadd.f32 %v12535_v9, %v12534_v31 }
 0x8a8   : > { %v12537_v21 = vpop.f32.mrf.mxu0 }
 0x8a9   : > { %v4734_v24 = vpack.c.bf16 %v12536_v41, %v12533_v11 }
 0x8aa   : > { %v12538_v57 = vpop.f32.mrf.mxu0 }
 0x8ab   : > { %13476 = vmatmul.mubr.msk.bf16.gmra.mxu1 %vm1479_vm1, %v4734_v24  ;;  %v12539_v63 = vadd.f32 %v12538_v57, %v12537_v21 }
 0x8ac   : > { %v12540_v22 = vpop.f32.mrf.mxu0 }
 0x8ae   : > { %v12541_v40 = vpop.f32.mrf.mxu0 }
 0x8af   : > { %v12542_v23 = vadd.f32 %v12541_v40, %v12540_v22 }
 0x8b0   : > { %v12543_v12 = vpop.f32.mrf.mxu0 }
 0x8b1   : > { %v4735_v5 = vpack.c.bf16 %v12542_v23, %v12539_v63 }
 0x8b2   : > { %v12544_v48 = vpop.f32.mrf.mxu0 }
 0x8b3   : > { %13479 = vmatprep.mubr.msk.bf16.mxu1 %vm1479_vm1, %v4735_v5  ;;  %v12545_v34 = vadd.f32 %v12544_v48, %v12543_v12  ;;  %v14656_v12 = vld [vmem:[#allocation2 + $0x704] ss:$8 sps:$4 sm:$0xff]  }
 0x8b4   : > { %v12546_v61 = vpop.f32.mrf.mxu0 }
 0x8b6   : > { %v12547_v18 = vpop.f32.mrf.mxu0 }
 0x8b7   : > { %v12548_v29 = vadd.f32 %v12547_v18, %v12546_v61  ;;  %v14654_v61 = vld [vmem:[#allocation2 + $0x700] ss:$8 sps:$4 sm:$0xff]   ;;  %v14659_v18 = vld [vmem:[#allocation2 + $0x714] ss:$8 sps:$4 sm:$0xff]  }
 0x8b8   : > { %v12549_v52 = vpop.f32.mrf.mxu0 }
 0x8b9   : > { %v4736_v46 = vpack.c.bf16 %v12548_v29, %v12545_v34  ;;  %v14657_v34 = vld [vmem:[#allocation2 + $0x710] ss:$8 sps:$4 sm:$0xff]   ;;  %v14662_v29 = vld [vmem:[#allocation2 + $0x724] ss:$8 sps:$4 sm:$0xff]  }
 0x8ba   : > { %v12550_v31 = vpop.f32.mrf.mxu0 }
 0x8bb   : > { %13480 = vmatmul.mubr.msk.bf16.gmra.mxu1 %vm1479_vm1, %v4736_v46  ;;  %v12551_v41 = vadd.f32 %v12550_v31, %v12549_v52  ;;  %v14660_v52 = vld [vmem:[#allocation2 + $0x720] ss:$8 sps:$4 sm:$0xff]   ;;  %v14665_v46 = vld [vmem:[#allocation2 + $0x734] ss:$8 sps:$4 sm:$0xff]   ;;  %v14663_v31 = vld [vmem:[#allocation2 + $0x730] ss:$8 sps:$4 sm:$0xff]  }
 0x8bc   : > { %v12552_v9 = vpop.f32.mrf.mxu0 }
 0x8be   : > { %v12553_v11 = vpop.f32.mrf.mxu0 }
 0x8bf   : > { %v12554_v24 = vadd.f32 %v12553_v11, %v12552_v9  ;;  %v14668_v9 = vld [vmem:[#allocation2 + $0x744] ss:$8 sps:$4 sm:$0xff]   ;;  %v14666_v11 = vld [vmem:[#allocation2 + $0x740] ss:$8 sps:$4 sm:$0xff]  }
 0x8c0   : > { %v12555_v21 = vpop.f32.mrf.mxu0 }
 0x8c1   : > { %v4737_v57 = vpack.c.bf16 %v12554_v24, %v12551_v41  ;;  %v14671_v41 = vld [vmem:[#allocation2 + $0x754] ss:$8 sps:$4 sm:$0xff]   ;;  %v14669_v24 = vld [vmem:[#allocation2 + $0x750] ss:$8 sps:$4 sm:$0xff]  }
 0x8c2   : > { %v12556_v22 = vpop.f32.mrf.mxu0 }
 0x8c3   : > { %13483 = vmatprep.mubr.msk.bf16.mxu1 %vm1479_vm1, %v4737_v57  ;;  %v12557_v23 = vadd.f32 %v12556_v22, %v12555_v21  ;;  %v14674_v21 = vld [vmem:[#allocation2 + $0x764] ss:$8 sps:$4 sm:$0xff]   ;;  %v14672_v22 = vld [vmem:[#allocation2 + $0x760] ss:$8 sps:$4 sm:$0xff]  }
 0x8c4   : > { %v12558_v40 = vpop.f32.mrf.mxu0  ;;  %v5356_v57 = vld [vmem:[#allocation5 + $0xe] sm:$0x3] }
 0x8c5   : > { %14128 = vmatprep.subr.msk.bf16.mxu0 %vm1528_vm0, %v5356_v57 }
 0x8c6   : > { %v12559_v63 = vpop.f32.mrf.mxu0 }
 0x8c7   : > { %v12560_v5 = vadd.f32 %v12559_v63, %v12558_v40  ;;  %v14677_v40 = vld [vmem:[#allocation2 + $0x774] ss:$8 sps:$4 sm:$0xff]   ;;  %v5406_v63 = vsel %vm1528_vm0, %v5356_v57, 0 }
 0x8c8   : > { %13488 = vmatpush3.bf16.msra.mxu0 %v5406_v63 }
 0x8c9   : > { %v4738_v48 = vpack.c.bf16 %v12560_v5, %v12557_v23  ;;  %12707 = vmatprep.subr.bf16.mxu0 %v15733_v3  ;;  %v14675_v23 = vld [vmem:[#allocation2 + $0x770] ss:$8 sps:$4 sm:$0xff]   ;;  %v14680_v5 = vld [vmem:[#allocation2 + $0x784] ss:$8 sps:$4 sm:$0xff]  }
 0x8cb   : > { %13484 = vmatmul.mubr.msk.bf16.gmra.mxu1 %vm1479_vm1, %v4738_v48  ;;  %v14683_v48 = vld [vmem:[#allocation2 + $0x794] ss:$8 sps:$4 sm:$0xff]  }
 0x8cc   : > { %5210 = vmatprep.mubr.bf16.mxu1 %v14656_v12  ;;  %v14678_v12 = vld [vmem:[#allocation2 + $0x780] ss:$8 sps:$4 sm:$0xff]  }
 0x8d3   : > { %5211 = vmatmul.mubr.bf16.vlgmr.msra.gmra.mxu1 %v14654_v61  ;;  %v14681_v61 = vld [vmem:[#allocation2 + $0x790] ss:$8 sps:$4 sm:$0xff]  }
 0x8d4   : > { %5218 = vmatprep.mubr.bf16.mxu1 %v14659_v18  ;;  %v14686_v18 = vld [vmem:[#allocation2 + $0x7a4] ss:$8 sps:$4 sm:$0xff]  }
 0x8db   : > { %5219 = vmatmul.mubr.bf16.gmra.mxu1 %v14657_v34 }
 0x8dc   : > { %5226 = vmatprep.mubr.bf16.mxu1 %v14662_v29 }
 0x8e3   : > { %5227 = vmatmul.mubr.bf16.gmra.mxu1 %v14660_v52 }
 0x8e4   : > { %5234 = vmatprep.mubr.bf16.mxu1 %v14665_v46 }
 0x8eb   : > { %5235 = vmatmul.mubr.bf16.gmra.mxu1 %v14663_v31  ;;  %v14684_v31 = vld [vmem:[#allocation2 + $0x7a0] ss:$8 sps:$4 sm:$0xff]  }
 0x8ec   : > { %5242 = vmatprep.mubr.bf16.mxu1 %v14668_v9 }
 0x8f3   : > { %5243 = vmatmul.mubr.bf16.gmra.mxu1 %v14666_v11  ;;  %v14689_v11 = vld [vmem:[#allocation2 + $0x7b4] ss:$8 sps:$4 sm:$0xff]  }
 0x8f4   : > { %5250 = vmatprep.mubr.bf16.mxu1 %v14671_v41  ;;  %v14687_v41 = vld [vmem:[#allocation2 + $0x7b0] ss:$8 sps:$4 sm:$0xff]  }
 0x8fb   : > { %5251 = vmatmul.mubr.bf16.gmra.mxu1 %v14669_v24  ;;  %v14692_v24 = vld [vmem:[#allocation2 + $0x7c4] ss:$8 sps:$4 sm:$0xff]  }
 0x8fc   : > { %5258 = vmatprep.mubr.bf16.mxu1 %v14674_v21 }
 0x903   : > { %5259 = vmatmul.mubr.bf16.gmra.mxu1 %v14672_v22 }
 0x904   : > { %5266 = vmatprep.mubr.bf16.mxu1 %v14677_v40 }
 0x90b   : > { %5267 = vmatmul.mubr.bf16.gmra.mxu1 %v14675_v23  ;;  %v14695_v23 = vld [vmem:[#allocation2 + $0x7d4] ss:$8 sps:$4 sm:$0xff]  }
 0x90c   : > { %5274 = vmatprep.mubr.bf16.mxu1 %v14680_v5  ;;  %v14693_v5 = vld [vmem:[#allocation2 + $0x7d0] ss:$8 sps:$4 sm:$0xff]  }
 0x913   : > { %5275 = vmatmul.mubr.bf16.gmra.mxu1 %v14678_v12  ;;  %v14698_v12 = vld [vmem:[#allocation2 + $0x7e4] ss:$8 sps:$4 sm:$0xff]  }
 0x914   : > { %5282 = vmatprep.mubr.bf16.mxu1 %v14683_v48 }
 0x91b   : > { %v13457_v34 = vpop.f32.mrf.mxu1  ;;  %5283 = vmatmul.mubr.bf16.gmra.mxu1 %v14681_v61 }
 0x91c   : > { %v16484_v29 = vadd.f32 %v13457_v34, %v16362_v1  ;;  %5290 = vmatprep.mubr.bf16.mxu1 %v14686_v18 }
 0x91d   : > { %v4826_v52 = vpop.f32.mrf.mxu1 }
 0x91e   : > { %v16487_v3 = vadd.f32 %v4826_v52, %v16365_v36 }
 0x91f   : > { %v13458_v46 = vpop.f32.mrf.mxu1 }
 0x920   : > { %v16490_v9 = vadd.f32 %v13458_v46, %v16368_v25  ;;  %v14690_v25 = vld [vmem:[#allocation2 + $0x7c0] ss:$8 sps:$4 sm:$0xff]   ;;  %v14701_v46 = vld [vmem:[#allocation2 + $0x7f4] ss:$8 sps:$4 sm:$0xff]  }
 0x921   : > { %v16492_v21 = vpop.f32.mrf.mxu1 }
 0x922   : > { %17541 = vst [vmem:[#allocation85_spill] sm:$0xff] %v16492_v21 }
 0x923   : > { %5291 = vmatmul.mubr.bf16.gmra.mxu1 %v14684_v31  ;;  %v14699_v31 = vld [vmem:[#allocation2 + $0x7f0] ss:$8 sps:$4 sm:$0xff]  }
 0x924   : > { %5298 = vmatprep.mubr.bf16.mxu1 %v14689_v11 }
 0x92b   : > { %v13461_v57 = vpop.f32.mrf.mxu1  ;;  %5299 = vmatmul.mubr.bf16.gmra.mxu1 %v14687_v41 }
 0x92c   : > { %v16495_v1 = vadd.f32 %v13461_v57, %v16373_v54  ;;  %5306 = vmatprep.mubr.bf16.mxu1 %v14692_v24 }
 0x92d   : > { %v4842_v36 = vpop.f32.mrf.mxu1 }
 0x92e   : > { %v16498_v22 = vadd.f32 %v4842_v36, %v16376_v59 }
 0x92f   : > { %v13462_v40 = vpop.f32.mrf.mxu1 }
 0x930   : > { %v16501_v63 = vadd.f32 %v13462_v40, %v16379_v10  ;;  %v14696_v10 = vld [vmem:[#allocation2 + $0x7e0] ss:$8 sps:$4 sm:$0xff]  }
 0x931   : > { %v16503_v48 = vpop.f32.mrf.mxu1 }
 0x932   : > { %17542 = vst [vmem:[#allocation86_spill] sm:$0xff] %v16503_v48 }
 0x933   : > { %5307 = vmatmul.mubr.bf16.gmra.mxu1 %v14690_v25 }
 0x934   : > { %5314 = vmatprep.mubr.bf16.mxu1 %v14695_v23 }
 0x93b   : > { %v13465_v61 = vpop.f32.mrf.mxu1  ;;  %5315 = vmatmul.mubr.bf16.gmra.mxu1 %v14693_v5 }
 0x93c   : > { %v16506_v54 = vadd.f32 %v13465_v61, %v16384_v37  ;;  %5322 = vmatprep.mubr.bf16.mxu1 %v14698_v12 }
 0x93d   : > { %v4858_v59 = vpop.f32.mrf.mxu1 }
 0x93e   : > { %v16509_v18 = vadd.f32 %v4858_v59, %v16387_v50 }
 0x93f   : > { %v13466_v34 = vpop.f32.mrf.mxu1 }
 0x940   : > { %v16512_v52 = vadd.f32 %v13466_v34, %v16390_v56 }
 0x941   : > { %v16514_v11 = vpop.f32.mrf.mxu1 }
 0x943   : > { %5323 = vmatmul.mubr.bf16.gmra.mxu1 %v14696_v10 }
 0x944   : > { %5330 = vmatprep.mubr.bf16.mxu1 %v14701_v46 }
 0x94b   : > { %v13469_v41 = vpop.f32.mrf.mxu1  ;;  %5331 = vmatmul.mubr.bf16.gmra.mxu1 %v14699_v31 }
 0x94c   : > { %v16517_v37 = vadd.f32 %v13469_v41, %v16395_v6 }
 0x94d   : > { %v4874_v24 = vpop.f32.mrf.mxu1 }
 0x94e   : > { %v16520_v50 = vadd.f32 %v4874_v24, %v16398_v62 }
 0x94f   : > { %v13470_v57 = vpop.f32.mrf.mxu1 }
 0x950   : > { %v16523_v36 = vadd.f32 %v13470_v57, %v16401_v0 }
 0x951   : > { %v16525_v56 = vpop.f32.mrf.mxu1 }
 0x95b   : > { %v13473_v40 = vpop.f32.mrf.mxu1 }
 0x95c   : > { %v16528_v25 = vadd.f32 %v13473_v40, %v16406_v44 }
 0x95d   : > { %v4890_v23 = vpop.f32.mrf.mxu1 }
 0x95e   : > { %v16531_v5 = vadd.f32 %v4890_v23, %v16409_v15 }
 0x95f   : > { %v13474_v6 = vpop.f32.mrf.mxu1 }
 0x960   : > { %v16534_v12 = vadd.f32 %v13474_v6, %v16412_v43 }
 0x961   : > { %v16536_v62 = vpop.f32.mrf.mxu1 }
 0x962   : > { %17543 = vst [vmem:[#allocation87_spill] sm:$0xff] %v16536_v62 }
 0x96b   : > { %v13477_v61 = vpop.f32.mrf.mxu1 }
 0x96c   : > { %v16539_v0 = vadd.f32 %v13477_v61, %v16417_v51 }
 0x96d   : > { %v4906_v59 = vpop.f32.mrf.mxu1 }
 0x96e   : > { %v16542_v34 = vadd.f32 %v4906_v59, %v16420_v53 }
 0x96f   : > { %v13478_v44 = vpop.f32.mrf.mxu1 }
 0x970   : > { %v16545_v10 = vadd.f32 %v13478_v44, %v16423_v38 }
 0x971   : > { %v16547_v15 = vpop.f32.mrf.mxu1 }
 0x972   : > { %17544 = vst [vmem:[#allocation88_spill] sm:$0xff] %v16547_v15 }
 0x97b   : > { %v13481_v46 = vpop.f32.mrf.mxu1 }
 0x97c   : > { %v16550_v43 = vadd.f32 %v13481_v46, %v16428_v60 }
 0x97d   : > { %v4922_v31 = vpop.f32.mrf.mxu1 }
 0x97e   : > { %v16553_v41 = vadd.f32 %v4922_v31, %v16431_v58 }
 0x97f   : > { %v13482_v51 = vpop.f32.mrf.mxu1 }
 0x980   : > { %v16556_v24 = vadd.f32 %v13482_v51, %v16434_v4 }
 0x981   : > { %v16558_v53 = vpop.f32.mrf.mxu1 }
 0x98b   : > { %v13485_v57 = vpop.f32.mrf.mxu1 }
 0x98c   : > { %v16561_v38 = vadd.f32 %v13485_v57, %v16439_v32 }
 0x98d   : > { %v4938_v40 = vpop.f32.mrf.mxu1 }
 0x98e   : > { %v16564_v23 = vadd.f32 %v4938_v40, %v16442_v16 }
 0x98f   : > { %v13486_v60 = vpop.f32.mrf.mxu1 }
 0x990   : > { %v16567_v6 = vadd.f32 %v13486_v60, %v16445_v55 }
 0x991   : > { %v16569_v58 = vpop.f32.mrf.mxu1 }
 0x993   : > { %v12594_v61 = vpop.f32.mrf.mxu1 }
 0x995   : > { %v12595_v59 = vpop.f32.mrf.mxu1 }
 0x996   : > { %v12596_v46 = vadd.f32 %v12595_v59, %v12594_v61 }
 0x997   : > { %v12597_v4 = vpop.f32.mrf.mxu1 }
 0x999   : > { %v12598_v44 = vpop.f32.mrf.mxu1 }
 0x99a   : > { %v12599_v31 = vadd.f32 %v12598_v44, %v12597_v4 }
 0x99b   : > { %v12600_v51 = vpop.f32.mrf.mxu1 }
 0x99c   : > { %v5339_v21 = vpack.c.bf16 %v12599_v31, %v12596_v46 }
 0x99d   : > { %v12601_v32 = vpop.f32.mrf.mxu1 }
 0x99e   : > { %13489 = vmatprep.mubr.msk.bf16.mxu0 %vm1479_vm1, %v5339_v21  ;;  %v12602_v40 = vadd.f32 %v12601_v32, %v12600_v51 }
 0x99f   : > { %v12603_v57 = vpop.f32.mrf.mxu1 }
 0x9a1   : > { %v12604_v16 = vpop.f32.mrf.mxu1 }
 0x9a2   : > { %v12605_v62 = vadd.f32 %v12604_v16, %v12603_v57 }
 0x9a3   : > { %v12606_v48 = vpop.f32.mrf.mxu1 }
 0x9a4   : > { %v5340_v55 = vpack.c.bf16 %v12605_v62, %v12602_v40 }
 0x9a5   : > { %v12607_v60 = vpop.f32.mrf.mxu1 }
 0x9a6   : > { %13490 = vmatmul.mubr.msk.bf16.vlgmr.msra.gmra.mxu0 %vm1479_vm1, %v5340_v55  ;;  %v12608_v59 = vadd.f32 %v12607_v60, %v12606_v48 }
 0x9a7   : > { %v12609_v15 = vpop.f32.mrf.mxu1  ;;  %12708 = vmatpush3.bf16.msra.mxu0 %v15738_v7 }
 0x9a8   : > { %12709 = vmatprep.subr.bf16.mxu0 %v15740_v8 }
 0x9a9   : > { %v12610_v61 = vpop.f32.mrf.mxu1 }
 0x9aa   : > { %v12611_v4 = vadd.f32 %v12610_v61, %v12609_v15 }
 0x9ab   : > { %v12612_v44 = vpop.f32.mrf.mxu1  ;;  %12710 = vmatpush3.bf16.msra.mxu0 %v15750_v13 }
 0x9ac   : > { %v5341_v21 = vpack.c.bf16 %v12611_v4, %v12608_v59  ;;  %12711 = vmatprep.subr.bf16.mxu0 %v15754_v14 }
 0x9ad   : > { %v12613_v46 = vpop.f32.mrf.mxu1 }
 0x9ae   : > { %13493 = vmatprep.mubr.msk.bf16.mxu0 %vm1479_vm1, %v5341_v21  ;;  %v12614_v31 = vadd.f32 %v12613_v46, %v12612_v44 }
 0x9af   : > { %v12615_v62 = vpop.f32.mrf.mxu1  ;;  %12712 = vmatpush3.bf16.msra.mxu0 %v15762_v19 }
 0x9b0   : > { %12713 = vmatprep.subr.bf16.mxu0 %v15766_v20 }
 0x9b1   : > { %v12616_v7 = vpop.f32.mrf.mxu1 }
 0x9b2   : > { %v12617_v8 = vadd.f32 %v12616_v7, %v12615_v62 }
 0x9b3   : > { %v12618_v51 = vpop.f32.mrf.mxu1  ;;  %12714 = vmatpush3.bf16.msra.mxu0 %v15776_v28 }
 0x9b4   : > { %v5342_v48 = vpack.c.bf16 %v12617_v8, %v12614_v31  ;;  %12715 = vmatprep.subr.bf16.mxu0 %v15781_v30 }
 0x9b5   : > { %v12619_v13 = vpop.f32.mrf.mxu1 }
 0x9b6   : > { %13494 = vmatmul.mubr.msk.bf16.gmra.mxu0 %vm1479_vm1, %v5342_v48  ;;  %v12620_v15 = vadd.f32 %v12619_v13, %v12618_v51 }
 0x9b7   : > { %v12621_v14 = vpop.f32.mrf.mxu1  ;;  %12716 = vmatpush3.bf16.msra.mxu0 %v15786_v33 }
 0x9b8   : > { %12717 = vmatprep.subr.bf16.mxu0 %v15791_v35 }
 0x9b9   : > { %v12622_v19 = vpop.f32.mrf.mxu1 }
 0x9ba   : > { %v12623_v20 = vadd.f32 %v12622_v19, %v12621_v14 }
 0x9bb   : > { %v12624_v32 = vpop.f32.mrf.mxu1  ;;  %12718 = vmatpush3.bf16.msra.mxu0 %v15798_v39 }
 0x9bc   : > { %v5343_v57 = vpack.c.bf16 %v12623_v20, %v12620_v15  ;;  %12719 = vmatprep.subr.bf16.mxu0 %v15804_v42 }
 0x9bd   : > { %v12625_v28 = vpop.f32.mrf.mxu1 }
 0x9be   : > { %13497 = vmatprep.mubr.msk.bf16.mxu0 %vm1479_vm1, %v5343_v57  ;;  %v12626_v16 = vadd.f32 %v12625_v28, %v12624_v32 }
 0x9bf   : > { %v12627_v30 = vpop.f32.mrf.mxu1  ;;  %12720 = vmatpush3.bf16.msra.mxu0 %v15810_v45 }
 0x9c0   : > { %12721 = vmatprep.subr.bf16.mxu0 %v15815_v47 }
 0x9c1   : > { %v12628_v33 = vpop.f32.mrf.mxu1 }
 0x9c2   : > { %v12629_v35 = vadd.f32 %v12628_v33, %v12627_v30 }
 0x9c3   : > { %v12630_v40 = vpop.f32.mrf.mxu1  ;;  %12722 = vmatpush3.bf16.msra.mxu0 %v15820_v49 }
 0x9c4   : > { %v5344_v55 = vpack.c.bf16 %v12629_v35, %v12626_v16 }
 0x9c5   : > { %v12631_v60 = vpop.f32.mrf.mxu1 }
 0x9c6   : > { %13498 = vmatmul.mubr.msk.bf16.gmra.mxu0 %vm1479_vm1, %v5344_v55  ;;  %v12632_v61 = vadd.f32 %v12631_v60, %v12630_v40 }
 0x9c7   : > { %v12633_v39 = vpop.f32.mrf.mxu1 }
 0x9c9   : > { %v12634_v42 = vpop.f32.mrf.mxu1 }
 0x9ca   : > { %v12635_v59 = vadd.f32 %v12634_v42, %v12633_v39 }
 0x9cb   : > { %v12636_v4 = vpop.f32.mrf.mxu1 }
 0x9cc   : > { %v5345_v44 = vpack.c.bf16 %v12635_v59, %v12632_v61 }
 0x9cd   : > { %v12637_v21 = vpop.f32.mrf.mxu1 }
 0x9ce   : > { %13501 = vmatprep.mubr.msk.bf16.mxu0 %vm1479_vm1, %v5345_v44  ;;  %v12638_v46 = vadd.f32 %v12637_v21, %v12636_v4 }
 0x9cf   : > { %v12639_v45 = vpop.f32.mrf.mxu1 }
 0x9d1   : > { %v12640_v47 = vpop.f32.mrf.mxu1 }
 0x9d2   : > { %v12641_v62 = vadd.f32 %v12640_v47, %v12639_v45 }
 0x9d3   : > { %v12642_v7 = vpop.f32.mrf.mxu1 }
 0x9d4   : > { %v5346_v31 = vpack.c.bf16 %v12641_v62, %v12638_v46 }
 0x9d5   : > { %v12643_v49 = vpop.f32.mrf.mxu1 }
 0x9d6   : > { %13502 = vmatmul.mubr.msk.bf16.gmra.mxu0 %vm1479_vm1, %v5346_v31  ;;  %v12644_v48 = vadd.f32 %v12643_v49, %v12642_v7 }
 0x9d7   : > { %v12645_v8 = vpop.f32.mrf.mxu1 }
 0x9d9   : > { %v12646_v51 = vpop.f32.mrf.mxu1 }
 0x9da   : > { %v12647_v13 = vadd.f32 %v12646_v51, %v12645_v8 }
 0x9db   : > { %v12648_v14 = vpop.f32.mrf.mxu1 }
 0x9dc   : > { %v5347_v19 = vpack.c.bf16 %v12647_v13, %v12644_v48 }
 0x9dd   : > { %v12649_v15 = vpop.f32.mrf.mxu1 }
 0x9de   : > { %13505 = vmatprep.mubr.msk.bf16.mxu0 %vm1479_vm1, %v5347_v19  ;;  %v12650_v57 = vadd.f32 %v12649_v15, %v12648_v14 }
 0x9df   : > { %v12651_v20 = vpop.f32.mrf.mxu1 }
 0x9e1   : > { %v12652_v32 = vpop.f32.mrf.mxu1 }
 0x9e2   : > { %v12653_v28 = vadd.f32 %v12652_v32, %v12651_v20 }
 0x9e3   : > { %v12654_v30 = vpop.f32.mrf.mxu1 }
 0x9e4   : > { %v5348_v33 = vpack.c.bf16 %v12653_v28, %v12650_v57 }
 0x9e5   : > { %v12655_v16 = vpop.f32.mrf.mxu1 }
 0x9e6   : > { %13506 = vmatmul.mubr.msk.bf16.gmra.mxu0 %vm1479_vm1, %v5348_v33  ;;  %v12656_v55 = vadd.f32 %v12655_v16, %v12654_v30 }
 0x9e7   : > { %v12657_v35 = vpop.f32.mrf.mxu1 }
 0x9e9   : > { %v12658_v40 = vpop.f32.mrf.mxu1 }
 0x9ea   : > { %v12659_v60 = vadd.f32 %v12658_v40, %v12657_v35 }
 0x9eb   : > { %v12660_v39 = vpop.f32.mrf.mxu1 }
 0x9ec   : > { %v5349_v42 = vpack.c.bf16 %v12659_v60, %v12656_v55 }
 0x9ed   : > { %v12661_v61 = vpop.f32.mrf.mxu1 }
 0x9ee   : > { %13509 = vmatprep.mubr.msk.bf16.mxu0 %vm1479_vm1, %v5349_v42  ;;  %v12662_v44 = vadd.f32 %v12661_v61, %v12660_v39 }
 0x9ef   : > { %v12663_v59 = vpop.f32.mrf.mxu1 }
 0x9f1   : > { %v12664_v4 = vpop.f32.mrf.mxu1 }
 0x9f2   : > { %v12665_v21 = vadd.f32 %v12664_v4, %v12663_v59  ;;  %v14704_v59 = vld [vmem:[#allocation2 + $0x804] ss:$8 sps:$4 sm:$0xff]  }
 0x9f3   : > { %v12666_v45 = vpop.f32.mrf.mxu1 }
 0x9f4   : > { %v5350_v47 = vpack.c.bf16 %v12665_v21, %v12662_v44  ;;  %v14702_v44 = vld [vmem:[#allocation2 + $0x800] ss:$8 sps:$4 sm:$0xff]   ;;  %v14707_v21 = vld [vmem:[#allocation2 + $0x814] ss:$8 sps:$4 sm:$0xff]  }
 0x9f5   : > { %v12667_v46 = vpop.f32.mrf.mxu1 }
 0x9f6   : > { %13510 = vmatmul.mubr.msk.bf16.gmra.mxu0 %vm1479_vm1, %v5350_v47  ;;  %v12668_v31 = vadd.f32 %v12667_v46, %v12666_v45  ;;  %v14705_v45 = vld [vmem:[#allocation2 + $0x810] ss:$8 sps:$4 sm:$0xff]   ;;  %v14710_v47 = vld [vmem:[#allocation2 + $0x824] ss:$8 sps:$4 sm:$0xff]   ;;  %v14708_v46 = vld [vmem:[#allocation2 + $0x820] ss:$8 sps:$4 sm:$0xff]  }
 0x9f7   : > { %v12669_v62 = vpop.f32.mrf.mxu1 }
 0x9f9   : > { %v12670_v7 = vpop.f32.mrf.mxu1 }
 0x9fa   : > { %v12671_v49 = vadd.f32 %v12670_v7, %v12669_v62  ;;  %v14713_v62 = vld [vmem:[#allocation2 + $0x834] ss:$8 sps:$4 sm:$0xff]   ;;  %v14711_v7 = vld [vmem:[#allocation2 + $0x830] ss:$8 sps:$4 sm:$0xff]  }
 0x9fb   : > { %v12672_v8 = vpop.f32.mrf.mxu1 }
 0x9fc   : > { %v5351_v51 = vpack.c.bf16 %v12671_v49, %v12668_v31  ;;  %v14716_v31 = vld [vmem:[#allocation2 + $0x844] ss:$8 sps:$4 sm:$0xff]   ;;  %v14714_v49 = vld [vmem:[#allocation2 + $0x840] ss:$8 sps:$4 sm:$0xff]  }
 0x9fd   : > { %v12673_v48 = vpop.f32.mrf.mxu1 }
 0x9fe   : > { %13513 = vmatprep.mubr.msk.bf16.mxu0 %vm1479_vm1, %v5351_v51  ;;  %v12674_v19 = vadd.f32 %v12673_v48, %v12672_v8  ;;  %v14719_v8 = vld [vmem:[#allocation2 + $0x854] ss:$8 sps:$4 sm:$0xff]   ;;  %v14717_v51 = vld [vmem:[#allocation2 + $0x850] ss:$8 sps:$4 sm:$0xff]   ;;  %v14722_v48 = vld [vmem:[#allocation2 + $0x864] ss:$8 sps:$4 sm:$0xff]  }
 0x9ff   : > { %v12675_v13 = vpop.f32.mrf.mxu1 }
 0xa01   : > { %v12676_v14 = vpop.f32.mrf.mxu1 }
 0xa02   : > { %v12677_v15 = vadd.f32 %v12676_v14, %v12675_v13  ;;  %v5972_v13 = vld [vmem:[#allocation5 + $0x10] sm:$0x3]  ;;  %v14720_v14 = vld [vmem:[#allocation2 + $0x860] ss:$8 sps:$4 sm:$0xff]  }
 0xa03   : > { %v12678_v20 = vpop.f32.mrf.mxu1  ;;  %14129 = vmatprep.subr.msk.bf16.mxu1 %vm1528_vm0, %v5972_v13 }
 0xa04   : > { %v5352_v32 = vpack.c.bf16 %v12677_v15, %v12674_v19  ;;  %v14725_v19 = vld [vmem:[#allocation2 + $0x874] ss:$8 sps:$4 sm:$0xff]   ;;  %v6022_v15 = vsel %vm1528_vm0, %v5972_v13, 0 }
 0xa05   : > { %v12679_v57 = vpop.f32.mrf.mxu1  ;;  %13522 = vmatpush3.bf16.msra.mxu1 %v6022_v15 }
 0xa06   : > { %13514 = vmatmul.mubr.msk.bf16.gmra.mxu0 %vm1479_vm1, %v5352_v32  ;;  %v12680_v33 = vadd.f32 %v12679_v57, %v12678_v20  ;;  %v14723_v20 = vld [vmem:[#allocation2 + $0x870] ss:$8 sps:$4 sm:$0xff]   ;;  %v14728_v32 = vld [vmem:[#allocation2 + $0x884] ss:$8 sps:$4 sm:$0xff]   ;;  %v14726_v57 = vld [vmem:[#allocation2 + $0x880] ss:$8 sps:$4 sm:$0xff]  }
 0xa07   : > { %v12681_v28 = vpop.f32.mrf.mxu1 }
 0xa09   : > { %v12682_v30 = vpop.f32.mrf.mxu1 }
 0xa0a   : > { %v12683_v16 = vadd.f32 %v12682_v30, %v12681_v28  ;;  %v14731_v28 = vld [vmem:[#allocation2 + $0x894] ss:$8 sps:$4 sm:$0xff]   ;;  %v14729_v30 = vld [vmem:[#allocation2 + $0x890] ss:$8 sps:$4 sm:$0xff]  }
 0xa0b   : > { %v12684_v35 = vpop.f32.mrf.mxu1 }
 0xa0c   : > { %v5353_v40 = vpack.c.bf16 %v12683_v16, %v12680_v33  ;;  %v14734_v33 = vld [vmem:[#allocation2 + $0x8a4] ss:$8 sps:$4 sm:$0xff]  }
 0xa0d   : > { %v12685_v55 = vpop.f32.mrf.mxu1 }
 0xa0e   : > { %13517 = vmatprep.mubr.msk.bf16.mxu0 %vm1479_vm1, %v5353_v40  ;;  %v12686_v42 = vadd.f32 %v12685_v55, %v12684_v35 }
 0xa0f   : > { %v12687_v60 = vpop.f32.mrf.mxu1 }
 0xa11   : > { %v12688_v39 = vpop.f32.mrf.mxu1 }
 0xa12   : > { %v12689_v61 = vadd.f32 %v12688_v39, %v12687_v60  ;;  %v14732_v39 = vld [vmem:[#allocation2 + $0x8a0] ss:$8 sps:$4 sm:$0xff]  }
 0xa14   : > { %v5354_v4 = vpack.c.bf16 %v12689_v61, %v12686_v42  ;;  %v14737_v61 = vld [vmem:[#allocation2 + $0x8b4] ss:$8 sps:$4 sm:$0xff]  }
 0xa16   : > { %13518 = vmatmul.mubr.msk.bf16.gmra.mxu0 %vm1479_vm1, %v5354_v4  ;;  %v14740_v4 = vld [vmem:[#allocation2 + $0x8c4] ss:$8 sps:$4 sm:$0xff]  }
 0xa17   : > { %5826 = vmatprep.mubr.bf16.mxu0 %v14704_v59  ;;  %v14735_v59 = vld [vmem:[#allocation2 + $0x8b0] ss:$8 sps:$4 sm:$0xff]  }
 0xa1e   : > { %5827 = vmatmul.mubr.bf16.vlgmr.msra.gmra.mxu0 %v14702_v44 }
 0xa1f   : > { %5834 = vmatprep.mubr.bf16.mxu0 %v14707_v21 }
 0xa26   : > { %5835 = vmatmul.mubr.bf16.gmra.mxu0 %v14705_v45 }
 0xa27   : > { %5842 = vmatprep.mubr.bf16.mxu0 %v14710_v47 }
 0xa2e   : > { %5843 = vmatmul.mubr.bf16.gmra.mxu0 %v14708_v46 }
 0xa2f   : > { %5850 = vmatprep.mubr.bf16.mxu0 %v14713_v62  ;;  %v14743_v62 = vld [vmem:[#allocation2 + $0x8d4] ss:$8 sps:$4 sm:$0xff]  }
 0xa36   : > { %5851 = vmatmul.mubr.bf16.gmra.mxu0 %v14711_v7  ;;  %v14741_v7 = vld [vmem:[#allocation2 + $0x8d0] ss:$8 sps:$4 sm:$0xff]  }
 0xa37   : > { %5858 = vmatprep.mubr.bf16.mxu0 %v14716_v31  ;;  %v14746_v31 = vld [vmem:[#allocation2 + $0x8e4] ss:$8 sps:$4 sm:$0xff]  }
 0xa3e   : > { %5859 = vmatmul.mubr.bf16.gmra.mxu0 %v14714_v49 }
 0xa3f   : > { %5866 = vmatprep.mubr.bf16.mxu0 %v14719_v8 }
 0xa46   : > { %5867 = vmatmul.mubr.bf16.gmra.mxu0 %v14717_v51 }
 0xa47   : > { %5874 = vmatprep.mubr.bf16.mxu0 %v14722_v48 }
 0xa4e   : > { %5875 = vmatmul.mubr.bf16.gmra.mxu0 %v14720_v14  ;;  %v14749_v14 = vld [vmem:[#allocation2 + $0x8f4] ss:$8 sps:$4 sm:$0xff]  }
 0xa4f   : > { %5882 = vmatprep.mubr.bf16.mxu0 %v14725_v19  ;;  %v14747_v19 = vld [vmem:[#allocation2 + $0x8f0] ss:$8 sps:$4 sm:$0xff]  }
 0xa56   : > { %5883 = vmatmul.mubr.bf16.gmra.mxu0 %v14723_v20 }
 0xa57   : > { %5890 = vmatprep.mubr.bf16.mxu0 %v14728_v32 }
 0xa5e   : > { %5891 = vmatmul.mubr.bf16.gmra.mxu0 %v14726_v57 }
 0xa5f   : > { %5898 = vmatprep.mubr.bf16.mxu0 %v14731_v28 }
 0xa66   : > { %v13491_v16 = vpop.f32.mrf.mxu0  ;;  %5899 = vmatmul.mubr.bf16.gmra.mxu0 %v14729_v30 }
 0xa67   : > { %v16605_v35 = vadd.f32 %v13491_v16, %v16484_v29  ;;  %5906 = vmatprep.mubr.bf16.mxu0 %v14734_v33 }
 0xa68   : > { %v5442_v40 = vpop.f32.mrf.mxu0 }
 0xa69   : > { %v16608_v55 = vadd.f32 %v5442_v40, %v16487_v3 }
 0xa6a   : > { %v13492_v60 = vpop.f32.mrf.mxu0 }
 0xa6b   : > { %v16611_v42 = vadd.f32 %v13492_v60, %v16490_v9  ;;  %v14738_v9 = vld [vmem:[#allocation2 + $0x8c0] ss:$8 sps:$4 sm:$0xff]  }
 0xa6c   : > { %v16613_v44 = vpop.f32.mrf.mxu0 }
 0xa6e   : > { %5907 = vmatmul.mubr.bf16.gmra.mxu0 %v14732_v39 }
 0xa6f   : > { %5914 = vmatprep.mubr.bf16.mxu0 %v14737_v61 }
 0xa76   : > { %v13495_v21 = vpop.f32.mrf.mxu0  ;;  %5915 = vmatmul.mubr.bf16.gmra.mxu0 %v14735_v59 }
 0xa77   : > { %v16616_v29 = vadd.f32 %v13495_v21, %v16495_v1  ;;  %5922 = vmatprep.mubr.bf16.mxu0 %v14740_v4 }
 0xa78   : > { %v5458_v3 = vpop.f32.mrf.mxu0 }
 0xa79   : > { %v16619_v45 = vadd.f32 %v5458_v3, %v16498_v22 }
 0xa7a   : > { %v13496_v47 = vpop.f32.mrf.mxu0 }
 0xa7b   : > { %v16622_v46 = vadd.f32 %v13496_v47, %v16501_v63  ;;  %v14744_v63 = vld [vmem:[#allocation2 + $0x8e0] ss:$8 sps:$4 sm:$0xff]  }
 0xa7c   : > { %v16624_v49 = vpop.f32.mrf.mxu0 }
 0xa7e   : > { %5923 = vmatmul.mubr.bf16.gmra.mxu0 %v14738_v9 }
 0xa7f   : > { %5930 = vmatprep.mubr.bf16.mxu0 %v14743_v62 }
 0xa86   : > { %v13499_v8 = vpop.f32.mrf.mxu0  ;;  %5931 = vmatmul.mubr.bf16.gmra.mxu0 %v14741_v7 }
 0xa87   : > { %v16627_v1 = vadd.f32 %v13499_v8, %v16506_v54  ;;  %5938 = vmatprep.mubr.bf16.mxu0 %v14746_v31 }
 0xa88   : > { %v5474_v22 = vpop.f32.mrf.mxu0 }
 0xa89   : > { %v16630_v51 = vadd.f32 %v5474_v22, %v16509_v18 }
 0xa8a   : > { %v13500_v48 = vpop.f32.mrf.mxu0 }
 0xa8b   : > { %v16633_v13 = vadd.f32 %v13500_v48, %v16512_v52 }
 0xa8c   : > { %v16635_v15 = vpop.f32.mrf.mxu0 }
 0xa8e   : > { %5939 = vmatmul.mubr.bf16.gmra.mxu0 %v14744_v63 }
 0xa8f   : > { %5946 = vmatprep.mubr.bf16.mxu0 %v14749_v14 }
 0xa96   : > { %v13503_v20 = vpop.f32.mrf.mxu0  ;;  %5947 = vmatmul.mubr.bf16.gmra.mxu0 %v14747_v19 }
 0xa97   : > { %v16638_v54 = vadd.f32 %v13503_v20, %v16517_v37 }
 0xa98   : > { %v5490_v32 = vpop.f32.mrf.mxu0 }
 0xa99   : > { %v16641_v18 = vadd.f32 %v5490_v32, %v16520_v50 }
 0xa9a   : > { %v13504_v57 = vpop.f32.mrf.mxu0 }
 0xa9b   : > { %v16644_v28 = vadd.f32 %v13504_v57, %v16523_v36 }
 0xa9c   : > { %v16646_v52 = vpop.f32.mrf.mxu0 }
 0xaa6   : > { %v13507_v30 = vpop.f32.mrf.mxu0 }
 0xaa7   : > { %v16649_v33 = vadd.f32 %v13507_v30, %v16528_v25 }
 0xaa8   : > { %v5506_v16 = vpop.f32.mrf.mxu0 }
 0xaa9   : > { %v16652_v40 = vadd.f32 %v5506_v16, %v16531_v5 }
 0xaaa   : > { %v13508_v37 = vpop.f32.mrf.mxu0 }
 0xaab   : > { %v16655_v60 = vadd.f32 %v13508_v37, %v16534_v12 }
 0xaac   : > { %v16657_v50 = vpop.f32.mrf.mxu0 }
 0xab6   : > { %v13511_v39 = vpop.f32.mrf.mxu0 }
 0xab7   : > { %v16660_v36 = vadd.f32 %v13511_v39, %v16539_v0 }
 0xab8   : > { %v5522_v61 = vpop.f32.mrf.mxu0 }
 0xab9   : > { %v16663_v59 = vadd.f32 %v5522_v61, %v16542_v34 }
 0xaba   : > { %v13512_v25 = vpop.f32.mrf.mxu0 }
 0xabb   : > { %v16666_v4 = vadd.f32 %v13512_v25, %v16545_v10 }
 0xabc   : > { %v16668_v5 = vpop.f32.mrf.mxu0 }
 0xac6   : > { %v13515_v21 = vpop.f32.mrf.mxu0 }
 0xac7   : > { %v16671_v12 = vadd.f32 %v13515_v21, %v16550_v43 }
 0xac8   : > { %v5538_v3 = vpop.f32.mrf.mxu0 }
 0xac9   : > { %v16674_v47 = vadd.f32 %v5538_v3, %v16553_v41 }
 0xaca   : > { %v13516_v0 = vpop.f32.mrf.mxu0 }
 0xacb   : > { %v16677_v9 = vadd.f32 %v13516_v0, %v16556_v24 }
 0xacc   : > { %v16679_v34 = vpop.f32.mrf.mxu0 }
 0xad6   : > { %v13519_v62 = vpop.f32.mrf.mxu0 }
 0xad7   : > { %v16682_v10 = vadd.f32 %v13519_v62, %v16561_v38 }
 0xad8   : > { %v5554_v7 = vpop.f32.mrf.mxu0 }
 0xad9   : > { %v16685_v31 = vadd.f32 %v5554_v7, %v16564_v23 }
 0xada   : > { %v13520_v43 = vpop.f32.mrf.mxu0 }
 0xadb   : > { %v16688_v8 = vadd.f32 %v13520_v43, %v16567_v6 }
 0xadc   : > { %v16690_v41 = vpop.f32.mrf.mxu0 }
 0xade   : > { %v12723_v22 = vpop.f32.mrf.mxu0 }
 0xae0   : > { %v12724_v48 = vpop.f32.mrf.mxu0 }
 0xae1   : > { %v12725_v14 = vadd.f32 %v12724_v48, %v12723_v22 }
 0xae2   : > { %v12726_v24 = vpop.f32.mrf.mxu0 }
 0xae4   : > { %v12727_v63 = vpop.f32.mrf.mxu0 }
 0xae5   : > { %v12728_v19 = vadd.f32 %v12727_v63, %v12726_v24 }
 0xae6   : > { %v12729_v20 = vpop.f32.mrf.mxu0 }
 0xae7   : > { %v5955_v32 = vpack.c.bf16 %v12728_v19, %v12725_v14 }
 0xae8   : > { %v12730_v38 = vpop.f32.mrf.mxu0 }
 0xae9   : > { %13523 = vmatprep.mubr.msk.bf16.mxu1 %vm1479_vm1, %v5955_v32  ;;  %v12731_v30 = vadd.f32 %v12730_v38, %v12729_v20 }
 0xaea   : > { %v12732_v57 = vpop.f32.mrf.mxu0 }
 0xaec   : > { %v12733_v23 = vpop.f32.mrf.mxu0 }
 0xaed   : > { %v12734_v16 = vadd.f32 %v12733_v23, %v12732_v57 }
 0xaee   : > { %v12735_v37 = vpop.f32.mrf.mxu0 }
 0xaef   : > { %v5956_v6 = vpack.c.bf16 %v12734_v16, %v12731_v30 }
 0xaf0   : > { %v12736_v39 = vpop.f32.mrf.mxu0 }
 0xaf1   : > { %13524 = vmatmul.mubr.msk.bf16.vlgmr.msra.gmra.mxu1 %vm1479_vm1, %v5956_v6  ;;  %v12737_v21 = vadd.f32 %v12736_v39, %v12735_v37 }
 0xaf2   : > { %v12738_v61 = vpop.f32.mrf.mxu0 }
 0xaf4   : > { %v12739_v25 = vpop.f32.mrf.mxu0 }
 0xaf5   : > { %v12740_v3 = vadd.f32 %v12739_v25, %v12738_v61 }
 0xaf6   : > { %v12741_v0 = vpop.f32.mrf.mxu0 }
 0xaf7   : > { %v5957_v62 = vpack.c.bf16 %v12740_v3, %v12737_v21 }
 0xaf8   : > { %v12742_v7 = vpop.f32.mrf.mxu0 }
 0xaf9   : > { %13527 = vmatprep.mubr.msk.bf16.mxu1 %vm1479_vm1, %v5957_v62  ;;  %v12743_v48 = vadd.f32 %v12742_v7, %v12741_v0 }
 0xafa   : > { %v12744_v43 = vpop.f32.mrf.mxu0 }
 0xafc   : > { %v12745_v22 = vpop.f32.mrf.mxu0 }
 0xafd   : > { %v12746_v24 = vadd.f32 %v12745_v22, %v12744_v43 }
 0xafe   : > { %v12747_v63 = vpop.f32.mrf.mxu0 }
 0xaff   : > { %v5958_v14 = vpack.c.bf16 %v12746_v24, %v12743_v48 }
 0xb00   : > { %v12748_v19 = vpop.f32.mrf.mxu0 }
 0xb01   : > { %13528 = vmatmul.mubr.msk.bf16.gmra.mxu1 %vm1479_vm1, %v5958_v14  ;;  %v12749_v38 = vadd.f32 %v12748_v19, %v12747_v63 }
 0xb02   : > { %v12750_v20 = vpop.f32.mrf.mxu0 }
 0xb04   : > { %v12751_v32 = vpop.f32.mrf.mxu0 }
 0xb05   : > { %v12752_v57 = vadd.f32 %v12751_v32, %v12750_v20 }
 0xb06   : > { %v12753_v23 = vpop.f32.mrf.mxu0 }
 0xb07   : > { %v5959_v30 = vpack.c.bf16 %v12752_v57, %v12749_v38 }
 0xb08   : > { %v12754_v16 = vpop.f32.mrf.mxu0 }
 0xb09   : > { %13531 = vmatprep.mubr.msk.bf16.mxu1 %vm1479_vm1, %v5959_v30  ;;  %v12755_v39 = vadd.f32 %v12754_v16, %v12753_v23 }
 0xb0a   : > { %v12756_v37 = vpop.f32.mrf.mxu0 }
 0xb0c   : > { %v12757_v6 = vpop.f32.mrf.mxu0 }
 0xb0d   : > { %v12758_v61 = vadd.f32 %v12757_v6, %v12756_v37 }
 0xb0e   : > { %v12759_v25 = vpop.f32.mrf.mxu0 }
 0xb0f   : > { %v5960_v21 = vpack.c.bf16 %v12758_v61, %v12755_v39 }
 0xb10   : > { %v12760_v3 = vpop.f32.mrf.mxu0 }
 0xb11   : > { %13532 = vmatmul.mubr.msk.bf16.gmra.mxu1 %vm1479_vm1, %v5960_v21  ;;  %v12761_v7 = vadd.f32 %v12760_v3, %v12759_v25 }
 0xb12   : > { %v12762_v0 = vpop.f32.mrf.mxu0 }
 0xb14   : > { %v12763_v62 = vpop.f32.mrf.mxu0 }
 0xb15   : > { %v12764_v43 = vadd.f32 %v12763_v62, %v12762_v0 }
 0xb16   : > { %v12765_v22 = vpop.f32.mrf.mxu0 }
 0xb17   : > { %v5961_v48 = vpack.c.bf16 %v12764_v43, %v12761_v7 }
 0xb18   : > { %v12766_v24 = vpop.f32.mrf.mxu0 }
 0xb19   : > { %13535 = vmatprep.mubr.msk.bf16.mxu1 %vm1479_vm1, %v5961_v48  ;;  %v12767_v19 = vadd.f32 %v12766_v24, %v12765_v22 }
 0xb1a   : > { %v12768_v63 = vpop.f32.mrf.mxu0 }
 0xb1c   : > { %v12769_v14 = vpop.f32.mrf.mxu0 }
 0xb1d   : > { %v12770_v20 = vadd.f32 %v12769_v14, %v12768_v63 }
 0xb1e   : > { %v12771_v32 = vpop.f32.mrf.mxu0 }
 0xb1f   : > { %v5962_v38 = vpack.c.bf16 %v12770_v20, %v12767_v19 }
 0xb20   : > { %v12772_v57 = vpop.f32.mrf.mxu0 }
 0xb21   : > { %13536 = vmatmul.mubr.msk.bf16.gmra.mxu1 %vm1479_vm1, %v5962_v38  ;;  %v12773_v16 = vadd.f32 %v12772_v57, %v12771_v32 }
 0xb22   : > { %v12774_v23 = vpop.f32.mrf.mxu0 }
 0xb24   : > { %v12775_v30 = vpop.f32.mrf.mxu0 }
 0xb25   : > { %v12776_v37 = vadd.f32 %v12775_v30, %v12774_v23 }
 0xb26   : > { %v12777_v6 = vpop.f32.mrf.mxu0 }
 0xb27   : > { %v5963_v39 = vpack.c.bf16 %v12776_v37, %v12773_v16 }
 0xb28   : > { %v12778_v61 = vpop.f32.mrf.mxu0 }
 0xb29   : > { %13539 = vmatprep.mubr.msk.bf16.mxu1 %vm1479_vm1, %v5963_v39  ;;  %v12779_v3 = vadd.f32 %v12778_v61, %v12777_v6 }
 0xb2a   : > { %v12780_v25 = vpop.f32.mrf.mxu0 }
 0xb2c   : > { %v12781_v21 = vpop.f32.mrf.mxu0 }
 0xb2d   : > { %v12782_v0 = vadd.f32 %v12781_v21, %v12780_v25 }
 0xb2e   : > { %v12783_v62 = vpop.f32.mrf.mxu0 }
 0xb2f   : > { %v5964_v7 = vpack.c.bf16 %v12782_v0, %v12779_v3 }
 0xb30   : > { %v12784_v43 = vpop.f32.mrf.mxu0 }
 0xb31   : > { %13540 = vmatmul.mubr.msk.bf16.gmra.mxu1 %vm1479_vm1, %v5964_v7  ;;  %v12785_v24 = vadd.f32 %v12784_v43, %v12783_v62 }
 0xb32   : > { %v12786_v22 = vpop.f32.mrf.mxu0 }
 0xb34   : > { %v12787_v48 = vpop.f32.mrf.mxu0 }
 0xb35   : > { %v12788_v63 = vadd.f32 %v12787_v48, %v12786_v22 }
 0xb36   : > { %v12789_v14 = vpop.f32.mrf.mxu0 }
 0xb37   : > { %v5965_v19 = vpack.c.bf16 %v12788_v63, %v12785_v24 }
 0xb38   : > { %v12790_v20 = vpop.f32.mrf.mxu0 }
 0xb39   : > { %13543 = vmatprep.mubr.msk.bf16.mxu1 %vm1479_vm1, %v5965_v19  ;;  %v12791_v57 = vadd.f32 %v12790_v20, %v12789_v14 }
 0xb3a   : > { %v12792_v32 = vpop.f32.mrf.mxu0 }
 0xb3c   : > { %v12793_v38 = vpop.f32.mrf.mxu0 }
 0xb3d   : > { %v12794_v23 = vadd.f32 %v12793_v38, %v12792_v32 }
 0xb3e   : > { %v12795_v30 = vpop.f32.mrf.mxu0 }
 0xb3f   : > { %v5966_v16 = vpack.c.bf16 %v12794_v23, %v12791_v57 }
 0xb40   : > { %v12796_v37 = vpop.f32.mrf.mxu0 }
 0xb41   : > { %13544 = vmatmul.mubr.msk.bf16.gmra.mxu1 %vm1479_vm1, %v5966_v16  ;;  %v12797_v61 = vadd.f32 %v12796_v37, %v12795_v30 }
 0xb42   : > { %v12798_v6 = vpop.f32.mrf.mxu0 }
 0xb44   : > { %v12799_v39 = vpop.f32.mrf.mxu0 }
 0xb45   : > { %v12800_v25 = vadd.f32 %v12799_v39, %v12798_v6 }
 0xb46   : > { %v12801_v21 = vpop.f32.mrf.mxu0 }
 0xb47   : > { %v5967_v3 = vpack.c.bf16 %v12800_v25, %v12797_v61 }
 0xb48   : > { %v12802_v0 = vpop.f32.mrf.mxu0 }
 0xb49   : > { %13547 = vmatprep.mubr.msk.bf16.mxu1 %vm1479_vm1, %v5967_v3  ;;  %v12803_v43 = vadd.f32 %v12802_v0, %v12801_v21  ;;  %v16709_v21 = vld [vmem:[#allocation7] ss:$0 sm:$0xff] }
 0xb4a   : > { %v12804_v62 = vpop.f32.mrf.mxu0 }
 0xb4c   : > { %v12805_v7 = vpop.f32.mrf.mxu0 }
 0xb4d   : > { %v12806_v22 = vadd.f32 %v12805_v7, %v12804_v62 }
 0xb4e   : > { %v12807_v48 = vpop.f32.mrf.mxu0 }
 0xb4f   : > { %v5968_v24 = vpack.c.bf16 %v12806_v22, %v12803_v43 }
 0xb50   : > { %v12808_v63 = vpop.f32.mrf.mxu0 }
 0xb51   : > { %13548 = vmatmul.mubr.msk.bf16.gmra.mxu1 %vm1479_vm1, %v5968_v24  ;;  %v12809_v20 = vadd.f32 %v12808_v63, %v12807_v48 }
 0xb52   : > { %v12810_v14 = vpop.f32.mrf.mxu0 }
 0xb54   : > { %v12811_v19 = vpop.f32.mrf.mxu0 }
 0xb55   : > { %v12812_v32 = vadd.f32 %v12811_v19, %v12810_v14 }
 0xb56   : > { %v12813_v38 = vpop.f32.mrf.mxu0 }
 0xb57   : > { %v5969_v57 = vpack.c.bf16 %v12812_v32, %v12809_v20 }
 0xb58   : > { %v12814_v23 = vpop.f32.mrf.mxu0 }
 0xb59   : > { %13551 = vmatprep.mubr.msk.bf16.mxu1 %vm1479_vm1, %v5969_v57  ;;  %v12815_v37 = vadd.f32 %v12814_v23, %v12813_v38 }
 0xb5a   : > { %v12816_v30 = vpop.f32.mrf.mxu0 }
 0xb5c   : > { %v12817_v16 = vpop.f32.mrf.mxu0 }
 0xb5d   : > { %v12818_v6 = vadd.f32 %v12817_v16, %v12816_v30  ;;  %v14752_v16 = vld [vmem:[#allocation8 + $0x4] ss:$8 sps:$4 sm:$0xff]  }
 0xb5f   : > { %v5970_v39 = vpack.c.bf16 %v12818_v6, %v12815_v37 }
 0xb61   : > { %13552 = vmatmul.mubr.msk.bf16.gmra.mxu1 %vm1479_vm1, %v5970_v39 }
 0xb62   : > { %6384 = vmatprep.mubr.bf16.mxu1 %v14752_v16 }
 0xbb1   : > { %v13525_v61 = vpop.f32.mrf.mxu1 }
 0xbb2   : > { %v6187_v25 = vadd.f32 %v13525_v61, %v16605_v35 }
 0xbb3   : > { %v6058_v3 = vpop.f32.mrf.mxu1 }
 0xbb4   : > { %v16712_v0 = vadd.f32 %v6058_v3, %v16608_v55  ;;  %v6226_v7 = vadd.f32 %v16709_v21, %v6187_v25 }
 0xbb5   : > { %v13526_v62 = vpop.f32.mrf.mxu1 }
 0xbb6   : > { %v6188_v43 = vadd.f32 %v13526_v62, %v16611_v42  ;;  %v6258_v48 = vmax.f32 %v6226_v7, 0.0 }
 0xbb7   : > { %v16719_v14 = vpop.f32.mrf.mxu1 }
 0xbb8   : > { %v6227_v22 = vadd.f32 %v16709_v21, %v6188_v43 }
 0xbba   : > { %v6259_v24 = vmax.f32 %v6227_v22, 0.0 }
 0xbbc   : > { %v16717_v63 = vpack.c.bf16 %v6259_v24, %v6258_v48 }
 0xbbe   : > { %17545 = vst [vmem:[#allocation89_spill] sm:$0xff] %v16717_v63  ;;  %v17558_v63 = vld [vmem:[#allocation76_spill] sm:$0xff] }
 0xbc1   : > { %v13529_v35 = vpop.f32.mrf.mxu1 }
 0xbc2   : > { %v6191_v19 = vadd.f32 %v13529_v35, %v16616_v29 }
 0xbc3   : > { %v6074_v20 = vpop.f32.mrf.mxu1 }
 0xbc4   : > { %v16723_v55 = vadd.f32 %v6074_v20, %v16619_v45  ;;  %v6230_v38 = vadd.f32 %v16709_v21, %v6191_v19 }
 0xbc5   : > { %v13530_v32 = vpop.f32.mrf.mxu1 }
 0xbc6   : > { %v6192_v42 = vadd.f32 %v13530_v32, %v16622_v46  ;;  %v6262_v23 = vmax.f32 %v6230_v38, 0.0 }
 0xbc7   : > { %v16730_v6 = vpop.f32.mrf.mxu1 }
 0xbc8   : > { %v6231_v57 = vadd.f32 %v16709_v21, %v6192_v42 }
 0xbca   : > { %v6263_v30 = vmax.f32 %v6231_v57, 0.0 }
 0xbcc   : > { %v16728_v37 = vpack.c.bf16 %v6263_v30, %v6262_v23 }
 0xbd1   : > { %v13533_v29 = vpop.f32.mrf.mxu1 }
 0xbd2   : > { %v6195_v39 = vadd.f32 %v13533_v29, %v16627_v1 }
 0xbd3   : > { %v16733_v45 = vpop.f32.mrf.mxu1 }
 0xbd4   : > { %v6234_v25 = vadd.f32 %v16709_v21, %v6195_v39 }
 0xbd5   : > { %v13534_v61 = vpop.f32.mrf.mxu1 }
 0xbd6   : > { %v6196_v46 = vadd.f32 %v13534_v61, %v16633_v13  ;;  %v6266_v62 = vmax.f32 %v6234_v25, 0.0 }
 0xbd7   : > { %v16740_v22 = vpop.f32.mrf.mxu1 }
 0xbd8   : > { %v6235_v3 = vadd.f32 %v16709_v21, %v6196_v46 }
 0xbda   : > { %v6267_v7 = vmax.f32 %v6235_v3, 0.0 }
 0xbdc   : > { %v16738_v43 = vpack.c.bf16 %v6267_v7, %v6266_v62 }
 0xbe1   : > { %v13537_v48 = vpop.f32.mrf.mxu1 }
 0xbe2   : > { %v6199_v24 = vadd.f32 %v13537_v48, %v16638_v54 }
 0xbe3   : > { %v16743_v35 = vpop.f32.mrf.mxu1 }
 0xbe4   : > { %v6238_v19 = vadd.f32 %v16709_v21, %v6199_v24  ;;  %v14776_v24 = vld [vmem:[#allocation8 + $0x84] ss:$8 sps:$4 sm:$0xff]  }
 0xbe5   : > { %v13538_v1 = vpop.f32.mrf.mxu1  ;;  %6612 = vmatprep.mubr.bf16.mxu0 %v14776_v24 }
 0xbe6   : > { %v6200_v20 = vadd.f32 %v13538_v1, %v16644_v28  ;;  %v6270_v32 = vmax.f32 %v6238_v19, 0.0 }
 0xbe7   : > { %v16750_v57 = vpop.f32.mrf.mxu1 }
 0xbe8   : > { %v6239_v13 = vadd.f32 %v16709_v21, %v6200_v20 }
 0xbea   : > { %v6271_v38 = vmax.f32 %v6239_v13, 0.0 }
 0xbec   : > { %v16748_v42 = vpack.c.bf16 %v6271_v38, %v6270_v32 }
 0xbf1   : > { %v13541_v23 = vpop.f32.mrf.mxu1 }
 0xbf2   : > { %v6203_v30 = vadd.f32 %v13541_v23, %v16649_v33 }
 0xbf3   : > { %v16753_v16 = vpop.f32.mrf.mxu1 }
 0xbf4   : > { %v6242_v29 = vadd.f32 %v16709_v21, %v6203_v30 }
 0xbf5   : > { %v13542_v54 = vpop.f32.mrf.mxu1 }
 0xbf6   : > { %v6204_v39 = vadd.f32 %v13542_v54, %v16655_v60  ;;  %v6274_v61 = vmax.f32 %v6242_v29, 0.0 }
 0xbf7   : > { %v16760_v3 = vpop.f32.mrf.mxu1 }
 0xbf8   : > { %v6243_v28 = vadd.f32 %v16709_v21, %v6204_v39 }
 0xbfa   : > { %v6275_v25 = vmax.f32 %v6243_v28, 0.0 }
 0xbfc   : > { %v16758_v46 = vpack.c.bf16 %v6275_v25, %v6274_v61  ;;  %v17546_v25 = vld [vmem:[#allocation53_spill] sm:$0xff] }
 0xc01   : > { %v13545_v62 = vpop.f32.mrf.mxu1 }
 0xc02   : > { %v6207_v7 = vadd.f32 %v13545_v62, %v16660_v36  ;;  %v1894_v62 = vadd.f32 %v17546_v25, %v15957_v17 }
 0xc03   : > { %v16763_v48 = vpop.f32.mrf.mxu1 }
 0xc04   : > { %v6246_v1 = vadd.f32 %v16709_v21, %v6207_v7 }
 0xc05   : > { %v13546_v33 = vpop.f32.mrf.mxu1 }
 0xc06   : > { %v6208_v19 = vadd.f32 %v13546_v33, %v16666_v4  ;;  %v6278_v20 = vmax.f32 %v6246_v1, 0.0  ;;  %v1830_v4 = vadd.f32 %v15919_v27, %v15917_v26  ;;  %v17548_v1 = vld [vmem:[#allocation51_spill] sm:$0xff] }
 0xc07   : > { %v16770_v38 = vpop.f32.mrf.mxu1  ;;  %v17552_v27 = vld [vmem:[#allocation59_spill] sm:$0xff] }
 0xc08   : > { %v6247_v60 = vadd.f32 %v16709_v21, %v6208_v19  ;;  %v2502_v61 = vadd.f32 %v16037_v2, %v1830_v4  ;;  %v17549_v19 = vld [vmem:[#allocation52_spill] sm:$0xff]  ;;  %v17555_v4 = vld [vmem:[#allocation46_spill] sm:$0xff] }
 0xc0a   : > { %v6279_v13 = vmax.f32 %v6247_v60, 0.0  ;;  %v1878_v60 = vadd.f32 %v17549_v19, %v17548_v1  ;;  %v17559_v19 = vld [vmem:[#allocation56_spill] sm:$0xff] }
 0xc0c   : > { %v16768_v32 = vpack.c.bf16 %v6279_v13, %v6278_v20  ;;  %v17550_v20 = vld [vmem:[#allocation60_spill] sm:$0xff] }
 0xc0d   : > { %v2518_v13 = vadd.f32 %v17550_v20, %v1894_v62 }
 0xc11   : > { %v13549_v23 = vpop.f32.mrf.mxu1 }
 0xc12   : > { %v6211_v36 = vadd.f32 %v13549_v23, %v16671_v12  ;;  %v17547_v12 = vld [vmem:[#allocation64_spill] sm:$0xff] }
 0xc13   : > { %v16773_v30 = vpop.f32.mrf.mxu1  ;;  %v3118_v24 = vadd.f32 %v17547_v12, %v2502_v61  ;;  %v17551_v23 = vld [vmem:[#allocation72_spill] sm:$0xff]  ;;  %v17557_v61 = vld [vmem:[#allocation67_spill] sm:$0xff] }
 0xc14   : > { %v6250_v29 = vadd.f32 %v16709_v21, %v6211_v36  ;;  %v2514_v36 = vadd.f32 %v17552_v27, %v1878_v60  ;;  %v17561_v60 = vld [vmem:[#allocation84_spill] sm:$0xff]  ;;  %v17562_v27 = vld [vmem:[#allocation49_spill] sm:$0xff] }
 0xc15   : > { %v13550_v54 = vpop.f32.mrf.mxu1  ;;  %v3734_v26 = vadd.f32 %v17551_v23, %v3118_v24  ;;  %v17560_v24 = vld [vmem:[#allocation75_spill] sm:$0xff] }
 0xc16   : > { %v6212_v39 = vadd.f32 %v13550_v54, %v16677_v9  ;;  %v6282_v7 = vmax.f32 %v6250_v29, 0.0  ;;  %v17553_v54 = vld [vmem:[#allocation68_spill] sm:$0xff]  ;;  %v3130_v12 = vadd.f32 %v17557_v61, %v2514_v36 }
 0xc17   : > { %v3134_v2 = vadd.f32 %v17553_v54, %v2518_v13  ;;  %v17556_v29 = vld [vmem:[#allocation80_spill] sm:$0xff]  ;;  %v6157_v25 = vpop.f32.mrf.mxu1  ;;  %v17563_v54 = vld [vmem:[#allocation50_spill] sm:$0xff] }
 0xc18   : > { %v6251_v28 = vadd.f32 %v16709_v21, %v6212_v39  ;;  %v17554_v39 = vld [vmem:[#allocation45_spill] sm:$0xff]  ;;  %v3746_v20 = vadd.f32 %v17560_v24, %v3130_v12  ;;  %v17567_v61 = vld [vmem:[#allocation44_spill] sm:$0xff] }
 0xc19   : > { %v1814_v17 = vadd.f32 %v17555_v4, %v17554_v39  ;;  %v3750_v1 = vadd.f32 %v17558_v63, %v3134_v2  ;;  %v1862_v39 = vadd.f32 %v17563_v54, %v17562_v27  ;;  %v17565_v63 = vld [vmem:[#allocation83_spill] sm:$0xff]  ;;  %v17572_v27 = vld [vmem:[#allocation66_spill] sm:$0xff] }
 0xc1a   : > { %v6283_v33 = vmax.f32 %v6251_v28, 0.0  ;;  %v4350_v28 = vadd.f32 %v17556_v29, %v3734_v26  ;;  %v17564_v26 = vld [vmem:[#allocation63_spill] sm:$0xff]  ;;  %v4362_v2 = vadd.f32 %v17565_v63, %v3746_v20  ;;  %v17575_v63 = vld [vmem:[#allocation74_spill] sm:$0xff] }
 0xc1b   : > { %v2498_v62 = vadd.f32 %v17559_v19, %v1814_v17  ;;  %v4366_v23 = vadd.f32 %v17561_v60, %v3750_v1  ;;  %v17568_v1 = vld [vmem:[#allocation58_spill] sm:$0xff]  ;;  %v17570_v20 = vld [vmem:[#allocation47_spill] sm:$0xff] }
 0xc1c   : > { %v16787_v9 = vpack.c.bf16 %v6283_v33, %v6282_v7  ;;  %v4966_v7 = vadd.f32 %v16525_v56, %v4350_v28  ;;  %v17566_v28 = vld [vmem:[#allocation43_spill] sm:$0xff]  ;;  %v2510_v19 = vadd.f32 %v17568_v1, %v1862_v39 }
 0xc1d   : > { %v3114_v4 = vadd.f32 %v17564_v26, %v2498_v62  ;;  %v4982_v17 = vadd.f32 %v16569_v58, %v4366_v23  ;;  %v1798_v12 = vadd.f32 %v17567_v61, %v17566_v28  ;;  %v4978_v62 = vadd.f32 %v16558_v53, %v4362_v2  ;;  %v17573_v26 = vld [vmem:[#allocation79_spill] sm:$0xff] }
 0xc1e   : > { %v5582_v36 = vadd.f32 %v16646_v52, %v4966_v7  ;;  %v3126_v54 = vadd.f32 %v17572_v27, %v2510_v19  ;;  %v17580_v27 = vld [vmem:[#allocation88_spill] sm:$0xff] }
 0xc1f   : > { %v5598_v52 = vadd.f32 %v16690_v41, %v4982_v17 }
 0xc20   : > { %v6198_v24 = vadd.f32 %v16750_v57, %v5582_v36  ;;  %v5594_v36 = vadd.f32 %v16679_v34, %v4978_v62  ;;  %v3742_v2 = vadd.f32 %v17575_v63, %v3126_v54  ;;  %v17586_v63 = vld [vmem:[#allocation86_spill] sm:$0xff] }
 0xc21   : > { %v13553_v33 = vpop.f32.mrf.mxu1 }
 0xc22   : > { %v6215_v13 = vadd.f32 %v13553_v33, %v16682_v10  ;;  %v17569_v10 = vld [vmem:[#allocation71_spill] sm:$0xff]  ;;  %v6237_v28 = vadd.f32 %v16709_v21, %v6198_v24  ;;  %v6210_v61 = vadd.f32 %v6157_v25, %v5594_v36  ;;  %v17578_v25 = vld [vmem:[#allocation57_spill] sm:$0xff] }
 0xc23   : > { %v6170_v29 = vpop.f32.mrf.mxu1  ;;  %v3730_v33 = vadd.f32 %v17569_v10, %v3114_v4  ;;  %v6197_v4 = vadd.f32 %v16743_v35, %v16641_v18  ;;  %v17576_v35 = vld [vmem:[#allocation62_spill] sm:$0xff]  ;;  %v17584_v36 = vld [vmem:[#allocation65_spill] sm:$0xff] }
 0xc24   : > { %v6213_v56 = vadd.f32 %v6170_v29, %v16685_v31  ;;  %v6254_v7 = vadd.f32 %v16709_v21, %v6215_v13  ;;  %v17571_v31 = vld [vmem:[#allocation48_spill] sm:$0xff]  ;;  %v17574_v29 = vld [vmem:[#allocation55_spill] sm:$0xff]  ;;  %v17577_v10 = vld [vmem:[#allocation82_spill] sm:$0xff] }
 0xc25   : > { %v13554_v60 = vpop.f32.mrf.mxu1  ;;  %v1846_v23 = vadd.f32 %v17571_v31, %v17570_v20  ;;  %v4346_v39 = vadd.f32 %v17573_v26, %v3730_v33  ;;  %v6269_v31 = vmax.f32 %v6237_v28, 0.0 }
 0xc26   : > { %v6216_v58 = vadd.f32 %v13554_v60, %v16688_v8  ;;  %v6252_v53 = vadd.f32 %v16709_v21, %v6213_v56  ;;  %v2494_v8 = vadd.f32 %v17574_v29, %v1798_v12  ;;  %v6286_v1 = vmax.f32 %v6254_v7, 0.0  ;;  %v17579_v7 = vld [vmem:[#allocation70_spill] sm:$0xff] }
 0xc27   : > { %v6173_v57 = vpop.f32.mrf.mxu1  ;;  %v4962_v17 = vadd.f32 %v16514_v11, %v4346_v39  ;;  %v4358_v56 = vadd.f32 %v17577_v10, %v3742_v2  ;;  %v6236_v60 = vadd.f32 %v16709_v21, %v6197_v4  ;;  %v6209_v12 = vadd.f32 %v16773_v30, %v16674_v47  ;;  %v17581_v47 = vld [vmem:[#allocation41_spill] sm:$0xff]  ;;  %v17582_v30 = vld [vmem:[#allocation42_spill] sm:$0xff] }
 0xc28   : > { %v6255_v41 = vadd.f32 %v16709_v21, %v6216_v58  ;;  %v6214_v13 = vadd.f32 %v6173_v57, %v5598_v52  ;;  %v3110_v34 = vadd.f32 %v17576_v35, %v2494_v8  ;;  %v6284_v62 = vmax.f32 %v6252_v53, 0.0  ;;  %v17583_v4 = vld [vmem:[#allocation78_spill] sm:$0xff] }
 0xc29   : > { %v5578_v33 = vadd.f32 %v16635_v15, %v4962_v17  ;;  %v2506_v52 = vadd.f32 %v17578_v25, %v1846_v23  ;;  %v4974_v54 = vadd.f32 %v17580_v27, %v4358_v56  ;;  %v6249_v15 = vadd.f32 %v16709_v21, %v6210_v61  ;;  %v17585_v29 = vld [vmem:[#allocation54_spill] sm:$0xff]  ;;  %v17587_v17 = vld [vmem:[#allocation73_spill] sm:$0xff] }
 0xc2a   : > { %v6287_v19 = vmax.f32 %v6255_v41, 0.0  ;;  %v6253_v18 = vadd.f32 %v16709_v21, %v6214_v13  ;;  %v3726_v58 = vadd.f32 %v17579_v7, %v3110_v34  ;;  %v1782_v39 = vadd.f32 %v17582_v30, %v17581_v47  ;;  %v17589_v34 = vld [vmem:[#allocation81_spill] sm:$0xff] }
 0xc2b   : > { %v6194_v20 = vadd.f32 %v16740_v22, %v5578_v33  ;;  %v6193_v57 = vadd.f32 %v16733_v45, %v16630_v51  ;;  %v6268_v22 = vmax.f32 %v6236_v60, 0.0  ;;  %v3122_v53 = vadd.f32 %v17584_v36, %v2506_v52  ;;  %v17592_v7 = vld [vmem:[#allocation77_spill] sm:$0xff] }
 0xc2c   : > { %v16838_v11 = vpack.c.bf16 %v6287_v19, %v6286_v1  ;;  %v6285_v24 = vmax.f32 %v6253_v18, 0.0  ;;  %v4342_v23 = vadd.f32 %v17583_v4, %v3726_v58  ;;  %v5590_v41 = vadd.f32 %v16668_v5, %v4974_v54  ;;  %v17588_v5 = vld [vmem:[#allocation61_spill] sm:$0xff] }
 0xc2d   : > { %v6248_v13 = vadd.f32 %v16709_v21, %v6209_v12  ;;  %v2490_v8 = vadd.f32 %v17585_v29, %v1782_v39  ;;  %v6233_v51 = vadd.f32 %v16709_v21, %v6194_v20  ;;  %v16864_v45 = vpack.c.bf16 %v6269_v31, %v6268_v22 }
 0xc2e   : > { %v16845_v26 = vpack.c.bf16 %v6285_v24, %v6284_v62  ;;  %12836 = vmatprep.subr.bf16.mxu1 %v16838_v11  ;;  %12916 = vmatprep.subr.bf16.mxu0 %v16838_v11  ;;  %v4958_v2 = vadd.f32 %v17586_v63, %v4342_v23  ;;  %v3738_v28 = vadd.f32 %v17587_v17, %v3122_v53  ;;  %v6281_v1 = vmax.f32 %v6249_v15, 0.0  ;;  %v17591_v62 = vld [vmem:[#allocation87_spill] sm:$0xff]  ;;  %v14774_v63 = vld [vmem:[#allocation8 + $0x80] ss:$8 sps:$4 sm:$0xff]  }
 0xc2f   : > { %12837 = vmatpush3.bf16.msra.mxu1 %v16748_v42  ;;  %12917 = vmatpush3.bf16.msra.mxu0 %v16748_v42  ;;  %v6206_v61 = vadd.f32 %v16770_v38, %v5590_v41  ;;  %v3106_v19 = vadd.f32 %v17588_v5, %v2490_v8  ;;  %v6232_v35 = vadd.f32 %v16709_v21, %v6193_v57  ;;  %v6280_v33 = vmax.f32 %v6248_v13, 0.0  ;;  %v17590_v38 = vld [vmem:[#allocation69_spill] sm:$0xff]  ;;  %v14753_v17 = vld [vmem:[#allocation8 + $0x10] ss:$8 sps:$4 sm:$0xff]  }
 0xc30   : > { %12838 = vmatprep.subr.bf16.mxu1 %v16845_v26  ;;  %12918 = vmatprep.subr.bf16.mxu0 %v16845_v26  ;;  %v5574_v18 = vadd.f32 %v16624_v49, %v4958_v2  ;;  %v4354_v10 = vadd.f32 %v17589_v34, %v3738_v28  ;;  %v6205_v56 = vadd.f32 %v16763_v48, %v16663_v59  ;;  %v6265_v12 = vmax.f32 %v6233_v51, 0.0  ;;  %v17594_v8 = vld [vmem:[#allocation89_spill] sm:$0xff]  ;;  %v14755_v2 = vld [vmem:[#allocation8 + $0x14] ss:$8 sps:$4 sm:$0xff]   ;;  %v14780_v28 = vld [vmem:[#allocation8 + $0x90] ss:$8 sps:$4 sm:$0xff]  }
 0xc31   : > { %v3722_v60 = vadd.f32 %v17590_v38, %v3106_v19  ;;  %v6245_v25 = vadd.f32 %v16709_v21, %v6206_v61  ;;  %v16882_v52 = vpack.c.bf16 %v6281_v1, %v6280_v33  ;;  %v6264_v20 = vmax.f32 %v6232_v35, 0.0  ;;  %v14782_v51 = vld [vmem:[#allocation8 + $0x94] ss:$8 sps:$4 sm:$0xff]   ;;  %v14758_v61 = vld [vmem:[#allocation8 + $0x24] ss:$8 sps:$4 sm:$0xff]  }
 0xc32   : > { %v6190_v49 = vadd.f32 %v16730_v6, %v5574_v18  ;;  %v4970_v24 = vadd.f32 %v17591_v62, %v4354_v10  ;;  %v6244_v48 = vadd.f32 %v16709_v21, %v6205_v56  ;;  %v17593_v6 = vld [vmem:[#allocation85_spill] sm:$0xff]  ;;  %v6201_v39 = vadd.f32 %v16753_v16, %v16652_v40  ;;  %v14761_v18 = vld [vmem:[#allocation8 + $0x34] ss:$8 sps:$4 sm:$0xff]   ;;  %v14759_v34 = vld [vmem:[#allocation8 + $0x30] ss:$8 sps:$4 sm:$0xff]  }
 0xc33   : > { %12839 = vmatpush3.bf16.msra.mxu1 %v16864_v45  ;;  %12919 = vmatpush3.bf16.msra.mxu0 %v16864_v45  ;;  %v4338_v58 = vadd.f32 %v17592_v7, %v3722_v60  ;;  %v16893_v54 = vpack.c.bf16 %v6265_v12, %v6264_v20  ;;  %v6277_v47 = vmax.f32 %v6245_v25, 0.0  ;;  %v6224_v36 = vadd.f32 %v16709_v21, %v16712_v0  ;;  %v14750_v0 = vld [vmem:[#allocation8] ss:$8 sps:$4 sm:$0xff]   ;;  %v14788_v1 = vld [vmem:[#allocation8 + $0xa4] ss:$8 sps:$4 sm:$0xff]  }
 0xc34   : > { %12840 = vmatprep.subr.bf16.mxu1 %v16787_v9  ;;  %12920 = vmatprep.subr.bf16.mxu0 %v16787_v9  ;;  %v5586_v59 = vadd.f32 %v16657_v50, %v4970_v24  ;;  %v6229_v27 = vadd.f32 %v16709_v21, %v6190_v49  ;;  %v6228_v50 = vadd.f32 %v16709_v21, %v16723_v55  ;;  %v6276_v4 = vmax.f32 %v6244_v48, 0.0  ;;  %v14756_v5 = vld [vmem:[#allocation8 + $0x20] ss:$8 sps:$4 sm:$0xff]   ;;  %v14794_v35 = vld [vmem:[#allocation8 + $0xb4] ss:$8 sps:$4 sm:$0xff]  }
 0xc35   : > { %v4954_v31 = vadd.f32 %v17593_v6, %v4338_v58  ;;  %v6240_v22 = vadd.f32 %v16709_v21, %v6201_v39  ;;  %v6256_v29 = vmax.f32 %v6224_v36, 0.0  ;;  %v14786_v19 = vld [vmem:[#allocation8 + $0xa0] ss:$8 sps:$4 sm:$0xff]   ;;  %v14792_v10 = vld [vmem:[#allocation8 + $0xb0] ss:$8 sps:$4 sm:$0xff]  }
 0xc36   : > { %v6202_v15 = vadd.f32 %v16760_v3, %v5586_v59  ;;  %v6261_v23 = vmax.f32 %v6229_v27, 0.0  ;;  %v16907_v57 = vpack.c.bf16 %v6277_v47, %v6276_v4  ;;  %v6260_v55 = vmax.f32 %v6228_v50, 0.0  ;;  %v14764_v56 = vld [vmem:[#allocation8 + $0x44] ss:$8 sps:$4 sm:$0xff]   ;;  %v14762_v33 = vld [vmem:[#allocation8 + $0x40] ss:$8 sps:$4 sm:$0xff]  }
 0xc37   : > { %12841 = vmatpush3.bf16.msra.mxu1 %v16738_v43  ;;  %12921 = vmatpush3.bf16.msra.mxu0 %v16738_v43  ;;  %v5570_v30 = vadd.f32 %v16613_v44, %v4954_v31  ;;  %v6272_v53 = vmax.f32 %v6240_v22, 0.0  ;;  %v14767_v38 = vld [vmem:[#allocation8 + $0x54] ss:$8 sps:$4 sm:$0xff]   ;;  %v14765_v60 = vld [vmem:[#allocation8 + $0x50] ss:$8 sps:$4 sm:$0xff]   ;;  %v14798_v24 = vld [vmem:[#allocation10 + $0x20] sm:$0xff]  }
 0xc38   : > { %12842 = vmatprep.subr.bf16.mxu1 %v16882_v52  ;;  %12922 = vmatprep.subr.bf16.mxu0 %v16882_v52  ;;  %v6241_v44 = vadd.f32 %v16709_v21, %v6202_v15  ;;  %v16915_v16 = vpack.c.bf16 %v6261_v23, %v6260_v55  ;;  %v14770_v49 = vld [vmem:[#allocation8 + $0x64] ss:$8 sps:$4 sm:$0xff]   ;;  %v14768_v12 = vld [vmem:[#allocation8 + $0x60] ss:$8 sps:$4 sm:$0xff]   ;;  %v14797_v62 = vld [vmem:[#allocation8 + $0xf4] ss:$8 sps:$4 sm:$0xff]  }
 0xc39   : > { %v6186_v3 = vadd.f32 %v16719_v14, %v5570_v30  ;;  %v14799_v25 = vld [vmem:[#allocation10] sm:$0xff]  }
 0xc3a   : > { %v6273_v14 = vmax.f32 %v6241_v44, 0.0 }
 0xc3b   : > { %12843 = vmatpush3.bf16.msra.mxu1 %v16893_v54  ;;  %12923 = vmatpush3.bf16.msra.mxu0 %v16893_v54  ;;  %v6225_v40 = vadd.f32 %v16709_v21, %v6186_v3 }
 0xc3c   : > { %12844 = vmatprep.subr.bf16.mxu1 %v16768_v32  ;;  %12924 = vmatprep.subr.bf16.mxu0 %v16768_v32  ;;  %v16923_v13 = vpack.c.bf16 %v6273_v14, %v6272_v53 }
 0xc3d   : > { %v6257_v41 = vmax.f32 %v6225_v40, 0.0 }
 0xc3f   : > { %12845 = vmatpush3.bf16.msra.mxu1 %v16728_v37  ;;  %12925 = vmatpush3.bf16.msra.mxu0 %v16728_v37  ;;  %v16929_v21 = vpack.c.bf16 %v6257_v41, %v6256_v29 }
 0xc40   : > { %12846 = vmatprep.subr.bf16.mxu1 %v16907_v57  ;;  %12926 = vmatprep.subr.bf16.mxu0 %v16907_v57 }
 0xc43   : > { %12847 = vmatpush3.bf16.msra.mxu1 %v16915_v16  ;;  %12927 = vmatpush3.bf16.msra.mxu0 %v16915_v16 }
 0xc44   : > { %12848 = vmatprep.subr.bf16.mxu1 %v16758_v46  ;;  %12928 = vmatprep.subr.bf16.mxu0 %v16758_v46 }
 0xc47   : > { %12849 = vmatpush3.bf16.msra.mxu1 %v17594_v8  ;;  %12929 = vmatpush3.bf16.msra.mxu0 %v17594_v8 }
 0xc48   : > { %12850 = vmatprep.subr.bf16.mxu1 %v16923_v13  ;;  %12930 = vmatprep.subr.bf16.mxu0 %v16923_v13 }
 0xc4b   : > { %12851 = vmatpush3.bf16.msra.mxu1 %v16929_v21  ;;  %12931 = vmatpush3.bf16.msra.mxu0 %v16929_v21 }
 0xc4c   : > { %12876 = vmatprep.subr.bf16.mxu1 %v16838_v11 }
 0xc4e   : > { %6385 = vmatmul.mubr.bf16.vlgmr.msra.gmra.mxu1 %v14750_v0  ;;  %6613 = vmatmul.mubr.bf16.vlgmr.msra.gmra.mxu0 %v14774_v63 }
 0xc4f   : > { %12877 = vmatpush3.bf16.msra.mxu1 %v16748_v42  ;;  %6392 = vmatprep.mubr.bf16.mxu1 %v14755_v2 }
 0xc50   : > { %12878 = vmatprep.subr.bf16.mxu1 %v16845_v26  ;;  %6620 = vmatprep.mubr.bf16.mxu0 %v14782_v51 }
 0xc53   : > { %12879 = vmatpush3.bf16.msra.mxu1 %v16864_v45 }
 0xc54   : > { %12880 = vmatprep.subr.bf16.mxu1 %v16787_v9 }
 0xc56   : > { %6393 = vmatmul.mubr.bf16.gmra.mxu1 %v14753_v17  ;;  %6621 = vmatmul.mubr.bf16.gmra.mxu0 %v14780_v28 }
 0xc57   : > { %12881 = vmatpush3.bf16.msra.mxu1 %v16738_v43  ;;  %6400 = vmatprep.mubr.bf16.mxu1 %v14758_v61 }
 0xc58   : > { %12882 = vmatprep.subr.bf16.mxu1 %v16882_v52  ;;  %6628 = vmatprep.mubr.bf16.mxu0 %v14788_v1 }
 0xc5b   : > { %12883 = vmatpush3.bf16.msra.mxu1 %v16893_v54 }
 0xc5c   : > { %12884 = vmatprep.subr.bf16.mxu1 %v16768_v32 }
 0xc5e   : > { %6401 = vmatmul.mubr.bf16.gmra.mxu1 %v14756_v5  ;;  %6629 = vmatmul.mubr.bf16.gmra.mxu0 %v14786_v19 }
 0xc5f   : > { %12885 = vmatpush3.bf16.msra.mxu1 %v16728_v37  ;;  %6408 = vmatprep.mubr.bf16.mxu1 %v14761_v18 }
 0xc60   : > { %12886 = vmatprep.subr.bf16.mxu1 %v16907_v57  ;;  %6636 = vmatprep.mubr.bf16.mxu0 %v14794_v35 }
 0xc63   : > { %12887 = vmatpush3.bf16.msra.mxu1 %v16915_v16 }
 0xc64   : > { %12888 = vmatprep.subr.bf16.mxu1 %v16758_v46 }
 0xc66   : > { %6409 = vmatmul.mubr.bf16.gmra.mxu1 %v14759_v34  ;;  %6637 = vmatmul.mubr.bf16.gmra.mxu0 %v14792_v10 }
 0xc67   : > { %12889 = vmatpush3.bf16.msra.mxu1 %v17594_v8  ;;  %6498 = vmatprep.mubr.bf16.mxu1 %v14764_v56 }
 0xc68   : > { %12890 = vmatprep.subr.bf16.mxu1 %v16923_v13  ;;  %13563 = vmatprep.mubr.msk.bf16.mxu0 %vm6815_vm2, %v14799_v25 }
 0xc6b   : > { %12891 = vmatpush3.bf16.msra.mxu1 %v16929_v21 }
 0xc6c   : > { %12956 = vmatprep.subr.bf16.mxu1 %v16838_v11  ;;  %v14773_v11 = vld [vmem:[#allocation8 + $0x74] ss:$8 sps:$4 sm:$0xff]  }
 0xc6e   : > { %6499 = vmatmul.mubr.bf16.vlgmr.msra.gmra.mxu1 %v14762_v33 }
 0xc6f   : > { %12957 = vmatpush3.bf16.msra.mxu1 %v16748_v42  ;;  %6506 = vmatprep.mubr.bf16.mxu1 %v14767_v38  ;;  %v14771_v42 = vld [vmem:[#allocation8 + $0x70] ss:$8 sps:$4 sm:$0xff]  }
 0xc70   : > { %12958 = vmatprep.subr.bf16.mxu1 %v16845_v26  ;;  %v14791_v26 = vld [vmem:[#allocation8 + $0xe4] ss:$8 sps:$4 sm:$0xff]  }
 0xc73   : > { %12959 = vmatpush3.bf16.msra.mxu1 %v16864_v45  ;;  %v14789_v45 = vld [vmem:[#allocation8 + $0xe0] ss:$8 sps:$4 sm:$0xff]  }
 0xc74   : > { %12960 = vmatprep.subr.bf16.mxu1 %v16787_v9  ;;  %v14779_v9 = vld [vmem:[#allocation8 + $0xc4] ss:$8 sps:$4 sm:$0xff]  }
 0xc76   : > { %6507 = vmatmul.mubr.bf16.gmra.mxu1 %v14765_v60 }
 0xc77   : > { %12961 = vmatpush3.bf16.msra.mxu1 %v16738_v43  ;;  %6514 = vmatprep.mubr.bf16.mxu1 %v14770_v49  ;;  %v14777_v43 = vld [vmem:[#allocation8 + $0xc0] ss:$8 sps:$4 sm:$0xff]  }
 0xc78   : > { %12962 = vmatprep.subr.bf16.mxu1 %v16882_v52 }
 0xc7b   : > { %12963 = vmatpush3.bf16.msra.mxu1 %v16893_v54 }
 0xc7c   : > { %12964 = vmatprep.subr.bf16.mxu1 %v16768_v32  ;;  %v14785_v32 = vld [vmem:[#allocation8 + $0xd4] ss:$8 sps:$4 sm:$0xff]  }
 0xc7e   : > { %6515 = vmatmul.mubr.bf16.gmra.mxu1 %v14768_v12 }
 0xc7f   : > { %12965 = vmatpush3.bf16.msra.mxu1 %v16728_v37  ;;  %6522 = vmatprep.mubr.bf16.mxu1 %v14773_v11  ;;  %v14783_v37 = vld [vmem:[#allocation8 + $0xd0] ss:$8 sps:$4 sm:$0xff]  }
 0xc80   : > { %12966 = vmatprep.subr.bf16.mxu1 %v16907_v57 }
 0xc83   : > { %12967 = vmatpush3.bf16.msra.mxu1 %v16915_v16 }
 0xc84   : > { %12968 = vmatprep.subr.bf16.mxu1 %v16758_v46  ;;  %v14795_v46 = vld [vmem:[#allocation8 + $0xf0] ss:$8 sps:$4 sm:$0xff]  }
 0xc86   : > { %6523 = vmatmul.mubr.bf16.gmra.mxu1 %v14771_v42 }
 0xc87   : > { %12969 = vmatpush3.bf16.msra.mxu1 %v17594_v8  ;;  %6726 = vmatprep.mubr.bf16.mxu1 %v14779_v9 }
 0xc88   : > { %12970 = vmatprep.subr.bf16.mxu1 %v16923_v13 }
 0xc8b   : > { %12971 = vmatpush3.bf16.msra.mxu1 %v16929_v21 }
 0xc8e   : > { %6727 = vmatmul.mubr.bf16.vlgmr.msra.gmra.mxu1 %v14777_v43 }
 0xc8f   : > { %6734 = vmatprep.mubr.bf16.mxu1 %v14785_v32 }
 0xc96   : > { %6735 = vmatmul.mubr.bf16.gmra.mxu1 %v14783_v37 }
 0xc97   : > { %6742 = vmatprep.mubr.bf16.mxu1 %v14791_v26 }
 0xc9e   : > { %6743 = vmatmul.mubr.bf16.gmra.mxu1 %v14789_v45 }
 0xc9f   : > { %6750 = vmatprep.mubr.bf16.mxu1 %v14797_v62 }
 0xca6   : > { %6751 = vmatmul.mubr.bf16.gmra.mxu1 %v14795_v46 }
 0xca7   : > { %13579 = vmatprep.mubr.msk.bf16.mxu1 %vm6815_vm2, %v14798_v24 }
 0xd0e   : > { %v12852_v52 = vpop.f32.mrf.mxu1  ;;  %v12932_v22 = vpop.f32.mrf.mxu0 }
 0xd10   : > { %v12853_v7 = vpop.f32.mrf.mxu1  ;;  %v12933_v36 = vpop.f32.mrf.mxu0 }
 0xd11   : > { %v16967_v58 = vadd.f32 %v12853_v7, %v12852_v52  ;;  %v12934_v43 = vadd.f32 %v12933_v36, %v12932_v22 }
 0xd12   : > { %v12855_v20 = vpop.f32.mrf.mxu1  ;;  %v12935_v21 = vpop.f32.mrf.mxu0 }
 0xd14   : > { %v12856_v59 = vpop.f32.mrf.mxu1  ;;  %v12936_v51 = vpop.f32.mrf.mxu0 }
 0xd15   : > { %v12857_v13 = vadd.f32 %v12856_v59, %v12855_v20  ;;  %v12937_v26 = vadd.f32 %v12936_v51, %v12935_v21 }
 0xd16   : > { %v12858_v48 = vpop.f32.mrf.mxu1  ;;  %v12938_v61 = vpop.f32.mrf.mxu0 }
 0xd18   : > { %v12859_v6 = vpop.f32.mrf.mxu1  ;;  %v12939_v19 = vpop.f32.mrf.mxu0 }
 0xd19   : > { %v16969_v31 = vadd.f32 %v12859_v6, %v12858_v48 }
 0xd1a   : > { %v16971_v27 = vpop.f32.mrf.mxu1  ;;  %v12941_v34 = vpop.f32.mrf.mxu0 }
 0xd1c   : > { %v16973_v54 = vpop.f32.mrf.mxu1  ;;  %v12942_v33 = vpop.f32.mrf.mxu0 }
 0xd1d   : > { %v12943_v22 = vadd.f32 %v12942_v33, %v12941_v34 }
 0xd1e   : > { %v12864_v15 = vpop.f32.mrf.mxu1  ;;  %v12944_v49 = vpop.f32.mrf.mxu0 }
 0xd20   : > { %v12865_v47 = vpop.f32.mrf.mxu1  ;;  %v12945_v9 = vpop.f32.mrf.mxu0 }
 0xd21   : > { %v16975_v30 = vadd.f32 %v12865_v47, %v12864_v15  ;;  %v12940_v47 = vadd.f32 %v12939_v19, %v12938_v61 }
 0xd22   : > { %v16977_v50 = vpop.f32.mrf.mxu1  ;;  %v12947_v46 = vpop.f32.mrf.mxu0 }
 0xd24   : > { %v16979_v39 = vpop.f32.mrf.mxu1  ;;  %v12948_v59 = vpop.f32.mrf.mxu0 }
 0xd25   : > { %v12869_v61 = vadd.f32 %v16979_v39, %v16977_v50  ;;  %v12949_v34 = vadd.f32 %v12948_v59, %v12947_v46  ;;  %v14808_v59 = vld [vmem:[#allocation11 + $0x8] sm:$0xff]  }
 0xd26   : > { %v12870_v4 = vpop.f32.mrf.mxu1 }
 0xd28   : > { %v12871_v3 = vpop.f32.mrf.mxu1 }
 0xd29   : > { %v16981_v23 = vadd.f32 %v12871_v3, %v12870_v4  ;;  %v12863_v3 = vadd.f32 %v16973_v54, %v16971_v27  ;;  %v12946_v27 = vadd.f32 %v12945_v9, %v12944_v49 }
 0xd2a   : > { %v16983_v44 = vpop.f32.mrf.mxu1 }
 0xd2c   : > { %v16985_v57 = vpop.f32.mrf.mxu1 }
 0xd2e   : > { %v12892_v55 = vpop.f32.mrf.mxu1 }
 0xd30   : > { %v12893_v40 = vpop.f32.mrf.mxu1 }
 0xd31   : > { %v12894_v16 = vadd.f32 %v12893_v40, %v12892_v55 }
 0xd32   : > { %v12895_v14 = vpop.f32.mrf.mxu1 }
 0xd33   : > { %v6759_v53 = vmax.f32 %v16967_v58, %v12894_v16 }
 0xd34   : > { %v12896_v41 = vpop.f32.mrf.mxu1 }
 0xd35   : > { %v12897_v29 = vadd.f32 %v12896_v41, %v12895_v14  ;;  %v12950_v14 = vpop.f32.mrf.mxu0 }
 0xd36   : > { %v12898_v8 = vpop.f32.mrf.mxu1 }
 0xd37   : > { %v6760_v0 = vmax.f32 %v12857_v13, %v12897_v29 }
 0xd38   : > { %v12899_v63 = vpop.f32.mrf.mxu1 }
 0xd39   : > { %v12900_v48 = vadd.f32 %v12899_v63, %v12898_v8  ;;  %v12951_v63 = vpop.f32.mrf.mxu0 }
 0xd3a   : > { %v12901_v2 = vpop.f32.mrf.mxu1  ;;  %v12952_v9 = vadd.f32 %v12951_v63, %v12950_v14 }
 0xd3b   : > { %v6761_v36 = vmax.f32 %v16969_v31, %v12900_v48  ;;  %v14809_v48 = vld [vmem:[#allocation11] sm:$0xff]  }
 0xd3c   : > { %v12902_v17 = vpop.f32.mrf.mxu1 }
 0xd3d   : > { %v12903_v6 = vadd.f32 %v12902_v17, %v12901_v2 }
 0xd3e   : > { %v12904_v28 = vpop.f32.mrf.mxu1 }
 0xd40   : > { %v12905_v1 = vpop.f32.mrf.mxu1 }
 0xd41   : > { %v12906_v2 = vadd.f32 %v12905_v1, %v12904_v28 }
 0xd42   : > { %v12907_v5 = vpop.f32.mrf.mxu1 }
 0xd44   : > { %v12908_v18 = vpop.f32.mrf.mxu1 }
 0xd45   : > { %v12909_v51 = vadd.f32 %v12908_v18, %v12907_v5 }
 0xd46   : > { %v16988_v35 = vpop.f32.mrf.mxu1 }
 0xd48   : > { %v16990_v10 = vpop.f32.mrf.mxu1 }
 0xd49   : > { %v12912_v49 = vadd.f32 %v16990_v10, %v16988_v35  ;;  %v14804_v35 = vld [vmem:[#allocation10 + $0x30] sm:$0xff]  }
 0xd4a   : > { %v16992_v56 = vpop.f32.mrf.mxu1  ;;  %v14803_v10 = vld [vmem:[#allocation11 + $0x10] sm:$0xff]  }
 0xd4b   : > { %v6765_v46 = vmax.f32 %v16981_v23, %v12912_v49  ;;  %v14801_v23 = vld [vmem:[#allocation11 + $0x18] sm:$0xff]   ;;  %v14823_v49 = vld [vmem:[#allocation10 + $0xa8] sm:$0xff]  }
 0xd4c   : > { %v12914_v38 = vpop.f32.mrf.mxu1 }
 0xd4d   : > { %v12915_v50 = vadd.f32 %v12914_v38, %v16992_v56  ;;  %v14806_v56 = vld [vmem:[#allocation10 + $0x10] sm:$0xff]   ;;  %v14805_v38 = vld [vmem:[#allocation10 + $0x38] sm:$0xff]  }
 0xd4e   : > { %v12972_v60 = vpop.f32.mrf.mxu1 }
 0xd50   : > { %v12973_v12 = vpop.f32.mrf.mxu1 }
 0xd51   : > { %v12974_v11 = vadd.f32 %v12973_v12, %v12972_v60  ;;  %v12953_v60 = vpop.f32.mrf.mxu0  ;;  %v6763_v12 = vmax.f32 %v16975_v30, %v12906_v2  ;;  %v12875_v30 = vadd.f32 %v16985_v57, %v16983_v44  ;;  %v14800_v44 = vld [vmem:[#allocation10 + $0x28] sm:$0xff]  }
 0xd52   : > { %v12975_v42 = vpop.f32.mrf.mxu1  ;;  %v14802_v57 = vld [vmem:[#allocation10 + $0x8] sm:$0xff]  }
 0xd53   : > { %v6767_v37 = vmax.f32 %v12934_v43, %v12974_v11  ;;  %v6764_v11 = vmax.f32 %v12869_v61, %v12909_v51  ;;  %v12954_v18 = vpop.f32.mrf.mxu0  ;;  %v14810_v61 = vld [vmem:[#allocation10 + $0x40] sm:$0xff]  }
 0xd54   : > { %v12976_v32 = vpop.f32.mrf.mxu1 }
 0xd55   : > { %v12977_v45 = vadd.f32 %v12976_v32, %v12975_v42  ;;  %v6775_v52 = vmax.f32 %v6759_v53, %v6767_v37  ;;  %v6762_v53 = vmax.f32 %v12863_v3, %v12903_v6 }
 0xd56   : > { %v12978_v62 = vpop.f32.mrf.mxu1 }
 0xd57   : > { %v6768_v24 = vmax.f32 %v12937_v26, %v12977_v45  ;;  %v12955_v45 = vadd.f32 %v12954_v18, %v12953_v60  ;;  %v14813_v60 = vld [vmem:[#allocation10 + $0x58] sm:$0xff]   ;;  %v14822_v18 = vld [vmem:[#allocation10 + $0xa0] sm:$0xff]  }
 0xd58   : > { %v12979_v25 = vpop.f32.mrf.mxu1 }
 0xd59   : > { %v6776_v7 = vmax.f32 %v6760_v0, %v6768_v24  ;;  %v12980_v58 = vadd.f32 %v12979_v25, %v12978_v62  ;;  %v6766_v24 = vmax.f32 %v12875_v30, %v12915_v50  ;;  %v14824_v50 = vld [vmem:[#allocation10 + $0xb0] sm:$0xff]   ;;  %v14827_v30 = vld [vmem:[#allocation10 + $0xc8] sm:$0xff]  }
 0xd5a   : > { %v12981_v20 = vpop.f32.mrf.mxu1 }
 0xd5b   : > { %v16994_v15 = vpack.c.bf16 %v6776_v7, %v6775_v52  ;;  %v6769_v55 = vmax.f32 %v12940_v47, %v12980_v58 }
 0xd5c   : > { %v12982_v4 = vpop.f32.mrf.mxu1 }
 0xd5d   : > { %v12983_v40 = vadd.f32 %v12982_v4, %v12981_v20  ;;  %v6777_v29 = vmax.f32 %v6761_v36, %v6769_v55  ;;  %v14807_v20 = vld [vmem:[#allocation10 + $0x18] sm:$0xff]  }
 0xd5e   : > { %v12984_v16 = vpop.f32.mrf.mxu1 }
 0xd5f   : > { %v6770_v41 = vmax.f32 %v12943_v22, %v12983_v40 }
 0xd60   : > { %v12985_v13 = vpop.f32.mrf.mxu1 }
 0xd61   : > { %v6778_v8 = vmax.f32 %v6762_v53, %v6770_v41  ;;  %v12986_v21 = vadd.f32 %v12985_v13, %v12984_v16 }
 0xd62   : > { %v12987_v0 = vpop.f32.mrf.mxu1 }
 0xd63   : > { %v16999_v17 = vpack.c.bf16 %v6778_v8, %v6777_v29  ;;  %v6771_v19 = vmax.f32 %v12946_v27, %v12986_v21 }
 0xd64   : > { %v12988_v54 = vpop.f32.mrf.mxu1 }
 0xd65   : > { %v12989_v31 = vadd.f32 %v12988_v54, %v12987_v0  ;;  %v6779_v32 = vmax.f32 %v6763_v12, %v6771_v19  ;;  %v14814_v12 = vld [vmem:[#allocation10 + $0x60] sm:$0xff]  }
 0xd66   : > { %v12990_v33 = vpop.f32.mrf.mxu1 }
 0xd67   : > { %v6772_v42 = vmax.f32 %v12949_v34, %v12989_v31  ;;  %v14811_v31 = vld [vmem:[#allocation10 + $0x48] sm:$0xff]  }
 0xd68   : > { %v12991_v43 = vpop.f32.mrf.mxu1 }
 0xd69   : > { %v6780_v28 = vmax.f32 %v6764_v11, %v6772_v42  ;;  %v12992_v1 = vadd.f32 %v12991_v43, %v12990_v33  ;;  %v14812_v33 = vld [vmem:[#allocation10 + $0x50] sm:$0xff]   ;;  %v14815_v11 = vld [vmem:[#allocation10 + $0x68] sm:$0xff]   ;;  %v14817_v43 = vld [vmem:[#allocation10 + $0x78] sm:$0xff]  }
 0xd6a   : > { %v12993_v5 = vpop.f32.mrf.mxu1  ;;  %v14816_v42 = vld [vmem:[#allocation10 + $0x70] sm:$0xff]  }
 0xd6b   : > { %v17007_v39 = vpack.c.bf16 %v6780_v28, %v6779_v32  ;;  %v6773_v26 = vmax.f32 %v12952_v9, %v12992_v1  ;;  %v14818_v32 = vld [vmem:[#allocation10 + $0x80] sm:$0xff]   ;;  %v14819_v28 = vld [vmem:[#allocation10 + $0x88] sm:$0xff]   ;;  %v14820_v1 = vld [vmem:[#allocation10 + $0x90] sm:$0xff]  }
 0xd6c   : > { %v12994_v37 = vpop.f32.mrf.mxu1  ;;  %v14825_v9 = vld [vmem:[#allocation10 + $0xb8] sm:$0xff]  }
 0xd6d   : > { %v12995_v62 = vadd.f32 %v12994_v37, %v12993_v5  ;;  %v6781_v52 = vmax.f32 %v6765_v46, %v6773_v26  ;;  %v14821_v5 = vld [vmem:[#allocation10 + $0x98] sm:$0xff]   ;;  %v14826_v37 = vld [vmem:[#allocation10 + $0xc0] sm:$0xff]   ;;  %v14828_v26 = vld [vmem:[#allocation10 + $0xd0] sm:$0xff]  }
 0xd6e   : > { %v14830_v46 = vld [vmem:[#allocation10 + $0xe0] sm:$0xff]  }
 0xd6f   : > { %v6774_v25 = vmax.f32 %v12955_v45, %v12995_v62  ;;  %v14838_v45 = vld [vmem:[#allocation11 + $0x28] sm:$0xff]   ;;  %v14829_v62 = vld [vmem:[#allocation10 + $0xd8] sm:$0xff]  }
 0xd71   : > { %v6782_v7 = vmax.f32 %v6766_v24, %v6774_v25  ;;  %v14839_v24 = vld [vmem:[#allocation11 + $0x20] sm:$0xff]   ;;  %v14831_v25 = vld [vmem:[#allocation10 + $0xe8] sm:$0xff]  }
 0xd73   : > { %v17012_v58 = vpack.c.bf16 %v6782_v7, %v6781_v52  ;;  %v14832_v52 = vld [vmem:[#allocation10 + $0xf0] sm:$0xff]   ;;  %v14840_v7 = vld [vmem:[#allocation11 + $0x38] sm:$0xff]  }
 0xd75   : > { %13555 = vmatprep.subr.bf16.mxu0 %v17012_v58  ;;  %13571 = vmatprep.subr.bf16.mxu1 %v17012_v58 }
 0xd76   : > { %13556 = vmatpush3.bf16.msra.mxu0 %v17012_v58  ;;  %13572 = vmatpush3.bf16.msra.mxu1 %v17012_v58 }
 0xd77   : > { %13557 = vmatprep.subr.bf16.mxu0 %v17007_v39  ;;  %13573 = vmatprep.subr.bf16.mxu1 %v17007_v39 }
 0xd7a   : > { %13558 = vmatpush3.bf16.msra.mxu0 %v17007_v39  ;;  %13574 = vmatpush3.bf16.msra.mxu1 %v17007_v39 }
 0xd7b   : > { %13559 = vmatprep.subr.bf16.mxu0 %v16999_v17  ;;  %13575 = vmatprep.subr.bf16.mxu1 %v16999_v17 }
 0xd7e   : > { %13560 = vmatpush3.bf16.msra.mxu0 %v16999_v17  ;;  %13576 = vmatpush3.bf16.msra.mxu1 %v16999_v17 }
 0xd7f   : > { %13561 = vmatprep.subr.bf16.mxu0 %v16994_v15  ;;  %13577 = vmatprep.subr.bf16.mxu1 %v16994_v15 }
 0xd82   : > { %13562 = vmatpush3.bf16.msra.mxu0 %v16994_v15  ;;  %13578 = vmatpush3.bf16.msra.mxu1 %v16994_v15 }
 0xd83   : > { %13587 = vmatprep.subr.bf16.mxu0 %v14801_v23  ;;  %13599 = vmatprep.subr.bf16.mxu1 %v14808_v59 }
 0xd85   : > { %13580 = vmatmul.mubr.msk.bf16.vlgmr.msra.gmra.mxu1 %vm6815_vm2, %v14800_v44  ;;  %13564 = vmatmul.mubr.msk.bf16.vlgmr.msra.gmra.mxu0 %vm6815_vm2, %v14802_v57  ;;  %v14834_v44 = vld [vmem:[#allocation10 + $0x100] sm:$0xff]   ;;  %v14836_v57 = vld [vmem:[#allocation10 + $0x110] sm:$0xff]  }
 0xd86   : > { %13588 = vmatpush3.bf16.msra.mxu0 %v14801_v23  ;;  %13583 = vmatprep.mubr.msk.bf16.mxu1 %vm6815_vm2, %v14804_v35  ;;  %v14833_v23 = vld [vmem:[#allocation10 + $0xf8] sm:$0xff]  }
 0xd87   : > { %13589 = vmatprep.subr.bf16.mxu0 %v14803_v10  ;;  %13567 = vmatprep.mubr.msk.bf16.mxu0 %vm6815_vm2, %v14806_v56 }
 0xd88   : > { %13600 = vmatpush3.bf16.msra.mxu1 %v14808_v59 }
 0xd89   : > { %13601 = vmatprep.subr.bf16.mxu1 %v14809_v48 }
 0xd8a   : > { %13590 = vmatpush3.bf16.msra.mxu0 %v14803_v10 }
 0xd8b   : > { %13611 = vmatprep.subr.bf16.mxu0 %v17012_v58 }
 0xd8c   : > { %13602 = vmatpush3.bf16.msra.mxu1 %v14809_v48 }
 0xd8d   : > { %13584 = vmatmul.mubr.msk.bf16.gmra.mxu1 %vm6815_vm2, %v14805_v38  ;;  %13568 = vmatmul.mubr.msk.bf16.gmra.mxu0 %vm6815_vm2, %v14807_v20 }
 0xd8e   : > { %13627 = vmatprep.subr.bf16.mxu1 %v14838_v45 }
 0xe45   : > { %v13581_v6 = vpop.f32.mrf.mxu1  ;;  %v13565_v47 = vpop.f32.mrf.mxu0 }
 0xe47   : > { %v6976_v4 = vpop.f32.mrf.mxu1  ;;  %v6862_v3 = vpop.f32.mrf.mxu0 }
 0xe49   : > { %v13582_v55 = vpop.f32.mrf.mxu1  ;;  %v13566_v22 = vpop.f32.mrf.mxu0 }
 0xe4a   : > { %v6894_v16 = vpack.c.bf16 %v13566_v22, %v13565_v47  ;;  %v7008_v41 = vpack.c.bf16 %v13582_v55, %v13581_v6 }
 0xe4b   : > { %v6979_v40 = vpop.f32.mrf.mxu1  ;;  %v6865_v14 = vpop.f32.mrf.mxu0 }
 0xe4c   : > { %v7007_v36 = vpack.c.bf16 %v6979_v40, %v6976_v4  ;;  %v6893_v53 = vpack.c.bf16 %v6865_v14, %v6862_v3 }
 0xe4d   : > { %v13585_v13 = vpop.f32.mrf.mxu1  ;;  %v13569_v29 = vpop.f32.mrf.mxu0 }
 0xe4e   : > { %13591 = vmatprep.mubr.msk.bf16.mxu0 %vm7028_vm3, %v7007_v36  ;;  %13603 = vmatprep.mubr.msk.bf16.mxu1 %vm7028_vm3, %v6893_v53 }
 0xe4f   : > { %v6992_v8 = vpop.f32.mrf.mxu1  ;;  %13592 = vmatmul.mubr.msk.bf16.vlgmr.msra.gmra.mxu0 %vm7028_vm3, %v7008_v41  ;;  %v6878_v21 = vpop.f32.mrf.mxu0  ;;  %13604 = vmatmul.mubr.msk.bf16.vlgmr.msra.gmra.mxu1 %vm7028_vm3, %v6894_v16 }
 0xe50   : > { %13612 = vmatpush3.bf16.msra.mxu0 %v17012_v58  ;;  %13628 = vmatpush3.bf16.msra.mxu1 %v14838_v45 }
 0xe51   : > { %13613 = vmatprep.subr.bf16.mxu0 %v17007_v39  ;;  %v13586_v0 = vpop.f32.mrf.mxu1  ;;  %v13570_v63 = vpop.f32.mrf.mxu0  ;;  %13629 = vmatprep.subr.bf16.mxu1 %v14839_v24 }
 0xe52   : > { %v6896_v51 = vpack.c.bf16 %v13570_v63, %v13569_v29  ;;  %v7010_v34 = vpack.c.bf16 %v13586_v0, %v13585_v13 }
 0xe53   : > { %v6995_v2 = vpop.f32.mrf.mxu1  ;;  %v6881_v27 = vpop.f32.mrf.mxu0 }
 0xe54   : > { %v7009_v54 = vpack.c.bf16 %v6995_v2, %v6992_v8  ;;  %13614 = vmatpush3.bf16.msra.mxu0 %v17007_v39  ;;  %v6895_v19 = vpack.c.bf16 %v6881_v27, %v6878_v21  ;;  %13630 = vmatpush3.bf16.msra.mxu1 %v14839_v24 }
 0xe55   : > { %13615 = vmatprep.subr.bf16.mxu0 %v16999_v17  ;;  %13655 = vmatprep.subr.bf16.mxu1 %v14840_v7 }
 0xe56   : > { %13595 = vmatprep.mubr.msk.bf16.mxu0 %vm7028_vm3, %v7009_v54  ;;  %13607 = vmatprep.mubr.msk.bf16.mxu1 %vm7028_vm3, %v6895_v19 }
 0xe57   : > { %13596 = vmatmul.mubr.msk.bf16.gmra.mxu0 %vm7028_vm3, %v7010_v34  ;;  %13608 = vmatmul.mubr.msk.bf16.gmra.mxu1 %vm7028_vm3, %v6896_v51  ;;  %v14841_v51 = vld [vmem:[#allocation11 + $0x30] sm:$0xff]  }
 0xe58   : > { %13616 = vmatpush3.bf16.msra.mxu0 %v16999_v17  ;;  %13619 = vmatprep.mubr.msk.bf16.mxu0 %vm6815_vm2, %v14810_v61  ;;  %v14842_v61 = vld [vmem:[#allocation11 + $0x48] sm:$0xff]  }
 0xe59   : > { %13617 = vmatprep.subr.bf16.mxu0 %v16994_v15 }
 0xe5c   : > { %13618 = vmatpush3.bf16.msra.mxu0 %v16994_v15 }
 0xe5d   : > { %13639 = vmatprep.subr.bf16.mxu0 %v17012_v58 }
 0xe5f   : > { %13620 = vmatmul.mubr.msk.bf16.vlgmr.msra.gmra.mxu0 %vm6815_vm2, %v14811_v31 }
 0xe60   : > { %13640 = vmatpush3.bf16.msra.mxu0 %v17012_v58  ;;  %13623 = vmatprep.mubr.msk.bf16.mxu0 %vm6815_vm2, %v14812_v33 }
 0xe61   : > { %13641 = vmatprep.subr.bf16.mxu0 %v17007_v39 }
 0xe64   : > { %13642 = vmatpush3.bf16.msra.mxu0 %v17007_v39 }
 0xe65   : > { %13643 = vmatprep.subr.bf16.mxu0 %v16999_v17 }
 0xe67   : > { %13624 = vmatmul.mubr.msk.bf16.gmra.mxu0 %vm6815_vm2, %v14813_v60 }
 0xe68   : > { %13644 = vmatpush3.bf16.msra.mxu0 %v16999_v17  ;;  %13647 = vmatprep.mubr.msk.bf16.mxu0 %vm6815_vm2, %v14814_v12 }
 0xe69   : > { %13645 = vmatprep.subr.bf16.mxu0 %v16994_v15 }
 0xe6c   : > { %13646 = vmatpush3.bf16.msra.mxu0 %v16994_v15 }
 0xe6d   : > { %13667 = vmatprep.subr.bf16.mxu0 %v17012_v58 }
 0xe6f   : > { %13648 = vmatmul.mubr.msk.bf16.vlgmr.msra.gmra.mxu0 %vm6815_vm2, %v14815_v11 }
 0xe70   : > { %13668 = vmatpush3.bf16.msra.mxu0 %v17012_v58  ;;  %13651 = vmatprep.mubr.msk.bf16.mxu0 %vm6815_vm2, %v14816_v42 }
 0xe71   : > { %13669 = vmatprep.subr.bf16.mxu0 %v17007_v39 }
 0xe74   : > { %13670 = vmatpush3.bf16.msra.mxu0 %v17007_v39 }
 0xe75   : > { %13671 = vmatprep.subr.bf16.mxu0 %v16999_v17 }
 0xe77   : > { %13652 = vmatmul.mubr.msk.bf16.gmra.mxu0 %vm6815_vm2, %v14817_v43 }
 0xe78   : > { %13672 = vmatpush3.bf16.msra.mxu0 %v16999_v17  ;;  %13675 = vmatprep.mubr.msk.bf16.mxu0 %vm6815_vm2, %v14818_v32 }
 0xe79   : > { %13673 = vmatprep.subr.bf16.mxu0 %v16994_v15 }
 0xe7c   : > { %13674 = vmatpush3.bf16.msra.mxu0 %v16994_v15 }
 0xe7d   : > { %13695 = vmatprep.subr.bf16.mxu0 %v17012_v58 }
 0xe7f   : > { %13676 = vmatmul.mubr.msk.bf16.vlgmr.msra.gmra.mxu0 %vm6815_vm2, %v14819_v28  ;;  %v14843_v28 = vld [vmem:[#allocation11 + $0x40] sm:$0xff]  }
 0xe80   : > { %13696 = vmatpush3.bf16.msra.mxu0 %v17012_v58  ;;  %13679 = vmatprep.mubr.msk.bf16.mxu0 %vm6815_vm2, %v14820_v1 }
 0xe81   : > { %13697 = vmatprep.subr.bf16.mxu0 %v17007_v39 }
 0xe84   : > { %13698 = vmatpush3.bf16.msra.mxu0 %v17007_v39 }
 0xe85   : > { %13699 = vmatprep.subr.bf16.mxu0 %v16999_v17 }
 0xe87   : > { %13680 = vmatmul.mubr.msk.bf16.gmra.mxu0 %vm6815_vm2, %v14821_v5 }
 0xe88   : > { %13700 = vmatpush3.bf16.msra.mxu0 %v16999_v17  ;;  %13703 = vmatprep.mubr.msk.bf16.mxu0 %vm6815_vm2, %v14822_v18  ;;  %v14844_v18 = vld [vmem:[#allocation11 + $0x58] sm:$0xff]  }
 0xe89   : > { %13701 = vmatprep.subr.bf16.mxu0 %v16994_v15 }
 0xe8c   : > { %13702 = vmatpush3.bf16.msra.mxu0 %v16994_v15 }
 0xe8d   : > { %13723 = vmatprep.subr.bf16.mxu0 %v17012_v58 }
 0xe8f   : > { %13704 = vmatmul.mubr.msk.bf16.vlgmr.msra.gmra.mxu0 %vm6815_vm2, %v14823_v49 }
 0xe90   : > { %13724 = vmatpush3.bf16.msra.mxu0 %v17012_v58  ;;  %13707 = vmatprep.mubr.msk.bf16.mxu0 %vm6815_vm2, %v14824_v50 }
 0xe91   : > { %13725 = vmatprep.subr.bf16.mxu0 %v17007_v39 }
 0xe94   : > { %13726 = vmatpush3.bf16.msra.mxu0 %v17007_v39 }
 0xe95   : > { %13727 = vmatprep.subr.bf16.mxu0 %v16999_v17 }
 0xe97   : > { %13708 = vmatmul.mubr.msk.bf16.gmra.mxu0 %vm6815_vm2, %v14825_v9 }
 0xe98   : > { %13728 = vmatpush3.bf16.msra.mxu0 %v16999_v17  ;;  %13731 = vmatprep.mubr.msk.bf16.mxu0 %vm6815_vm2, %v14826_v37 }
 0xe99   : > { %13729 = vmatprep.subr.bf16.mxu0 %v16994_v15 }
 0xe9c   : > { %13730 = vmatpush3.bf16.msra.mxu0 %v16994_v15 }
 0xe9d   : > { %13751 = vmatprep.subr.bf16.mxu0 %v17012_v58 }
 0xe9f   : > { %13732 = vmatmul.mubr.msk.bf16.vlgmr.msra.gmra.mxu0 %vm6815_vm2, %v14827_v30 }
 0xea0   : > { %13752 = vmatpush3.bf16.msra.mxu0 %v17012_v58  ;;  %13735 = vmatprep.mubr.msk.bf16.mxu0 %vm6815_vm2, %v14828_v26 }
 0xea1   : > { %13753 = vmatprep.subr.bf16.mxu0 %v17007_v39 }
 0xea4   : > { %13754 = vmatpush3.bf16.msra.mxu0 %v17007_v39 }
 0xea5   : > { %13755 = vmatprep.subr.bf16.mxu0 %v16999_v17 }
 0xea7   : > { %13736 = vmatmul.mubr.msk.bf16.gmra.mxu0 %vm6815_vm2, %v14829_v62 }
 0xea8   : > { %13756 = vmatpush3.bf16.msra.mxu0 %v16999_v17  ;;  %13759 = vmatprep.mubr.msk.bf16.mxu0 %vm6815_vm2, %v14830_v46 }
 0xea9   : > { %13757 = vmatprep.subr.bf16.mxu0 %v16994_v15 }
 0xeac   : > { %13758 = vmatpush3.bf16.msra.mxu0 %v16994_v15 }
 0xead   : > { %13779 = vmatprep.subr.bf16.mxu0 %v17012_v58 }
 0xeaf   : > { %13760 = vmatmul.mubr.msk.bf16.vlgmr.msra.gmra.mxu0 %vm6815_vm2, %v14831_v25  ;;  %v14845_v25 = vld [vmem:[#allocation11 + $0x50] sm:$0xff]  }
 0xeb0   : > { %13780 = vmatpush3.bf16.msra.mxu0 %v17012_v58  ;;  %13763 = vmatprep.mubr.msk.bf16.mxu0 %vm6815_vm2, %v14832_v52  ;;  %v14835_v58 = vld [vmem:[#allocation10 + $0x108] sm:$0xff]  }
 0xeb1   : > { %13781 = vmatprep.subr.bf16.mxu0 %v17007_v39 }
 0xeb4   : > { %13782 = vmatpush3.bf16.msra.mxu0 %v17007_v39  ;;  %v14837_v39 = vld [vmem:[#allocation10 + $0x118] sm:$0xff]  }
 0xeb5   : > { %13783 = vmatprep.subr.bf16.mxu0 %v16999_v17 }
 0xeb7   : > { %13764 = vmatmul.mubr.msk.bf16.gmra.mxu0 %vm6815_vm2, %v14833_v23  ;;  %v14846_v23 = vld [vmem:[#allocation11 + $0x68] sm:$0xff]  }
 0xeb8   : > { %13784 = vmatpush3.bf16.msra.mxu0 %v16999_v17  ;;  %13787 = vmatprep.mubr.msk.bf16.mxu0 %vm6815_vm2, %v14834_v44 }
 0xeb9   : > { %13785 = vmatprep.subr.bf16.mxu0 %v16994_v15 }
 0xebc   : > { %13786 = vmatpush3.bf16.msra.mxu0 %v16994_v15 }
 0xebf   : > { %13788 = vmatmul.mubr.msk.bf16.vlgmr.msra.gmra.mxu0 %vm6815_vm2, %v14835_v58 }
 0xec0   : > { %13791 = vmatprep.mubr.msk.bf16.mxu0 %vm6815_vm2, %v14836_v57 }
 0xec7   : > { %13792 = vmatmul.mubr.msk.bf16.gmra.mxu0 %vm6815_vm2, %v14837_v39 }
 0xf0f   : > { %v13593_v35 = vpop.f32.mrf.mxu0  ;;  %v13605_v10 = vpop.f32.mrf.mxu1 }
 0xf10   : > { %v17128_v56 = vadd.f32 %v13605_v10, %v13593_v35 }
 0xf11   : > { %v7075_v17 = vpop.f32.mrf.mxu0  ;;  %v7164_v38 = vpop.f32.mrf.mxu1 }
 0xf12   : > { %v17130_v20 = vadd.f32 %v7164_v38, %v7075_v17 }
 0xf13   : > { %v13594_v59 = vpop.f32.mrf.mxu0  ;;  %v13606_v48 = vpop.f32.mrf.mxu1 }
 0xf14   : > { %v17132_v6 = vadd.f32 %v13606_v48, %v13594_v59 }
 0xf15   : > { %v17134_v15 = vpop.f32.mrf.mxu0  ;;  %v17136_v47 = vpop.f32.mrf.mxu1 }
 0xf17   : > { %v13597_v4 = vpop.f32.mrf.mxu0  ;;  %v13609_v3 = vpop.f32.mrf.mxu1 }
 0xf18   : > { %v17138_v55 = vadd.f32 %v13609_v3, %v13597_v4  ;;  %v14847_v4 = vld [vmem:[#allocation11 + $0x60] sm:$0xff]  }
 0xf19   : > { %v7091_v22 = vpop.f32.mrf.mxu0  ;;  %v7180_v40 = vpop.f32.mrf.mxu1 }
 0xf1a   : > { %v17140_v16 = vadd.f32 %v7180_v40, %v7091_v22  ;;  %v14848_v40 = vld [vmem:[#allocation11 + $0x78] sm:$0xff]  }
 0xf1b   : > { %v13598_v14 = vpop.f32.mrf.mxu0  ;;  %v13610_v36 = vpop.f32.mrf.mxu1 }
 0xf1c   : > { %v17142_v53 = vadd.f32 %v13610_v36, %v13598_v14 }
 0xf1d   : > { %v17144_v41 = vpop.f32.mrf.mxu0 }
 0xf1f   : > { %v13621_v13 = vpop.f32.mrf.mxu0 }
 0xf21   : > { %v7270_v29 = vpop.f32.mrf.mxu0 }
 0xf23   : > { %v13622_v8 = vpop.f32.mrf.mxu0 }
 0xf24   : > { %v7302_v63 = vpack.c.bf16 %v13622_v8, %v13621_v13 }
 0xf25   : > { %v7273_v21 = vpop.f32.mrf.mxu0 }
 0xf26   : > { %v7301_v0 = vpack.c.bf16 %v7273_v21, %v7270_v29 }
 0xf27   : > { %v13625_v2 = vpop.f32.mrf.mxu0 }
 0xf28   : > { %13631 = vmatprep.mubr.msk.bf16.mxu1 %vm7028_vm3, %v7301_v0 }
 0xf29   : > { %v7286_v27 = vpop.f32.mrf.mxu0  ;;  %13632 = vmatmul.mubr.msk.bf16.vlgmr.msra.gmra.mxu1 %vm7028_vm3, %v7302_v63 }
 0xf2a   : > { %13656 = vmatpush3.bf16.msra.mxu1 %v14840_v7 }
 0xf2b   : > { %v13626_v54 = vpop.f32.mrf.mxu0  ;;  %13657 = vmatprep.subr.bf16.mxu1 %v14841_v51 }
 0xf2c   : > { %v7304_v31 = vpack.c.bf16 %v13626_v54, %v13625_v2 }
 0xf2d   : > { %v7289_v19 = vpop.f32.mrf.mxu0 }
 0xf2e   : > { %v7303_v34 = vpack.c.bf16 %v7289_v19, %v7286_v27  ;;  %13658 = vmatpush3.bf16.msra.mxu1 %v14841_v51  ;;  %v14849_v27 = vld [vmem:[#allocation11 + $0x70] sm:$0xff]   ;;  %v14850_v19 = vld [vmem:[#allocation11 + $0x88] sm:$0xff]  }
 0xf2f   : > { %v13649_v33 = vpop.f32.mrf.mxu0  ;;  %13683 = vmatprep.subr.bf16.mxu1 %v14842_v61 }
 0xf30   : > { %13635 = vmatprep.mubr.msk.bf16.mxu1 %vm7028_vm3, %v7303_v34 }
 0xf31   : > { %13636 = vmatmul.mubr.msk.bf16.gmra.mxu1 %vm7028_vm3, %v7304_v31  ;;  %v7482_v60 = vpop.f32.mrf.mxu0 }
 0xf33   : > { %v13650_v12 = vpop.f32.mrf.mxu0 }
 0xf34   : > { %v7514_v43 = vpack.c.bf16 %v13650_v12, %v13649_v33 }
 0xf35   : > { %v7485_v11 = vpop.f32.mrf.mxu0 }
 0xf36   : > { %v7513_v42 = vpack.c.bf16 %v7485_v11, %v7482_v60 }
 0xf37   : > { %v13653_v32 = vpop.f32.mrf.mxu0 }
 0xf38   : > { %13659 = vmatprep.mubr.msk.bf16.mxu1 %vm7028_vm3, %v7513_v42 }
 0xf39   : > { %v7498_v1 = vpop.f32.mrf.mxu0  ;;  %13660 = vmatmul.mubr.msk.bf16.vlgmr.msra.gmra.mxu1 %vm7028_vm3, %v7514_v43 }
 0xf3a   : > { %13684 = vmatpush3.bf16.msra.mxu1 %v14842_v61 }
 0xf3b   : > { %v13654_v5 = vpop.f32.mrf.mxu0  ;;  %13685 = vmatprep.subr.bf16.mxu1 %v14843_v28 }
 0xf3c   : > { %v7516_v9 = vpack.c.bf16 %v13654_v5, %v13653_v32 }
 0xf3d   : > { %v7501_v49 = vpop.f32.mrf.mxu0 }
 0xf3e   : > { %v7515_v50 = vpack.c.bf16 %v7501_v49, %v7498_v1  ;;  %13686 = vmatpush3.bf16.msra.mxu1 %v14843_v28  ;;  %v14851_v1 = vld [vmem:[#allocation11 + $0x80] sm:$0xff]  }
 0xf3f   : > { %v13677_v37 = vpop.f32.mrf.mxu0  ;;  %13711 = vmatprep.subr.bf16.mxu1 %v14844_v18 }
 0xf40   : > { %13663 = vmatprep.mubr.msk.bf16.mxu1 %vm7028_vm3, %v7515_v50 }
 0xf41   : > { %13664 = vmatmul.mubr.msk.bf16.gmra.mxu1 %vm7028_vm3, %v7516_v9  ;;  %v7694_v30 = vpop.f32.mrf.mxu0 }
 0xf43   : > { %v13678_v26 = vpop.f32.mrf.mxu0 }
 0xf44   : > { %v7726_v46 = vpack.c.bf16 %v13678_v26, %v13677_v37 }
 0xf45   : > { %v7697_v45 = vpop.f32.mrf.mxu0 }
 0xf46   : > { %v7725_v62 = vpack.c.bf16 %v7697_v45, %v7694_v30 }
 0xf47   : > { %v13681_v24 = vpop.f32.mrf.mxu0 }
 0xf48   : > { %13687 = vmatprep.mubr.msk.bf16.mxu1 %vm7028_vm3, %v7725_v62 }
 0xf49   : > { %v7710_v52 = vpop.f32.mrf.mxu0  ;;  %13688 = vmatmul.mubr.msk.bf16.vlgmr.msra.gmra.mxu1 %vm7028_vm3, %v7726_v46 }
 0xf4a   : > { %13712 = vmatpush3.bf16.msra.mxu1 %v14844_v18 }
 0xf4b   : > { %v13682_v7 = vpop.f32.mrf.mxu0  ;;  %13713 = vmatprep.subr.bf16.mxu1 %v14845_v25 }
 0xf4c   : > { %v7728_v57 = vpack.c.bf16 %v13682_v7, %v13681_v24 }
 0xf4d   : > { %v7713_v44 = vpop.f32.mrf.mxu0 }
 0xf4e   : > { %v7727_v58 = vpack.c.bf16 %v7713_v44, %v7710_v52  ;;  %13714 = vmatpush3.bf16.msra.mxu1 %v14845_v25 }
 0xf4f   : > { %v13705_v39 = vpop.f32.mrf.mxu0  ;;  %13739 = vmatprep.subr.bf16.mxu1 %v14846_v23 }
 0xf50   : > { %13691 = vmatprep.mubr.msk.bf16.mxu1 %vm7028_vm3, %v7727_v58  ;;  %v15411_v58 = vmov 0.0  }
 0xf51   : > { %13692 = vmatmul.mubr.msk.bf16.gmra.mxu1 %vm7028_vm3, %v7728_v57  ;;  %v7906_v35 = vpop.f32.mrf.mxu0  ;;  %13807 = vmatprep.subr.bf16.mxu0 %v15411_v58  ;;  %v7183_v57 = vpop.f32.mrf.mxu1 }
 0xf52   : > { %13815 = vmatprep.mubr.msk.bf16.mxu0 %vm15412_vm4, %v15411_v58 }
 0xf53   : > { %v13706_v10 = vpop.f32.mrf.mxu0 }
 0xf54   : > { %v7938_v59 = vpack.c.bf16 %v13706_v10, %v13705_v39 }
 0xf55   : > { %v7909_v17 = vpop.f32.mrf.mxu0 }
 0xf56   : > { %v7937_v38 = vpack.c.bf16 %v7909_v17, %v7906_v35 }
 0xf57   : > { %v13709_v48 = vpop.f32.mrf.mxu0 }
 0xf58   : > { %13715 = vmatprep.mubr.msk.bf16.mxu1 %vm7028_vm3, %v7937_v38 }
 0xf59   : > { %v7922_v3 = vpop.f32.mrf.mxu0  ;;  %13716 = vmatmul.mubr.msk.bf16.vlgmr.msra.gmra.mxu1 %vm7028_vm3, %v7938_v59 }
 0xf5a   : > { %13740 = vmatpush3.bf16.msra.mxu1 %v14846_v23 }
 0xf5b   : > { %v13710_v22 = vpop.f32.mrf.mxu0  ;;  %13741 = vmatprep.subr.bf16.mxu1 %v14847_v4 }
 0xf5c   : > { %v7940_v13 = vpack.c.bf16 %v13710_v22, %v13709_v48 }
 0xf5d   : > { %v7925_v14 = vpop.f32.mrf.mxu0 }
 0xf5e   : > { %v7939_v36 = vpack.c.bf16 %v7925_v14, %v7922_v3  ;;  %13742 = vmatpush3.bf16.msra.mxu1 %v14847_v4 }
 0xf5f   : > { %v13733_v29 = vpop.f32.mrf.mxu0  ;;  %13767 = vmatprep.subr.bf16.mxu1 %v14848_v40 }
 0xf60   : > { %13719 = vmatprep.mubr.msk.bf16.mxu1 %vm7028_vm3, %v7939_v36 }
 0xf61   : > { %13720 = vmatmul.mubr.msk.bf16.gmra.mxu1 %vm7028_vm3, %v7940_v13  ;;  %v8118_v8 = vpop.f32.mrf.mxu0 }
 0xf63   : > { %v13734_v21 = vpop.f32.mrf.mxu0 }
 0xf64   : > { %v8150_v2 = vpack.c.bf16 %v13734_v21, %v13733_v29 }
 0xf65   : > { %v8121_v0 = vpop.f32.mrf.mxu0 }
 0xf66   : > { %v8149_v63 = vpack.c.bf16 %v8121_v0, %v8118_v8 }
 0xf67   : > { %v13737_v51 = vpop.f32.mrf.mxu0 }
 0xf68   : > { %13743 = vmatprep.mubr.msk.bf16.mxu1 %vm7028_vm3, %v8149_v63 }
 0xf69   : > { %v8134_v54 = vpop.f32.mrf.mxu0  ;;  %13744 = vmatmul.mubr.msk.bf16.vlgmr.msra.gmra.mxu1 %vm7028_vm3, %v8150_v2 }
 0xf6a   : > { %13768 = vmatpush3.bf16.msra.mxu1 %v14848_v40 }
 0xf6b   : > { %v13738_v61 = vpop.f32.mrf.mxu0  ;;  %13769 = vmatprep.subr.bf16.mxu1 %v14849_v27 }
 0xf6c   : > { %v8152_v33 = vpack.c.bf16 %v13738_v61, %v13737_v51 }
 0xf6d   : > { %v8137_v34 = vpop.f32.mrf.mxu0 }
 0xf6e   : > { %v8151_v31 = vpack.c.bf16 %v8137_v34, %v8134_v54  ;;  %13770 = vmatpush3.bf16.msra.mxu1 %v14849_v27 }
 0xf6f   : > { %v13761_v60 = vpop.f32.mrf.mxu0  ;;  %13795 = vmatprep.subr.bf16.mxu1 %v14850_v19 }
 0xf70   : > { %13747 = vmatprep.mubr.msk.bf16.mxu1 %vm7028_vm3, %v8151_v31 }
 0xf71   : > { %13748 = vmatmul.mubr.msk.bf16.gmra.mxu1 %vm7028_vm3, %v8152_v33  ;;  %v8330_v12 = vpop.f32.mrf.mxu0 }
 0xf73   : > { %v13762_v11 = vpop.f32.mrf.mxu0 }
 0xf74   : > { %v8362_v32 = vpack.c.bf16 %v13762_v11, %v13761_v60 }
 0xf75   : > { %v8333_v42 = vpop.f32.mrf.mxu0 }
 0xf76   : > { %v8361_v43 = vpack.c.bf16 %v8333_v42, %v8330_v12 }
 0xf77   : > { %v13765_v28 = vpop.f32.mrf.mxu0 }
 0xf78   : > { %13771 = vmatprep.mubr.msk.bf16.mxu1 %vm7028_vm3, %v8361_v43 }
 0xf79   : > { %v8346_v5 = vpop.f32.mrf.mxu0  ;;  %13772 = vmatmul.mubr.msk.bf16.vlgmr.msra.gmra.mxu1 %vm7028_vm3, %v8362_v32 }
 0xf7a   : > { %13796 = vmatpush3.bf16.msra.mxu1 %v14850_v19 }
 0xf7b   : > { %v13766_v18 = vpop.f32.mrf.mxu0  ;;  %13797 = vmatprep.subr.bf16.mxu1 %v14851_v1 }
 0xf7c   : > { %v8364_v9 = vpack.c.bf16 %v13766_v18, %v13765_v28 }
 0xf7d   : > { %v8349_v49 = vpop.f32.mrf.mxu0 }
 0xf7e   : > { %v8363_v50 = vpack.c.bf16 %v8349_v49, %v8346_v5  ;;  %13798 = vmatpush3.bf16.msra.mxu1 %v14851_v1 }
 0xf7f   : > { %v13789_v37 = vpop.f32.mrf.mxu0  ;;  %13819 = vmatprep.subr.bf16.mxu1 %v15411_v58 }
 0xf80   : > { %13775 = vmatprep.mubr.msk.bf16.mxu1 %vm7028_vm3, %v8363_v50 }
 0xf81   : > { %13776 = vmatmul.mubr.msk.bf16.gmra.mxu1 %vm7028_vm3, %v8364_v9  ;;  %v8542_v30 = vpop.f32.mrf.mxu0 }
 0xf83   : > { %v13790_v26 = vpop.f32.mrf.mxu0 }
 0xf84   : > { %v8574_v46 = vpack.c.bf16 %v13790_v26, %v13789_v37 }
 0xf85   : > { %v8545_v45 = vpop.f32.mrf.mxu0 }
 0xf86   : > { %v8573_v62 = vpack.c.bf16 %v8545_v45, %v8542_v30 }
 0xf87   : > { %v13793_v24 = vpop.f32.mrf.mxu0 }
 0xf88   : > { %13799 = vmatprep.mubr.msk.bf16.mxu1 %vm7028_vm3, %v8573_v62 }
 0xf89   : > { %v8558_v25 = vpop.f32.mrf.mxu0  ;;  %13800 = vmatmul.mubr.msk.bf16.vlgmr.msra.gmra.mxu1 %vm7028_vm3, %v8574_v46 }
 0xf8b   : > { %v13794_v52 = vpop.f32.mrf.mxu0 }
 0xf8c   : > { %v8576_v44 = vpack.c.bf16 %v13794_v52, %v13793_v24 }
 0xf8d   : > { %v8561_v7 = vpop.f32.mrf.mxu0 }
 0xf8e   : > { %v8575_v23 = vpack.c.bf16 %v8561_v7, %v8558_v25 }
 0xf90   : > { %13803 = vmatprep.mubr.msk.bf16.mxu1 %vm7028_vm3, %v8575_v23 }
 0xf91   : > { %13804 = vmatmul.mubr.msk.bf16.gmra.mxu1 %vm7028_vm3, %v8576_v44 }
 0xf92   : > { %13827 = vmatprep.mubr.msk.bf16.mxu1 %vm15412_vm4, %v15411_v58 }
 0xfe9   : > { %v13633_v39 = vpop.f32.mrf.mxu1 }
 0xfea   : > { %v7401_v35 = vadd.f32 %v13633_v39, %v17128_v56 }
 0xfeb   : > { %v7368_v10 = vpop.f32.mrf.mxu1 }
 0xfec   : > { %v7399_v17 = vadd.f32 %v7368_v10, %v17130_v20  ;;  %v7168_v20 = vadd.f32 %v17136_v47, %v17134_v15 }
 0xfed   : > { %v13634_v38 = vpop.f32.mrf.mxu1 }
 0xfee   : > { %v7402_v59 = vadd.f32 %v13634_v38, %v17132_v6 }
 0xfef   : > { %v7371_v48 = vpop.f32.mrf.mxu1 }
 0xff0   : > { %v7400_v6 = vadd.f32 %v7371_v48, %v7168_v20 }
 0xff1   : > { %v13637_v4 = vpop.f32.mrf.mxu1 }
 0xff2   : > { %v7405_v3 = vadd.f32 %v13637_v4, %v17138_v55 }
 0xff3   : > { %v7384_v22 = vpop.f32.mrf.mxu1 }
 0xff4   : > { %v7403_v56 = vadd.f32 %v7384_v22, %v17140_v16  ;;  %v7184_v16 = vadd.f32 %v7183_v57, %v17144_v41 }
 0xff5   : > { %v13638_v40 = vpop.f32.mrf.mxu1 }
 0xff6   : > { %v7406_v14 = vadd.f32 %v13638_v40, %v17142_v53 }
 0xff7   : > { %v7387_v36 = vpop.f32.mrf.mxu1 }
 0xff8   : > { %v7404_v19 = vadd.f32 %v7387_v36, %v7184_v16 }
 0xff9   : > { %v13661_v13 = vpop.f32.mrf.mxu1 }
 0xffa   : > { %v7613_v29 = vadd.f32 %v13661_v13, %v7401_v35 }
 0xffb   : > { %v7580_v8 = vpop.f32.mrf.mxu1 }
 0xffc   : > { %v7611_v21 = vadd.f32 %v7580_v8, %v7399_v17 }
 0xffd   : > { %v13662_v0 = vpop.f32.mrf.mxu1 }
 0xffe   : > { %v7614_v63 = vadd.f32 %v13662_v0, %v7402_v59 }
 0xfff   : > { %v7583_v2 = vpop.f32.mrf.mxu1 }
0x1000   : > { %v7612_v51 = vadd.f32 %v7583_v2, %v7400_v6  ;;  %v11562_v6 = vld [vmem:[#allocation13] ss:$0 sm:$0xff] }
0x1001   : > { %v13665_v55 = vpop.f32.mrf.mxu1 }
0x1002   : > { %v7617_v27 = vadd.f32 %v13665_v55, %v7405_v3 }
0x1003   : > { %v7596_v54 = vpop.f32.mrf.mxu1 }
0x1004   : > { %v7615_v61 = vadd.f32 %v7596_v54, %v7403_v56 }
0x1005   : > { %v13666_v53 = vpop.f32.mrf.mxu1 }
0x1006   : > { %v7618_v34 = vadd.f32 %v13666_v53, %v7406_v14 }
0x1007   : > { %v7599_v31 = vpop.f32.mrf.mxu1 }
0x1008   : > { %v17189_v33 = vadd.f32 %v7599_v31, %v7404_v19 }
0x1009   : > { %v13689_v60 = vpop.f32.mrf.mxu1 }
0x100a   : > { %v7825_v15 = vadd.f32 %v13689_v60, %v7613_v29 }
0x100b   : > { %v7792_v47 = vpop.f32.mrf.mxu1 }
0x100c   : > { %v7823_v12 = vadd.f32 %v7792_v47, %v7611_v21 }
0x100d   : > { %v13690_v11 = vpop.f32.mrf.mxu1 }
0x100e   : > { %v7826_v42 = vadd.f32 %v13690_v11, %v7614_v63 }
0x100f   : > { %v7795_v43 = vpop.f32.mrf.mxu1 }
0x1010   : > { %v7824_v32 = vadd.f32 %v7795_v43, %v7612_v51 }
0x1011   : > { %v13693_v28 = vpop.f32.mrf.mxu1 }
0x1012   : > { %v7829_v36 = vadd.f32 %v13693_v28, %v7617_v27 }
0x1013   : > { %v7808_v1 = vpop.f32.mrf.mxu1 }
0x1014   : > { %v7827_v0 = vadd.f32 %v7808_v1, %v7615_v61 }
0x1015   : > { %v13694_v5 = vpop.f32.mrf.mxu1 }
0x1016   : > { %v7830_v16 = vadd.f32 %v13694_v5, %v7618_v34 }
0x1017   : > { %v7811_v18 = vpop.f32.mrf.mxu1 }
0x1018   : > { %v7828_v27 = vadd.f32 %v7811_v18, %v17189_v33 }
0x1019   : > { %v13717_v41 = vpop.f32.mrf.mxu1 }
0x101a   : > { %v8037_v48 = vadd.f32 %v13717_v41, %v7825_v15 }
0x101b   : > { %v8004_v49 = vpop.f32.mrf.mxu1 }
0x101c   : > { %v8035_v50 = vadd.f32 %v8004_v49, %v7823_v12 }
0x101d   : > { %v13718_v9 = vpop.f32.mrf.mxu1 }
0x101e   : > { %v8038_v56 = vadd.f32 %v13718_v9, %v7826_v42 }
0x101f   : > { %v8007_v37 = vpop.f32.mrf.mxu1 }
0x1020   : > { %v8036_v29 = vadd.f32 %v8007_v37, %v7824_v32 }
0x1021   : > { %v13721_v30 = vpop.f32.mrf.mxu1 }
0x1022   : > { %v8041_v2 = vadd.f32 %v13721_v30, %v7829_v36 }
0x1023   : > { %v8020_v26 = vpop.f32.mrf.mxu1 }
0x1024   : > { %v8039_v53 = vadd.f32 %v8020_v26, %v7827_v0 }
0x1025   : > { %v13722_v45 = vpop.f32.mrf.mxu1 }
0x1026   : > { %v8042_v12 = vadd.f32 %v13722_v45, %v7830_v16 }
0x1027   : > { %v8023_v62 = vpop.f32.mrf.mxu1 }
0x1028   : > { %v8040_v1 = vadd.f32 %v8023_v62, %v7828_v27 }
0x1029   : > { %v13745_v46 = vpop.f32.mrf.mxu1 }
0x102a   : > { %v8249_v3 = vadd.f32 %v13745_v46, %v8037_v48 }
0x102b   : > { %v8216_v24 = vpop.f32.mrf.mxu1 }
0x102c   : > { %v8247_v40 = vadd.f32 %v8216_v24, %v8035_v50 }
0x102d   : > { %v13746_v25 = vpop.f32.mrf.mxu1 }
0x102e   : > { %v8250_v8 = vadd.f32 %v13746_v25, %v8038_v56  ;;  %v14853_v56 = vld [vmem:[#allocation14 + $0x8] sm:$0xff]  }
0x102f   : > { %v8219_v52 = vpop.f32.mrf.mxu1 }
0x1030   : > { %v8248_v51 = vadd.f32 %v8219_v52, %v8036_v29 }
0x1031   : > { %v13749_v7 = vpop.f32.mrf.mxu1 }
0x1032   : > { %v8253_v31 = vadd.f32 %v13749_v7, %v8041_v2 }
0x1033   : > { %v8232_v23 = vpop.f32.mrf.mxu1 }
0x1034   : > { %v8251_v11 = vadd.f32 %v8232_v23, %v8039_v53 }
0x1035   : > { %v13750_v44 = vpop.f32.mrf.mxu1 }
0x1036   : > { %v8254_v41 = vadd.f32 %v13750_v44, %v8042_v12 }
0x1037   : > { %v8235_v57 = vpop.f32.mrf.mxu1 }
0x1038   : > { %v8252_v30 = vadd.f32 %v8235_v57, %v8040_v1  ;;  %v14862_v1 = vld [vmem:[#allocation17 + $0x18] sm:$0xff]  }
0x1039   : > { %v13773_v39 = vpop.f32.mrf.mxu1 }
0x103a   : > { %v8461_v14 = vadd.f32 %v13773_v39, %v8249_v3 }
0x103b   : > { %v8428_v35 = vpop.f32.mrf.mxu1 }
0x103c   : > { %v8459_v20 = vadd.f32 %v8428_v35, %v8247_v40  ;;  %v14854_v40 = vld [vmem:[#allocation14 + $0x10] sm:$0xff]  }
0x103d   : > { %v13774_v10 = vpop.f32.mrf.mxu1 }
0x103e   : > { %v8462_v55 = vadd.f32 %v13774_v10, %v8250_v8 }
0x103f   : > { %v8431_v17 = vpop.f32.mrf.mxu1 }
0x1040   : > { %v8460_v60 = vadd.f32 %v8431_v17, %v8248_v51 }
0x1041   : > { %v13777_v38 = vpop.f32.mrf.mxu1 }
0x1042   : > { %v8465_v43 = vadd.f32 %v13777_v38, %v8253_v31 }
0x1043   : > { %v8444_v59 = vpop.f32.mrf.mxu1 }
0x1044   : > { %v8463_v49 = vadd.f32 %v8444_v59, %v8251_v11 }
0x1045   : > { %v13778_v4 = vpop.f32.mrf.mxu1 }
0x1046   : > { %v8466_v26 = vadd.f32 %v13778_v4, %v8254_v41  ;;  %v14864_v41 = vld [vmem:[#allocation17 + $0x10] sm:$0xff]  }
0x1047   : > { %v8447_v22 = vpop.f32.mrf.mxu1 }
0x1048   : > { %v8464_v52 = vadd.f32 %v8447_v22, %v8252_v30  ;;  %v14852_v22 = vld [vmem:[#allocation14] sm:$0xff]  }
0x1049   : > { %v13801_v13 = vpop.f32.mrf.mxu1 }
0x104a   : > { %v8673_v21 = vadd.f32 %v13801_v13, %v8461_v14  ;;  %v14855_v14 = vld [vmem:[#allocation14 + $0x18] sm:$0xff]  }
0x104b   : > { %v8640_v63 = vpop.f32.mrf.mxu1 }
0x104c   : > { %v8671_v54 = vadd.f32 %v8640_v63, %v8459_v20  ;;  %v8688_v15 = vadd.f32 %v11562_v6, %v8673_v21 }
0x104d   : > { %v13802_v19 = vpop.f32.mrf.mxu1 }
0x104e   : > { %v8674_v47 = vadd.f32 %v13802_v19, %v8462_v55  ;;  %v8686_v61 = vadd.f32 %v11562_v6, %v8671_v54  ;;  %v8696_v34 = vmax.f32 %v8688_v15, 0.0 }
0x104f   : > { %v8643_v42 = vpop.f32.mrf.mxu1 }
0x1050   : > { %v8689_v32 = vadd.f32 %v11562_v6, %v8674_v47  ;;  %v8672_v28 = vadd.f32 %v8643_v42, %v8460_v60  ;;  %v8694_v24 = vmax.f32 %v8686_v61, 0.0  ;;  %v14856_v42 = vld [vmem:[#allocation16 + $0x8] sm:$0xff]   ;;  %v14858_v61 = vld [vmem:[#allocation17 + $0x38] sm:$0xff]  }
0x1051   : > { %v13805_v50 = vpop.f32.mrf.mxu1 }
0x1052   : > { %v8697_v5 = vmax.f32 %v8689_v32, 0.0  ;;  %v8687_v9 = vadd.f32 %v11562_v6, %v8672_v28  ;;  %v8677_v37 = vadd.f32 %v13805_v50, %v8465_v43  ;;  %v14857_v43 = vld [vmem:[#allocation16] sm:$0xff]   ;;  %v14859_v32 = vld [vmem:[#allocation17 + $0x30] sm:$0xff]   ;;  %v14860_v28 = vld [vmem:[#allocation17 + $0x28] sm:$0xff]  }
0x1053   : > { %v8656_v46 = vpop.f32.mrf.mxu1  ;;  %v14861_v50 = vld [vmem:[#allocation17 + $0x20] sm:$0xff]  }
0x1054   : > { %v8703_v33 = vpack.c.bf16 %v8697_v5, %v8696_v34  ;;  %v8695_v18 = vmax.f32 %v8687_v9, 0.0  ;;  %v8675_v45 = vadd.f32 %v8656_v46, %v8463_v49  ;;  %v8692_v23 = vadd.f32 %v11562_v6, %v8677_v37  ;;  %v14865_v49 = vld [vmem:[#allocation17 + $0x8] sm:$0xff]   ;;  %v14867_v34 = vld [vmem:[#allocation17] sm:$0xff]  }
0x1055   : > { %v13806_v25 = vpop.f32.mrf.mxu1 }
0x1056   : > { %v8702_v7 = vpack.c.bf16 %v8695_v18, %v8694_v24  ;;  %v8678_v39 = vadd.f32 %v13806_v25, %v8466_v26  ;;  %v8690_v44 = vadd.f32 %v11562_v6, %v8675_v45  ;;  %v8700_v17 = vmax.f32 %v8692_v23, 0.0  ;;  %v14868_v18 = vld [vmem:[#allocation17 + $0x58] sm:$0xff]   ;;  %v14869_v23 = vld [vmem:[#allocation17 + $0x50] sm:$0xff]  }
0x1057   : > { %v8659_v62 = vpop.f32.mrf.mxu1 }
0x1058   : > { %v8693_v35 = vadd.f32 %v11562_v6, %v8678_v39  ;;  %v8676_v10 = vadd.f32 %v8659_v62, %v8464_v52  ;;  %v8698_v48 = vmax.f32 %v8690_v44, 0.0  ;;  %v14863_v52 = vld [vmem:[#allocation16 + $0x10] sm:$0xff]   ;;  %v14871_v62 = vld [vmem:[#allocation17 + $0x78] sm:$0xff]   ;;  %v14872_v44 = vld [vmem:[#allocation17 + $0x40] sm:$0xff]  }
0x1059   : > { %v14870_v39 = vld [vmem:[#allocation17 + $0x48] sm:$0xff]  }
0x105a   : > { %v8701_v38 = vmax.f32 %v8693_v35, 0.0  ;;  %v8691_v59 = vadd.f32 %v11562_v6, %v8676_v10  ;;  %v14873_v35 = vld [vmem:[#allocation17 + $0x70] sm:$0xff]   ;;  %v14874_v10 = vld [vmem:[#allocation17 + $0x68] sm:$0xff]  }
0x105c   : > { %v8705_v57 = vpack.c.bf16 %v8701_v38, %v8700_v17  ;;  %v8699_v4 = vmax.f32 %v8691_v59, 0.0  ;;  %v14875_v17 = vld [vmem:[#allocation17 + $0x60] sm:$0xff]  }
0x105e   : > { %v8704_v3 = vpack.c.bf16 %v8699_v4, %v8698_v48  ;;  %13808 = vmatpush3.bf16.msra.mxu0 %v8705_v57  ;;  %13820 = vmatpush3.bf16.msra.mxu1 %v8705_v57 }
0x105f   : > { %13809 = vmatprep.subr.bf16.mxu0 %v15411_v58  ;;  %13821 = vmatprep.subr.bf16.mxu1 %v15411_v58 }
0x1062   : > { %13810 = vmatpush3.bf16.msra.mxu0 %v8704_v3  ;;  %13822 = vmatpush3.bf16.msra.mxu1 %v8704_v3 }
0x1063   : > { %13811 = vmatprep.subr.bf16.mxu0 %v15411_v58  ;;  %13823 = vmatprep.subr.bf16.mxu1 %v15411_v58 }
0x1066   : > { %13812 = vmatpush3.bf16.msra.mxu0 %v8703_v33  ;;  %13824 = vmatpush3.bf16.msra.mxu1 %v8703_v33 }
0x1067   : > { %13813 = vmatprep.subr.bf16.mxu0 %v15411_v58  ;;  %13825 = vmatprep.subr.bf16.mxu1 %v15411_v58 }
0x106a   : > { %13814 = vmatpush3.bf16.msra.mxu0 %v8702_v7  ;;  %13826 = vmatpush3.bf16.msra.mxu1 %v8702_v7 }
0x106b   : > { %13831 = vmatprep.subr.bf16.mxu0 %v15411_v58  ;;  %13843 = vmatprep.subr.bf16.mxu1 %v15411_v58 }
0x106d   : > { %13816 = vmatmul.mubr.msk.bf16.vlgmr.msra.gmra.mxu0 %vm6815_vm2, %v14852_v22  ;;  %13828 = vmatmul.mubr.msk.bf16.vlgmr.msra.gmra.mxu1 %vm6815_vm2, %v14853_v56 }
0x106e   : > { %13832 = vmatpush3.bf16.msra.mxu0 %v8705_v57  ;;  %13844 = vmatpush3.bf16.msra.mxu1 %v8705_v57 }
0x106f   : > { %13833 = vmatprep.subr.bf16.mxu0 %v15411_v58  ;;  %13845 = vmatprep.subr.bf16.mxu1 %v15411_v58 }
0x1070   : > { %13839 = vmatprep.mubr.msk.bf16.mxu0 %vm15412_vm4, %v15411_v58  ;;  %13851 = vmatprep.mubr.msk.bf16.mxu1 %vm15412_vm4, %v15411_v58 }
0x1072   : > { %13834 = vmatpush3.bf16.msra.mxu0 %v8704_v3  ;;  %13846 = vmatpush3.bf16.msra.mxu1 %v8704_v3 }
0x1073   : > { %13835 = vmatprep.subr.bf16.mxu0 %v15411_v58  ;;  %13847 = vmatprep.subr.bf16.mxu1 %v15411_v58 }
0x1076   : > { %13836 = vmatpush3.bf16.msra.mxu0 %v8703_v33  ;;  %13848 = vmatpush3.bf16.msra.mxu1 %v8703_v33 }
0x1077   : > { %13837 = vmatprep.subr.bf16.mxu0 %v15411_v58  ;;  %13849 = vmatprep.subr.bf16.mxu1 %v15411_v58 }
0x107a   : > { %13838 = vmatpush3.bf16.msra.mxu0 %v8702_v7  ;;  %13850 = vmatpush3.bf16.msra.mxu1 %v8702_v7  ;;  %v14866_v7 = vld [vmem:[#allocation16 + $0x18] sm:$0xff]  }
0x107b   : > { %13861 = vmatprep.subr.bf16.mxu1 %v15411_v58  ;;  %13855 = vmatprep.subr.bf16.mxu0 %v15411_v58 }
0x107d   : > { %13840 = vmatmul.mubr.msk.bf16.vlgmr.msra.gmra.mxu0 %vm6815_vm2, %v14854_v40  ;;  %13852 = vmatmul.mubr.msk.bf16.vlgmr.msra.gmra.mxu1 %vm6815_vm2, %v14855_v14 }
0x107e   : > { %13863 = vmatprep.mubr.msk.bf16.mxu1 %vm15412_vm4, %v15411_v58  ;;  %13857 = vmatprep.mubr.msk.bf16.mxu0 %vm15412_vm4, %v15411_v58 }
0x112d   : > { %v8750_v36 = vpop.f32.mrf.mxu0  ;;  %v8802_v13 = vpop.f32.mrf.mxu1 }
0x112e   : > { %v8913_v19 = vmax.f32 %v8750_v36, %v8802_v13 }
0x112f   : > { %v13817_v29 = vpop.f32.mrf.mxu0  ;;  %v13829_v8 = vpop.f32.mrf.mxu1 }
0x1131   : > { %v8753_v20 = vpop.f32.mrf.mxu0  ;;  %v8805_v21 = vpop.f32.mrf.mxu1 }
0x1132   : > { %v8914_v31 = vmax.f32 %v8753_v20, %v8805_v21 }
0x1133   : > { %v13818_v0 = vpop.f32.mrf.mxu0  ;;  %v13830_v6 = vpop.f32.mrf.mxu1 }
0x1134   : > { %v14876_v6 = vld [vmem:[#allocation16 + $0x20] sm:$0xff]  }
0x113d   : > { %v8854_v63 = vpop.f32.mrf.mxu0  ;;  %v8906_v2 = vpop.f32.mrf.mxu1 }
0x113e   : > { %v8915_v54 = vmax.f32 %v8854_v63, %v8906_v2 }
0x113f   : > { %v13841_v51 = vpop.f32.mrf.mxu0  ;;  %v13853_v55 = vpop.f32.mrf.mxu1 }
0x1140   : > { %v8917_v27 = vmax.f32 %v8913_v19, %v8915_v54  ;;  %v14878_v51 = vld [vmem:[#allocation17 + $0x98] sm:$0xff]   ;;  %v14877_v54 = vld [vmem:[#allocation16 + $0x28] sm:$0xff]  }
0x1141   : > { %v8857_v16 = vpop.f32.mrf.mxu0  ;;  %v8909_v53 = vpop.f32.mrf.mxu1  ;;  %v14881_v19 = vld [vmem:[#allocation17 + $0xb8] sm:$0xff]  }
0x1142   : > { %v8916_v60 = vmax.f32 %v8857_v16, %v8909_v53  ;;  %v14879_v16 = vld [vmem:[#allocation17 + $0x90] sm:$0xff]   ;;  %v14880_v53 = vld [vmem:[#allocation17 + $0x88] sm:$0xff]  }
0x1143   : > { %v13842_v15 = vpop.f32.mrf.mxu0  ;;  %v13854_v47 = vpop.f32.mrf.mxu1 }
0x1144   : > { %v8918_v12 = vmax.f32 %v8914_v31, %v8916_v60  ;;  %v14882_v31 = vld [vmem:[#allocation17 + $0x80] sm:$0xff]   ;;  %v14883_v60 = vld [vmem:[#allocation17 + $0xb0] sm:$0xff]   ;;  %v14884_v15 = vld [vmem:[#allocation17 + $0xa8] sm:$0xff]  }
0x1145   : > { %v14885_v47 = vld [vmem:[#allocation17 + $0xa0] sm:$0xff]  }
0x1146   : > { %v17220_v11 = vpack.c.bf16 %v8918_v12, %v8917_v27 }
0x1148   : > { %13862 = vmatpush3.bf16.msra.mxu1 %v17220_v11  ;;  %13856 = vmatpush3.bf16.msra.mxu0 %v17220_v11 }
0x1149   : > { %13867 = vmatprep.subr.bf16.mxu0 %v15411_v58  ;;  %13879 = vmatprep.subr.bf16.mxu1 %v15411_v58 }
0x114b   : > { %13864 = vmatmul.mubr.msk.bf16.vlgmr.msra.gmra.mxu1 %vm8927_vm5, %v14856_v42  ;;  %13858 = vmatmul.mubr.msk.bf16.vlgmr.msra.gmra.mxu0 %vm8927_vm5, %v14857_v43 }
0x114c   : > { %13868 = vmatpush3.bf16.msra.mxu0 %v14858_v61  ;;  %13875 = vmatprep.mubr.msk.bf16.mxu0 %vm15412_vm4, %v15411_v58 }
0x114d   : > { %13869 = vmatprep.subr.bf16.mxu0 %v15411_v58  ;;  %13887 = vmatprep.mubr.msk.bf16.mxu1 %vm15412_vm4, %v15411_v58 }
0x114e   : > { %13880 = vmatpush3.bf16.msra.mxu1 %v14862_v1 }
0x114f   : > { %13881 = vmatprep.subr.bf16.mxu1 %v15411_v58 }
0x1150   : > { %13870 = vmatpush3.bf16.msra.mxu0 %v14859_v32 }
0x1151   : > { %13871 = vmatprep.subr.bf16.mxu0 %v15411_v58 }
0x1152   : > { %13882 = vmatpush3.bf16.msra.mxu1 %v14864_v41 }
0x1153   : > { %13883 = vmatprep.subr.bf16.mxu1 %v15411_v58 }
0x1154   : > { %13872 = vmatpush3.bf16.msra.mxu0 %v14860_v28 }
0x1155   : > { %13873 = vmatprep.subr.bf16.mxu0 %v15411_v58 }
0x1156   : > { %13884 = vmatpush3.bf16.msra.mxu1 %v14865_v49 }
0x1157   : > { %13885 = vmatprep.subr.bf16.mxu1 %v15411_v58 }
0x1158   : > { %13874 = vmatpush3.bf16.msra.mxu0 %v14861_v50 }
0x1159   : > { %13891 = vmatprep.subr.bf16.mxu0 %v15411_v58 }
0x115a   : > { %13886 = vmatpush3.bf16.msra.mxu1 %v14867_v34 }
0x115b   : > { %13897 = vmatprep.subr.bf16.mxu1 %v15411_v58 }
0x120b   : > { %v9026_v5 = vpop.f32.mrf.mxu1  ;;  %v8965_v9 = vpop.f32.mrf.mxu0 }
0x120d   : > { %v13865_v37 = vpop.f32.mrf.mxu1  ;;  %v13859_v30 = vpop.f32.mrf.mxu0 }
0x120f   : > { %v9029_v26 = vpop.f32.mrf.mxu1  ;;  %v8968_v46 = vpop.f32.mrf.mxu0 }
0x1210   : > { %v9033_v24 = vpack.c.bf16 %v9029_v26, %v9026_v5  ;;  %v8972_v33 = vpack.c.bf16 %v8968_v46, %v8965_v9 }
0x1211   : > { %v13866_v45 = vpop.f32.mrf.mxu1  ;;  %v13860_v25 = vpop.f32.mrf.mxu0 }
0x1212   : > { %13876 = vmatmul.mubr.msk.bf16.vlgmr.msra.gmra.mxu0 %vm6815_vm2, %v9033_v24  ;;  %13888 = vmatmul.mubr.msk.bf16.vlgmr.msra.gmra.mxu1 %vm6815_vm2, %v8972_v33  ;;  %v14886_v33 = vld [vmem:[#allocation16 + $0x30] sm:$0xff]   ;;  %v14888_v25 = vld [vmem:[#allocation17 + $0xd8] sm:$0xff]  }
0x1213   : > { %13892 = vmatpush3.bf16.msra.mxu0 %v17220_v11  ;;  %13893 = vmatprep.mubr.msk.bf16.mxu0 %vm15412_vm4, %v15411_v58 }
0x1214   : > { %13909 = vmatprep.subr.bf16.mxu0 %v15411_v58  ;;  %13898 = vmatpush3.bf16.msra.mxu1 %v14868_v18 }
0x1215   : > { %13899 = vmatprep.subr.bf16.mxu1 %v15411_v58  ;;  %13905 = vmatprep.mubr.msk.bf16.mxu1 %vm15412_vm4, %v15411_v58 }
0x1218   : > { %13900 = vmatpush3.bf16.msra.mxu1 %v14869_v23  ;;  %v14889_v23 = vld [vmem:[#allocation17 + $0xd0] sm:$0xff]  }
0x1219   : > { %13901 = vmatprep.subr.bf16.mxu1 %v15411_v58 }
0x121a   : > { %13894 = vmatmul.mubr.msk.bf16.vlgmr.msra.gmra.mxu0 %vm8927_vm5, %v14863_v52 }
0x121b   : > { %13910 = vmatpush3.bf16.msra.mxu0 %v17220_v11  ;;  %13911 = vmatprep.mubr.msk.bf16.mxu0 %vm15412_vm4, %v15411_v58 }
0x121c   : > { %13915 = vmatprep.subr.bf16.mxu0 %v15411_v58  ;;  %13902 = vmatpush3.bf16.msra.mxu1 %v14870_v39  ;;  %v14890_v39 = vld [vmem:[#allocation17 + $0xc8] sm:$0xff]  }
0x121d   : > { %13903 = vmatprep.subr.bf16.mxu1 %v15411_v58 }
0x1220   : > { %13904 = vmatpush3.bf16.msra.mxu1 %v14872_v44  ;;  %v14892_v44 = vld [vmem:[#allocation17 + $0xc0] sm:$0xff]  }
0x1221   : > { %13927 = vmatprep.subr.bf16.mxu1 %v15411_v58 }
0x1222   : > { %13912 = vmatmul.mubr.msk.bf16.vlgmr.msra.gmra.mxu0 %vm8927_vm5, %v14866_v7  ;;  %v14887_v7 = vld [vmem:[#allocation16 + $0x38] sm:$0xff]  }
0x1223   : > { %13923 = vmatprep.mubr.msk.bf16.mxu0 %vm15412_vm4, %v15411_v58  ;;  %13916 = vmatpush3.bf16.msra.mxu0 %v14871_v62  ;;  %v14891_v62 = vld [vmem:[#allocation17 + $0xf8] sm:$0xff]  }
0x1224   : > { %13917 = vmatprep.subr.bf16.mxu0 %v15411_v58 }
0x1227   : > { %13918 = vmatpush3.bf16.msra.mxu0 %v14873_v35  ;;  %v14893_v35 = vld [vmem:[#allocation17 + $0xf0] sm:$0xff]  }
0x1228   : > { %13919 = vmatprep.subr.bf16.mxu0 %v15411_v58 }
0x122b   : > { %13920 = vmatpush3.bf16.msra.mxu0 %v14874_v10  ;;  %v14894_v10 = vld [vmem:[#allocation17 + $0xe8] sm:$0xff]  }
0x122c   : > { %13921 = vmatprep.subr.bf16.mxu0 %v15411_v58 }
0x122f   : > { %13922 = vmatpush3.bf16.msra.mxu0 %v14875_v17  ;;  %v14895_v17 = vld [vmem:[#allocation17 + $0xe0] sm:$0xff]  }
0x1230   : > { %13945 = vmatprep.subr.bf16.mxu0 %v15411_v58 }
0x12d2   : > { %v9104_v38 = vpop.f32.mrf.mxu0  ;;  %v9172_v59 = vpop.f32.mrf.mxu1 }
0x12d3   : > { %v9173_v48 = vadd.f32 %v9172_v59, %v9104_v38 }
0x12d4   : > { %v13877_v57 = vpop.f32.mrf.mxu0  ;;  %v13889_v4 = vpop.f32.mrf.mxu1 }
0x12d6   : > { %v9107_v3 = vpop.f32.mrf.mxu0  ;;  %v9175_v22 = vpop.f32.mrf.mxu1 }
0x12d7   : > { %v9176_v56 = vadd.f32 %v9175_v22, %v9107_v3 }
0x12d8   : > { %v13878_v40 = vpop.f32.mrf.mxu0  ;;  %v13890_v14 = vpop.f32.mrf.mxu1 }
0x12da   : > { %v9224_v36 = vpop.f32.mrf.mxu0 }
0x12dc   : > { %v13895_v13 = vpop.f32.mrf.mxu0 }
0x12de   : > { %v9227_v29 = vpop.f32.mrf.mxu0 }
0x12df   : > { %v9231_v8 = vpack.c.bf16 %v9227_v29, %v9224_v36 }
0x12e0   : > { %v13896_v20 = vpop.f32.mrf.mxu0 }
0x12e1   : > { %13906 = vmatmul.mubr.msk.bf16.vlgmr.msra.gmra.mxu1 %vm6815_vm2, %v9231_v8 }
0x12e2   : > { %13928 = vmatpush3.bf16.msra.mxu1 %v17220_v11  ;;  %v9356_v21 = vpop.f32.mrf.mxu0  ;;  %13929 = vmatprep.mubr.msk.bf16.mxu1 %vm15412_vm4, %v15411_v58 }
0x12e3   : > { %13933 = vmatprep.subr.bf16.mxu1 %v15411_v58 }
0x12e4   : > { %v13913_v0 = vpop.f32.mrf.mxu0 }
0x12e6   : > { %v9359_v63 = vpop.f32.mrf.mxu0 }
0x12e7   : > { %v9363_v2 = vpack.c.bf16 %v9359_v63, %v9356_v21 }
0x12e8   : > { %v13914_v55 = vpop.f32.mrf.mxu0 }
0x12e9   : > { %13924 = vmatmul.mubr.msk.bf16.vlgmr.msra.gmra.mxu0 %vm6815_vm2, %v9363_v2  ;;  %13930 = vmatmul.mubr.msk.bf16.vlgmr.msra.gmra.mxu1 %vm8927_vm5, %v14876_v6  ;;  %v14896_v2 = vld [vmem:[#allocation16 + $0x40] sm:$0xff]  }
0x12ea   : > { %13946 = vmatpush3.bf16.msra.mxu0 %v17220_v11  ;;  %13947 = vmatprep.mubr.msk.bf16.mxu0 %vm15412_vm4, %v15411_v58 }
0x12eb   : > { %13934 = vmatpush3.bf16.msra.mxu1 %v14878_v51  ;;  %13951 = vmatprep.subr.bf16.mxu0 %v15411_v58 }
0x12ec   : > { %13935 = vmatprep.subr.bf16.mxu1 %v15411_v58  ;;  %13941 = vmatprep.mubr.msk.bf16.mxu1 %vm15412_vm4, %v15411_v58 }
0x12ef   : > { %13936 = vmatpush3.bf16.msra.mxu1 %v14879_v16  ;;  %v14898_v16 = vld [vmem:[#allocation17 + $0x110] sm:$0xff]  }
0x12f0   : > { %13937 = vmatprep.subr.bf16.mxu1 %v15411_v58 }
0x12f1   : > { %13948 = vmatmul.mubr.msk.bf16.vlgmr.msra.gmra.mxu0 %vm8927_vm5, %v14877_v54 }
0x12f2   : > { %13959 = vmatprep.mubr.msk.bf16.mxu0 %vm15412_vm4, %v15411_v58  ;;  %13952 = vmatpush3.bf16.msra.mxu0 %v14881_v19  ;;  %v14900_v19 = vld [vmem:[#allocation17 + $0x100] sm:$0xff]  }
0x12f3   : > { %13938 = vmatpush3.bf16.msra.mxu1 %v14880_v53  ;;  %13953 = vmatprep.subr.bf16.mxu0 %v15411_v58  ;;  %v14899_v53 = vld [vmem:[#allocation17 + $0x108] sm:$0xff]  }
0x12f4   : > { %13939 = vmatprep.subr.bf16.mxu1 %v15411_v58 }
0x12f6   : > { %13954 = vmatpush3.bf16.msra.mxu0 %v14883_v60 }
0x12f7   : > { %13940 = vmatpush3.bf16.msra.mxu1 %v14882_v31  ;;  %13955 = vmatprep.subr.bf16.mxu0 %v15411_v58 }
0x12f8   : > { %13963 = vmatprep.subr.bf16.mxu1 %v15411_v58 }
0x12fa   : > { %13956 = vmatpush3.bf16.msra.mxu0 %v14884_v15 }
0x12fb   : > { %13957 = vmatprep.subr.bf16.mxu0 %v15411_v58 }
0x12fe   : > { %13958 = vmatpush3.bf16.msra.mxu0 %v14885_v47 }
0x12ff   : > { %13981 = vmatprep.subr.bf16.mxu0 %v15411_v58 }
0x13a1   : > { %v9302_v27 = vpop.f32.mrf.mxu1 }
0x13a2   : > { %v9309_v12 = vadd.f32 %v9302_v27, %v9173_v48 }
0x13a3   : > { %v13907_v42 = vpop.f32.mrf.mxu1 }
0x13a5   : > { %v9305_v43 = vpop.f32.mrf.mxu1 }
0x13a6   : > { %v9310_v61 = vadd.f32 %v9305_v43, %v9176_v56 }
0x13a7   : > { %v13908_v32 = vpop.f32.mrf.mxu1 }
0x13a9   : > { %v9434_v28 = vpop.f32.mrf.mxu0  ;;  %v9488_v1 = vpop.f32.mrf.mxu1 }
0x13aa   : > { %v9441_v41 = vadd.f32 %v9434_v28, %v9309_v12 }
0x13ab   : > { %v13925_v49 = vpop.f32.mrf.mxu0  ;;  %v13931_v50 = vpop.f32.mrf.mxu1 }
0x13ad   : > { %v9437_v34 = vpop.f32.mrf.mxu0  ;;  %v9491_v5 = vpop.f32.mrf.mxu1 }
0x13ae   : > { %v9442_v9 = vadd.f32 %v9437_v34, %v9310_v61  ;;  %v9495_v37 = vpack.c.bf16 %v9491_v5, %v9488_v1 }
0x13af   : > { %v13926_v30 = vpop.f32.mrf.mxu0  ;;  %v13932_v26 = vpop.f32.mrf.mxu1 }
0x13b0   : > { %13942 = vmatmul.mubr.msk.bf16.vlgmr.msra.gmra.mxu1 %vm6815_vm2, %v9495_v37  ;;  %v11634_v30 = vld [vmem:[#allocation19] ss:$0 sm:$0xff] }
0x13b1   : > { %13964 = vmatpush3.bf16.msra.mxu1 %v17220_v11  ;;  %v9620_v46 = vpop.f32.mrf.mxu0  ;;  %13965 = vmatprep.mubr.msk.bf16.mxu1 %vm15412_vm4, %v15411_v58 }
0x13b2   : > { %13969 = vmatprep.subr.bf16.mxu1 %v15411_v58 }
0x13b3   : > { %v13949_v24 = vpop.f32.mrf.mxu0 }
0x13b5   : > { %v9623_v18 = vpop.f32.mrf.mxu0 }
0x13b6   : > { %v9627_v45 = vpack.c.bf16 %v9623_v18, %v9620_v46 }
0x13b7   : > { %v13950_v52 = vpop.f32.mrf.mxu0 }
0x13b8   : > { %13960 = vmatmul.mubr.msk.bf16.vlgmr.msra.gmra.mxu0 %vm6815_vm2, %v9627_v45  ;;  %13966 = vmatmul.mubr.msk.bf16.vlgmr.msra.gmra.mxu1 %vm8927_vm5, %v14886_v33 }
0x13b9   : > { %13982 = vmatpush3.bf16.msra.mxu0 %v17220_v11  ;;  %13983 = vmatprep.mubr.msk.bf16.mxu0 %vm15412_vm4, %v15411_v58 }
0x13ba   : > { %13970 = vmatpush3.bf16.msra.mxu1 %v14888_v25  ;;  %13987 = vmatprep.subr.bf16.mxu0 %v15411_v58 }
0x13bb   : > { %13971 = vmatprep.subr.bf16.mxu1 %v15411_v58  ;;  %13977 = vmatprep.mubr.msk.bf16.mxu1 %vm15412_vm4, %v15411_v58 }
0x13be   : > { %13972 = vmatpush3.bf16.msra.mxu1 %v14889_v23  ;;  %v10115_v23 = vld [vmem:[#allocation20] sm:$0x3] }
0x13bf   : > { %13973 = vmatprep.subr.bf16.mxu1 %v15411_v58 }
0x13c0   : > { %13984 = vmatmul.mubr.msk.bf16.vlgmr.msra.gmra.mxu0 %vm8927_vm5, %v14887_v7 }
0x13c1   : > { %13995 = vmatprep.mubr.msk.bf16.mxu0 %vm15412_vm4, %v15411_v58  ;;  %13988 = vmatpush3.bf16.msra.mxu0 %v14891_v62  ;;  %v14901_v62 = vld [vmem:[#allocation22 + $0x38] sm:$0xff]  }
0x13c2   : > { %13974 = vmatpush3.bf16.msra.mxu1 %v14890_v39  ;;  %13989 = vmatprep.subr.bf16.mxu0 %v15411_v58  ;;  %v10205_v39 = vld [vmem:[#allocation20 + $0x4] sm:$0x3] }
0x13c3   : > { %13975 = vmatprep.subr.bf16.mxu1 %v15411_v58 }
0x13c5   : > { %13990 = vmatpush3.bf16.msra.mxu0 %v14893_v35  ;;  %v10160_v35 = vld [vmem:[#allocation20 + $0x2] sm:$0x3] }
0x13c6   : > { %13976 = vmatpush3.bf16.msra.mxu1 %v14892_v44  ;;  %13991 = vmatprep.subr.bf16.mxu0 %v15411_v58  ;;  %v14903_v44 = vld [vmem:[#allocation22 + $0x30] sm:$0xff]  }
0x13c7   : > { %13999 = vmatprep.subr.bf16.mxu1 %v15411_v58 }
0x13c9   : > { %13992 = vmatpush3.bf16.msra.mxu0 %v14894_v10  ;;  %v14905_v10 = vld [vmem:[#allocation22 + $0x28] sm:$0xff]  }
0x13ca   : > { %13993 = vmatprep.subr.bf16.mxu0 %v15411_v58 }
0x13cd   : > { %13994 = vmatpush3.bf16.msra.mxu0 %v14895_v17  ;;  %v10250_v17 = vld [vmem:[#allocation20 + $0x6] sm:$0x3] }
0x13ce   : > { %14017 = vmatprep.subr.bf16.mxu0 %v15411_v58 }
0x1470   : > { %v9566_v38 = vpop.f32.mrf.mxu1 }
0x1471   : > { %v9573_v59 = vadd.f32 %v9566_v38, %v9441_v41  ;;  %v14902_v38 = vld [vmem:[#allocation22 + $0x78] sm:$0xff]  }
0x1472   : > { %v13943_v48 = vpop.f32.mrf.mxu1 }
0x1473   : > { %v14906_v48 = vld [vmem:[#allocation22 + $0x68] sm:$0xff]  }
0x1474   : > { %v9569_v57 = vpop.f32.mrf.mxu1 }
0x1475   : > { %v9574_v4 = vadd.f32 %v9569_v57, %v9442_v9  ;;  %v14907_v57 = vld [vmem:[#allocation22 + $0x20] sm:$0xff]  }
0x1476   : > { %v13944_v3 = vpop.f32.mrf.mxu1 }
0x1477   : > { %v14909_v3 = vld [vmem:[#allocation22 + $0x18] sm:$0xff]  }
0x1478   : > { %v9698_v22 = vpop.f32.mrf.mxu0  ;;  %v9752_v56 = vpop.f32.mrf.mxu1 }
0x1479   : > { %v9705_v40 = vadd.f32 %v9698_v22, %v9573_v59  ;;  %v14904_v59 = vld [vmem:[#allocation22 + $0x70] sm:$0xff]   ;;  %v14910_v22 = vld [vmem:[#allocation22 + $0x58] sm:$0xff]  }
0x147a   : > { %v13961_v14 = vpop.f32.mrf.mxu0  ;;  %v13967_v36 = vpop.f32.mrf.mxu1 }
0x147b   : > { %v14913_v14 = vld [vmem:[#allocation22 + $0x8] sm:$0xff]  }
0x147c   : > { %v9701_v13 = vpop.f32.mrf.mxu0  ;;  %v9755_v29 = vpop.f32.mrf.mxu1  ;;  %v14914_v36 = vld [vmem:[#allocation22 + $0x48] sm:$0xff]  }
0x147d   : > { %v9706_v8 = vadd.f32 %v9701_v13, %v9574_v4  ;;  %v9759_v20 = vpack.c.bf16 %v9755_v29, %v9752_v56  ;;  %v14908_v4 = vld [vmem:[#allocation22 + $0x60] sm:$0xff]   ;;  %v14911_v56 = vld [vmem:[#allocation22 + $0x10] sm:$0xff]  }
0x147e   : > { %v13962_v21 = vpop.f32.mrf.mxu0  ;;  %v13968_v0 = vpop.f32.mrf.mxu1  ;;  %v14915_v13 = vld [vmem:[#allocation22] sm:$0xff]  }
0x147f   : > { %13978 = vmatmul.mubr.msk.bf16.vlgmr.msra.gmra.mxu1 %vm6815_vm2, %v9759_v20  ;;  %v14916_v29 = vld [vmem:[#allocation22 + $0x40] sm:$0xff]  }
0x1480   : > { %14000 = vmatpush3.bf16.msra.mxu1 %v17220_v11  ;;  %v9884_v6 = vpop.f32.mrf.mxu0  ;;  %14001 = vmatprep.mubr.msk.bf16.mxu1 %vm15412_vm4, %v15411_v58  ;;  %v14897_v11 = vld [vmem:[#allocation17 + $0x118] sm:$0xff]  }
0x1481   : > { %14005 = vmatprep.subr.bf16.mxu1 %v15411_v58 }
0x1482   : > { %v13985_v63 = vpop.f32.mrf.mxu0 }
0x1484   : > { %v9887_v51 = vpop.f32.mrf.mxu0 }
0x1485   : > { %v9891_v55 = vpack.c.bf16 %v9887_v51, %v9884_v6 }
0x1486   : > { %v13986_v54 = vpop.f32.mrf.mxu0 }
0x1487   : > { %13996 = vmatmul.mubr.msk.bf16.vlgmr.msra.gmra.mxu0 %vm6815_vm2, %v9891_v55  ;;  %14002 = vmatmul.mubr.msk.bf16.vlgmr.msra.gmra.mxu1 %vm8927_vm5, %v14896_v2 }
0x1488   : > { %14013 = vmatprep.mubr.msk.bf16.mxu1 %vm15412_vm4, %v15411_v58  ;;  %14019 = vmatprep.mubr.msk.bf16.mxu0 %vm15412_vm4, %v15411_v58 }
0x1489   : > { %14006 = vmatpush3.bf16.msra.mxu1 %v14897_v11 }
0x148a   : > { %14007 = vmatprep.subr.bf16.mxu1 %v15411_v58 }
0x148d   : > { %14008 = vmatpush3.bf16.msra.mxu1 %v14898_v16 }
0x148e   : > { %14009 = vmatprep.subr.bf16.mxu1 %v15411_v58 }
0x1491   : > { %14010 = vmatpush3.bf16.msra.mxu1 %v14899_v53 }
0x1492   : > { %14011 = vmatprep.subr.bf16.mxu1 %v15411_v58 }
0x1495   : > { %14012 = vmatpush3.bf16.msra.mxu1 %v14900_v19 }
0x1496   : > { %14029 = vmatprep.subr.bf16.mxu1 %v15411_v58 }
0x153f   : > { %v9830_v31 = vpop.f32.mrf.mxu1 }
0x1540   : > { %v9837_v60 = vadd.f32 %v9830_v31, %v9705_v40  ;;  %v14912_v40 = vld [vmem:[#allocation22 + $0x50] sm:$0xff]  }
0x1541   : > { %v13979_v15 = vpop.f32.mrf.mxu1 }
0x1543   : > { %v9833_v47 = vpop.f32.mrf.mxu1 }
0x1544   : > { %v9838_v27 = vadd.f32 %v9833_v47, %v9706_v8  ;;  %v14917_v47 = vld [vmem:[#allocation22 + $0xb8] sm:$0xff]  }
0x1545   : > { %v13980_v12 = vpop.f32.mrf.mxu1 }
0x1547   : > { %v9962_v42 = vpop.f32.mrf.mxu0  ;;  %v10016_v43 = vpop.f32.mrf.mxu1 }
0x1548   : > { %v9969_v61 = vadd.f32 %v9962_v42, %v9837_v60  ;;  %v14918_v42 = vld [vmem:[#allocation22 + $0xf8] sm:$0xff]  }
0x1549   : > { %v13997_v32 = vpop.f32.mrf.mxu0  ;;  %v14003_v28 = vpop.f32.mrf.mxu1 }
0x154a   : > { %v14919_v32 = vld [vmem:[#allocation22 + $0xb0] sm:$0xff]  }
0x154b   : > { %v9965_v1 = vpop.f32.mrf.mxu0  ;;  %v10019_v41 = vpop.f32.mrf.mxu1  ;;  %v14920_v28 = vld [vmem:[#allocation22 + $0xf0] sm:$0xff]  }
0x154c   : > { %v9970_v49 = vadd.f32 %v9965_v1, %v9838_v27  ;;  %v10023_v50 = vpack.c.bf16 %v10019_v41, %v10016_v43  ;;  %v14921_v1 = vld [vmem:[#allocation22 + $0xa8] sm:$0xff]  }
0x154d   : > { %v14004_v34 = vpop.f32.mrf.mxu1  ;;  %v13998_v5 = vpop.f32.mrf.mxu0  ;;  %v14922_v41 = vld [vmem:[#allocation22 + $0xe8] sm:$0xff]  }
0x154e   : > { %14014 = vmatmul.mubr.msk.bf16.vlgmr.msra.gmra.mxu1 %vm6815_vm2, %v10023_v50  ;;  %v14924_v50 = vld [vmem:[#allocation22 + $0xe0] sm:$0xff]   ;;  %v14925_v34 = vld [vmem:[#allocation22 + $0x98] sm:$0xff]  }
0x154f   : > { %14031 = vmatprep.mubr.msk.bf16.mxu1 %vm15412_vm4, %v15411_v58  ;;  %v14926_v5 = vld [vmem:[#allocation22 + $0xd8] sm:$0xff]  }
0x160e   : > { %v10094_v9 = vpop.f32.mrf.mxu1 }
0x160f   : > { %v10101_v37 = vadd.f32 %v10094_v9, %v9969_v61  ;;  %v14927_v9 = vld [vmem:[#allocation22 + $0x90] sm:$0xff]  }
0x1610   : > { %v14015_v26 = vpop.f32.mrf.mxu1 }
0x1611   : > { %v10110_v24 = vadd.f32 %v11634_v30, %v10101_v37  ;;  %v14928_v37 = vld [vmem:[#allocation22 + $0xd0] sm:$0xff]   ;;  %v14930_v26 = vld [vmem:[#allocation22 + $0xc8] sm:$0xff]  }
0x1612   : > { %v10097_v46 = vpop.f32.mrf.mxu1 }
0x1613   : > { %v10102_v33 = vadd.f32 %v10097_v46, %v9970_v49  ;;  %v10112_v25 = vmax.f32 %v10110_v24, 0.0  ;;  %v14923_v49 = vld [vmem:[#allocation22 + $0xa0] sm:$0xff]  }
0x1614   : > { %v14016_v18 = vpop.f32.mrf.mxu1  ;;  %v14931_v46 = vld [vmem:[#allocation22 + $0x80] sm:$0xff]  }
0x1615   : > { %v10111_v45 = vadd.f32 %v11634_v30, %v10102_v33  ;;  %v14929_v30 = vld [vmem:[#allocation22 + $0x88] sm:$0xff]   ;;  %v14932_v24 = vld [vmem:[#allocation22 + $0xc0] sm:$0xff]  }
0x1617   : > { %v10113_v52 = vmax.f32 %v10111_v45, 0.0 }
0x1619   : > { %v10114_v7 = vpack.c.bf16 %v10113_v52, %v10112_v25 }
0x161b   : > { %14018 = vmatpush3.bf16.msra.mxu0 %v10114_v7  ;;  %14030 = vmatpush3.bf16.msra.mxu1 %v10114_v7 }
0x161c   : > { %14023 = vmatprep.subr.bf16.mxu0 %v15411_v58  ;;  %14041 = vmatprep.subr.bf16.mxu1 %v15411_v58 }
0x161e   : > { %14020 = vmatmul.mubr.msk.bf16.vlgmr.msra.gmra.mxu0 %vm8927_vm5, %v10115_v23  ;;  %14032 = vmatmul.mubr.msk.bf16.vlgmr.msra.gmra.mxu1 %vm8927_vm5, %v10205_v39 }
0x161f   : > { %14024 = vmatpush3.bf16.msra.mxu0 %v10114_v7  ;;  %14025 = vmatprep.mubr.msk.bf16.mxu0 %vm15412_vm4, %v15411_v58 }
0x1620   : > { %14035 = vmatprep.subr.bf16.mxu0 %v15411_v58  ;;  %14042 = vmatpush3.bf16.msra.mxu1 %v14901_v62 }
0x1621   : > { %14043 = vmatprep.subr.bf16.mxu1 %v15411_v58  ;;  %14057 = vmatprep.mubr.msk.bf16.mxu1 %vm15412_vm4, %v15411_v58 }
0x1624   : > { %14044 = vmatpush3.bf16.msra.mxu1 %v14903_v44 }
0x1625   : > { %14045 = vmatprep.subr.bf16.mxu1 %v15411_v58 }
0x1626   : > { %14026 = vmatmul.mubr.msk.bf16.vlgmr.msra.gmra.mxu0 %vm8927_vm5, %v10160_v35  ;;  %v10297_v35 = vld [vmem:[#allocation23] sm:$0x1] }
0x1627   : > { %14036 = vmatpush3.bf16.msra.mxu0 %v10114_v7  ;;  %14037 = vmatprep.mubr.msk.bf16.mxu0 %vm15412_vm4, %v15411_v58 }
0x1628   : > { %14061 = vmatprep.subr.bf16.mxu0 %v15411_v58  ;;  %14046 = vmatpush3.bf16.msra.mxu1 %v14905_v10 }
0x1629   : > { %14047 = vmatprep.subr.bf16.mxu1 %v15411_v58 }
0x162c   : > { %14048 = vmatpush3.bf16.msra.mxu1 %v14907_v57 }
0x162d   : > { %14049 = vmatprep.subr.bf16.mxu1 %v15411_v58 }
0x162e   : > { %14038 = vmatmul.mubr.msk.bf16.vlgmr.msra.gmra.mxu0 %vm8927_vm5, %v10250_v17 }
0x162f   : > { %14062 = vmatpush3.bf16.msra.mxu0 %v14902_v38  ;;  %14077 = vmatprep.mubr.msk.bf16.mxu0 %vm15412_vm4, %v15411_v58 }
0x1630   : > { %14063 = vmatprep.subr.bf16.mxu0 %v15411_v58  ;;  %14050 = vmatpush3.bf16.msra.mxu1 %v14909_v3 }
0x1631   : > { %14051 = vmatprep.subr.bf16.mxu1 %v15411_v58 }
0x1633   : > { %14064 = vmatpush3.bf16.msra.mxu0 %v14904_v59 }
0x1634   : > { %14065 = vmatprep.subr.bf16.mxu0 %v15411_v58  ;;  %14052 = vmatpush3.bf16.msra.mxu1 %v14911_v56 }
0x1635   : > { %14053 = vmatprep.subr.bf16.mxu1 %v15411_v58 }
0x1637   : > { %14066 = vmatpush3.bf16.msra.mxu0 %v14906_v48 }
0x1638   : > { %14067 = vmatprep.subr.bf16.mxu0 %v15411_v58  ;;  %14054 = vmatpush3.bf16.msra.mxu1 %v14913_v14 }
0x1639   : > { %14055 = vmatprep.subr.bf16.mxu1 %v15411_v58 }
0x163b   : > { %14068 = vmatpush3.bf16.msra.mxu0 %v14908_v4 }
0x163c   : > { %14069 = vmatprep.subr.bf16.mxu0 %v15411_v58  ;;  %14056 = vmatpush3.bf16.msra.mxu1 %v14915_v13 }
0x163d   : > { %14081 = vmatprep.subr.bf16.mxu1 %v15411_v58 }
0x163f   : > { %14070 = vmatpush3.bf16.msra.mxu0 %v14910_v22 }
0x1640   : > { %14071 = vmatprep.subr.bf16.mxu0 %v15411_v58 }
0x1643   : > { %14072 = vmatpush3.bf16.msra.mxu0 %v14912_v40 }
0x1644   : > { %14073 = vmatprep.subr.bf16.mxu0 %v15411_v58 }
0x1647   : > { %14074 = vmatpush3.bf16.msra.mxu0 %v14914_v36 }
0x1648   : > { %14075 = vmatprep.subr.bf16.mxu0 %v15411_v58 }
0x164b   : > { %14076 = vmatpush3.bf16.msra.mxu0 %v14916_v29 }
0x164c   : > { %14101 = vmatprep.subr.bf16.mxu0 %v15411_v58 }
0x16de   : > { %v10153_v8 = vpop.f32.mrf.mxu0  ;;  %v10243_v20 = vpop.f32.mrf.mxu1 }
0x16e0   : > { %v14021_v21 = vpop.f32.mrf.mxu0  ;;  %v14033_v0 = vpop.f32.mrf.mxu1 }
0x16e2   : > { %v10156_v6 = vpop.f32.mrf.mxu0  ;;  %v10246_v63 = vpop.f32.mrf.mxu1 }
0x16e4   : > { %v14022_v2 = vpop.f32.mrf.mxu0  ;;  %v14034_v51 = vpop.f32.mrf.mxu1 }
0x16e6   : > { %v10198_v55 = vpop.f32.mrf.mxu0 }
0x16e7   : > { %v10294_v19 = vmax.f32 %v10153_v8, %v10198_v55 }
0x16e8   : > { %v14027_v54 = vpop.f32.mrf.mxu0 }
0x16ea   : > { %v10201_v11 = vpop.f32.mrf.mxu0 }
0x16ec   : > { %v14028_v16 = vpop.f32.mrf.mxu0 }
0x16ee   : > { %v10288_v53 = vpop.f32.mrf.mxu0 }
0x16ef   : > { %v10295_v31 = vmax.f32 %v10243_v20, %v10288_v53 }
0x16f0   : > { %v14039_v60 = vpop.f32.mrf.mxu0 }
0x16f1   : > { %v10296_v15 = vmax.f32 %v10294_v19, %v10295_v31 }
0x16f2   : > { %v10291_v27 = vpop.f32.mrf.mxu0 }
0x16f3   : > { %v10298_v12 = vpack.c.bf16 %v10296_v15, %v10296_v15 }
0x16f4   : > { %v14040_v43 = vpop.f32.mrf.mxu0 }
0x16f5   : > { %v10422_v61 = vshrl.u32 %v10298_v12, 16  ;;  %14058 = vmatmul.mubr.bf16.vlgmr.msra.gmra.mxu1 %v10298_v12  ;;  %v10532_v33 = vrot.slane %v10298_v12, 1 }
0x16f6   : > { %14082 = vmatpush3.bf16.msra.mxu1 %v14917_v47  ;;  %14097 = vmatprep.mubr.msk.bf16.mxu1 %vm15412_vm4, %v15411_v58 }
0x16f7   : > { %14078 = vmatmul.mubr.bf16.vlgmr.msra.gmra.mxu0 %v10422_v61  ;;  %14083 = vmatprep.subr.bf16.mxu1 %v15411_v58  ;;  %v10640_v18 = vrot.slane %v10422_v61, 1 }
0x16f8   : > { %14102 = vmatpush3.bf16.msra.mxu0 %v14918_v42  ;;  %14117 = vmatprep.mubr.msk.bf16.mxu0 %vm15412_vm4, %v15411_v58 }
0x16f9   : > { %14103 = vmatprep.subr.bf16.mxu0 %v15411_v58 }
0x16fa   : > { %14084 = vmatpush3.bf16.msra.mxu1 %v14919_v32 }
0x16fb   : > { %14085 = vmatprep.subr.bf16.mxu1 %v15411_v58 }
0x16fc   : > { %14104 = vmatpush3.bf16.msra.mxu0 %v14920_v28 }
0x16fd   : > { %14105 = vmatprep.subr.bf16.mxu0 %v15411_v58 }
0x16fe   : > { %14086 = vmatpush3.bf16.msra.mxu1 %v14921_v1 }
0x16ff   : > { %14087 = vmatprep.subr.bf16.mxu1 %v15411_v58 }
0x1700   : > { %14106 = vmatpush3.bf16.msra.mxu0 %v14922_v41 }
0x1701   : > { %14107 = vmatprep.subr.bf16.mxu0 %v15411_v58 }
0x1702   : > { %14088 = vmatpush3.bf16.msra.mxu1 %v14923_v49 }
0x1703   : > { %14089 = vmatprep.subr.bf16.mxu1 %v15411_v58 }
0x1704   : > { %14108 = vmatpush3.bf16.msra.mxu0 %v14924_v50 }
0x1705   : > { %14109 = vmatprep.subr.bf16.mxu0 %v15411_v58 }
0x1706   : > { %14090 = vmatpush3.bf16.msra.mxu1 %v14925_v34 }
0x1707   : > { %14091 = vmatprep.subr.bf16.mxu1 %v15411_v58 }
0x1708   : > { %14110 = vmatpush3.bf16.msra.mxu0 %v14926_v5 }
0x1709   : > { %14111 = vmatprep.subr.bf16.mxu0 %v15411_v58 }
0x170a   : > { %14092 = vmatpush3.bf16.msra.mxu1 %v14927_v9 }
0x170b   : > { %14093 = vmatprep.subr.bf16.mxu1 %v15411_v58 }
0x170c   : > { %14112 = vmatpush3.bf16.msra.mxu0 %v14928_v37 }
0x170d   : > { %14113 = vmatprep.subr.bf16.mxu0 %v15411_v58 }
0x170e   : > { %14094 = vmatpush3.bf16.msra.mxu1 %v14929_v30 }
0x170f   : > { %14095 = vmatprep.subr.bf16.mxu1 %v15411_v58 }
0x1710   : > { %14114 = vmatpush3.bf16.msra.mxu0 %v14930_v26 }
0x1711   : > { %14115 = vmatprep.subr.bf16.mxu0 %v15411_v58 }
0x1712   : > { %14096 = vmatpush3.bf16.msra.mxu1 %v14931_v46 }
0x1714   : > { %14116 = vmatpush3.bf16.msra.mxu0 %v14932_v24 }
0x1715   : > { %14098 = vmatmul.mubr.bf16.vlgmr.msra.gmra.mxu1 %v10532_v33 }
0x1717   : > { %14118 = vmatmul.mubr.bf16.vlgmr.msra.gmra.mxu0 %v10640_v18 }
0x17b5   : > { %v10397_v45 = vpop.f32.mrf.mxu1 }
0x17b6   : > { %v10403_v10 = vadd.f32 %v10397_v45, %v10297_v35 }
0x17b7   : > { %v14059_v25 = vpop.f32.mrf.mxu1  ;;  %v10507_v52 = vpop.f32.mrf.mxu0 }
0x17b8   : > { %v10513_v58 = vadd.f32 %v10507_v52, %v10403_v10 }
0x17b9   : > { %v10400_v7 = vpop.f32.mrf.mxu1  ;;  %v14079_v23 = vpop.f32.mrf.mxu0 }
0x17bb   : > { %v14060_v39 = vpop.f32.mrf.mxu1  ;;  %v10510_v62 = vpop.f32.mrf.mxu0 }
0x17bd   : > { %v14080_v44 = vpop.f32.mrf.mxu0 }
0x17d5   : > { %v10616_v17 = vpop.f32.mrf.mxu1 }
0x17d6   : > { %v10622_v38 = vadd.f32 %v10616_v17, %v10513_v58 }
0x17d7   : > { %v14099_v59 = vpop.f32.mrf.mxu1  ;;  %v10724_v48 = vpop.f32.mrf.mxu0 }
0x17d8   : > { %v10730_v57 = vadd.f32 %v10724_v48, %v10622_v38 }
0x17d9   : > { %v10619_v4 = vpop.f32.mrf.mxu1  ;;  %v14119_v3 = vpop.f32.mrf.mxu0 }
0x17da   : > { %10732 = vst.msk [vmem:[%s682_s20] sm:$0x1] %vm10731_vm6, %v10730_v57 }
0x17db   : > { %v14100_v22 = vpop.f32.mrf.mxu1  ;;  %v10727_v56 = vpop.f32.mrf.mxu0 }
0x17dc   : > { %15310 = shalt.err (!%p15307_p0)
}
0x17dd   : > { %s15311_s15 = scalar_lea.hbm %s17385_s1, 16  ;;  %s15315_s2 = scalar_lea.hbm %s17596_s26, 32 }
0x17de   : > { %p15312_p2 = scmp.ne.s32.totalorder %s17385_s1, %s15311_s15  ;;  %p15316_p13 = scmp.lt.s32.totalorder %s17385_s1, %s17596_s26 }
0x17df   : > { %p15317_p7 = scmp.lt.s32.totalorder %s15315_s2, %s15311_s15 }
0x17e0   : > { %p15313_p3 = pnand %p15312_p2, %p15532_p5 }
0x17e1   : > { %p15318_p11 = por %p15317_p7, %p15316_p13 }
0x17e2   : > { %p15314_p4 = pneg %p15313_p3 }
0x17e4   : > { %p15319_p8 = pnand %p15318_p11, %p15314_p4 }
0x17e6   : > { %15322 = shalt.err (!%p15319_p8)
}
0x17e7   : > { %14186 = dma.vmem_to_hbm [thread:$0]  (%p15532_p5), %s17387_s18, 16, %s17385_s1, %s10734_s22   ;;  %v14120_v40 = vpop.f32.mrf.mxu0 }
0x17e8 PF: > { %s17597_s16 = sld [smem:[#allocation37_spill]] }
0x17e9   : > { %s17598_s21 = sld [smem:[#allocation35_spill]] }
0x17ea   : > { %s17599_s24 = sld [smem:[#allocation40_spill]] }
0x17ee   : > { %p14263_p12 = scmp.ge.s32.totalorder %s17597_s16, 2 }
0x17ef   : > { %s10758_s27 = sand.u32 1, %s17598_s21  }
0x17f0   : > { %p17600_p10 = scmp.ne.s32.totalorder %s17599_s24, 0  ;;  %s10759_s30 = scalar_lea.sflag [#allocation4], %s10758_s27 }
0x17f2   : > { %p14232_p6 = pnand %p14263_p12, %p17600_p10 }
0x17f4   : > { %p14233_p9 = pneg %p14232_p6 }
0x17f6   : > { %15372 = dma.done.wait (%p14233_p9), %s10759_s30, 16  }
0x17f7   : > { %15374 = vsyncadd (%p14233_p9), %s10759_s30, 4294967280  ;;  %s17601_s21 = sld [smem:[#allocation38_spill]]  ;;  %s17604_s18 = smov %s15381_s19 }
0x17f8   : > { %s17602_s23 = sld [smem:[#allocation36_spill]] }
0x17f9   : > { %s17603_s20 = sld [smem:[#allocation39_spill]] }
0x17fd   : > { %p33_p1 = scmp.ge.s32.totalorder %s17601_s21, 4  }
0x17fe   : > { %s17605_s19 = smov %s17602_s23 }
0x17ff   :  { %35 = sbr.rel (!%p33_p1) target bundleno = 15 (0xf), region = 232 }
0x1804   :  { %10763 = vsyncpa [#allocation3], 1 }
0x1805   :  { %10765 = vsyncpa [#allocation3 + $0x1], 1 }
0x1806   :  { %10766 = vsyncpa [#allocation6], 1 }
0x1807   :  { %10767 = vsyncpa [#allocation9], 1 }
0x1808   :  { %10768 = vsyncpa [#allocation12], 1 }
0x1809   :  { %10769 = vsyncpa [#allocation15], 1 }
0x180a   :  { %10770 = vsyncpa [#allocation18], 1 }
0x180b   :  { %10771 = vsyncpa [#allocation21], 1 }
0x180c   :  { %10772 = vsyncpa [#allocation24], 1 }
0x180d   :  { %10773 = vsyncpa [#allocation4], 1 }
0x180e   :  { %10775 = vsyncpa [#allocation4 + $0x1], 1 }

</bundles_post_ra>
